<compile_context>
chip_gen: v7x
topology: tpu7x:2x2x1
jax: 0.10.0
libtpu: 0.0.40
codegen_flags: <defaults>
</compile_context>

<pallas_src>
import jax
import jax.numpy as jnp
from jax.experimental import pallas as pl
from jax.experimental.pallas import tpu as pltpu

# ---- static configuration (small-shape config) -----------------------------
S0 = 32             # input spatial size
S1 = S0 // 2        # 16: spatial size after conv1 + pool
S2 = S0 // 4        # 8 : spatial size after conv2 + pool
C1, C1P = 28, 32    # conv1 out channels (true / lane-padded)
C2 = 64             # conv2 out channels
FCH, FCHP = 30, 32  # fc hidden width (true / lane-padded)
NCLS = 2
FC1_IN = C2 * S2 * S2   # 4096


# -----------------------------------------------------------------------------
# Fused forward kernel: one grid step per batch element.
# -----------------------------------------------------------------------------
def xray_fused_kernel(x_ref, w1_ref, b1_ref, w2_ref, b2_ref,
                      fw1_ref, fb1_ref, fw2_ref, fb2_ref, fw3_ref, fb3_ref,
                      o_ref, xpad1, xpad2):
    f32 = jnp.float32

    # ---- conv1 (3x3, pad=1) + bias + ReLU + 2x2 maxpool: one MXU matmul ----
    xpad1[...] = jnp.zeros_like(xpad1)
    xpad1[1:S0 + 1, 1:S0 + 1, :] = x_ref[...]                  # zero-padded image
    cols = []
    for i in range(4):                                         # 4x4 receptive field of
        for j in range(4):                                     # each pooled output
            t = xpad1[pl.ds(i, S1, 2), pl.ds(j, S1, 2), :]     # (16, 16, 1)
            cols.append(t.reshape(S1 * S1, 1))
    x1 = jnp.concatenate(cols, axis=1)                         # (256, 16)
    y1 = jnp.dot(x1, w1_ref[...], preferred_element_type=f32) + b1_ref[...]
    y1 = jnp.maximum(y1, 0.0)                                  # (256, 4*C1P)
    p1 = jnp.maximum(jnp.maximum(y1[:, 0:C1P], y1[:, C1P:2 * C1P]),
                     jnp.maximum(y1[:, 2 * C1P:3 * C1P], y1[:, 3 * C1P:4 * C1P]))
    p1 = p1.reshape(S1, S1, C1P)                               # pooled NHWC 16x16x32

    # ---- conv2 (3x3, pad=1) + bias + ReLU + 2x2 maxpool: one MXU matmul ----
    xpad2[...] = jnp.zeros_like(xpad2)
    xpad2[1:S1 + 1, 1:S1 + 1, :] = p1
    cols = []
    for i in range(4):
        for j in range(4):
            t = xpad2[pl.ds(i, S2, 2), pl.ds(j, S2, 2), :]     # (8, 8, 32)
            cols.append(t.reshape(S2 * S2, C1P))
    x2 = jnp.concatenate(cols, axis=1)                         # (64, 512)
    y2 = jnp.dot(x2, w2_ref[...], preferred_element_type=f32) + b2_ref[...]
    y2 = jnp.maximum(y2, 0.0)                                  # (64, 4*C2)
    p2 = jnp.maximum(jnp.maximum(y2[:, 0:C2], y2[:, C2:2 * C2]),
                     jnp.maximum(y2[:, 2 * C2:3 * C2], y2[:, 3 * C2:4 * C2]))
    # p2: (64, 64), rows = h2*8 + w2, cols = channel (pooled NHWC)

    # ---- flatten (fc1 weight rows are pre-permuted to this NHWC order) ----
    flat = jnp.concatenate([p2[m:m + 1, :] for m in range(S2 * S2)], axis=1)  # (1, 4096)

    # ---- fc1 + ReLU, dropout (eval) = identity, fc2 + ReLU, fc3 ----
    h = jnp.dot(flat, fw1_ref[...], preferred_element_type=f32) + fb1_ref[...]
    h = jnp.maximum(h, 0.0)
    # TODO(synk): nn.Dropout(0.2) is identity in eval mode; training-mode mask omitted.
    h = jnp.dot(h, fw2_ref[...], preferred_element_type=f32) + fb2_ref[...]
    h = jnp.maximum(h, 0.0)
    out = jnp.dot(h, fw3_ref[...], preferred_element_type=f32) + fb3_ref[...]
    o_ref[...] = out.astype(o_ref.dtype)


def xray_forward(x_nchw, kp):
    """x_nchw: (B, 1, S0, S0) float32; kp: packed kernel params."""
    B = x_nchw.shape[0]
    # C == 1, so NCHW -> NHWC is a pure (free) reshape, not a transpose.
    x_nhwc = x_nchw.reshape(B, S0, S0, 1)
    wmap = lambda b: (0, 0)
    out = pl.pallas_call(
        xray_fused_kernel,
        out_shape=jax.ShapeDtypeStruct((B, 1, NCLS), jnp.float32),
        grid=(B,),
        in_specs=[
            pl.BlockSpec((None, S0, S0, 1), lambda b: (b, 0, 0, 0)),
            pl.BlockSpec((16, 4 * C1P), wmap),          # conv1 expanded weights
            pl.BlockSpec((1, 4 * C1P), wmap),           # conv1 bias (tiled x4)
            pl.BlockSpec((16 * C1P, 4 * C2), wmap),     # conv2 expanded weights
            pl.BlockSpec((1, 4 * C2), wmap),            # conv2 bias (tiled x4)
            pl.BlockSpec((FC1_IN, FCHP), wmap),         # fc1 (rows NHWC-permuted, padded)
            pl.BlockSpec((1, FCHP), wmap),
            pl.BlockSpec((FCHP, FCHP), wmap),           # fc2 (padded)
            pl.BlockSpec((1, FCHP), wmap),
            pl.BlockSpec((FCHP, NCLS), wmap),           # fc3 (padded rows)
            pl.BlockSpec((1, NCLS), wmap),
        ],
        out_specs=pl.BlockSpec((None, 1, NCLS), lambda b: (b, 0, 0)),
        scratch_shapes=[
            pltpu.VMEM((S0 + 2, S0 + 2, 1), jnp.float32),    # zero-padded input image
            pltpu.VMEM((S1 + 2, S1 + 2, C1P), jnp.float32),  # zero-padded pooled1 map
        ],
        compiler_params=pltpu.CompilerParams(dimension_semantics=("parallel",)),
    )(x_nhwc, kp["w1"], kp["b1"], kp["w2"], kp["b2"],
      kp["fc1w"], kp["fc1b"], kp["fc2w"], kp["fc2b"], kp["fc3w"], kp["fc3b"])
    return out.reshape(B, NCLS)


# -----------------------------------------------------------------------------
# One-time (host side) parameter packing from PyTorch-convention tensors.
# -----------------------------------------------------------------------------
def _conv_pool_weight(w_hwio, cout_pad):
    """(3,3,cin,cout) -> (16*cin, 4*cout_pad): the 3x3 kernel embedded at each of the
    4 positions (a,b) of the 2x2 pool window inside a 4x4 patch; rows = (i*4+j)*cin+ci,
    cols = (a*2+b)*cout_pad + c.  Extra output channels are zero-padded."""
    _, _, cin, cout = w_hwio.shape
    wp = jnp.pad(w_hwio, ((0, 0), (0, 0), (0, 0), (0, cout_pad - cout)))
    big = jnp.zeros((4, 4, cin, 2, 2, cout_pad), jnp.float32)
    for a in range(2):
        for b in range(2):
            big = big.at[a:a + 3, b:b + 3, :, a, b, :].set(wp)
    return big.reshape(16 * cin, 4 * cout_pad)


def prepare_kernel_params(tp):
    # conv1: OIHW (28,1,3,3) -> HWIO (3,3,1,28) -> expanded (16, 128)
    w1 = _conv_pool_weight(jnp.transpose(tp["conv1_w"], (2, 3, 1, 0)), C1P)
    b1 = jnp.tile(jnp.pad(tp["conv1_b"], (0, C1P - C1)), 4).reshape(1, 4 * C1P)
    # conv2: OIHW (64,28,3,3) -> HWIO -> pad cin 28->32 -> expanded (512, 256)
    w2_hwio = jnp.transpose(tp["conv2_w"], (2, 3, 1, 0))
    w2_hwio = jnp.pad(w2_hwio, ((0, 0), (0, 0), (0, C1P - C1), (0, 0)))
    w2 = _conv_pool_weight(w2_hwio, C2)
    b2 = jnp.tile(tp["conv2_b"], 4).reshape(1, 4 * C2)
    # fc1: torch row k = c*64 + h*8 + w  ->  kernel row r = (h*8 + w)*64 + c
    fw1 = tp["fc1_w"].T.reshape(C2, S2, S2, FCH)            # (c, h, w, n)
    fw1 = jnp.transpose(fw1, (1, 2, 0, 3)).reshape(FC1_IN, FCH)
    fc1w = jnp.pad(fw1, ((0, 0), (0, FCHP - FCH)))
    fc1b = jnp.pad(tp["fc1_b"], (0, FCHP - FCH)).reshape(1, FCHP)
    fc2w = jnp.pad(tp["fc2_w"].T, ((0, FCHP - FCH), (0, FCHP - FCH)))
    fc2b = jnp.pad(tp["fc2_b"], (0, FCHP - FCH)).reshape(1, FCHP)
    fc3w = jnp.pad(tp["fc3_w"].T, ((0, FCHP - FCH), (0, 0)))
    fc3b = tp["fc3_b"].reshape(1, NCLS)
    return dict(w1=w1, b1=b1, w2=w2, b2=b2, fc1w=fc1w, fc1b=fc1b,
                fc2w=fc2w, fc2b=fc2b, fc3w=fc3w, fc3b=fc3b)


def init_torch_params(key):
    """PyTorch-convention (OIHW conv, (out,in) linear) parameters."""
    def u(k, shape, fan_in):
        bound = 1.0 / (float(fan_in) ** 0.5)
        return jax.random.uniform(k, shape, jnp.float32, -bound, bound)
    ks = jax.random.split(key, 10)
    return {
        "conv1_w": u(ks[0], (C1, 1, 3, 3), 9), "conv1_b": u(ks[1], (C1,), 9),
        "conv2_w": u(ks[2], (C2, C1, 3, 3), C1 * 9), "conv2_b": u(ks[3], (C2,), C1 * 9),
        "fc1_w": u(ks[4], (FCH, FC1_IN), FC1_IN), "fc1_b": u(ks[5], (FCH,), FC1_IN),
        "fc2_w": u(ks[6], (FCH, FCH), FCH), "fc2_b": u(ks[7], (FCH,), FCH),
        "fc3_w": u(ks[8], (NCLS, FCH), FCH), "fc3_b": u(ks[9], (NCLS,), FCH),
    }


# -----------------------------------------------------------------------------
# Pure-JAX reference (same math as the PyTorch module, eval mode).
# -----------------------------------------------------------------------------
def reference_forward(x_nchw, tp):
    hp = jax.lax.Precision.HIGHEST
    x = jnp.transpose(x_nchw, (0, 2, 3, 1))
    for wkey, bkey in (("conv1_w", "conv1_b"), ("conv2_w", "conv2_b")):
        w = jnp.transpose(tp[wkey], (2, 3, 1, 0))            # OIHW -> HWIO
        x = jax.lax.conv_general_dilated(
            x, w, (1, 1), "SAME",
            dimension_numbers=("NHWC", "HWIO", "NHWC"), precision=hp)
        x = jax.nn.relu(x + tp[bkey][None, None, None, :])
        x = jax.lax.reduce_window(x, -jnp.inf, jax.lax.max,
                                  (1, 2, 2, 1), (1, 2, 2, 1), "VALID")
    h = jnp.transpose(x, (0, 3, 1, 2)).reshape(x.shape[0], -1)   # NCHW flatten
    h = jax.nn.relu(jnp.dot(h, tp["fc1_w"].T, precision=hp) + tp["fc1_b"])
    h = jax.nn.relu(jnp.dot(h, tp["fc2_w"].T, precision=hp) + tp["fc2_b"])
    return jnp.dot(h, tp["fc3_w"].T, precision=hp) + tp["fc3_b"]


if __name__ == "__main__":
    key = jax.random.PRNGKey(0)
    kx, kparam = jax.random.split(key)

    B = 2
    x = jax.random.normal(kx, (B, 1, S0, S0), jnp.float32)      # NCHW, like PyTorch
    torch_params = init_torch_params(kparam)
    kernel_params = prepare_kernel_params(torch_params)

    fwd = jax.jit(xray_forward)
    out = jax.block_until_ready(fwd(x, kernel_params))
    assert out.shape == (B, NCLS), out.shape
    assert bool(jnp.all(jnp.isfinite(out)))

    ref = jax.block_until_ready(jax.jit(reference_forward)(x, torch_params))
    err = float(jnp.max(jnp.abs(out - ref)))
    assert err < 2e-2, f"mismatch vs pure-JAX reference: max abs err = {err}"

    print("KERNEL_OK")
</pallas_src>

<mosaic_0001>
module attributes {stable_mosaic.version = 11 : i64} {
  func.func @xray_fused_kernel(%arg0: i32, %arg1: memref<1x32x32x1xf32, #tpu.memory_space<vmem>>, %arg2: memref<16x128xf32, #tpu.memory_space<vmem>>, %arg3: memref<1x128xf32, #tpu.memory_space<vmem>>, %arg4: memref<512x256xf32, #tpu.memory_space<vmem>>, %arg5: memref<1x256xf32, #tpu.memory_space<vmem>>, %arg6: memref<4096x32xf32, #tpu.memory_space<vmem>>, %arg7: memref<1x32xf32, #tpu.memory_space<vmem>>, %arg8: memref<32x32xf32, #tpu.memory_space<vmem>>, %arg9: memref<1x32xf32, #tpu.memory_space<vmem>>, %arg10: memref<32x2xf32, #tpu.memory_space<vmem>>, %arg11: memref<1x2xf32, #tpu.memory_space<vmem>>, %arg12: memref<1x1x2xf32, #tpu.memory_space<vmem>>, %arg13: memref<34x34x1xf32, #tpu.memory_space<vmem>>, %arg14: memref<18x18x32xf32, #tpu.memory_space<vmem>>) attributes {dimension_semantics = [#tpu.dimension_semantics<parallel>], iteration_bounds = array<i64: 2>, scalar_prefetch = 0 : i64, scratch_operands = 2 : i64, tpu.core_type = #tpu.core_type<tc>, window_params = [{transform_indices = @transform_0, window_bounds = array<i64: 1, 32, 32, 1>}, {pipeline_mode = #tpu.pipeline_mode<synchronous>, transform_indices = @transform_1, window_bounds = array<i64: 16, 128>}, {pipeline_mode = #tpu.pipeline_mode<synchronous>, transform_indices = @transform_2, window_bounds = array<i64: 1, 128>}, {pipeline_mode = #tpu.pipeline_mode<synchronous>, transform_indices = @transform_3, window_bounds = array<i64: 512, 256>}, {pipeline_mode = #tpu.pipeline_mode<synchronous>, transform_indices = @transform_4, window_bounds = array<i64: 1, 256>}, {pipeline_mode = #tpu.pipeline_mode<synchronous>, transform_indices = @transform_5, window_bounds = array<i64: 4096, 32>}, {pipeline_mode = #tpu.pipeline_mode<synchronous>, transform_indices = @transform_6, window_bounds = array<i64: 1, 32>}, {pipeline_mode = #tpu.pipeline_mode<synchronous>, transform_indices = @transform_7, window_bounds = array<i64: 32, 32>}, {pipeline_mode = #tpu.pipeline_mode<synchronous>, transform_indices = @transform_8, window_bounds = array<i64: 1, 32>}, {pipeline_mode = #tpu.pipeline_mode<synchronous>, transform_indices = @transform_9, window_bounds = array<i64: 32, 2>}, {pipeline_mode = #tpu.pipeline_mode<synchronous>, transform_indices = @transform_10, window_bounds = array<i64: 1, 2>}, {transform_indices = @transform_11, window_bounds = array<i64: 1, 1, 2>}]} {
    %cst = arith.constant 0.000000e+00 : f32
    %0 = vector.broadcast %cst : f32 to vector<34x34x1xf32>
    %c0 = arith.constant 0 : index
    %c0_0 = arith.constant 0 : index
    %c0_1 = arith.constant 0 : index
    %1 = vector.load %arg13[%c0, %c0_0, %c0_1] : memref<34x34x1xf32, #tpu.memory_space<vmem>>, vector<34x34x1xf32>
    tpu.vector_store %arg13[%c0, %c0_0, %c0_1], %0 {strides = array<i32>} : memref<34x34x1xf32, #tpu.memory_space<vmem>>, vector<34x34x1xf32>,
    %c0_2 = arith.constant 0 : index
    %c0_3 = arith.constant 0 : index
    %c0_4 = arith.constant 0 : index
    %c0_5 = arith.constant 0 : index
    %2 = vector.load %arg1[%c0_2, %c0_3, %c0_4, %c0_5] : memref<1x32x32x1xf32, #tpu.memory_space<vmem>>, vector<1x32x32x1xf32>
    %3 = vector.shape_cast %2 : vector<1x32x32x1xf32> to vector<32x32x1xf32>
    %c1 = arith.constant 1 : index
    %c1_6 = arith.constant 1 : index
    %c0_7 = arith.constant 0 : index
    %4 = vector.load %arg13[%c1, %c1_6, %c0_7] : memref<34x34x1xf32, #tpu.memory_space<vmem>>, vector<32x32x1xf32>
    tpu.vector_store %arg13[%c1, %c1_6, %c0_7], %3 {strides = array<i32>} : memref<34x34x1xf32, #tpu.memory_space<vmem>>, vector<32x32x1xf32>,
    %c0_8 = arith.constant 0 : index
    %c0_9 = arith.constant 0 : index
    %c0_10 = arith.constant 0 : index
    %5 = tpu.strided_load %arg13[%c0_8, %c0_9, %c0_10] {strides = array<i32: 2, 2, 1>} : memref<34x34x1xf32, #tpu.memory_space<vmem>>, vector<16x16x1xf32>
    %6 = vector.shape_cast %5 : vector<16x16x1xf32> to vector<256x1xf32>
    %c0_11 = arith.constant 0 : index
    %c1_12 = arith.constant 1 : index
    %c0_13 = arith.constant 0 : index
    %7 = tpu.strided_load %arg13[%c0_11, %c1_12, %c0_13] {strides = array<i32: 2, 2, 1>} : memref<34x34x1xf32, #tpu.memory_space<vmem>>, vector<16x16x1xf32>
    %8 = vector.shape_cast %7 : vector<16x16x1xf32> to vector<256x1xf32>
    %c0_14 = arith.constant 0 : index
    %c2 = arith.constant 2 : index
    %c0_15 = arith.constant 0 : index
    %9 = tpu.strided_load %arg13[%c0_14, %c2, %c0_15] {strides = array<i32: 2, 2, 1>} : memref<34x34x1xf32, #tpu.memory_space<vmem>>, vector<16x16x1xf32>
    %10 = vector.shape_cast %9 : vector<16x16x1xf32> to vector<256x1xf32>
    %c0_16 = arith.constant 0 : index
    %c3 = arith.constant 3 : index
    %c0_17 = arith.constant 0 : index
    %11 = tpu.strided_load %arg13[%c0_16, %c3, %c0_17] {strides = array<i32: 2, 2, 1>} : memref<34x34x1xf32, #tpu.memory_space<vmem>>, vector<16x16x1xf32>
    %12 = vector.shape_cast %11 : vector<16x16x1xf32> to vector<256x1xf32>
    %c1_18 = arith.constant 1 : index
    %c0_19 = arith.constant 0 : index
    %c0_20 = arith.constant 0 : index
    %13 = tpu.strided_load %arg13[%c1_18, %c0_19, %c0_20] {strides = array<i32: 2, 2, 1>} : memref<34x34x1xf32, #tpu.memory_space<vmem>>, vector<16x16x1xf32>
    %14 = vector.shape_cast %13 : vector<16x16x1xf32> to vector<256x1xf32>
    %c1_21 = arith.constant 1 : index
    %c1_22 = arith.constant 1 : index
    %c0_23 = arith.constant 0 : index
    %15 = tpu.strided_load %arg13[%c1_21, %c1_22, %c0_23] {strides = array<i32: 2, 2, 1>} : memref<34x34x1xf32, #tpu.memory_space<vmem>>, vector<16x16x1xf32>
    %16 = vector.shape_cast %15 : vector<16x16x1xf32> to vector<256x1xf32>
    %c1_24 = arith.constant 1 : index
    %c2_25 = arith.constant 2 : index
    %c0_26 = arith.constant 0 : index
    %17 = tpu.strided_load %arg13[%c1_24, %c2_25, %c0_26] {strides = array<i32: 2, 2, 1>} : memref<34x34x1xf32, #tpu.memory_space<vmem>>, vector<16x16x1xf32>
    %18 = vector.shape_cast %17 : vector<16x16x1xf32> to vector<256x1xf32>
    %c1_27 = arith.constant 1 : index
    %c3_28 = arith.constant 3 : index
    %c0_29 = arith.constant 0 : index
    %19 = tpu.strided_load %arg13[%c1_27, %c3_28, %c0_29] {strides = array<i32: 2, 2, 1>} : memref<34x34x1xf32, #tpu.memory_space<vmem>>, vector<16x16x1xf32>
    %20 = vector.shape_cast %19 : vector<16x16x1xf32> to vector<256x1xf32>
    %c2_30 = arith.constant 2 : index
    %c0_31 = arith.constant 0 : index
    %c0_32 = arith.constant 0 : index
    %21 = tpu.strided_load %arg13[%c2_30, %c0_31, %c0_32] {strides = array<i32: 2, 2, 1>} : memref<34x34x1xf32, #tpu.memory_space<vmem>>, vector<16x16x1xf32>
    %22 = vector.shape_cast %21 : vector<16x16x1xf32> to vector<256x1xf32>
    %c2_33 = arith.constant 2 : index
    %c1_34 = arith.constant 1 : index
    %c0_35 = arith.constant 0 : index
    %23 = tpu.strided_load %arg13[%c2_33, %c1_34, %c0_35] {strides = array<i32: 2, 2, 1>} : memref<34x34x1xf32, #tpu.memory_space<vmem>>, vector<16x16x1xf32>
    %24 = vector.shape_cast %23 : vector<16x16x1xf32> to vector<256x1xf32>
    %c2_36 = arith.constant 2 : index
    %c2_37 = arith.constant 2 : index
    %c0_38 = arith.constant 0 : index
    %25 = tpu.strided_load %arg13[%c2_36, %c2_37, %c0_38] {strides = array<i32: 2, 2, 1>} : memref<34x34x1xf32, #tpu.memory_space<vmem>>, vector<16x16x1xf32>
    %26 = vector.shape_cast %25 : vector<16x16x1xf32> to vector<256x1xf32>
    %c2_39 = arith.constant 2 : index
    %c3_40 = arith.constant 3 : index
    %c0_41 = arith.constant 0 : index
    %27 = tpu.strided_load %arg13[%c2_39, %c3_40, %c0_41] {strides = array<i32: 2, 2, 1>} : memref<34x34x1xf32, #tpu.memory_space<vmem>>, vector<16x16x1xf32>
    %28 = vector.shape_cast %27 : vector<16x16x1xf32> to vector<256x1xf32>
    %c3_42 = arith.constant 3 : index
    %c0_43 = arith.constant 0 : index
    %c0_44 = arith.constant 0 : index
    %29 = tpu.strided_load %arg13[%c3_42, %c0_43, %c0_44] {strides = array<i32: 2, 2, 1>} : memref<34x34x1xf32, #tpu.memory_space<vmem>>, vector<16x16x1xf32>
    %30 = vector.shape_cast %29 : vector<16x16x1xf32> to vector<256x1xf32>
    %c3_45 = arith.constant 3 : index
    %c1_46 = arith.constant 1 : index
    %c0_47 = arith.constant 0 : index
    %31 = tpu.strided_load %arg13[%c3_45, %c1_46, %c0_47] {strides = array<i32: 2, 2, 1>} : memref<34x34x1xf32, #tpu.memory_space<vmem>>, vector<16x16x1xf32>
    %32 = vector.shape_cast %31 : vector<16x16x1xf32> to vector<256x1xf32>
    %c3_48 = arith.constant 3 : index
    %c2_49 = arith.constant 2 : index
    %c0_50 = arith.constant 0 : index
    %33 = tpu.strided_load %arg13[%c3_48, %c2_49, %c0_50] {strides = array<i32: 2, 2, 1>} : memref<34x34x1xf32, #tpu.memory_space<vmem>>, vector<16x16x1xf32>
    %34 = vector.shape_cast %33 : vector<16x16x1xf32> to vector<256x1xf32>
    %c3_51 = arith.constant 3 : index
    %c3_52 = arith.constant 3 : index
    %c0_53 = arith.constant 0 : index
    %35 = tpu.strided_load %arg13[%c3_51, %c3_52, %c0_53] {strides = array<i32: 2, 2, 1>} : memref<34x34x1xf32, #tpu.memory_space<vmem>>, vector<16x16x1xf32>
    %36 = vector.shape_cast %35 : vector<16x16x1xf32> to vector<256x1xf32>
    %37 = tpu.concatenate %6, %8, %10, %12, %14, %16, %18, %20, %22, %24, %26, %28, %30, %32, %34, %36 in 1 : vector<256x1xf32>, vector<256x1xf32>, vector<256x1xf32>, vector<256x1xf32>, vector<256x1xf32>, vector<256x1xf32>, vector<256x1xf32>, vector<256x1xf32>, vector<256x1xf32>, vector<256x1xf32>, vector<256x1xf32>, vector<256x1xf32>, vector<256x1xf32>, vector<256x1xf32>, vector<256x1xf32>, vector<256x1xf32> -> vector<256x16xf32>
    %c0_54 = arith.constant 0 : index
    %c0_55 = arith.constant 0 : index
    %38 = vector.load %arg2[%c0_54, %c0_55] : memref<16x128xf32, #tpu.memory_space<vmem>>, vector<16x128xf32>
    %cst_56 = arith.constant dense<0.000000e+00> : vector<256x128xf32>
    %39 = tpu.matmul %37, %38, %cst_56 {dimension_numbers = #tpu.dot_dimension_numbers<[1], [0], [0], [1], [0, 0, 1, 1], [], []>} : vector<256x16xf32>, vector<16x128xf32>, vector<256x128xf32> -> vector<256x128xf32>
    %c0_57 = arith.constant 0 : index
    %c0_58 = arith.constant 0 : index
    %40 = vector.load %arg3[%c0_57, %c0_58] : memref<1x128xf32, #tpu.memory_space<vmem>>, vector<1x128xf32>
    %41 = vector.broadcast %40 : vector<1x128xf32> to vector<256x128xf32>
    %42 = arith.addf %39, %41 : vector<256x128xf32>
    %cst_59 = arith.constant 0.000000e+00 : f32
    %43 = vector.broadcast %cst_59 : f32 to vector<256x128xf32>
    %44 = arith.maximumf %42, %43 : vector<256x128xf32>
    %45 = vector.extract_strided_slice %44 {offsets = [0, 0], sizes = [256, 32], strides = [1, 1]} : vector<256x128xf32> to vector<256x32xf32>
    %46 = vector.extract_strided_slice %44 {offsets = [0, 32], sizes = [256, 32], strides = [1, 1]} : vector<256x128xf32> to vector<256x32xf32>
    %47 = arith.maximumf %45, %46 : vector<256x32xf32>
    %48 = vector.extract_strided_slice %44 {offsets = [0, 64], sizes = [256, 32], strides = [1, 1]} : vector<256x128xf32> to vector<256x32xf32>
    %49 = vector.extract_strided_slice %44 {offsets = [0, 96], sizes = [256, 32], strides = [1, 1]} : vector<256x128xf32> to vector<256x32xf32>
    %50 = arith.maximumf %48, %49 : vector<256x32xf32>
    %51 = arith.maximumf %47, %50 : vector<256x32xf32>
    %52 = vector.shape_cast %51 : vector<256x32xf32> to vector<16x16x32xf32>
    %cst_60 = arith.constant 0.000000e+00 : f32
    %53 = vector.broadcast %cst_60 : f32 to vector<18x18x32xf32>
    %c0_61 = arith.constant 0 : index
    %c0_62 = arith.constant 0 : index
    %c0_63 = arith.constant 0 : index
    %54 = vector.load %arg14[%c0_61, %c0_62, %c0_63] : memref<18x18x32xf32, #tpu.memory_space<vmem>>, vector<18x18x32xf32>
    tpu.vector_store %arg14[%c0_61, %c0_62, %c0_63], %53 {strides = array<i32>} : memref<18x18x32xf32, #tpu.memory_space<vmem>>, vector<18x18x32xf32>,
    %c1_64 = arith.constant 1 : index
    %c1_65 = arith.constant 1 : index
    %c0_66 = arith.constant 0 : index
    %55 = vector.load %arg14[%c1_64, %c1_65, %c0_66] : memref<18x18x32xf32, #tpu.memory_space<vmem>>, vector<16x16x32xf32>
    tpu.vector_store %arg14[%c1_64, %c1_65, %c0_66], %52 {strides = array<i32>} : memref<18x18x32xf32, #tpu.memory_space<vmem>>, vector<16x16x32xf32>,
    %c0_67 = arith.constant 0 : index
    %c0_68 = arith.constant 0 : index
    %c0_69 = arith.constant 0 : index
    %56 = tpu.strided_load %arg14[%c0_67, %c0_68, %c0_69] {strides = array<i32: 2, 2, 1>} : memref<18x18x32xf32, #tpu.memory_space<vmem>>, vector<8x8x32xf32>
    %57 = vector.shape_cast %56 : vector<8x8x32xf32> to vector<64x32xf32>
    %c0_70 = arith.constant 0 : index
    %c1_71 = arith.constant 1 : index
    %c0_72 = arith.constant 0 : index
    %58 = tpu.strided_load %arg14[%c0_70, %c1_71, %c0_72] {strides = array<i32: 2, 2, 1>} : memref<18x18x32xf32, #tpu.memory_space<vmem>>, vector<8x8x32xf32>
    %59 = vector.shape_cast %58 : vector<8x8x32xf32> to vector<64x32xf32>
    %c0_73 = arith.constant 0 : index
    %c2_74 = arith.constant 2 : index
    %c0_75 = arith.constant 0 : index
    %60 = tpu.strided_load %arg14[%c0_73, %c2_74, %c0_75] {strides = array<i32: 2, 2, 1>} : memref<18x18x32xf32, #tpu.memory_space<vmem>>, vector<8x8x32xf32>
    %61 = vector.shape_cast %60 : vector<8x8x32xf32> to vector<64x32xf32>
    %c0_76 = arith.constant 0 : index
    %c3_77 = arith.constant 3 : index
    %c0_78 = arith.constant 0 : index
    %62 = tpu.strided_load %arg14[%c0_76, %c3_77, %c0_78] {strides = array<i32: 2, 2, 1>} : memref<18x18x32xf32, #tpu.memory_space<vmem>>, vector<8x8x32xf32>
    %63 = vector.shape_cast %62 : vector<8x8x32xf32> to vector<64x32xf32>
    %c1_79 = arith.constant 1 : index
    %c0_80 = arith.constant 0 : index
    %c0_81 = arith.constant 0 : index
    %64 = tpu.strided_load %arg14[%c1_79, %c0_80, %c0_81] {strides = array<i32: 2, 2, 1>} : memref<18x18x32xf32, #tpu.memory_space<vmem>>, vector<8x8x32xf32>
    %65 = vector.shape_cast %64 : vector<8x8x32xf32> to vector<64x32xf32>
    %c1_82 = arith.constant 1 : index
    %c1_83 = arith.constant 1 : index
    %c0_84 = arith.constant 0 : index
    %66 = tpu.strided_load %arg14[%c1_82, %c1_83, %c0_84] {strides = array<i32: 2, 2, 1>} : memref<18x18x32xf32, #tpu.memory_space<vmem>>, vector<8x8x32xf32>
    %67 = vector.shape_cast %66 : vector<8x8x32xf32> to vector<64x32xf32>
    %c1_85 = arith.constant 1 : index
    %c2_86 = arith.constant 2 : index
    %c0_87 = arith.constant 0 : index
    %68 = tpu.strided_load %arg14[%c1_85, %c2_86, %c0_87] {strides = array<i32: 2, 2, 1>} : memref<18x18x32xf32, #tpu.memory_space<vmem>>, vector<8x8x32xf32>
    %69 = vector.shape_cast %68 : vector<8x8x32xf32> to vector<64x32xf32>
    %c1_88 = arith.constant 1 : index
    %c3_89 = arith.constant 3 : index
    %c0_90 = arith.constant 0 : index
    %70 = tpu.strided_load %arg14[%c1_88, %c3_89, %c0_90] {strides = array<i32: 2, 2, 1>} : memref<18x18x32xf32, #tpu.memory_space<vmem>>, vector<8x8x32xf32>
    %71 = vector.shape_cast %70 : vector<8x8x32xf32> to vector<64x32xf32>
    %c2_91 = arith.constant 2 : index
    %c0_92 = arith.constant 0 : index
    %c0_93 = arith.constant 0 : index
    %72 = tpu.strided_load %arg14[%c2_91, %c0_92, %c0_93] {strides = array<i32: 2, 2, 1>} : memref<18x18x32xf32, #tpu.memory_space<vmem>>, vector<8x8x32xf32>
    %73 = vector.shape_cast %72 : vector<8x8x32xf32> to vector<64x32xf32>
    %c2_94 = arith.constant 2 : index
    %c1_95 = arith.constant 1 : index
    %c0_96 = arith.constant 0 : index
    %74 = tpu.strided_load %arg14[%c2_94, %c1_95, %c0_96] {strides = array<i32: 2, 2, 1>} : memref<18x18x32xf32, #tpu.memory_space<vmem>>, vector<8x8x32xf32>
    %75 = vector.shape_cast %74 : vector<8x8x32xf32> to vector<64x32xf32>
    %c2_97 = arith.constant 2 : index
    %c2_98 = arith.constant 2 : index
    %c0_99 = arith.constant 0 : index
    %76 = tpu.strided_load %arg14[%c2_97, %c2_98, %c0_99] {strides = array<i32: 2, 2, 1>} : memref<18x18x32xf32, #tpu.memory_space<vmem>>, vector<8x8x32xf32>
    %77 = vector.shape_cast %76 : vector<8x8x32xf32> to vector<64x32xf32>
    %c2_100 = arith.constant 2 : index
    %c3_101 = arith.constant 3 : index
    %c0_102 = arith.constant 0 : index
    %78 = tpu.strided_load %arg14[%c2_100, %c3_101, %c0_102] {strides = array<i32: 2, 2, 1>} : memref<18x18x32xf32, #tpu.memory_space<vmem>>, vector<8x8x32xf32>
    %79 = vector.shape_cast %78 : vector<8x8x32xf32> to vector<64x32xf32>
    %c3_103 = arith.constant 3 : index
    %c0_104 = arith.constant 0 : index
    %c0_105 = arith.constant 0 : index
    %80 = tpu.strided_load %arg14[%c3_103, %c0_104, %c0_105] {strides = array<i32: 2, 2, 1>} : memref<18x18x32xf32, #tpu.memory_space<vmem>>, vector<8x8x32xf32>
    %81 = vector.shape_cast %80 : vector<8x8x32xf32> to vector<64x32xf32>
    %c3_106 = arith.constant 3 : index
    %c1_107 = arith.constant 1 : index
    %c0_108 = arith.constant 0 : index
    %82 = tpu.strided_load %arg14[%c3_106, %c1_107, %c0_108] {strides = array<i32: 2, 2, 1>} : memref<18x18x32xf32, #tpu.memory_space<vmem>>, vector<8x8x32xf32>
    %83 = vector.shape_cast %82 : vector<8x8x32xf32> to vector<64x32xf32>
    %c3_109 = arith.constant 3 : index
    %c2_110 = arith.constant 2 : index
    %c0_111 = arith.constant 0 : index
    %84 = tpu.strided_load %arg14[%c3_109, %c2_110, %c0_111] {strides = array<i32: 2, 2, 1>} : memref<18x18x32xf32, #tpu.memory_space<vmem>>, vector<8x8x32xf32>
    %85 = vector.shape_cast %84 : vector<8x8x32xf32> to vector<64x32xf32>
    %c3_112 = arith.constant 3 : index
    %c3_113 = arith.constant 3 : index
    %c0_114 = arith.constant 0 : index
    %86 = tpu.strided_load %arg14[%c3_112, %c3_113, %c0_114] {strides = array<i32: 2, 2, 1>} : memref<18x18x32xf32, #tpu.memory_space<vmem>>, vector<8x8x32xf32>
    %87 = vector.shape_cast %86 : vector<8x8x32xf32> to vector<64x32xf32>
    %88 = tpu.concatenate %57, %59, %61, %63, %65, %67, %69, %71, %73, %75, %77, %79, %81, %83, %85, %87 in 1 : vector<64x32xf32>, vector<64x32xf32>, vector<64x32xf32>, vector<64x32xf32>, vector<64x32xf32>, vector<64x32xf32>, vector<64x32xf32>, vector<64x32xf32>, vector<64x32xf32>, vector<64x32xf32>, vector<64x32xf32>, vector<64x32xf32>, vector<64x32xf32>, vector<64x32xf32>, vector<64x32xf32>, vector<64x32xf32> -> vector<64x512xf32>
    %c0_115 = arith.constant 0 : index
    %c0_116 = arith.constant 0 : index
    %89 = vector.load %arg4[%c0_115, %c0_116] : memref<512x256xf32, #tpu.memory_space<vmem>>, vector<512x256xf32>
    %cst_117 = arith.constant dense<0.000000e+00> : vector<64x256xf32>
    %90 = tpu.matmul %88, %89, %cst_117 {dimension_numbers = #tpu.dot_dimension_numbers<[1], [0], [0], [1], [0, 0, 1, 1], [], []>} : vector<64x512xf32>, vector<512x256xf32>, vector<64x256xf32> -> vector<64x256xf32>
    %c0_118 = arith.constant 0 : index
    %c0_119 = arith.constant 0 : index
    %91 = vector.load %arg5[%c0_118, %c0_119] : memref<1x256xf32, #tpu.memory_space<vmem>>, vector<1x256xf32>
    %92 = vector.broadcast %91 : vector<1x256xf32> to vector<64x256xf32>
    %93 = arith.addf %90, %92 : vector<64x256xf32>
    %cst_120 = arith.constant 0.000000e+00 : f32
    %94 = vector.broadcast %cst_120 : f32 to vector<64x256xf32>
    %95 = arith.maximumf %93, %94 : vector<64x256xf32>
    %96 = vector.extract_strided_slice %95 {offsets = [0, 0], sizes = [64, 64], strides = [1, 1]} : vector<64x256xf32> to vector<64x64xf32>
    %97 = vector.extract_strided_slice %95 {offsets = [0, 64], sizes = [64, 64], strides = [1, 1]} : vector<64x256xf32> to vector<64x64xf32>
    %98 = arith.maximumf %96, %97 : vector<64x64xf32>
    %99 = vector.extract_strided_slice %95 {offsets = [0, 128], sizes = [64, 64], strides = [1, 1]} : vector<64x256xf32> to vector<64x64xf32>
    %100 = vector.extract_strided_slice %95 {offsets = [0, 192], sizes = [64, 64], strides = [1, 1]} : vector<64x256xf32> to vector<64x64xf32>
    %101 = arith.maximumf %99, %100 : vector<64x64xf32>
    %102 = arith.maximumf %98, %101 : vector<64x64xf32>
    %103 = vector.extract_strided_slice %102 {offsets = [0, 0], sizes = [1, 64], strides = [1, 1]} : vector<64x64xf32> to vector<1x64xf32>
    %104 = vector.extract_strided_slice %102 {offsets = [1, 0], sizes = [1, 64], strides = [1, 1]} : vector<64x64xf32> to vector<1x64xf32>
    %105 = vector.extract_strided_slice %102 {offsets = [2, 0], sizes = [1, 64], strides = [1, 1]} : vector<64x64xf32> to vector<1x64xf32>
    %106 = vector.extract_strided_slice %102 {offsets = [3, 0], sizes = [1, 64], strides = [1, 1]} : vector<64x64xf32> to vector<1x64xf32>
    %107 = vector.extract_strided_slice %102 {offsets = [4, 0], sizes = [1, 64], strides = [1, 1]} : vector<64x64xf32> to vector<1x64xf32>
    %108 = vector.extract_strided_slice %102 {offsets = [5, 0], sizes = [1, 64], strides = [1, 1]} : vector<64x64xf32> to vector<1x64xf32>
    %109 = vector.extract_strided_slice %102 {offsets = [6, 0], sizes = [1, 64], strides = [1, 1]} : vector<64x64xf32> to vector<1x64xf32>
    %110 = vector.extract_strided_slice %102 {offsets = [7, 0], sizes = [1, 64], strides = [1, 1]} : vector<64x64xf32> to vector<1x64xf32>
    %111 = vector.extract_strided_slice %102 {offsets = [8, 0], sizes = [1, 64], strides = [1, 1]} : vector<64x64xf32> to vector<1x64xf32>
    %112 = vector.extract_strided_slice %102 {offsets = [9, 0], sizes = [1, 64], strides = [1, 1]} : vector<64x64xf32> to vector<1x64xf32>
    %113 = vector.extract_strided_slice %102 {offsets = [10, 0], sizes = [1, 64], strides = [1, 1]} : vector<64x64xf32> to vector<1x64xf32>
    %114 = vector.extract_strided_slice %102 {offsets = [11, 0], sizes = [1, 64], strides = [1, 1]} : vector<64x64xf32> to vector<1x64xf32>
    %115 = vector.extract_strided_slice %102 {offsets = [12, 0], sizes = [1, 64], strides = [1, 1]} : vector<64x64xf32> to vector<1x64xf32>
    %116 = vector.extract_strided_slice %102 {offsets = [13, 0], sizes = [1, 64], strides = [1, 1]} : vector<64x64xf32> to vector<1x64xf32>
    %117 = vector.extract_strided_slice %102 {offsets = [14, 0], sizes = [1, 64], strides = [1, 1]} : vector<64x64xf32> to vector<1x64xf32>
    %118 = vector.extract_strided_slice %102 {offsets = [15, 0], sizes = [1, 64], strides = [1, 1]} : vector<64x64xf32> to vector<1x64xf32>
    %119 = vector.extract_strided_slice %102 {offsets = [16, 0], sizes = [1, 64], strides = [1, 1]} : vector<64x64xf32> to vector<1x64xf32>
    %120 = vector.extract_strided_slice %102 {offsets = [17, 0], sizes = [1, 64], strides = [1, 1]} : vector<64x64xf32> to vector<1x64xf32>
    %121 = vector.extract_strided_slice %102 {offsets = [18, 0], sizes = [1, 64], strides = [1, 1]} : vector<64x64xf32> to vector<1x64xf32>
    %122 = vector.extract_strided_slice %102 {offsets = [19, 0], sizes = [1, 64], strides = [1, 1]} : vector<64x64xf32> to vector<1x64xf32>
    %123 = vector.extract_strided_slice %102 {offsets = [20, 0], sizes = [1, 64], strides = [1, 1]} : vector<64x64xf32> to vector<1x64xf32>
    %124 = vector.extract_strided_slice %102 {offsets = [21, 0], sizes = [1, 64], strides = [1, 1]} : vector<64x64xf32> to vector<1x64xf32>
    %125 = vector.extract_strided_slice %102 {offsets = [22, 0], sizes = [1, 64], strides = [1, 1]} : vector<64x64xf32> to vector<1x64xf32>
    %126 = vector.extract_strided_slice %102 {offsets = [23, 0], sizes = [1, 64], strides = [1, 1]} : vector<64x64xf32> to vector<1x64xf32>
    %127 = vector.extract_strided_slice %102 {offsets = [24, 0], sizes = [1, 64], strides = [1, 1]} : vector<64x64xf32> to vector<1x64xf32>
    %128 = vector.extract_strided_slice %102 {offsets = [25, 0], sizes = [1, 64], strides = [1, 1]} : vector<64x64xf32> to vector<1x64xf32>
    %129 = vector.extract_strided_slice %102 {offsets = [26, 0], sizes = [1, 64], strides = [1, 1]} : vector<64x64xf32> to vector<1x64xf32>
    %130 = vector.extract_strided_slice %102 {offsets = [27, 0], sizes = [1, 64], strides = [1, 1]} : vector<64x64xf32> to vector<1x64xf32>
    %131 = vector.extract_strided_slice %102 {offsets = [28, 0], sizes = [1, 64], strides = [1, 1]} : vector<64x64xf32> to vector<1x64xf32>
    %132 = vector.extract_strided_slice %102 {offsets = [29, 0], sizes = [1, 64], strides = [1, 1]} : vector<64x64xf32> to vector<1x64xf32>
    %133 = vector.extract_strided_slice %102 {offsets = [30, 0], sizes = [1, 64], strides = [1, 1]} : vector<64x64xf32> to vector<1x64xf32>
    %134 = vector.extract_strided_slice %102 {offsets = [31, 0], sizes = [1, 64], strides = [1, 1]} : vector<64x64xf32> to vector<1x64xf32>
    %135 = vector.extract_strided_slice %102 {offsets = [32, 0], sizes = [1, 64], strides = [1, 1]} : vector<64x64xf32> to vector<1x64xf32>
    %136 = vector.extract_strided_slice %102 {offsets = [33, 0], sizes = [1, 64], strides = [1, 1]} : vector<64x64xf32> to vector<1x64xf32>
    %137 = vector.extract_strided_slice %102 {offsets = [34, 0], sizes = [1, 64], strides = [1, 1]} : vector<64x64xf32> to vector<1x64xf32>
    %138 = vector.extract_strided_slice %102 {offsets = [35, 0], sizes = [1, 64], strides = [1, 1]} : vector<64x64xf32> to vector<1x64xf32>
    %139 = vector.extract_strided_slice %102 {offsets = [36, 0], sizes = [1, 64], strides = [1, 1]} : vector<64x64xf32> to vector<1x64xf32>
    %140 = vector.extract_strided_slice %102 {offsets = [37, 0], sizes = [1, 64], strides = [1, 1]} : vector<64x64xf32> to vector<1x64xf32>
    %141 = vector.extract_strided_slice %102 {offsets = [38, 0], sizes = [1, 64], strides = [1, 1]} : vector<64x64xf32> to vector<1x64xf32>
    %142 = vector.extract_strided_slice %102 {offsets = [39, 0], sizes = [1, 64], strides = [1, 1]} : vector<64x64xf32> to vector<1x64xf32>
    %143 = vector.extract_strided_slice %102 {offsets = [40, 0], sizes = [1, 64], strides = [1, 1]} : vector<64x64xf32> to vector<1x64xf32>
    %144 = vector.extract_strided_slice %102 {offsets = [41, 0], sizes = [1, 64], strides = [1, 1]} : vector<64x64xf32> to vector<1x64xf32>
    %145 = vector.extract_strided_slice %102 {offsets = [42, 0], sizes = [1, 64], strides = [1, 1]} : vector<64x64xf32> to vector<1x64xf32>
    %146 = vector.extract_strided_slice %102 {offsets = [43, 0], sizes = [1, 64], strides = [1, 1]} : vector<64x64xf32> to vector<1x64xf32>
    %147 = vector.extract_strided_slice %102 {offsets = [44, 0], sizes = [1, 64], strides = [1, 1]} : vector<64x64xf32> to vector<1x64xf32>
    %148 = vector.extract_strided_slice %102 {offsets = [45, 0], sizes = [1, 64], strides = [1, 1]} : vector<64x64xf32> to vector<1x64xf32>
    %149 = vector.extract_strided_slice %102 {offsets = [46, 0], sizes = [1, 64], strides = [1, 1]} : vector<64x64xf32> to vector<1x64xf32>
    %150 = vector.extract_strided_slice %102 {offsets = [47, 0], sizes = [1, 64], strides = [1, 1]} : vector<64x64xf32> to vector<1x64xf32>
    %151 = vector.extract_strided_slice %102 {offsets = [48, 0], sizes = [1, 64], strides = [1, 1]} : vector<64x64xf32> to vector<1x64xf32>
    %152 = vector.extract_strided_slice %102 {offsets = [49, 0], sizes = [1, 64], strides = [1, 1]} : vector<64x64xf32> to vector<1x64xf32>
    %153 = vector.extract_strided_slice %102 {offsets = [50, 0], sizes = [1, 64], strides = [1, 1]} : vector<64x64xf32> to vector<1x64xf32>
    %154 = vector.extract_strided_slice %102 {offsets = [51, 0], sizes = [1, 64], strides = [1, 1]} : vector<64x64xf32> to vector<1x64xf32>
    %155 = vector.extract_strided_slice %102 {offsets = [52, 0], sizes = [1, 64], strides = [1, 1]} : vector<64x64xf32> to vector<1x64xf32>
    %156 = vector.extract_strided_slice %102 {offsets = [53, 0], sizes = [1, 64], strides = [1, 1]} : vector<64x64xf32> to vector<1x64xf32>
    %157 = vector.extract_strided_slice %102 {offsets = [54, 0], sizes = [1, 64], strides = [1, 1]} : vector<64x64xf32> to vector<1x64xf32>
    %158 = vector.extract_strided_slice %102 {offsets = [55, 0], sizes = [1, 64], strides = [1, 1]} : vector<64x64xf32> to vector<1x64xf32>
    %159 = vector.extract_strided_slice %102 {offsets = [56, 0], sizes = [1, 64], strides = [1, 1]} : vector<64x64xf32> to vector<1x64xf32>
    %160 = vector.extract_strided_slice %102 {offsets = [57, 0], sizes = [1, 64], strides = [1, 1]} : vector<64x64xf32> to vector<1x64xf32>
    %161 = vector.extract_strided_slice %102 {offsets = [58, 0], sizes = [1, 64], strides = [1, 1]} : vector<64x64xf32> to vector<1x64xf32>
    %162 = vector.extract_strided_slice %102 {offsets = [59, 0], sizes = [1, 64], strides = [1, 1]} : vector<64x64xf32> to vector<1x64xf32>
    %163 = vector.extract_strided_slice %102 {offsets = [60, 0], sizes = [1, 64], strides = [1, 1]} : vector<64x64xf32> to vector<1x64xf32>
    %164 = vector.extract_strided_slice %102 {offsets = [61, 0], sizes = [1, 64], strides = [1, 1]} : vector<64x64xf32> to vector<1x64xf32>
    %165 = vector.extract_strided_slice %102 {offsets = [62, 0], sizes = [1, 64], strides = [1, 1]} : vector<64x64xf32> to vector<1x64xf32>
    %166 = vector.extract_strided_slice %102 {offsets = [63, 0], sizes = [1, 64], strides = [1, 1]} : vector<64x64xf32> to vector<1x64xf32>
    %167 = tpu.concatenate %103, %104, %105, %106, %107, %108, %109, %110, %111, %112, %113, %114, %115, %116, %117, %118 in 1 : vector<1x64xf32>, vector<1x64xf32>, vector<1x64xf32>, vector<1x64xf32>, vector<1x64xf32>, vector<1x64xf32>, vector<1x64xf32>, vector<1x64xf32>, vector<1x64xf32>, vector<1x64xf32>, vector<1x64xf32>, vector<1x64xf32>, vector<1x64xf32>, vector<1x64xf32>, vector<1x64xf32>, vector<1x64xf32> -> vector<1x1024xf32>
    %168 = tpu.concatenate %119, %120, %121, %122, %123, %124, %125, %126, %127, %128, %129, %130, %131, %132, %133, %134 in 1 : vector<1x64xf32>, vector<1x64xf32>, vector<1x64xf32>, vector<1x64xf32>, vector<1x64xf32>, vector<1x64xf32>, vector<1x64xf32>, vector<1x64xf32>, vector<1x64xf32>, vector<1x64xf32>, vector<1x64xf32>, vector<1x64xf32>, vector<1x64xf32>, vector<1x64xf32>, vector<1x64xf32>, vector<1x64xf32> -> vector<1x1024xf32>
    %169 = tpu.concatenate %135, %136, %137, %138, %139, %140, %141, %142, %143, %144, %145, %146, %147, %148, %149, %150 in 1 : vector<1x64xf32>, vector<1x64xf32>, vector<1x64xf32>, vector<1x64xf32>, vector<1x64xf32>, vector<1x64xf32>, vector<1x64xf32>, vector<1x64xf32>, vector<1x64xf32>, vector<1x64xf32>, vector<1x64xf32>, vector<1x64xf32>, vector<1x64xf32>, vector<1x64xf32>, vector<1x64xf32>, vector<1x64xf32> -> vector<1x1024xf32>
    %170 = tpu.concatenate %151, %152, %153, %154, %155, %156, %157, %158, %159, %160, %161, %162, %163, %164, %165, %166 in 1 : vector<1x64xf32>, vector<1x64xf32>, vector<1x64xf32>, vector<1x64xf32>, vector<1x64xf32>, vector<1x64xf32>, vector<1x64xf32>, vector<1x64xf32>, vector<1x64xf32>, vector<1x64xf32>, vector<1x64xf32>, vector<1x64xf32>, vector<1x64xf32>, vector<1x64xf32>, vector<1x64xf32>, vector<1x64xf32> -> vector<1x1024xf32>
    %171 = tpu.concatenate %167, %168, %169, %170 in 1 : vector<1x1024xf32>, vector<1x1024xf32>, vector<1x1024xf32>, vector<1x1024xf32> -> vector<1x4096xf32>
    %c0_121 = arith.constant 0 : index
    %c0_122 = arith.constant 0 : index
    %172 = vector.load %arg6[%c0_121, %c0_122] : memref<4096x32xf32, #tpu.memory_space<vmem>>, vector<4096x32xf32>
    %cst_123 = arith.constant dense<0.000000e+00> : vector<1x32xf32>
    %173 = tpu.matmul %171, %172, %cst_123 {dimension_numbers = #tpu.dot_dimension_numbers<[1], [0], [0], [1], [0, 0, 1, 1], [], []>} : vector<1x4096xf32>, vector<4096x32xf32>, vector<1x32xf32> -> vector<1x32xf32>
    %c0_124 = arith.constant 0 : index
    %c0_125 = arith.constant 0 : index
    %174 = vector.load %arg7[%c0_124, %c0_125] : memref<1x32xf32, #tpu.memory_space<vmem>>, vector<1x32xf32>
    %175 = arith.addf %173, %174 : vector<1x32xf32>
    %cst_126 = arith.constant 0.000000e+00 : f32
    %176 = vector.broadcast %cst_126 : f32 to vector<1x32xf32>
    %177 = arith.maximumf %175, %176 : vector<1x32xf32>
    %c0_127 = arith.constant 0 : index
    %c0_128 = arith.constant 0 : index
    %178 = vector.load %arg8[%c0_127, %c0_128] : memref<32x32xf32, #tpu.memory_space<vmem>>, vector<32x32xf32>
    %cst_129 = arith.constant dense<0.000000e+00> : vector<1x32xf32>
    %179 = tpu.matmul %177, %178, %cst_129 {dimension_numbers = #tpu.dot_dimension_numbers<[1], [0], [0], [1], [0, 0, 1, 1], [], []>} : vector<1x32xf32>, vector<32x32xf32>, vector<1x32xf32> -> vector<1x32xf32>
    %c0_130 = arith.constant 0 : index
    %c0_131 = arith.constant 0 : index
    %180 = vector.load %arg9[%c0_130, %c0_131] : memref<1x32xf32, #tpu.memory_space<vmem>>, vector<1x32xf32>
    %181 = arith.addf %179, %180 : vector<1x32xf32>
    %cst_132 = arith.constant 0.000000e+00 : f32
    %182 = vector.broadcast %cst_132 : f32 to vector<1x32xf32>
    %183 = arith.maximumf %181, %182 : vector<1x32xf32>
    %c0_133 = arith.constant 0 : index
    %c0_134 = arith.constant 0 : index
    %184 = vector.load %arg10[%c0_133, %c0_134] : memref<32x2xf32, #tpu.memory_space<vmem>>, vector<32x2xf32>
    %cst_135 = arith.constant dense<0.000000e+00> : vector<1x2xf32>
    %185 = tpu.matmul %183, %184, %cst_135 {dimension_numbers = #tpu.dot_dimension_numbers<[1], [0], [0], [1], [0, 0, 1, 1], [], []>} : vector<1x32xf32>, vector<32x2xf32>, vector<1x2xf32> -> vector<1x2xf32>
    %c0_136 = arith.constant 0 : index
    %c0_137 = arith.constant 0 : index
    %186 = vector.load %arg11[%c0_136, %c0_137] : memref<1x2xf32, #tpu.memory_space<vmem>>, vector<1x2xf32>
    %187 = arith.addf %185, %186 : vector<1x2xf32>
    %c0_138 = arith.constant 0 : index
    %c0_139 = arith.constant 0 : index
    %c0_140 = arith.constant 0 : index
    %188 = vector.load %arg12[%c0_138, %c0_139, %c0_140] : memref<1x1x2xf32, #tpu.memory_space<vmem>>, vector<1x1x2xf32>
    %189 = vector.shape_cast %188 : vector<1x1x2xf32> to vector<1x2xf32>
    %190 = vector.shape_cast %187 : vector<1x2xf32> to vector<1x1x2xf32>
    tpu.vector_store %arg12[%c0_138, %c0_139, %c0_140], %190 {strides = array<i32>} : memref<1x1x2xf32, #tpu.memory_space<vmem>>, vector<1x1x2xf32>,
    return
  }
  func.func @transform_0(%arg0: i32) -> (i32, i32, i32, i32) {
    %c0_i32 = arith.constant 0 : i32
    %c0_i32_0 = arith.constant 0 : i32
    %c0_i32_1 = arith.constant 0 : i32
    %c0_i32_2 = arith.constant 0 : i32
    return %arg0, %c0_i32, %c0_i32_0, %c0_i32_1 : i32, i32, i32, i32
  }
  func.func @transform_1(%arg0: i32) -> (i32, i32) {
    %c0_i32 = arith.constant 0 : i32
    %c0_i32_0 = arith.constant 0 : i32
    %c0_i32_1 = arith.constant 0 : i32
    return %c0_i32, %c0_i32_0 : i32, i32
  }
  func.func @transform_2(%arg0: i32) -> (i32, i32) {
    %c0_i32 = arith.constant 0 : i32
    %c0_i32_0 = arith.constant 0 : i32
    %c0_i32_1 = arith.constant 0 : i32
    return %c0_i32, %c0_i32_0 : i32, i32
  }
  func.func @transform_3(%arg0: i32) -> (i32, i32) {
    %c0_i32 = arith.constant 0 : i32
    %c0_i32_0 = arith.constant 0 : i32
    %c0_i32_1 = arith.constant 0 : i32
    return %c0_i32, %c0_i32_0 : i32, i32
  }
  func.func @transform_4(%arg0: i32) -> (i32, i32) {
    %c0_i32 = arith.constant 0 : i32
    %c0_i32_0 = arith.constant 0 : i32
    %c0_i32_1 = arith.constant 0 : i32
    return %c0_i32, %c0_i32_0 : i32, i32
  }
  func.func @transform_5(%arg0: i32) -> (i32, i32) {
    %c0_i32 = arith.constant 0 : i32
    %c0_i32_0 = arith.constant 0 : i32
    %c0_i32_1 = arith.constant 0 : i32
    return %c0_i32, %c0_i32_0 : i32, i32
  }
  func.func @transform_6(%arg0: i32) -> (i32, i32) {
    %c0_i32 = arith.constant 0 : i32
    %c0_i32_0 = arith.constant 0 : i32
    %c0_i32_1 = arith.constant 0 : i32
    return %c0_i32, %c0_i32_0 : i32, i32
  }
  func.func @transform_7(%arg0: i32) -> (i32, i32) {
    %c0_i32 = arith.constant 0 : i32
    %c0_i32_0 = arith.constant 0 : i32
    %c0_i32_1 = arith.constant 0 : i32
    return %c0_i32, %c0_i32_0 : i32, i32
  }
  func.func @transform_8(%arg0: i32) -> (i32, i32) {
    %c0_i32 = arith.constant 0 : i32
    %c0_i32_0 = arith.constant 0 : i32
    %c0_i32_1 = arith.constant 0 : i32
    return %c0_i32, %c0_i32_0 : i32, i32
  }
  func.func @transform_9(%arg0: i32) -> (i32, i32) {
    %c0_i32 = arith.constant 0 : i32
    %c0_i32_0 = arith.constant 0 : i32
    %c0_i32_1 = arith.constant 0 : i32
    return %c0_i32, %c0_i32_0 : i32, i32
  }
  func.func @transform_10(%arg0: i32) -> (i32, i32) {
    %c0_i32 = arith.constant 0 : i32
    %c0_i32_0 = arith.constant 0 : i32
    %c0_i32_1 = arith.constant 0 : i32
    return %c0_i32, %c0_i32_0 : i32, i32
  }
  func.func @transform_11(%arg0: i32) -> (i32, i32, i32) {
    %c0_i32 = arith.constant 0 : i32
    %c0_i32_0 = arith.constant 0 : i32
    %c0_i32_1 = arith.constant 0 : i32
    return %arg0, %c0_i32, %c0_i32_0 : i32, i32, i32
  }
}

</mosaic_0001>

<bundles_post_ra>
// kernel: xray_forward.1
= control target key start
LH: loop header
LB: loop body
LE: loop exit
PB: predicated region body
PF: predicated region fallthrough
CT: control target
= control target key end

     0   :  { %s16703_s0 = inlined_call_operand.vmem [shape: f32[2,32,32,1], index: 0, kind: input, shape index: {}]   ;;  %s16704_s1 = inlined_call_operand.vmem [shape: f32[16,128], index: 1, kind: input, shape index: {}]   ;;  %s16705_s2 = inlined_call_operand.vmem [shape: f32[1,128], index: 2, kind: input, shape index: {}]   ;;  %s16706_s3 = inlined_call_operand.vmem [shape: f32[512,256], index: 3, kind: input, shape index: {}]   ;;  %s16707_s4 = inlined_call_operand.vmem [shape: f32[1,256], index: 4, kind: input, shape index: {}]   ;;  %s16708_s5 = inlined_call_operand.vmem [shape: f32[4096,32], index: 5, kind: input, shape index: {}]   ;;  %s16709_s6 = inlined_call_operand.vmem [shape: f32[1,32], index: 6, kind: input, shape index: {}]   ;;  %s16710_s7 = inlined_call_operand.vmem [shape: f32[32,32], index: 7, kind: input, shape index: {}]   ;;  %s16711_s8 = inlined_call_operand.vmem [shape: f32[1,32], index: 8, kind: input, shape index: {}]   ;;  %s16712_s9 = inlined_call_operand.vmem [shape: f32[32,2], index: 9, kind: input, shape index: {}]   ;;  %s16713_s10 = inlined_call_operand.vmem [shape: f32[1,2], index: 10, kind: input, shape index: {}]   ;;  %s16714_s11 = inlined_call_operand.hbm [shape: f32[2,1,2], index: 11, kind: output, shape index: {}]  }
   0x1   :  { %16767 = sst [smem:[#allocation37_spill]] %s16703_s0 }
   0x2   :  { %16768 = sst [smem:[#allocation38_spill]] %s16704_s1 }
   0x3   :  { %16 = vsyncpa [#allocation5], 0 }
   0x4   :  { %18 = vsyncpa [#allocation5 + $0x1], 0  ;;  %s10756_s17 = smov 0   ;;  %s10758_s18 = smov 0  }
   0x5   :  { %s10760_s19 = smov 0   ;;  %s10762_s20 = smov 0  }
   0x6 LB: > { %16769 = sst [smem:[#allocation7_spill]] %s10660_s17  ;;  %s10777_s21 = sadd.s32 4294967295, %s10672_s20   ;;  %s10672_s20 = sphi %s10762_s20, %s16897_s20   ;;  %s10668_s19 = sphi %s10760_s19, %s16899_s19   ;;  %s10664_s18 = sphi %s10758_s18, %s16901_s18   ;;  %s10660_s17 = sphi %s10756_s17, %s16900_s17  }
   0x7   : > { %16770 = sst [smem:[#allocation8_spill]] %s10668_s19  ;;  %s8778_s22 = sadd.s32 4294967294, %s10672_s20  }
   0x8   : > { %s10781_s23 = sadd.s32 1, %s10672_s20   ;;  %s267_s24 = sadd.s32 1, %s10668_s19 }
   0x9   : > { %16771 = sst [smem:[#allocation9_spill]] %s10781_s23  ;;  %s264_s25 = ssub.s32 %s10672_s20, %s10781_s23 }
   0xa   : > { %p277_p0 = scmp.ne.s32.totalorder %s10668_s19, %s10664_s18  ;;  %p265_p1 = scmp.eq.s32.totalorder %s264_s25, 0 }
   0xb   : > { %p278_p2 = scmp.eq.s32.totalorder %s10777_s21, 1  ;;  %p283_p3 = scmp.ne.s32.totalorder %s10664_s18, %s10660_s17 }
   0xc   : > { %p284_p4 = scmp.eq.s32.totalorder %s8778_s22, 1  ;;  %p8781_p7 = scmp.ge.s32.totalorder %s10672_s20, 1 }
   0xd   : > { %s10792_s26 = scalar_select %p265_p1, %s10668_s19, %s267_s24  }
   0xe   : > { %p10794_p5 = por %p278_p2, %p277_p0  ;;  %p10798_p6 = por %p284_p4, %p283_p3 }
   0xf   : > { %16772 = sst [smem:[#allocation10_spill]] %s10792_s26  ;;  %p340_p8 = scmp.lt.s32.totalorder %s10672_s20, 3 }
  0x10   : > { %s16774_s28 = scalar_select %p10798_p6, 1, 0 }
  0x11   : > { %p341_p9 = pnand %p8781_p7, %p340_p8 }
  0x12   : > { %16775 = sst [smem:[#allocation11_spill]] %s16774_s28 }
  0x13   : > { %344 = sbr.rel (%p341_p9) target bundleno = 3111 (0xc27), region = 64 }
  0x1a   : > { %vm384_vm0 = vcmask 7168   ;;  %vm389_vm1 = vcmask 1024   ;;  %v16749_v0 = vmov 0.0   ;;  %p379_p10 = scmp.lt.s32.totalorder %s10777_s21, 1  ;;  %s16776_s0 = sld [smem:[#allocation37_spill]]  ;;  %vm3787_vm2 = vcmask 15360  }
  0x1b   : > { %385 = vst.msk [vmem:[#allocation2] sm:$0xff] %vm384_vm0, %v16749_v0  ;;  %386 = vst.msk [vmem:[#allocation2 + $0x8] sm:$0xff] %vm384_vm0, %v16749_v0  ;;  %s16725_s15 = smov 2   ;;  %s16743_s16 = smov 1   ;;  %vm3820_vm3 = vcmask 23552   ;;  %vm3853_vm4 = vcmask 31744  }
  0x1c   : > { %387 = vst.msk [vmem:[#allocation2 + $0x10] sm:$0xff] %vm384_vm0, %v16749_v0  ;;  %388 = vst.msk [vmem:[#allocation2 + $0x18] sm:$0xff] %vm384_vm0, %v16749_v0  ;;  %s380_s29 = scalar_select %p379_p10, %s10777_s21, 1  ;;  %vm3886_vm5 = vcmask 39936   ;;  %vm3919_vm6 = vcmask 48128   ;;  %vm3952_vm7 = vcmask 56320  }
  0x1d   : > { %391 = vst.msk [vmem:[#allocation2 + $0x28] sm:$0xff] %vm384_vm0, %v16749_v0  ;;  %392 = vst.msk [vmem:[#allocation2 + $0x30] sm:$0xff] %vm384_vm0, %v16749_v0  ;;  %s16731_s22 = smov 3   ;;  %s16737_s24 = smov 4   ;;  %vm3985_vm8 = vcmask 64512   ;;  %vm4018_vm9 = vcmask 72704  }
  0x1e   : > { %393 = vst.msk [vmem:[#allocation2 + $0x38] sm:$0xff] %vm384_vm0, %v16749_v0  ;;  %394 = vst.msk [vmem:[#allocation2 + $0x40] sm:$0xff] %vm384_vm0, %v16749_v0  ;;  %s8822_s30 = sshll.u32 %s380_s29, 10  ;;  %s16735_s25 = smov 5   ;;  %vm4051_vm10 = vcmask 80896   ;;  %vm4084_vm11 = vcmask 89088  }
  0x1f   : > { %396 = vst.msk [vmem:[#allocation2 + $0x50] sm:$0xff] %vm384_vm0, %v16749_v0  ;;  %397 = vst.msk [vmem:[#allocation2 + $0x58] sm:$0xff] %vm384_vm0, %v16749_v0  ;;  %s16729_s29 = smov 6   ;;  %s16717_s12 = smov 8   ;;  %vm4117_vm12 = vcmask 97280   ;;  %vm4150_vm13 = vcmask 105472  }
  0x20   : > { %398 = vst.msk [vmem:[#allocation2 + $0x60] sm:$0xff] %vm384_vm0, %v16749_v0  ;;  %399 = vst.msk [vmem:[#allocation2 + $0x68] sm:$0xff] %vm384_vm0, %v16749_v0  ;;  %s11149_s14 = scalar_lea.vmem %s16776_s0, %s8822_s30  ;;  %s16715_s30 = smov 7   ;;  %vm4183_vm14 = vcmask 113664   ;;  %vm4216_vm15 = vcmask 121856  }
  0x21   : > { %401 = vst.msk [vmem:[#allocation2 + $0x78] sm:$0xff] %vm384_vm0, %v16749_v0  ;;  %402 = vst.msk [vmem:[#allocation2 + $0x80] sm:$0xff] %vm384_vm0, %v16749_v0  ;;  %v557_v1 = vld [vmem:[%s11149_s14 + $0x8] sm:$0xff]  ;;  %v558_v2 = vld [vmem:[%s11149_s14 + $0x10] sm:$0xff]  ;;  %s16733_s13 = smov 9   ;;  %s16778_s1 = sld [smem:[#allocation38_spill]] }
  0x22   : > { %403 = vst.msk [vmem:[#allocation2 + $0x88] sm:$0xff] %vm384_vm0, %v16749_v0  ;;  %404 = vst.msk [vmem:[#allocation2 + $0x90] sm:$0xff] %vm384_vm0, %v16749_v0  ;;  %v559_v3 = vld [vmem:[%s11149_s14 + $0x18] sm:$0xff]  ;;  %v877_v5 = vld [vmem:[#allocation2 + $0x1] ss:$2 sm:$0xff]  ;;  %s16787_s0 = smov 11  }
  0x23   : > { %406 = vst.msk [vmem:[#allocation2 + $0xa0] sm:$0xff] %vm384_vm0, %v16749_v0  ;;  %407 = vst.msk [vmem:[#allocation2 + $0xa8] sm:$0xff] %vm384_vm0, %v16749_v0  ;;  %v941_v4 = vld [vmem:[#allocation2 + $0x2] ss:$2 sm:$0xff]  ;;  %1867 = vrot.lane.b32.xlu0 %v877_v5, %s16743_s16  ;;  %v879_v7 = vld [vmem:[#allocation2 + $0x11] ss:$2 sm:$0xff] }
  0x24   : > { %408 = vst.msk [vmem:[#allocation2 + $0xb0] sm:$0xff] %vm384_vm0, %v16749_v0  ;;  %409 = vst.msk [vmem:[#allocation2 + $0xb8] sm:$0xff] %vm384_vm0, %v16749_v0  ;;  %1995 = vrot.lane.b32.xlu1 %v941_v4, %s16725_s15  ;;  %v556_v8 = vld [vmem:[%s11149_s14] sm:$0xff]  ;;  %v561_v10 = vld [vmem:[%s11149_s14 + $0x28] sm:$0xff]  ;;  %s16789_s26 = smov 12   ;;  %s16790_s19 = smov 13  }
  0x25   : > { %411 = vst.msk [vmem:[#allocation2 + $0xc8] sm:$0xff] %vm384_vm0, %v16749_v0  ;;  %412 = vst.msk [vmem:[#allocation2 + $0xd0] sm:$0xff] %vm384_vm0, %v16749_v0  ;;  %v560_v9 = vld [vmem:[%s11149_s14 + $0x20] sm:$0xff]  ;;  %v562_v11 = vld [vmem:[%s11149_s14 + $0x30] sm:$0xff]  ;;  %s16791_s23 = smov 14   ;;  %s16792_s28 = smov 15  }
  0x26   : > { %413 = vst.msk [vmem:[#allocation2 + $0xd8] sm:$0xff] %vm384_vm0, %v16749_v0  ;;  %414 = vst.msk [vmem:[#allocation2 + $0xe0] sm:$0xff] %vm384_vm0, %v16749_v0  ;;  %v563_v12 = vld [vmem:[%s11149_s14 + $0x38] sm:$0xff]  ;;  %v564_v13 = vld [vmem:[%s11149_s14 + $0x40] sm:$0xff]  ;;  %s10690_s17 = smov 96  }
  0x27   : > { %416 = vst.msk [vmem:[#allocation2 + $0xf0] sm:$0xff] %vm384_vm0, %v16749_v0  ;;  %417 = vst.msk [vmem:[#allocation2 + $0xf8] sm:$0xff] %vm384_vm0, %v16749_v0  ;;  %v565_v15 = vld [vmem:[%s11149_s14 + $0x48] sm:$0xff]  ;;  %v566_v16 = vld [vmem:[%s11149_s14 + $0x50] sm:$0xff]  ;;  %1869 = vrot.lane.b32.xlu0 %v879_v7, %s16743_s16 }
  0x28   : > { %418 = vst.msk [vmem:[#allocation2 + $0x100] sm:$0xff] %vm384_vm0, %v16749_v0  ;;  %419 = vst.msk [vmem:[#allocation2 + $0x108] sm:$0xff] %vm384_vm0, %v16749_v0  ;;  %v567_v17 = vld [vmem:[%s11149_s14 + $0x58] sm:$0xff]  ;;  %v1005_v18 = vld [vmem:[#allocation2 + $0x3] ss:$2 sm:$0xff] }
  0x29   : > { %421 = vst.msk [vmem:[#allocation2 + $0x118] sm:$0xff] %vm384_vm0, %v16749_v0  ;;  %422 = vst.msk [vmem:[#allocation2 + $0x120] sm:$0xff] %vm384_vm0, %v16749_v0  ;;  %v568_v19 = vld [vmem:[%s11149_s14 + $0x60] sm:$0xff]  ;;  %v569_v20 = vld [vmem:[%s11149_s14 + $0x68] sm:$0xff] }
  0x2a   : > { %423 = vst.msk [vmem:[#allocation2 + $0x128] sm:$0xff] %vm384_vm0, %v16749_v0  ;;  %424 = vst.msk [vmem:[#allocation2 + $0x130] sm:$0xff] %vm384_vm0, %v16749_v0  ;;  %v570_v21 = vld [vmem:[%s11149_s14 + $0x70] sm:$0xff]  ;;  %v571_v22 = vld [vmem:[%s11149_s14 + $0x78] sm:$0xff] }
  0x2b   : > { %426 = vst.msk [vmem:[#allocation2 + $0x140] sm:$0xff] %vm384_vm0, %v16749_v0  ;;  %427 = vst.msk [vmem:[#allocation2 + $0x148] sm:$0xff] %vm384_vm0, %v16749_v0  ;;  %v572_v23 = vld [vmem:[%s11149_s14 + $0x80] sm:$0xff]  ;;  %v573_v24 = vld [vmem:[%s11149_s14 + $0x88] sm:$0xff]  ;;  %2123 = vrot.lane.b32.xlu0 %v1005_v18, %s16731_s22 }
  0x2c   : > { %428 = vst.msk [vmem:[#allocation2 + $0x150] sm:$0xff] %vm384_vm0, %v16749_v0  ;;  %429 = vst.msk [vmem:[#allocation2 + $0x158] sm:$0xff] %vm384_vm0, %v16749_v0  ;;  %v576_v25 = vld [vmem:[%s11149_s14 + $0xa0] sm:$0xff]  ;;  %v577_v26 = vld [vmem:[%s11149_s14 + $0xa8] sm:$0xff] }
  0x2d   : > { %431 = vst.msk [vmem:[#allocation2 + $0x168] sm:$0xff] %vm384_vm0, %v16749_v0  ;;  %432 = vst.msk [vmem:[#allocation2 + $0x170] sm:$0xff] %vm384_vm0, %v16749_v0  ;;  %v574_v27 = vld [vmem:[%s11149_s14 + $0x90] sm:$0xff]  ;;  %v575_v36 = vld [vmem:[%s11149_s14 + $0x98] sm:$0xff] }
  0x2e   : > { %433 = vst.msk [vmem:[#allocation2 + $0x178] sm:$0xff] %vm384_vm0, %v16749_v0  ;;  %434 = vst.msk [vmem:[#allocation2 + $0x180] sm:$0xff] %vm384_vm0, %v16749_v0  ;;  %v578_v37 = vld [vmem:[%s11149_s14 + $0xb0] sm:$0xff]  ;;  %v579_v38 = vld [vmem:[%s11149_s14 + $0xb8] sm:$0xff] }
  0x2f   : > { %436 = vst.msk [vmem:[#allocation2 + $0x190] sm:$0xff] %vm384_vm0, %v16749_v0  ;;  %437 = vst.msk [vmem:[#allocation2 + $0x198] sm:$0xff] %vm384_vm0, %v16749_v0  ;;  %v580_v41 = vld [vmem:[%s11149_s14 + $0xc0] sm:$0xff]  ;;  %v581_v42 = vld [vmem:[%s11149_s14 + $0xc8] sm:$0xff] }
  0x30   : > { %438 = vst.msk [vmem:[#allocation2 + $0x1a0] sm:$0xff] %vm384_vm0, %v16749_v0  ;;  %439 = vst.msk [vmem:[#allocation2 + $0x1a8] sm:$0xff] %vm384_vm0, %v16749_v0  ;;  %v584_v45 = vld [vmem:[%s11149_s14 + $0xe0] sm:$0xff]  ;;  %v585_v46 = vld [vmem:[%s11149_s14 + $0xe8] sm:$0xff] }
  0x31   : > { %441 = vst.msk [vmem:[#allocation2 + $0x1b8] sm:$0xff] %vm384_vm0, %v16749_v0  ;;  %442 = vst.msk [vmem:[#allocation2 + $0x1c0] sm:$0xff] %vm384_vm0, %v16749_v0  ;;  %v582_v47 = vld [vmem:[%s11149_s14 + $0xd0] sm:$0xff]  ;;  %v583_v50 = vld [vmem:[%s11149_s14 + $0xd8] sm:$0xff] }
  0x32   : > { %443 = vst.msk [vmem:[#allocation2 + $0x1c8] sm:$0xff] %vm384_vm0, %v16749_v0  ;;  %444 = vst.msk [vmem:[#allocation2 + $0x1d0] sm:$0xff] %vm384_vm0, %v16749_v0  ;;  %v586_v51 = vld [vmem:[%s11149_s14 + $0xf0] sm:$0xff]  ;;  %v587_v52 = vld [vmem:[%s11149_s14 + $0xf8] sm:$0xff] }
  0x33   : > { %446 = vst.msk [vmem:[#allocation2 + $0x1e0] sm:$0xff] %vm384_vm0, %v16749_v0  ;;  %447 = vst.msk [vmem:[#allocation2 + $0x1e8] sm:$0xff] %vm384_vm0, %v16749_v0 }
  0x34   : > { %448 = vst.msk [vmem:[#allocation2 + $0x1f0] sm:$0xff] %vm384_vm0, %v16749_v0  ;;  %449 = vst.msk [vmem:[#allocation2 + $0x1f8] sm:$0xff] %vm384_vm0, %v16749_v0 }
  0x35   : > { %451 = vst.msk [vmem:[#allocation2 + $0x208] sm:$0xff] %vm384_vm0, %v16749_v0  ;;  %452 = vst.msk [vmem:[#allocation2 + $0x210] sm:$0xff] %vm384_vm0, %v16749_v0 }
  0x36   : > { %453 = vst.msk [vmem:[#allocation2 + $0x218] sm:$0xff] %vm384_vm0, %v16749_v0  ;;  %454 = vst.msk [vmem:[#allocation2 + $0x220] sm:$0xff] %vm384_vm0, %v16749_v0 }
  0x37   : > { %456 = vst.msk [vmem:[#allocation2 + $0x230] sm:$0xff] %vm384_vm0, %v16749_v0  ;;  %457 = vst.msk [vmem:[#allocation2 + $0x238] sm:$0xff] %vm384_vm0, %v16749_v0 }
  0x38   : > { %458 = vst.msk [vmem:[#allocation2 + $0x240] sm:$0xff] %vm384_vm0, %v16749_v0  ;;  %459 = vst.msk [vmem:[#allocation2 + $0x248] sm:$0xff] %vm384_vm0, %v16749_v0 }
  0x39   : > { %461 = vst.msk [vmem:[#allocation2 + $0x258] sm:$0xff] %vm384_vm0, %v16749_v0  ;;  %462 = vst.msk [vmem:[#allocation2 + $0x260] sm:$0xff] %vm384_vm0, %v16749_v0 }
  0x3a   : > { %463 = vst.msk [vmem:[#allocation2 + $0x268] sm:$0xff] %vm384_vm0, %v16749_v0  ;;  %464 = vst.msk [vmem:[#allocation2 + $0x270] sm:$0xff] %vm384_vm0, %v16749_v0 }
  0x3b   : > { %466 = vst.msk [vmem:[#allocation2 + $0x280] sm:$0xff] %vm384_vm0, %v16749_v0  ;;  %467 = vst.msk [vmem:[#allocation2 + $0x288] sm:$0xff] %vm384_vm0, %v16749_v0 }
  0x3c   : > { %468 = vst.msk [vmem:[#allocation2 + $0x290] sm:$0xff] %vm384_vm0, %v16749_v0  ;;  %469 = vst.msk [vmem:[#allocation2 + $0x298] sm:$0xff] %vm384_vm0, %v16749_v0 }
  0x3d   : > { %471 = vst.msk [vmem:[#allocation2 + $0x2a8] sm:$0xff] %vm384_vm0, %v16749_v0  ;;  %472 = vst.msk [vmem:[#allocation2 + $0x2b0] sm:$0xff] %vm384_vm0, %v16749_v0 }
  0x3e   : > { %473 = vst.msk [vmem:[#allocation2 + $0x2b8] sm:$0xff] %vm384_vm0, %v16749_v0  ;;  %474 = vst.msk [vmem:[#allocation2 + $0x2c0] sm:$0xff] %vm384_vm0, %v16749_v0 }
  0x3f   : > { %476 = vst.msk [vmem:[#allocation2 + $0x2d0] sm:$0xff] %vm384_vm0, %v16749_v0  ;;  %477 = vst.msk [vmem:[#allocation2 + $0x2d8] sm:$0xff] %vm384_vm0, %v16749_v0 }
  0x40   : > { %478 = vst.msk [vmem:[#allocation2 + $0x2e0] sm:$0xff] %vm384_vm0, %v16749_v0  ;;  %479 = vst.msk [vmem:[#allocation2 + $0x2e8] sm:$0xff] %vm384_vm0, %v16749_v0 }
  0x41   : > { %481 = vst.msk [vmem:[#allocation2 + $0x2f8] sm:$0xff] %vm384_vm0, %v16749_v0  ;;  %482 = vst.msk [vmem:[#allocation2 + $0x300] sm:$0xff] %vm384_vm0, %v16749_v0 }
  0x42   : > { %483 = vst.msk [vmem:[#allocation2 + $0x308] sm:$0xff] %vm384_vm0, %v16749_v0  ;;  %484 = vst.msk [vmem:[#allocation2 + $0x310] sm:$0xff] %vm384_vm0, %v16749_v0 }
  0x43   : > { %486 = vst.msk [vmem:[#allocation2 + $0x320] sm:$0xff] %vm384_vm0, %v16749_v0  ;;  %487 = vst.msk [vmem:[#allocation2 + $0x328] sm:$0xff] %vm384_vm0, %v16749_v0 }
  0x44   : > { %488 = vst.msk [vmem:[#allocation2 + $0x330] sm:$0xff] %vm384_vm0, %v16749_v0  ;;  %489 = vst.msk [vmem:[#allocation2 + $0x338] sm:$0xff] %vm384_vm0, %v16749_v0 }
  0x45   : > { %491 = vst.msk [vmem:[#allocation2 + $0x348] sm:$0xff] %vm384_vm0, %v16749_v0  ;;  %492 = vst.msk [vmem:[#allocation2 + $0x350] sm:$0xff] %vm384_vm0, %v16749_v0 }
  0x46   : > { %493 = vst.msk [vmem:[#allocation2 + $0x358] sm:$0xff] %vm384_vm0, %v16749_v0  ;;  %494 = vst.msk [vmem:[#allocation2 + $0x360] sm:$0xff] %vm384_vm0, %v16749_v0 }
  0x47   : > { %496 = vst.msk [vmem:[#allocation2 + $0x370] sm:$0xff] %vm384_vm0, %v16749_v0  ;;  %497 = vst.msk [vmem:[#allocation2 + $0x378] sm:$0xff] %vm384_vm0, %v16749_v0 }
  0x48   : > { %498 = vst.msk [vmem:[#allocation2 + $0x380] sm:$0xff] %vm384_vm0, %v16749_v0  ;;  %499 = vst.msk [vmem:[#allocation2 + $0x388] sm:$0xff] %vm384_vm0, %v16749_v0 }
  0x49   : > { %501 = vst.msk [vmem:[#allocation2 + $0x398] sm:$0xff] %vm384_vm0, %v16749_v0  ;;  %502 = vst.msk [vmem:[#allocation2 + $0x3a0] sm:$0xff] %vm384_vm0, %v16749_v0 }
  0x4a   : > { %503 = vst.msk [vmem:[#allocation2 + $0x3a8] sm:$0xff] %vm384_vm0, %v16749_v0  ;;  %504 = vst.msk [vmem:[#allocation2 + $0x3b0] sm:$0xff] %vm384_vm0, %v16749_v0 }
  0x4b   : > { %506 = vst.msk [vmem:[#allocation2 + $0x3c0] sm:$0xff] %vm384_vm0, %v16749_v0  ;;  %507 = vst.msk [vmem:[#allocation2 + $0x3c8] sm:$0xff] %vm384_vm0, %v16749_v0 }
  0x4c   : > { %508 = vst.msk [vmem:[#allocation2 + $0x3d0] sm:$0xff] %vm384_vm0, %v16749_v0  ;;  %509 = vst.msk [vmem:[#allocation2 + $0x3d8] sm:$0xff] %vm384_vm0, %v16749_v0 }
  0x4d   : > { %511 = vst.msk [vmem:[#allocation2 + $0x3e8] sm:$0xff] %vm384_vm0, %v16749_v0  ;;  %512 = vst.msk [vmem:[#allocation2 + $0x3f0] sm:$0xff] %vm384_vm0, %v16749_v0 }
  0x4e   : > { %513 = vst.msk [vmem:[#allocation2 + $0x3f8] sm:$0xff] %vm384_vm0, %v16749_v0  ;;  %514 = vst.msk [vmem:[#allocation2 + $0x400] sm:$0xff] %vm384_vm0, %v16749_v0 }
  0x4f   : > { %516 = vst.msk [vmem:[#allocation2 + $0x410] sm:$0xff] %vm384_vm0, %v16749_v0  ;;  %517 = vst.msk [vmem:[#allocation2 + $0x418] sm:$0xff] %vm384_vm0, %v16749_v0 }
  0x50   : > { %518 = vst.msk [vmem:[#allocation2 + $0x420] sm:$0xff] %vm384_vm0, %v16749_v0  ;;  %519 = vst.msk [vmem:[#allocation2 + $0x428] sm:$0xff] %vm384_vm0, %v16749_v0 }
  0x51   : > { %521 = vst.msk [vmem:[#allocation2 + $0x438] sm:$0xff] %vm384_vm0, %v16749_v0  ;;  %522 = vst.msk [vmem:[#allocation2 + $0x440] sm:$0xff] %vm384_vm0, %v16749_v0 }
  0x52   : > { %523 = vst.msk [vmem:[#allocation2 + $0x448] sm:$0xff] %vm384_vm0, %v16749_v0  ;;  %524 = vst.msk [vmem:[#allocation2 + $0x450] sm:$0xff] %vm384_vm0, %v16749_v0 }
  0x53   : > { %526 = vst.msk [vmem:[#allocation2 + $0x460] sm:$0xff] %vm384_vm0, %v16749_v0  ;;  %527 = vst.msk [vmem:[#allocation2 + $0x468] sm:$0xff] %vm384_vm0, %v16749_v0 }
  0x54   : > { %528 = vst.msk [vmem:[#allocation2 + $0x470] sm:$0xff] %vm384_vm0, %v16749_v0  ;;  %529 = vst.msk [vmem:[#allocation2 + $0x478] sm:$0xff] %vm384_vm0, %v16749_v0 }
  0x55   : > { %531 = vst.msk [vmem:[#allocation2 + $0x488] sm:$0xff] %vm384_vm0, %v16749_v0  ;;  %532 = vst.msk [vmem:[#allocation2 + $0x490] sm:$0xff] %vm384_vm0, %v16749_v0 }
  0x56   : > { %533 = vst.msk [vmem:[#allocation2 + $0x498] sm:$0xff] %vm384_vm0, %v16749_v0  ;;  %534 = vst.msk [vmem:[#allocation2 + $0x4a0] sm:$0xff] %vm384_vm0, %v16749_v0 }
  0x57   : > { %536 = vst.msk [vmem:[#allocation2 + $0x4b0] sm:$0xff] %vm384_vm0, %v16749_v0  ;;  %537 = vst.msk [vmem:[#allocation2 + $0x4b8] sm:$0xff] %vm384_vm0, %v16749_v0 }
  0x58   : > { %538 = vst.msk [vmem:[#allocation2 + $0x4c0] sm:$0xff] %vm384_vm0, %v16749_v0  ;;  %539 = vst.msk [vmem:[#allocation2 + $0x4c8] sm:$0xff] %vm384_vm0, %v16749_v0 }
  0x59   : > { %541 = vst.msk [vmem:[#allocation2 + $0x4d8] sm:$0xff] %vm384_vm0, %v16749_v0  ;;  %542 = vst.msk [vmem:[#allocation2 + $0x4e0] sm:$0xff] %vm384_vm0, %v16749_v0 }
  0x5a   : > { %543 = vst.msk [vmem:[#allocation2 + $0x4e8] sm:$0xff] %vm384_vm0, %v16749_v0  ;;  %544 = vst.msk [vmem:[#allocation2 + $0x4f0] sm:$0xff] %vm384_vm0, %v16749_v0 }
  0x5b   : > { %546 = vst.msk [vmem:[#allocation2 + $0x500] sm:$0xff] %vm384_vm0, %v16749_v0  ;;  %547 = vst.msk [vmem:[#allocation2 + $0x508] sm:$0xff] %vm384_vm0, %v16749_v0 }
  0x5c   : > { %548 = vst.msk [vmem:[#allocation2 + $0x510] sm:$0xff] %vm384_vm0, %v16749_v0  ;;  %549 = vst.msk [vmem:[#allocation2 + $0x518] sm:$0xff] %vm384_vm0, %v16749_v0 }
  0x5d   : > { %551 = vst.msk [vmem:[#allocation2 + $0x528] sm:$0xff] %vm384_vm0, %v16749_v0  ;;  %552 = vst.msk [vmem:[#allocation2 + $0x530] sm:$0xff] %vm384_vm0, %v16749_v0 }
  0x5e   : > { %553 = vst.msk [vmem:[#allocation2 + $0x538] sm:$0xff] %vm384_vm0, %v16749_v0  ;;  %554 = vst.msk [vmem:[#allocation2 + $0x540] sm:$0xff] %vm384_vm0, %v16749_v0 }
  0x5f   : > { %390 = vst.msk [vmem:[#allocation2 + $0x20] sm:$0x3] %vm389_vm1, %v16749_v0  ;;  %395 = vst.msk [vmem:[#allocation2 + $0x48] sm:$0x3] %vm389_vm1, %v16749_v0 }
  0x60   : > { %400 = vst.msk [vmem:[#allocation2 + $0x70] sm:$0x3] %vm389_vm1, %v16749_v0  ;;  %405 = vst.msk [vmem:[#allocation2 + $0x98] sm:$0x3] %vm389_vm1, %v16749_v0 }
  0x61   : > { %410 = vst.msk [vmem:[#allocation2 + $0xc0] sm:$0x3] %vm389_vm1, %v16749_v0  ;;  %415 = vst.msk [vmem:[#allocation2 + $0xe8] sm:$0x3] %vm389_vm1, %v16749_v0 }
  0x62   : > { %420 = vst.msk [vmem:[#allocation2 + $0x110] sm:$0x3] %vm389_vm1, %v16749_v0  ;;  %425 = vst.msk [vmem:[#allocation2 + $0x138] sm:$0x3] %vm389_vm1, %v16749_v0 }
  0x63   : > { %430 = vst.msk [vmem:[#allocation2 + $0x160] sm:$0x3] %vm389_vm1, %v16749_v0  ;;  %435 = vst.msk [vmem:[#allocation2 + $0x188] sm:$0x3] %vm389_vm1, %v16749_v0 }
  0x64   : > { %440 = vst.msk [vmem:[#allocation2 + $0x1b0] sm:$0x3] %vm389_vm1, %v16749_v0  ;;  %445 = vst.msk [vmem:[#allocation2 + $0x1d8] sm:$0x3] %vm389_vm1, %v16749_v0 }
  0x65   : > { %450 = vst.msk [vmem:[#allocation2 + $0x200] sm:$0x3] %vm389_vm1, %v16749_v0  ;;  %455 = vst.msk [vmem:[#allocation2 + $0x228] sm:$0x3] %vm389_vm1, %v16749_v0 }
  0x66   : > { %460 = vst.msk [vmem:[#allocation2 + $0x250] sm:$0x3] %vm389_vm1, %v16749_v0  ;;  %465 = vst.msk [vmem:[#allocation2 + $0x278] sm:$0x3] %vm389_vm1, %v16749_v0  ;;  %v943_v6 = vld [vmem:[#allocation2 + $0x12] ss:$2 sm:$0xff] }
  0x67   : > { %470 = vst.msk [vmem:[#allocation2 + $0x2a0] sm:$0x3] %vm389_vm1, %v16749_v0  ;;  %475 = vst.msk [vmem:[#allocation2 + $0x2c8] sm:$0x3] %vm389_vm1, %v16749_v0  ;;  %v1007_v14 = vld [vmem:[#allocation2 + $0x13] ss:$2 sm:$0xff]  ;;  %1997 = vrot.lane.b32.xlu1 %v943_v6, %s16725_s15 }
  0x68   : > { %480 = vst.msk [vmem:[#allocation2 + $0x2f0] sm:$0x3] %vm389_vm1, %v16749_v0  ;;  %485 = vst.msk [vmem:[#allocation2 + $0x318] sm:$0x3] %vm389_vm1, %v16749_v0 }
  0x69   : > { %490 = vst.msk [vmem:[#allocation2 + $0x340] sm:$0x3] %vm389_vm1, %v16749_v0  ;;  %495 = vst.msk [vmem:[#allocation2 + $0x368] sm:$0x3] %vm389_vm1, %v16749_v0 }
  0x6a   : > { %500 = vst.msk [vmem:[#allocation2 + $0x390] sm:$0x3] %vm389_vm1, %v16749_v0  ;;  %505 = vst.msk [vmem:[#allocation2 + $0x3b8] sm:$0x3] %vm389_vm1, %v16749_v0 }
  0x6b   : > { %510 = vst.msk [vmem:[#allocation2 + $0x3e0] sm:$0x3] %vm389_vm1, %v16749_v0  ;;  %515 = vst.msk [vmem:[#allocation2 + $0x408] sm:$0x3] %vm389_vm1, %v16749_v0  ;;  %2125 = vrot.lane.b32.xlu1 %v1007_v14, %s16731_s22  ;;  %v590_v14 = vld [vmem:[%s11149_s14 + $0x110] sm:$0xff] }
  0x6c   : > { %520 = vst.msk [vmem:[#allocation2 + $0x430] sm:$0x3] %vm389_vm1, %v16749_v0  ;;  %525 = vst.msk [vmem:[#allocation2 + $0x458] sm:$0x3] %vm389_vm1, %v16749_v0 }
  0x6d   : > { %530 = vst.msk [vmem:[#allocation2 + $0x480] sm:$0x3] %vm389_vm1, %v16749_v0  ;;  %535 = vst.msk [vmem:[#allocation2 + $0x4a8] sm:$0x3] %vm389_vm1, %v16749_v0 }
  0x6e   : > { %540 = vst.msk [vmem:[#allocation2 + $0x4d0] sm:$0x3] %vm389_vm1, %v16749_v0  ;;  %545 = vst.msk [vmem:[#allocation2 + $0x4f8] sm:$0x3] %vm389_vm1, %v16749_v0 }
  0x6f   : > { %550 = vst.msk [vmem:[#allocation2 + $0x520] sm:$0x3] %vm389_vm1, %v16749_v0  ;;  %555 = vst.msk [vmem:[#allocation2 + $0x548] sm:$0x3] %vm389_vm1, %v16749_v0  ;;  %vm4258_vm1 = vcmask 130048  }
  0x70   : > { %686 = vst.msk [vmem:[#allocation2 + $0x31] sm:$0xff] %vm384_vm0, %v557_v1  ;;  %687 = vst.msk [vmem:[#allocation2 + $0x39] sm:$0xff] %vm384_vm0, %v558_v2  ;;  %v588_v2 = vld [vmem:[%s11149_s14 + $0x100] sm:$0xff] }
  0x71   : > { %688 = vst.msk [vmem:[#allocation2 + $0x41] sm:$0xff] %vm384_vm0, %v559_v3  ;;  %685 = vst.msk [vmem:[#allocation2 + $0x29] sm:$0xff] %vm384_vm0, %v556_v8  ;;  %v589_v3 = vld [vmem:[%s11149_s14 + $0x108] sm:$0xff] }
  0x72   : > { %689 = vst.msk [vmem:[#allocation2 + $0x51] sm:$0xff] %vm384_vm0, %v560_v9  ;;  %690 = vst.msk [vmem:[#allocation2 + $0x59] sm:$0xff] %vm384_vm0, %v561_v10  ;;  %v592_v10 = vld [vmem:[%s11149_s14 + $0x120] sm:$0xff] }
  0x73   : > { %691 = vst.msk [vmem:[#allocation2 + $0x61] sm:$0xff] %vm384_vm0, %v562_v11  ;;  %692 = vst.msk [vmem:[#allocation2 + $0x69] sm:$0xff] %vm384_vm0, %v563_v12  ;;  %v593_v11 = vld [vmem:[%s11149_s14 + $0x128] sm:$0xff] }
  0x74   : > { %693 = vst.msk [vmem:[#allocation2 + $0x79] sm:$0xff] %vm384_vm0, %v564_v13  ;;  %694 = vst.msk [vmem:[#allocation2 + $0x81] sm:$0xff] %vm384_vm0, %v565_v15  ;;  %v591_v15 = vld [vmem:[%s11149_s14 + $0x118] sm:$0xff] }
  0x75   : > { %695 = vst.msk [vmem:[#allocation2 + $0x89] sm:$0xff] %vm384_vm0, %v566_v16  ;;  %696 = vst.msk [vmem:[#allocation2 + $0x91] sm:$0xff] %vm384_vm0, %v567_v17 }
  0x76   : > { %697 = vst.msk [vmem:[#allocation2 + $0xa1] sm:$0xff] %vm384_vm0, %v568_v19  ;;  %698 = vst.msk [vmem:[#allocation2 + $0xa9] sm:$0xff] %vm384_vm0, %v569_v20 }
  0x77   : > { %699 = vst.msk [vmem:[#allocation2 + $0xb1] sm:$0xff] %vm384_vm0, %v570_v21  ;;  %700 = vst.msk [vmem:[#allocation2 + $0xb9] sm:$0xff] %vm384_vm0, %v571_v22  ;;  %v594_v22 = vld [vmem:[%s11149_s14 + $0x130] sm:$0xff] }
  0x78   : > { %701 = vst.msk [vmem:[#allocation2 + $0xc9] sm:$0xff] %vm384_vm0, %v572_v23  ;;  %702 = vst.msk [vmem:[#allocation2 + $0xd1] sm:$0xff] %vm384_vm0, %v573_v24  ;;  %v1070_v28 = vld [vmem:[#allocation2 + $0x38] ss:$2 sm:$0xff]  ;;  %v1068_v29 = vld [vmem:[#allocation2 + $0x28] ss:$2 sm:$0xff] }
  0x79   : > { %705 = vst.msk [vmem:[#allocation2 + $0xf1] sm:$0xff] %vm384_vm0, %v576_v25  ;;  %706 = vst.msk [vmem:[#allocation2 + $0xf9] sm:$0xff] %vm384_vm0, %v577_v26  ;;  %2253 = vrot.lane.b32.xlu1 %v1070_v28, %s16737_s24  ;;  %2251 = vrot.lane.b32.xlu0 %v1068_v29, %s16737_s24  ;;  %v1134_v30 = vld [vmem:[#allocation2 + $0x39] ss:$2 sm:$0xff]  ;;  %v1132_v31 = vld [vmem:[#allocation2 + $0x29] ss:$2 sm:$0xff] }
  0x7a   : > { %703 = vst.msk [vmem:[#allocation2 + $0xd9] sm:$0xff] %vm384_vm0, %v574_v27  ;;  %v1198_v32 = vld [vmem:[#allocation2 + $0x3a] ss:$2 sm:$0xff]  ;;  %v1196_v33 = vld [vmem:[#allocation2 + $0x2a] ss:$2 sm:$0xff]  ;;  %704 = vst.msk [vmem:[#allocation2 + $0xe1] sm:$0xff] %vm384_vm0, %v575_v36 }
  0x7b   : > { %v881_v34 = vld [vmem:[#allocation2 + $0x51] ss:$2 sm:$0xff]  ;;  %v1324_v39 = vld [vmem:[#allocation2 + $0x50] ss:$2 sm:$0xff]  ;;  %707 = vst.msk [vmem:[#allocation2 + $0x101] sm:$0xff] %vm384_vm0, %v578_v37  ;;  %708 = vst.msk [vmem:[#allocation2 + $0x109] sm:$0xff] %vm384_vm0, %v579_v38 }
  0x7c   : > { %v1260_v35 = vld [vmem:[#allocation2 + $0x2b] ss:$2 sm:$0xff]  ;;  %v1262_v40 = vld [vmem:[#allocation2 + $0x3b] ss:$2 sm:$0xff]  ;;  %v945_v43 = vld [vmem:[#allocation2 + $0x52] ss:$2 sm:$0xff] }
  0x7d   : > { %2381 = vrot.lane.b32.xlu1 %v1134_v30, %s16735_s25  ;;  %2379 = vrot.lane.b32.xlu0 %v1132_v31, %s16735_s25  ;;  %v883_v44 = vld [vmem:[#allocation2 + $0x61] ss:$2 sm:$0xff]  ;;  %709 = vst.msk [vmem:[#allocation2 + $0x119] sm:$0xff] %vm384_vm0, %v580_v41  ;;  %710 = vst.msk [vmem:[#allocation2 + $0x121] sm:$0xff] %vm384_vm0, %v581_v42  ;;  %v1388_v48 = vld [vmem:[#allocation2 + $0x51] ss:$2 sm:$0xff] }
  0x7e   : > { %713 = vst.msk [vmem:[#allocation2 + $0x141] sm:$0xff] %vm384_vm0, %v584_v45  ;;  %714 = vst.msk [vmem:[#allocation2 + $0x149] sm:$0xff] %vm384_vm0, %v585_v46  ;;  %v1326_v49 = vld [vmem:[#allocation2 + $0x60] ss:$2 sm:$0xff]  ;;  %v1009_v53 = vld [vmem:[#allocation2 + $0x53] ss:$2 sm:$0xff] }
  0x7f   : > { %711 = vst.msk [vmem:[#allocation2 + $0x129] sm:$0xff] %vm384_vm0, %v582_v47  ;;  %712 = vst.msk [vmem:[#allocation2 + $0x131] sm:$0xff] %vm384_vm0, %v583_v50  ;;  %v947_v54 = vld [vmem:[#allocation2 + $0x62] ss:$2 sm:$0xff]  ;;  %v1452_v55 = vld [vmem:[#allocation2 + $0x52] ss:$2 sm:$0xff] }
  0x80   : > { %715 = vst.msk [vmem:[#allocation2 + $0x151] sm:$0xff] %vm384_vm0, %v586_v51  ;;  %716 = vst.msk [vmem:[#allocation2 + $0x159] sm:$0xff] %vm384_vm0, %v587_v52  ;;  %v1390_v56 = vld [vmem:[#allocation2 + $0x61] ss:$2 sm:$0xff]  ;;  %v1072_v57 = vld [vmem:[#allocation2 + $0x78] ss:$2 sm:$0xff] }
  0x81   : > { %2509 = vrot.lane.b32.xlu1 %v1198_v32, %s16729_s29  ;;  %2507 = vrot.lane.b32.xlu0 %v1196_v33, %s16729_s29  ;;  %v1011_v58 = vld [vmem:[#allocation2 + $0x63] ss:$2 sm:$0xff]  ;;  %v1516_v59 = vld [vmem:[#allocation2 + $0x53] ss:$2 sm:$0xff]  ;;  %v1454_v60 = vld [vmem:[#allocation2 + $0x62] ss:$2 sm:$0xff] }
  0x82   : > { %v1074_v61 = vld [vmem:[#allocation2 + $0x88] ss:$2 sm:$0xff]  ;;  %v885_v62 = vld [vmem:[#allocation2 + $0xa1] ss:$2 sm:$0xff]  ;;  %717 = vst.msk [vmem:[#allocation2 + $0x169] sm:$0xff] %vm384_vm0, %v588_v2  ;;  %718 = vst.msk [vmem:[#allocation2 + $0x171] sm:$0xff] %vm384_vm0, %v589_v3 }
  0x83   : > { %v1518_v63 = vld [vmem:[#allocation2 + $0x63] ss:$2 sm:$0xff]  ;;  %v1580_v5 = vld [vmem:[#allocation2 + $0x78] ss:$2 sm:$0xff]  ;;  %v1582_v8 = vld [vmem:[#allocation2 + $0x88] ss:$2 sm:$0xff] }
  0x84   : > { %v1136_v1 = vld [vmem:[#allocation2 + $0x79] ss:$2 sm:$0xff]  ;;  %v1138_v6 = vld [vmem:[#allocation2 + $0x89] ss:$2 sm:$0xff]  ;;  %v949_v7 = vld [vmem:[#allocation2 + $0xa2] ss:$2 sm:$0xff] }
  0x85   : > { %1871 = vrot.lane.b32.xlu1 %v881_v34, %s16743_s16  ;;  %2635 = vrot.lane.b32.xlu0 %v1260_v35, %s16715_s30  ;;  %v887_v4 = vld [vmem:[#allocation2 + $0xb1] ss:$2 sm:$0xff]  ;;  %v1200_v9 = vld [vmem:[#allocation2 + $0x7a] ss:$2 sm:$0xff]  ;;  %721 = vst.msk [vmem:[#allocation2 + $0x191] sm:$0xff] %vm384_vm0, %v592_v10  ;;  %722 = vst.msk [vmem:[#allocation2 + $0x199] sm:$0xff] %vm384_vm0, %v593_v11 }
  0x86   : > { %v951_v12 = vld [vmem:[#allocation2 + $0xb2] ss:$2 sm:$0xff]  ;;  %v1644_v13 = vld [vmem:[#allocation2 + $0x79] ss:$2 sm:$0xff]  ;;  %719 = vst.msk [vmem:[#allocation2 + $0x179] sm:$0xff] %vm384_vm0, %v590_v14  ;;  %720 = vst.msk [vmem:[#allocation2 + $0x181] sm:$0xff] %vm384_vm0, %v591_v15 }
  0x87   : > { %v1202_v16 = vld [vmem:[#allocation2 + $0x8a] ss:$2 sm:$0xff]  ;;  %v1013_v17 = vld [vmem:[#allocation2 + $0xa3] ss:$2 sm:$0xff]  ;;  %v1015_v20 = vld [vmem:[#allocation2 + $0xb3] ss:$2 sm:$0xff] }
  0x88   : > { %v1646_v18 = vld [vmem:[#allocation2 + $0x89] ss:$2 sm:$0xff]  ;;  %v1708_v21 = vld [vmem:[#allocation2 + $0x7a] ss:$2 sm:$0xff]  ;;  %723 = vst.msk [vmem:[#allocation2 + $0x1a1] sm:$0xff] %vm384_vm0, %v594_v22 }
  0x89   : > { %2763 = vrot.lane.b32.xlu1 %v1324_v39, %s16717_s12  ;;  %2637 = vrot.lane.b32.xlu0 %v1262_v40, %s16715_s30  ;;  %s16719_s30 = smov 10   ;;  %v1264_v19 = vld [vmem:[#allocation2 + $0x7b] ss:$2 sm:$0xff]  ;;  %v1266_v24 = vld [vmem:[#allocation2 + $0x8b] ss:$2 sm:$0xff] }
  0x8a   : > { %v595_v23 = vld [vmem:[%s11149_s14 + $0x138] sm:$0xff]  ;;  %v1076_v25 = vld [vmem:[#allocation2 + $0xc8] ss:$2 sm:$0xff]  ;;  %v4249_v28 = vld [vmem:[%s16778_s1] sm:$0xff] }
  0x8b   : > { %724 = vst.msk [vmem:[#allocation2 + $0x1a9] sm:$0xff] %vm384_vm0, %v595_v23  ;;  %v1710_v26 = vld [vmem:[#allocation2 + $0x8a] ss:$2 sm:$0xff]  ;;  %v889_v31 = vld [vmem:[#allocation2 + $0xf1] ss:$2 sm:$0xff]  ;;  %v596_v47 = vld [vmem:[%s11149_s14 + $0x140] sm:$0xff] }
  0x8c   : > { %v1328_v27 = vld [vmem:[#allocation2 + $0xa0] ss:$2 sm:$0xff]  ;;  %v1772_v32 = vld [vmem:[#allocation2 + $0x7b] ss:$2 sm:$0xff]  ;;  %v1330_v36 = vld [vmem:[#allocation2 + $0xb0] ss:$2 sm:$0xff] }
  0x8d   : > { %1999 = vrot.lane.b32.xlu1 %v945_v43, %s16725_s15  ;;  %1873 = vrot.lane.b32.xlu0 %v883_v44, %s16743_s16  ;;  %v4250_v29 = vld [vmem:[%s16778_s1 + $0x8] sm:$0xff]  ;;  %v1078_v34 = vld [vmem:[#allocation2 + $0xd8] ss:$2 sm:$0xff]  ;;  %v1142_v39 = vld [vmem:[#allocation2 + $0xd9] ss:$2 sm:$0xff]  ;;  %725 = vst.msk [vmem:[#allocation2 + $0x1b9] sm:$0xff] %vm384_vm0, %v596_v47 }
  0x8e   : > { %v9501_v30 = vpack.c.bf16 %v4250_v29, %v4249_v28  ;;  %v1140_v33 = vld [vmem:[#allocation2 + $0xc9] ss:$2 sm:$0xff]  ;;  %v953_v40 = vld [vmem:[#allocation2 + $0xf2] ss:$2 sm:$0xff]  ;;  %v1456_v50 = vld [vmem:[#allocation2 + $0xa2] ss:$2 sm:$0xff] }
  0x8f   : > { %v1392_v35 = vld [vmem:[#allocation2 + $0xa1] ss:$2 sm:$0xff]  ;;  %v1394_v43 = vld [vmem:[#allocation2 + $0xb1] ss:$2 sm:$0xff]  ;;  %v1204_v44 = vld [vmem:[#allocation2 + $0xca] ss:$2 sm:$0xff] }
  0x90   : > { %9502 = vmatprep.subr.bf16.mxu0 %v9501_v30  ;;  %v891_v37 = vld [vmem:[#allocation2 + $0x101] ss:$2 sm:$0xff]  ;;  %v1332_v11 = vld [vmem:[#allocation2 + $0xf0] ss:$2 sm:$0xff]  ;;  %s16788_s1 = smov 1  }
  0x91   : > { %2891 = vrot.lane.b32.xlu1 %v1388_v48, %s16733_s13  ;;  %2765 = vrot.lane.b32.xlu0 %v1326_v49, %s16717_s12  ;;  %s16721_s12 = smov 11   ;;  %v1774_v38 = vld [vmem:[#allocation2 + $0x8b] ss:$2 sm:$0xff]  ;;  %v955_v49 = vld [vmem:[#allocation2 + $0x102] ss:$2 sm:$0xff] }
  0x92   : > { %9504 = vmatpush3.bf16.msra.mxu0 %v9501_v30  ;;  %v597_v48 = vld [vmem:[%s11149_s14 + $0x148] sm:$0xff]  ;;  %v1522_v10 = vld [vmem:[#allocation2 + $0xb3] ss:$2 sm:$0xff]  ;;  %v1586_v29 = vld [vmem:[#allocation2 + $0xd8] ss:$2 sm:$0xff] }
  0x93   : > { %726 = vst.msk [vmem:[#allocation2 + $0x1c1] sm:$0xff] %vm384_vm0, %v597_v48  ;;  %v893_v14 = vld [vmem:[#allocation2 + $0x141] ss:$2 sm:$0xff]  ;;  %v1584_v15 = vld [vmem:[#allocation2 + $0xc8] ss:$2 sm:$0xff] }
  0x94   : > { %v1648_v28 = vld [vmem:[#allocation2 + $0xc9] ss:$2 sm:$0xff]  ;;  %v1712_v48 = vld [vmem:[#allocation2 + $0xca] ss:$2 sm:$0xff] }
  0x95   : > { %2127 = vrot.lane.b32.xlu1 %v1009_v53, %s16731_s22  ;;  %2001 = vrot.lane.b32.xlu0 %v947_v54, %s16725_s15  ;;  %v11297_v42 = vpop.permute.xlu0 %1867  ;;  %v1206_v53 = vld [vmem:[#allocation2 + $0xda] ss:$2 sm:$0xff]  ;;  %v1017_v54 = vld [vmem:[#allocation2 + $0xf3] ss:$2 sm:$0xff] }
  0x96   : > { %v11295_v41 = vpop.permute.xlu1 %1995 }
  0x99   : > { %3019 = vrot.lane.b32.xlu1 %v1452_v55, %s16719_s30  ;;  %2893 = vrot.lane.b32.xlu0 %v1390_v56, %s16733_s13  ;;  %s16783_s13 = smov 2   ;;  %v11303_v46 = vpop.permute.xlu0 %1869 }
  0x9d   : > { %2255 = vrot.lane.b32.xlu1 %v1072_v57, %s16737_s24  ;;  %2129 = vrot.lane.b32.xlu0 %v1011_v58, %s16731_s22  ;;  %v11313_v52 = vpop.permute.xlu0 %2123  ;;  %v1458_v57 = vld [vmem:[#allocation2 + $0xb2] ss:$2 sm:$0xff]  ;;  %v1268_v58 = vld [vmem:[#allocation2 + $0xcb] ss:$2 sm:$0xff] }
  0xa1   : > { %3147 = vrot.lane.b32.xlu1 %v1516_v59, %s16721_s12  ;;  %3021 = vrot.lane.b32.xlu0 %v1454_v60, %s16719_s30  ;;  %s16723_s30 = smov 12  }
  0xa5   : > { %2257 = vrot.lane.b32.xlu1 %v1074_v61, %s16737_s24  ;;  %1875 = vrot.lane.b32.xlu0 %v885_v62, %s16743_s16  ;;  %v600_v61 = vld [vmem:[%s11149_s14 + $0x160] sm:$0xff] }
  0xa6   : > { %v1019_v62 = vld [vmem:[#allocation2 + $0x103] ss:$2 sm:$0xff]  ;;  %729 = vst.msk [vmem:[#allocation2 + $0x1e1] sm:$0xff] %vm384_vm0, %v600_v61 }
  0xa9   : > { %3149 = vrot.lane.b32.xlu1 %v1518_v63, %s16721_s12  ;;  %2383 = vrot.lane.b32.xlu0 %v1136_v1, %s16735_s25  ;;  %s16727_s12 = smov 13   ;;  %v1520_v63 = vld [vmem:[#allocation2 + $0xa3] ss:$2 sm:$0xff] }
  0xaa   : > { %v601_v1 = vld [vmem:[%s11149_s14 + $0x168] sm:$0xff] }
  0xab   : > { %730 = vst.msk [vmem:[#allocation2 + $0x1e9] sm:$0xff] %vm384_vm0, %v601_v1  ;;  %v1272_v1 = vld [vmem:[#allocation2 + $0x11b] ss:$2 sm:$0xff] }
  0xad   : > { %1877 = vrot.lane.b32.xlu1 %v887_v4, %s16743_s16  ;;  %3275 = vrot.lane.b32.xlu0 %v1580_v5, %s16723_s30  ;;  %v598_v4 = vld [vmem:[%s11149_s14 + $0x150] sm:$0xff]  ;;  %v599_v5 = vld [vmem:[%s11149_s14 + $0x158] sm:$0xff] }
  0xae   : > { %727 = vst.msk [vmem:[#allocation2 + $0x1c9] sm:$0xff] %vm384_vm0, %v598_v4  ;;  %728 = vst.msk [vmem:[#allocation2 + $0x1d1] sm:$0xff] %vm384_vm0, %v599_v5  ;;  %v1210_v4 = vld [vmem:[#allocation2 + $0x12a] ss:$2 sm:$0xff] }
  0xb1   : > { %2385 = vrot.lane.b32.xlu1 %v1138_v6, %s16735_s25  ;;  %2003 = vrot.lane.b32.xlu0 %v949_v7, %s16725_s15  ;;  %s16779_s25 = smov 8   ;;  %v1270_v6 = vld [vmem:[#allocation2 + $0xdb] ss:$2 sm:$0xff]  ;;  %v1080_v7 = vld [vmem:[#allocation2 + $0x118] ss:$2 sm:$0xff] }
  0xb5   : > { %3277 = vrot.lane.b32.xlu1 %v1582_v8, %s16723_s30  ;;  %2511 = vrot.lane.b32.xlu0 %v1200_v9, %s16729_s29  ;;  %s16777_s30 = smov 7  }
  0xb9   : > { %2005 = vrot.lane.b32.xlu1 %v951_v12, %s16725_s15  ;;  %3403 = vrot.lane.b32.xlu0 %v1644_v13, %s16727_s12  ;;  %s16739_s15 = smov 14  }
  0xbd   : > { %2513 = vrot.lane.b32.xlu1 %v1202_v16, %s16729_s29  ;;  %2131 = vrot.lane.b32.xlu0 %v1013_v17, %s16731_s22  ;;  %s16780_s29 = smov 5  }
  0xc1   : > { %3405 = vrot.lane.b32.xlu1 %v1646_v18, %s16727_s12  ;;  %2639 = vrot.lane.b32.xlu0 %v1264_v19, %s16777_s30  ;;  %s16782_s12 = smov 9   ;;  %v602_v18 = vld [vmem:[%s11149_s14 + $0x170] sm:$0xff]  ;;  %v603_v19 = vld [vmem:[%s11149_s14 + $0x178] sm:$0xff] }
  0xc2   : > { %731 = vst.msk [vmem:[#allocation2 + $0x1f1] sm:$0xff] %vm384_vm0, %v602_v18  ;;  %732 = vst.msk [vmem:[#allocation2 + $0x1f9] sm:$0xff] %vm384_vm0, %v603_v19  ;;  %v1714_v18 = vld [vmem:[#allocation2 + $0xda] ss:$2 sm:$0xff] }
  0xc5   : > { %2133 = vrot.lane.b32.xlu1 %v1015_v20, %s16731_s22  ;;  %3531 = vrot.lane.b32.xlu0 %v1708_v21, %s16739_s15  ;;  %s16781_s22 = smov 4   ;;  %v1144_v20 = vld [vmem:[#allocation2 + $0x119] ss:$2 sm:$0xff]  ;;  %v1082_v21 = vld [vmem:[#allocation2 + $0x128] ss:$2 sm:$0xff] }
  0xc9   : > { %2641 = vrot.lane.b32.xlu1 %v1266_v24, %s16777_s30  ;;  %2259 = vrot.lane.b32.xlu0 %v1076_v25, %s16737_s24  ;;  %s16741_s24 = smov 15   ;;  %v1396_v24 = vld [vmem:[#allocation2 + $0xf1] ss:$2 sm:$0xff]  ;;  %v1334_v25 = vld [vmem:[#allocation2 + $0x100] ss:$2 sm:$0xff] }
  0xcd   : > { %3533 = vrot.lane.b32.xlu1 %v1710_v26, %s16739_s15  ;;  %2767 = vrot.lane.b32.xlu0 %v1328_v27, %s16779_s25  ;;  %s16784_s15 = smov 6  }
  0xd1   : > { %1879 = vrot.lane.b32.xlu1 %v889_v31, %s16743_s16  ;;  %3659 = vrot.lane.b32.xlu0 %v1772_v32, %s16741_s24  ;;  %v957_v32 = vld [vmem:[#allocation2 + $0x142] ss:$2 sm:$0xff] }
  0xd5   : > { %2387 = vrot.lane.b32.xlu1 %v1140_v33, %s16780_s29  ;;  %2261 = vrot.lane.b32.xlu0 %v1078_v34, %s16781_s22  ;;  %v895_v33 = vld [vmem:[#allocation2 + $0x151] ss:$2 sm:$0xff] }
  0xd9   : > { %2895 = vrot.lane.b32.xlu1 %v1392_v35, %s16782_s12  ;;  %2769 = vrot.lane.b32.xlu0 %v1330_v36, %s16779_s25  ;;  %v11301_v45 = vpop.permute.xlu1 %1997  ;;  %v1208_v36 = vld [vmem:[#allocation2 + $0x11a] ss:$2 sm:$0xff] }
  0xdd   : > { %1881 = vrot.lane.b32.xlu1 %v891_v37, %s16743_s16  ;;  %3661 = vrot.lane.b32.xlu0 %v1774_v38, %s16741_s24  ;;  %v11311_v51 = vpop.permute.xlu1 %2125  ;;  %s16785_s24 = smov 10   ;;  %s16786_s16 = smov 3   ;;  %v1146_v37 = vld [vmem:[#allocation2 + $0x129] ss:$2 sm:$0xff] }
  0xe1   : > { %2389 = vrot.lane.b32.xlu1 %v1142_v39, %s16780_s29  ;;  %2007 = vrot.lane.b32.xlu0 %v953_v40, %s16783_s13  ;;  %v1460_v40 = vld [vmem:[#allocation2 + $0xf2] ss:$2 sm:$0xff] }
  0xe5   : > { %2897 = vrot.lane.b32.xlu1 %v1394_v43, %s16782_s12  ;;  %2515 = vrot.lane.b32.xlu0 %v1204_v44, %s16784_s15  ;;  %v1398_v43 = vld [vmem:[#allocation2 + $0x101] ss:$2 sm:$0xff] }
  0xe9   : > { %2009 = vrot.lane.b32.xlu1 %v955_v49, %s16783_s13  ;;  %3023 = vrot.lane.b32.xlu0 %v1456_v50, %s16785_s24  ;;  %v1650_v49 = vld [vmem:[#allocation2 + $0xd9] ss:$2 sm:$0xff] }
  0xeb   : > { %v11317_v55 = vpop.permute.xlu1 %2253  ;;  %v11319_v56 = vpop.permute.xlu0 %2251 }
  0xed   : > { %2517 = vrot.lane.b32.xlu1 %v1206_v53, %s16784_s15  ;;  %2135 = vrot.lane.b32.xlu0 %v1017_v54, %s16786_s16  ;;  %v1021_v54 = vld [vmem:[#allocation2 + $0x143] ss:$2 sm:$0xff] }
  0xef   : > { %v11323_v59 = vpop.permute.xlu1 %2381  ;;  %v11325_v60 = vpop.permute.xlu0 %2379 }
  0xf1   : > { %3025 = vrot.lane.b32.xlu1 %v1458_v57, %s16785_s24  ;;  %2643 = vrot.lane.b32.xlu0 %v1268_v58, %s16777_s30  ;;  %v959_v57 = vld [vmem:[#allocation2 + $0x152] ss:$2 sm:$0xff] }
  0xf3   : > { %v11332_v2 = vpop.permute.xlu1 %2509  ;;  %v11334_v3 = vpop.permute.xlu0 %2507 }
  0xf5   : > { %2137 = vrot.lane.b32.xlu1 %v1019_v62, %s16786_s16  ;;  %3151 = vrot.lane.b32.xlu0 %v1520_v63, %s16787_s0  ;;  %v604_v62 = vld [vmem:[%s11149_s14 + $0x180] sm:$0xff]  ;;  %v605_v63 = vld [vmem:[%s11149_s14 + $0x188] sm:$0xff] }
  0xf6   : > { %733 = vst.msk [vmem:[#allocation2 + $0x209] sm:$0xff] %vm384_vm0, %v604_v62  ;;  %734 = vst.msk [vmem:[#allocation2 + $0x211] sm:$0xff] %vm384_vm0, %v605_v63  ;;  %v1526_v62 = vld [vmem:[#allocation2 + $0x103] ss:$2 sm:$0xff] }
  0xf7   : > { %v11343_v8 = vpop.permute.xlu1 %1871  ;;  %v11345_v9 = vpop.permute.xlu0 %2635 }
  0xf9   : > { %2645 = vrot.lane.b32.xlu1 %v1270_v6, %s16777_s30  ;;  %2263 = vrot.lane.b32.xlu0 %v1080_v7, %s16781_s22  ;;  %v1524_v7 = vld [vmem:[#allocation2 + $0xf3] ss:$2 sm:$0xff] }
  0xfb   : > { %v11349_v12 = vpop.permute.xlu1 %2763  ;;  %v11351_v13 = vpop.permute.xlu0 %2637 }
  0xfd   : > { %3153 = vrot.lane.b32.xlu1 %v1522_v10, %s16787_s0  ;;  %2771 = vrot.lane.b32.xlu0 %v1332_v11, %s16779_s25  ;;  %v1462_v10 = vld [vmem:[#allocation2 + $0x102] ss:$2 sm:$0xff] }
  0xff   : > { %v11355_v16 = vpop.permute.xlu1 %1999  ;;  %v11357_v17 = vpop.permute.xlu0 %1873 }
 0x101   : > { %1883 = vrot.lane.b32.xlu1 %v893_v14, %s16788_s1  ;;  %3279 = vrot.lane.b32.xlu0 %v1584_v15, %s16789_s26  ;;  %v1776_v15 = vld [vmem:[#allocation2 + $0xcb] ss:$2 sm:$0xff] }
 0x103   : > { %v11365_v22 = vpop.permute.xlu1 %2891  ;;  %v11367_v23 = vpop.permute.xlu0 %2765 }
 0x105   : > { %2391 = vrot.lane.b32.xlu1 %v1144_v20, %s16780_s29  ;;  %2265 = vrot.lane.b32.xlu0 %v1082_v21, %s16781_s22  ;;  %v608_v21 = vld [vmem:[%s11149_s14 + $0x1a0] sm:$0xff] }
 0x106   : > { %737 = vst.msk [vmem:[#allocation2 + $0x231] sm:$0xff] %vm384_vm0, %v608_v21 }
 0x107   : > { %v11371_v26 = vpop.permute.xlu1 %2127  ;;  %v11373_v27 = vpop.permute.xlu0 %2001 }
 0x109   : > { %2899 = vrot.lane.b32.xlu1 %v1396_v24, %s16782_s12  ;;  %2773 = vrot.lane.b32.xlu0 %v1334_v25, %s16779_s25  ;;  %v1084_v24 = vld [vmem:[#allocation2 + $0x168] ss:$2 sm:$0xff]  ;;  %v1023_v25 = vld [vmem:[#allocation2 + $0x153] ss:$2 sm:$0xff] }
 0x10b   : > { %v11377_v30 = vpop.permute.xlu1 %3019  ;;  %v11379_v31 = vpop.permute.xlu0 %2893 }
 0x10d   : > { %3407 = vrot.lane.b32.xlu1 %v1648_v28, %s16790_s19  ;;  %3281 = vrot.lane.b32.xlu0 %v1586_v29, %s16789_s26  ;;  %v609_v28 = vld [vmem:[%s11149_s14 + $0x1a8] sm:$0xff] }
 0x10e   : > { %738 = vst.msk [vmem:[#allocation2 + $0x239] sm:$0xff] %vm384_vm0, %v609_v28 }
 0x10f   : > { %v11383_v34 = vpop.permute.xlu1 %2255  ;;  %v11385_v35 = vpop.permute.xlu0 %2129 }
 0x111   : > { %2011 = vrot.lane.b32.xlu1 %v957_v32, %s16783_s13  ;;  %1885 = vrot.lane.b32.xlu0 %v895_v33, %s16788_s1  ;;  %v813_v33 = vld [vmem:[#allocation2] ss:$2 sm:$0xff] }
 0x113   : > { %v11389_v38 = vpop.permute.xlu1 %3147  ;;  %v11391_v39 = vpop.permute.xlu0 %3021 }
 0x115   : > { %2519 = vrot.lane.b32.xlu1 %v1208_v36, %s16784_s15  ;;  %2393 = vrot.lane.b32.xlu0 %v1146_v37, %s16780_s29  ;;  %v606_v36 = vld [vmem:[%s11149_s14 + $0x190] sm:$0xff]  ;;  %v607_v37 = vld [vmem:[%s11149_s14 + $0x198] sm:$0xff] }
 0x116   : > { %735 = vst.msk [vmem:[#allocation2 + $0x219] sm:$0xff] %vm384_vm0, %v606_v36  ;;  %736 = vst.msk [vmem:[#allocation2 + $0x221] sm:$0xff] %vm384_vm0, %v607_v37  ;;  %v1086_v36 = vld [vmem:[#allocation2 + $0x178] ss:$2 sm:$0xff] }
 0x117   : > { %v11395_v44 = vpop.permute.xlu1 %2257  ;;  %v11397_v47 = vpop.permute.xlu0 %1875 }
 0x119   : > { %3027 = vrot.lane.b32.xlu1 %v1460_v40, %s16785_s24  ;;  %2901 = vrot.lane.b32.xlu0 %v1398_v43, %s16782_s12  ;;  %v1336_v40 = vld [vmem:[#allocation2 + $0x140] ss:$2 sm:$0xff]  ;;  %v1274_v43 = vld [vmem:[#allocation2 + $0x12b] ss:$2 sm:$0xff] }
 0x11b   : > { %v11401_v50 = vpop.permute.xlu1 %3149  ;;  %v11403_v53 = vpop.permute.xlu0 %2383 }
 0x11d   : > { %3535 = vrot.lane.b32.xlu1 %v1712_v48, %s16791_s23  ;;  %3409 = vrot.lane.b32.xlu0 %v1650_v49, %s16790_s19 }
 0x11f   : > { %v11407_v58 = vpop.permute.xlu1 %1877  ;;  %v11409_v61 = vpop.permute.xlu0 %3275 }
 0x121   : > { %2139 = vrot.lane.b32.xlu1 %v1021_v54, %s16786_s16  ;;  %2013 = vrot.lane.b32.xlu0 %v959_v57, %s16783_s13  ;;  %v3755_v54 = vsel %vm384_vm0, %v813_v33, %v11297_v42  ;;  %v1588_v57 = vld [vmem:[#allocation2 + $0x118] ss:$2 sm:$0xff]  ;;  %v1148_v33 = vld [vmem:[#allocation2 + $0x169] ss:$2 sm:$0xff] }
 0x122   : > { %v3788_v63 = vsel %vm3787_vm2, %v3755_v54, %v11295_v41  ;;  %v1400_v54 = vld [vmem:[#allocation2 + $0x141] ss:$2 sm:$0xff] }
 0x123   : > { %v11417_v5 = vpop.permute.xlu1 %2385  ;;  %v11419_v6 = vpop.permute.xlu0 %2003 }
 0x125   : > { %2647 = vrot.lane.b32.xlu1 %v1272_v1, %s16777_s30  ;;  %2521 = vrot.lane.b32.xlu0 %v1210_v4, %s16784_s15 }
 0x127   : > { %v11423_v11 = vpop.permute.xlu1 %3277  ;;  %v11425_v14 = vpop.permute.xlu0 %2511 }
 0x129   : > { %3155 = vrot.lane.b32.xlu1 %v1524_v7, %s16787_s0  ;;  %3029 = vrot.lane.b32.xlu0 %v1462_v10, %s16785_s24  ;;  %v3821_v7 = vsel %vm3820_vm3, %v3788_v63, %v11313_v52  ;;  %v897_v10 = vld [vmem:[#allocation2 + $0x191] ss:$2 sm:$0xff] }
 0x12a   : > { %v3854_v42 = vsel %vm3853_vm4, %v3821_v7, %v11319_v56 }
 0x12b   : > { %v11429_v19 = vpop.permute.xlu1 %2005  ;;  %v11431_v20 = vpop.permute.xlu0 %3403  ;;  %v3887_v41 = vsel %vm3886_vm5, %v3854_v42, %v11325_v60 }
 0x12c   : > { %v3920_v52 = vsel %vm3919_vm6, %v3887_v41, %v11334_v3  ;;  %v611_v3 = vld [vmem:[%s11149_s14 + $0x1b8] sm:$0xff] }
 0x12d   : > { %3663 = vrot.lane.b32.xlu1 %v1776_v15, %s16792_s28  ;;  %3537 = vrot.lane.b32.xlu0 %v1714_v18, %s16791_s23  ;;  %v1778_v15 = vld [vmem:[#allocation2 + $0xdb] ss:$2 sm:$0xff]  ;;  %v3953_v21 = vsel %vm3952_vm7, %v3920_v52, %v11345_v9  ;;  %740 = vst.msk [vmem:[#allocation2 + $0x249] sm:$0xff] %vm384_vm0, %v611_v3  ;;  %v961_v52 = vld [vmem:[#allocation2 + $0x192] ss:$2 sm:$0xff] }
 0x12e   : > { %v3986_v60 = vsel %vm3985_vm8, %v3953_v21, %v11349_v12  ;;  %v899_v21 = vld [vmem:[#allocation2 + $0x1a1] ss:$2 sm:$0xff] }
 0x12f   : > { %v11438_v29 = vpop.permute.xlu1 %2513  ;;  %v11440_v32 = vpop.permute.xlu0 %2131  ;;  %v4019_v28 = vsel %vm4018_vm9, %v3986_v60, %v11365_v22  ;;  %v1150_v3 = vld [vmem:[#allocation2 + $0x179] ss:$2 sm:$0xff] }
 0x130   : > { %v4052_v9 = vsel %vm4051_vm10, %v4019_v28, %v11377_v30 }
 0x131   : > { %2267 = vrot.lane.b32.xlu1 %v1084_v24, %s16781_s22  ;;  %2141 = vrot.lane.b32.xlu0 %v1023_v25, %s16786_s16  ;;  %v815_v24 = vld [vmem:[#allocation2 + $0x10] ss:$2 sm:$0xff]  ;;  %v4085_v22 = vsel %vm4084_vm11, %v4052_v9, %v11389_v38 }
 0x132   : > { %v610_v25 = vld [vmem:[%s11149_s14 + $0x1b0] sm:$0xff] }
 0x133   : > { %v11449_v48 = vpop.permute.xlu1 %3405  ;;  %v11451_v49 = vpop.permute.xlu0 %2639  ;;  %739 = vst.msk [vmem:[#allocation2 + $0x241] sm:$0xff] %vm384_vm0, %v610_v25  ;;  %v1212_v25 = vld [vmem:[#allocation2 + $0x16a] ss:$2 sm:$0xff] }
 0x135   : > { %2775 = vrot.lane.b32.xlu1 %v1336_v40, %s16779_s25  ;;  %2649 = vrot.lane.b32.xlu0 %v1274_v43, %s16777_s30  ;;  %v3756_v40 = vsel %vm384_vm0, %v815_v24, %v11303_v46  ;;  %v4118_v43 = vsel %vm4117_vm12, %v4085_v22, %v11409_v61 }
 0x136   : > { %v4151_v30 = vsel %vm4150_vm13, %v4118_v43, %v11431_v20  ;;  %v3789_v46 = vsel %vm3787_vm2, %v3756_v40, %v11301_v45  ;;  %v1652_v20 = vld [vmem:[#allocation2 + $0x119] ss:$2 sm:$0xff]  ;;  %v1654_v40 = vld [vmem:[#allocation2 + $0x129] ss:$2 sm:$0xff] }
 0x137   : > { %v11459_v1 = vpop.permute.xlu1 %2133  ;;  %v3532_v4 = vpop.permute.xlu0 %3531  ;;  %v3822_v61 = vsel %vm3820_vm3, %v3789_v46, %v11311_v51 }
 0x138   : > { %v3855_v42 = vsel %vm3853_vm4, %v3822_v61, %v11317_v55  ;;  %v1276_v61 = vld [vmem:[#allocation2 + $0x16b] ss:$2 sm:$0xff] }
 0x139   : > { %3283 = vrot.lane.b32.xlu1 %v1588_v57, %s16789_s26  ;;  %3157 = vrot.lane.b32.xlu0 %v1526_v62, %s16787_s0  ;;  %v1338_v57 = vld [vmem:[#allocation2 + $0x150] ss:$2 sm:$0xff]  ;;  %v4184_v62 = vsel %vm4183_vm14, %v4151_v30, %v3532_v4  ;;  %v3888_v45 = vsel %vm3886_vm5, %v3855_v42, %v11323_v59  ;;  %v1025_v30 = vld [vmem:[#allocation2 + $0x193] ss:$2 sm:$0xff] }
 0x13a   : > { %v1590_v4 = vld [vmem:[#allocation2 + $0x128] ss:$2 sm:$0xff]  ;;  %v3921_v41 = vsel %vm3919_vm6, %v3888_v45, %v11332_v2 }
 0x13b   : > { %v11471_v18 = vpop.permute.xlu1 %2641  ;;  %v11473_v56 = vpop.permute.xlu0 %2259  ;;  %v3954_v55 = vsel %vm3952_vm7, %v3921_v41, %v11351_v13 }
 0x13d   : > { %1887 = vrot.lane.b32.xlu1 %v897_v10, %s16788_s1  ;;  %3665 = vrot.lane.b32.xlu0 %v1778_v15, %s16792_s28  ;;  %v3987_v15 = vsel %vm3985_vm8, %v3954_v55, %v11367_v23 }
 0x13e   : > { %v4020_v59 = vsel %vm4018_vm9, %v3987_v15, %v11379_v31  ;;  %v1780_v15 = vld [vmem:[#allocation2 + $0x11b] ss:$2 sm:$0xff] }
 0x13f   : > { %v3534_v12 = vpop.permute.xlu1 %3533  ;;  %v11489_v37 = vpop.permute.xlu0 %2767  ;;  %v4053_v2 = vsel %vm4051_vm10, %v4020_v59, %v11391_v39  ;;  %v1718_v59 = vld [vmem:[#allocation2 + $0x12a] ss:$2 sm:$0xff] }
 0x140   : > { %v4086_v13 = vsel %vm4084_vm11, %v4053_v2, %v11401_v50  ;;  %v1464_v50 = vld [vmem:[#allocation2 + $0x142] ss:$2 sm:$0xff] }
 0x141   : > { %2395 = vrot.lane.b32.xlu1 %v1148_v33, %s16780_s29  ;;  %2269 = vrot.lane.b32.xlu0 %v1086_v36, %s16781_s22  ;;  %v4119_v23 = vsel %vm4117_vm12, %v4086_v13, %v11423_v11  ;;  %v1402_v11 = vld [vmem:[#allocation2 + $0x151] ss:$2 sm:$0xff]  ;;  %v616_v2 = vld [vmem:[%s11149_s14 + $0x1e0] sm:$0xff] }
 0x142   : > { %v4152_v31 = vsel %vm4150_vm13, %v4119_v23, %v11449_v48  ;;  %v1088_v13 = vld [vmem:[#allocation2 + $0x1b8] ss:$2 sm:$0xff]  ;;  %v1027_v23 = vld [vmem:[#allocation2 + $0x1a3] ss:$2 sm:$0xff]  ;;  %745 = vst.msk [vmem:[#allocation2 + $0x281] sm:$0xff] %vm384_vm0, %v616_v2 }
 0x143   : > { %v11504_v38 = vpop.permute.xlu1 %1879  ;;  %v3660_v63 = vpop.permute.xlu0 %3659  ;;  %v4185_v39 = vsel %vm4183_vm14, %v4152_v31, %v3534_v12  ;;  %v1716_v12 = vld [vmem:[#allocation2 + $0x11a] ss:$2 sm:$0xff] }
 0x144   : > { %v4217_v7 = vsel %vm4216_vm15, %v4184_v62, %v3660_v63  ;;  %v612_v62 = vld [vmem:[%s11149_s14 + $0x1c0] sm:$0xff]  ;;  %v613_v63 = vld [vmem:[%s11149_s14 + $0x1c8] sm:$0xff] }
 0x145   : > { %2903 = vrot.lane.b32.xlu1 %v1400_v54, %s16782_s12  ;;  %2777 = vrot.lane.b32.xlu0 %v1338_v57, %s16779_s25  ;;  %v963_v54 = vld [vmem:[#allocation2 + $0x1a2] ss:$2 sm:$0xff]  ;;  %741 = vst.msk [vmem:[#allocation2 + $0x259] sm:$0xff] %vm384_vm0, %v612_v62  ;;  %742 = vst.msk [vmem:[#allocation2 + $0x261] sm:$0xff] %vm384_vm0, %v613_v63  ;;  %v901_v63 = vld [vmem:[#allocation2 + $0x1e1] ss:$2 sm:$0xff] }
 0x146   : > { %9431 = vmatprep.mubr.msk.f32.mxu0 %vm4258_vm1, %v4217_v7  ;;  %v1214_v7 = vld [vmem:[#allocation2 + $0x17a] ss:$2 sm:$0xff] }
 0x147   : > { %v11518_v51 = vpop.permute.xlu1 %2387  ;;  %v11520_v10 = vpop.permute.xlu0 %2261  ;;  %v617_v31 = vld [vmem:[%s11149_s14 + $0x1e8] sm:$0xff] }
 0x148   : > { %746 = vst.msk [vmem:[#allocation2 + $0x289] sm:$0xff] %vm384_vm0, %v617_v31  ;;  %v1090_v2 = vld [vmem:[#allocation2 + $0x1c8] ss:$2 sm:$0xff]  ;;  %v1404_v31 = vld [vmem:[#allocation2 + $0x191] ss:$2 sm:$0xff] }
 0x149   : > { %3411 = vrot.lane.b32.xlu1 %v1652_v20, %s16790_s19  ;;  %3285 = vrot.lane.b32.xlu0 %v1590_v4, %s16789_s26  ;;  %v1528_v20 = vld [vmem:[#allocation2 + $0x143] ss:$2 sm:$0xff]  ;;  %v1466_v4 = vld [vmem:[#allocation2 + $0x152] ss:$2 sm:$0xff] }
 0x14b   : > { %v11532_v24 = vpop.permute.xlu1 %2895  ;;  %v11534_v60 = vpop.permute.xlu0 %2769 }
 0x14d   : > { %2015 = vrot.lane.b32.xlu1 %v961_v52, %s16783_s13  ;;  %1889 = vrot.lane.b32.xlu0 %v899_v21, %s16788_s1 }
 0x14f   : > { %v11545_v28 = vpop.permute.xlu1 %1881  ;;  %v3662_v33 = vpop.permute.xlu0 %3661 }
 0x150   : > { %v4218_v36 = vsel %vm4216_vm15, %v4185_v39, %v3662_v33  ;;  %v614_v39 = vld [vmem:[%s11149_s14 + $0x1d0] sm:$0xff]  ;;  %v615_v33 = vld [vmem:[%s11149_s14 + $0x1d8] sm:$0xff] }
 0x151   : > { %2523 = vrot.lane.b32.xlu1 %v1212_v25, %s16784_s15  ;;  %2397 = vrot.lane.b32.xlu0 %v1150_v3, %s16780_s29  ;;  %743 = vst.msk [vmem:[#allocation2 + $0x269] sm:$0xff] %vm384_vm0, %v614_v39  ;;  %744 = vst.msk [vmem:[#allocation2 + $0x271] sm:$0xff] %vm384_vm0, %v615_v33  ;;  %v1342_v39 = vld [vmem:[#allocation2 + $0x1a0] ss:$2 sm:$0xff] }
 0x152   : > { %9432 = vmatmul.mubr.msk.f32.vlgmr.msra.gmra.mrb[0].mxu0 %vm4258_vm1, %v4218_v36  ;;  %v1340_v36 = vld [vmem:[#allocation2 + $0x190] ss:$2 sm:$0xff] }
 0x153   : > { %v11551_v9 = vpop.permute.xlu1 %2389  ;;  %v11553_v48 = vpop.permute.xlu0 %2007 }
 0x155   : > { %3031 = vrot.lane.b32.xlu1 %v1464_v50, %s16785_s24  ;;  %2905 = vrot.lane.b32.xlu0 %v1402_v11, %s16782_s12  ;;  %v1278_v50 = vld [vmem:[#allocation2 + $0x17b] ss:$2 sm:$0xff] }
 0x157   : > { %v11557_v22 = vpop.permute.xlu1 %2897  ;;  %v11559_v43 = vpop.permute.xlu0 %2515 }
 0x159   : > { %3539 = vrot.lane.b32.xlu1 %v1716_v12, %s16791_s23  ;;  %3413 = vrot.lane.b32.xlu0 %v1654_v40, %s16790_s19  ;;  %v1592_v40 = vld [vmem:[#allocation2 + $0x168] ss:$2 sm:$0xff] }
 0x15b   : > { %v11563_v57 = vpop.permute.xlu1 %2009  ;;  %v11565_v46 = vpop.permute.xlu0 %3023 }
 0x15d   : > { %2143 = vrot.lane.b32.xlu1 %v1025_v30, %s16786_s16  ;;  %2017 = vrot.lane.b32.xlu0 %v963_v54, %s16783_s13  ;;  %v1530_v30 = vld [vmem:[#allocation2 + $0x153] ss:$2 sm:$0xff] }
 0x15f   : > { %v11573_v42 = vpop.permute.xlu1 %2517  ;;  %v11575_v45 = vpop.permute.xlu0 %2135 }
 0x161   : > { %2651 = vrot.lane.b32.xlu1 %v1276_v61, %s16777_s30  ;;  %2525 = vrot.lane.b32.xlu0 %v1214_v7, %s16784_s15  ;;  %v1782_v61 = vld [vmem:[#allocation2 + $0x12b] ss:$2 sm:$0xff] }
 0x163   : > { %v11579_v41 = vpop.permute.xlu1 %3025  ;;  %v11581_v55 = vpop.permute.xlu0 %2643 }
 0x165   : > { %3159 = vrot.lane.b32.xlu1 %v1528_v20, %s16787_s0  ;;  %3033 = vrot.lane.b32.xlu0 %v1466_v4, %s16785_s24  ;;  %v618_v4 = vld [vmem:[%s11149_s14 + $0x1f0] sm:$0xff] }
 0x166   : > { %747 = vst.msk [vmem:[#allocation2 + $0x291] sm:$0xff] %vm384_vm0, %v618_v4  ;;  %v903_v4 = vld [vmem:[#allocation2 + $0x1f1] ss:$2 sm:$0xff] }
 0x167   : > { %v11585_v52 = vpop.permute.xlu1 %2137  ;;  %v11587_v21 = vpop.permute.xlu0 %3151 }
 0x168   : > { %16793 = vst [vmem:[#allocation12_spill] sm:$0xff] %v11585_v52 }
 0x169   : > { %3667 = vrot.lane.b32.xlu1 %v1780_v15, %s16792_s28  ;;  %3541 = vrot.lane.b32.xlu0 %v1718_v59, %s16791_s23  ;;  %v619_v15 = vld [vmem:[%s11149_s14 + $0x1f8] sm:$0xff] }
 0x16a   : > { %v1152_v59 = vld [vmem:[#allocation2 + $0x1b9] ss:$2 sm:$0xff]  ;;  %748 = vst.msk [vmem:[#allocation2 + $0x299] sm:$0xff] %vm384_vm0, %v619_v15 }
 0x16b   : > { %v11594_v25 = vpop.permute.xlu1 %2645  ;;  %v11596_v3 = vpop.permute.xlu0 %2263 }
 0x16d   : > { %2271 = vrot.lane.b32.xlu1 %v1088_v13, %s16781_s22  ;;  %2145 = vrot.lane.b32.xlu0 %v1027_v23, %s16786_s16 }
 0x16f   : > { %v11605_v11 = vpop.permute.xlu1 %3153  ;;  %v11607_v12 = vpop.permute.xlu0 %2771 }
 0x171   : > { %2779 = vrot.lane.b32.xlu1 %v1340_v36, %s16779_s25  ;;  %2653 = vrot.lane.b32.xlu0 %v1278_v50, %s16777_s30  ;;  %v1656_v50 = vld [vmem:[#allocation2 + $0x169] ss:$2 sm:$0xff] }
 0x173   : > { %v11611_v54 = vpop.permute.xlu1 %1883  ;;  %v11613_v62 = vpop.permute.xlu0 %3279 }
 0x174   : > { %16794 = vst [vmem:[#allocation13_spill] sm:$0xff] %v11611_v54 }
 0x175   : > { %3287 = vrot.lane.b32.xlu1 %v1592_v40, %s16789_s26  ;;  %3161 = vrot.lane.b32.xlu0 %v1530_v30, %s16787_s0  ;;  %v1594_v40 = vld [vmem:[#allocation2 + $0x178] ss:$2 sm:$0xff] }
 0x177   : > { %v11617_v7 = vpop.permute.xlu1 %2391  ;;  %v11619_v20 = vpop.permute.xlu0 %2265 }
 0x178   : > { %16795 = vst [vmem:[#allocation14_spill] sm:$0xff] %v11619_v20 }
 0x179   : > { %1891 = vrot.lane.b32.xlu1 %v901_v63, %s16788_s1  ;;  %3669 = vrot.lane.b32.xlu0 %v1782_v61, %s16792_s28  ;;  %v965_v61 = vld [vmem:[#allocation2 + $0x1e2] ss:$2 sm:$0xff] }
 0x17b   : > { %v11627_v13 = vpop.permute.xlu1 %2899  ;;  %v11629_v23 = vpop.permute.xlu0 %2773 }
 0x17d   : > { %2399 = vrot.lane.b32.xlu1 %v1152_v59, %s16780_s29  ;;  %2273 = vrot.lane.b32.xlu0 %v1090_v2, %s16781_s22  ;;  %v1216_v2 = vld [vmem:[#allocation2 + $0x1ba] ss:$2 sm:$0xff] }
 0x17f   : > { %v11633_v33 = vpop.permute.xlu1 %3407  ;;  %v11635_v36 = vpop.permute.xlu0 %3281 }
 0x181   : > { %2907 = vrot.lane.b32.xlu1 %v1404_v31, %s16782_s12  ;;  %2781 = vrot.lane.b32.xlu0 %v1342_v39, %s16779_s25  ;;  %v1154_v31 = vld [vmem:[#allocation2 + $0x1c9] ss:$2 sm:$0xff] }
 0x183   : > { %v11639_v30 = vpop.permute.xlu1 %2011  ;;  %v11641_v63 = vpop.permute.xlu0 %1885 }
 0x184   : > { %16796 = vst [vmem:[#allocation15_spill] sm:$0xff] %v11639_v30  ;;  %16797 = vst [vmem:[#allocation16_spill] sm:$0xff] %v11641_v63  ;;  %v817_v63 = vld [vmem:[#allocation2 + $0x50] ss:$2 sm:$0xff] }
 0x185   : > { %3415 = vrot.lane.b32.xlu1 %v1656_v50, %s16790_s19  ;;  %3289 = vrot.lane.b32.xlu0 %v1594_v40, %s16789_s26  ;;  %v1468_v50 = vld [vmem:[#allocation2 + $0x192] ss:$2 sm:$0xff]  ;;  %v1406_v40 = vld [vmem:[#allocation2 + $0x1a1] ss:$2 sm:$0xff] }
 0x187   : > { %v11645_v15 = vpop.permute.xlu1 %2519  ;;  %v11647_v59 = vpop.permute.xlu0 %2393 }
 0x188   : > { %16798 = vst [vmem:[#allocation17_spill] sm:$0xff] %v11647_v59  ;;  %v1658_v59 = vld [vmem:[#allocation2 + $0x179] ss:$2 sm:$0xff] }
 0x189   : > { %2019 = vrot.lane.b32.xlu1 %v965_v61, %s16783_s13  ;;  %1893 = vrot.lane.b32.xlu0 %v903_v4, %s16788_s1  ;;  %v3757_v61 = vsel %vm384_vm0, %v817_v63, %v11343_v8  ;;  %v1720_v4 = vld [vmem:[#allocation2 + $0x16a] ss:$2 sm:$0xff] }
 0x18a   : > { %v967_v63 = vld [vmem:[#allocation2 + $0x1f2] ss:$2 sm:$0xff] }
 0x18b   : > { %v11651_v39 = vpop.permute.xlu1 %3027  ;;  %v11653_v0 = vpop.permute.xlu0 %2901 }
 0x18d   : > { %2527 = vrot.lane.b32.xlu1 %v1216_v2, %s16784_s15  ;;  %2401 = vrot.lane.b32.xlu0 %v1154_v31, %s16780_s29  ;;  %v3790_v2 = vsel %vm3787_vm2, %v3757_v61, %v11355_v16  ;;  %v1029_v16 = vld [vmem:[#allocation2 + $0x1e3] ss:$2 sm:$0xff] }
 0x18e   : > { %v3823_v52 = vsel %vm3820_vm3, %v3790_v2, %v11371_v26 }
 0x18f   : > { %v3536_v30 = vpop.permute.xlu1 %3535  ;;  %v11657_v54 = vpop.permute.xlu0 %3409 }
 0x191   : > { %3035 = vrot.lane.b32.xlu1 %v1468_v50, %s16785_s24  ;;  %2909 = vrot.lane.b32.xlu0 %v1406_v40, %s16782_s12  ;;  %v3856_v50 = vsel %vm3853_vm4, %v3823_v52, %v11383_v34  ;;  %v621_v52 = vld [vmem:[%s11149_s14 + $0x208] sm:$0xff] }
 0x192   : > { %v3889_v8 = vsel %vm3886_vm5, %v3856_v50, %v11403_v53  ;;  %v620_v53 = vld [vmem:[%s11149_s14 + $0x200] sm:$0xff]  ;;  %750 = vst.msk [vmem:[#allocation2 + $0x2b1] sm:$0xff] %vm384_vm0, %v621_v52 }
 0x193   : > { %v11665_v20 = vpop.permute.xlu1 %2139  ;;  %v11667_v31 = vpop.permute.xlu0 %2013  ;;  %v3922_v40 = vsel %vm3919_vm6, %v3889_v8, %v11425_v14  ;;  %v1280_v14 = vld [vmem:[#allocation2 + $0x1bb] ss:$2 sm:$0xff]  ;;  %749 = vst.msk [vmem:[#allocation2 + $0x2a9] sm:$0xff] %vm384_vm0, %v620_v53 }
 0x194   : > { %16799 = vst [vmem:[#allocation18_spill] sm:$0xff] %v11667_v31  ;;  %v3955_v26 = vsel %vm3952_vm7, %v3922_v40, %v11451_v49 }
 0x195   : > { %3543 = vrot.lane.b32.xlu1 %v1720_v4, %s16791_s23  ;;  %3417 = vrot.lane.b32.xlu0 %v1658_v59, %s16790_s19  ;;  %v3988_v34 = vsel %vm3985_vm8, %v3955_v26, %v11489_v37  ;;  %v1218_v4 = vld [vmem:[#allocation2 + $0x1ca] ss:$2 sm:$0xff] }
 0x196   : > { %v4021_v59 = vsel %vm4018_vm9, %v3988_v34, %v11532_v24 }
 0x197   : > { %v11679_v61 = vpop.permute.xlu1 %2647  ;;  %v11681_v31 = vpop.permute.xlu0 %2521  ;;  %v4054_v49 = vsel %vm4051_vm10, %v4021_v59, %v11565_v46  ;;  %v819_v46 = vld [vmem:[#allocation2 + $0x60] ss:$2 sm:$0xff] }
 0x198   : > { %v4087_v50 = vsel %vm4084_vm11, %v4054_v49, %v11587_v21  ;;  %v3758_v21 = vsel %vm384_vm0, %v819_v46, %v11357_v17  ;;  %v1092_v17 = vld [vmem:[#allocation2 + $0x208] ss:$2 sm:$0xff]  ;;  %v1282_v46 = vld [vmem:[#allocation2 + $0x1cb] ss:$2 sm:$0xff] }
 0x199   : > { %2147 = vrot.lane.b32.xlu1 %v1029_v16, %s16786_s16  ;;  %2021 = vrot.lane.b32.xlu0 %v967_v63, %s16783_s13  ;;  %v4120_v8 = vsel %vm4117_vm12, %v4087_v50, %v11613_v62  ;;  %v1532_v16 = vld [vmem:[#allocation2 + $0x193] ss:$2 sm:$0xff]  ;;  %v1470_v63 = vld [vmem:[#allocation2 + $0x1a2] ss:$2 sm:$0xff] }
 0x19a   : > { %v4153_v24 = vsel %vm4150_vm13, %v4120_v8, %v11633_v33  ;;  %v1784_v62 = vld [vmem:[#allocation2 + $0x16b] ss:$2 sm:$0xff]  ;;  %v1722_v33 = vld [vmem:[#allocation2 + $0x17a] ss:$2 sm:$0xff] }
 0x19b   : > { %v11697_v2 = vpop.permute.xlu1 %3155  ;;  %v11699_v37 = vpop.permute.xlu0 %3029  ;;  %v4186_v40 = vsel %vm4183_vm14, %v4153_v24, %v3536_v30  ;;  %v3791_v30 = vsel %vm3787_vm2, %v3758_v21, %v11373_v27  ;;  %v1031_v27 = vld [vmem:[#allocation2 + $0x1f3] ss:$2 sm:$0xff]  ;;  %v625_v8 = vld [vmem:[%s11149_s14 + $0x228] sm:$0xff] }
 0x19c   : > { %v624_v50 = vld [vmem:[%s11149_s14 + $0x220] sm:$0xff]  ;;  %754 = vst.msk [vmem:[#allocation2 + $0x2d9] sm:$0xff] %vm384_vm0, %v625_v8 }
 0x19d   : > { %2655 = vrot.lane.b32.xlu1 %v1280_v14, %s16777_s30  ;;  %2529 = vrot.lane.b32.xlu0 %v1218_v4, %s16784_s15  ;;  %v3824_v14 = vsel %vm3820_vm3, %v3791_v30, %v11385_v35  ;;  %753 = vst.msk [vmem:[#allocation2 + $0x2d1] sm:$0xff] %vm384_vm0, %v624_v50  ;;  %v1156_v50 = vld [vmem:[#allocation2 + $0x209] ss:$2 sm:$0xff]  ;;  %v1094_v8 = vld [vmem:[#allocation2 + $0x218] ss:$2 sm:$0xff] }
 0x19e   : > { %v3857_v4 = vsel %vm3853_vm4, %v3824_v14, %v11395_v44 }
 0x19f   : > { %v3664_v26 = vpop.permute.xlu1 %3663  ;;  %v3538_v34 = vpop.permute.xlu0 %3537  ;;  %v3890_v49 = vsel %vm3886_vm5, %v3857_v4, %v11417_v5 }
 0x1a0   : > { %v4219_v53 = vsel %vm4216_vm15, %v4186_v40, %v3664_v26  ;;  %v3923_v24 = vsel %vm3919_vm6, %v3890_v49, %v11438_v29  ;;  %v622_v40 = vld [vmem:[%s11149_s14 + $0x210] sm:$0xff]  ;;  %v623_v26 = vld [vmem:[%s11149_s14 + $0x218] sm:$0xff] }
 0x1a1   : > { %3163 = vrot.lane.b32.xlu1 %v1532_v16, %s16787_s0  ;;  %3037 = vrot.lane.b32.xlu0 %v1470_v63, %s16785_s24  ;;  %v3956_v44 = vsel %vm3952_vm7, %v3923_v24, %v11471_v18  ;;  %v1344_v63 = vld [vmem:[#allocation2 + $0x1e0] ss:$2 sm:$0xff]  ;;  %751 = vst.msk [vmem:[#allocation2 + $0x2b9] sm:$0xff] %vm384_vm0, %v622_v40  ;;  %752 = vst.msk [vmem:[#allocation2 + $0x2c1] sm:$0xff] %vm384_vm0, %v623_v26  ;;  %v1660_v40 = vld [vmem:[#allocation2 + $0x1b9] ss:$2 sm:$0xff] }
 0x1a2   : > { %9434 = vmatprep.mubr.msk.f32.mxu0 %vm4258_vm1, %v4219_v53  ;;  %v3989_v5 = vsel %vm3985_vm8, %v3956_v44, %v11534_v60  ;;  %v1598_v26 = vld [vmem:[#allocation2 + $0x1c8] ss:$2 sm:$0xff] }
 0x1a3   : > { %v11718_v52 = vpop.permute.xlu1 %2267  ;;  %v11720_v59 = vpop.permute.xlu0 %2141  ;;  %v4022_v29 = vsel %vm4018_vm9, %v3989_v5, %v11557_v22  ;;  %v1408_v5 = vld [vmem:[#allocation2 + $0x1e1] ss:$2 sm:$0xff] }
 0x1a4   : > { %v4055_v53 = vsel %vm4051_vm10, %v4022_v29, %v11579_v41 }
 0x1a5   : > { %3671 = vrot.lane.b32.xlu1 %v1784_v62, %s16792_s28  ;;  %3545 = vrot.lane.b32.xlu0 %v1722_v33, %s16791_s23  ;;  %v4088_v60 = vsel %vm4084_vm11, %v4055_v53, %v11605_v11  ;;  %v1596_v62 = vld [vmem:[#allocation2 + $0x1b8] ss:$2 sm:$0xff]  ;;  %v1534_v33 = vld [vmem:[#allocation2 + $0x1a3] ss:$2 sm:$0xff] }
 0x1a6   : > { %v4121_v22 = vsel %vm4117_vm12, %v4088_v60, %v11635_v36  ;;  %v905_v36 = vld [vmem:[#allocation2 + $0x231] ss:$2 sm:$0xff] }
 0x1a7   : > { %v11734_v35 = vpop.permute.xlu1 %2775  ;;  %v11736_v16 = vpop.permute.xlu0 %2649  ;;  %v4154_v41 = vsel %vm4150_vm13, %v4121_v22, %v11657_v54  ;;  %v969_v22 = vld [vmem:[#allocation2 + $0x232] ss:$2 sm:$0xff] }
 0x1a8   : > { %v4187_v30 = vsel %vm4183_vm14, %v4154_v41, %v3538_v34  ;;  %v626_v34 = vld [vmem:[%s11149_s14 + $0x230] sm:$0xff]  ;;  %v907_v41 = vld [vmem:[#allocation2 + $0x241] ss:$2 sm:$0xff] }
 0x1a9   : > { %2275 = vrot.lane.b32.xlu1 %v1092_v17, %s16781_s22  ;;  %2149 = vrot.lane.b32.xlu0 %v1031_v27, %s16786_s16  ;;  %v1786_v17 = vld [vmem:[#allocation2 + $0x17b] ss:$2 sm:$0xff]  ;;  %755 = vst.msk [vmem:[#allocation2 + $0x2e1] sm:$0xff] %vm384_vm0, %v626_v34 }
 0x1aa   : > { %v627_v27 = vld [vmem:[%s11149_s14 + $0x238] sm:$0xff] }
 0x1ab   : > { %v11752_v21 = vpop.permute.xlu1 %3283  ;;  %v11754_v18 = vpop.permute.xlu0 %3157  ;;  %756 = vst.msk [vmem:[#allocation2 + $0x2e9] sm:$0xff] %vm384_vm0, %v627_v27  ;;  %v1410_v34 = vld [vmem:[#allocation2 + $0x1f1] ss:$2 sm:$0xff]  ;;  %v821_v27 = vld [vmem:[#allocation2 + $0xa0] ss:$2 sm:$0xff] }
 0x1ad   : > { %2783 = vrot.lane.b32.xlu1 %v1344_v63, %s16779_s25  ;;  %2657 = vrot.lane.b32.xlu0 %v1282_v46, %s16777_s30  ;;  %v1346_v63 = vld [vmem:[#allocation2 + $0x1f0] ss:$2 sm:$0xff] }
 0x1af   : > { %v11767_v14 = vpop.permute.xlu1 %1887  ;;  %v3666_v4 = vpop.permute.xlu0 %3665 }
 0x1b0   : > { %v4220_v11 = vsel %vm4216_vm15, %v4187_v30, %v3666_v4  ;;  %v1220_v30 = vld [vmem:[#allocation2 + $0x20a] ss:$2 sm:$0xff]  ;;  %v1158_v4 = vld [vmem:[#allocation2 + $0x219] ss:$2 sm:$0xff] }
 0x1b1   : > { %3291 = vrot.lane.b32.xlu1 %v1596_v62, %s16789_s26  ;;  %3165 = vrot.lane.b32.xlu0 %v1534_v33, %s16787_s0 }
 0x1b2   : > { %9435 = vmatmul.mubr.msk.f32.gmra.mrb[2].mxu0 %vm4258_vm1, %v4220_v11 }
 0x1b3   : > { %v11773_v54 = vpop.permute.xlu1 %2395  ;;  %v11775_v49 = vpop.permute.xlu0 %2269 }
 0x1b5   : > { %1895 = vrot.lane.b32.xlu1 %v905_v36, %s16788_s1  ;;  %3673 = vrot.lane.b32.xlu0 %v1786_v17, %s16792_s28  ;;  %v1472_v17 = vld [vmem:[#allocation2 + $0x1e2] ss:$2 sm:$0xff] }
 0x1b7   : > { %v11783_v24 = vpop.permute.xlu1 %2903  ;;  %v11785_v44 = vpop.permute.xlu0 %2777 }
 0x1b9   : > { %2403 = vrot.lane.b32.xlu1 %v1156_v50, %s16780_s29  ;;  %2277 = vrot.lane.b32.xlu0 %v1094_v8, %s16781_s22 }
 0x1bb   : > { %v11789_v29 = vpop.permute.xlu1 %3411  ;;  %v11791_v46 = vpop.permute.xlu0 %3285 }
 0x1bd   : > { %2911 = vrot.lane.b32.xlu1 %v1408_v5, %s16782_s12  ;;  %2785 = vrot.lane.b32.xlu0 %v1346_v63, %s16779_s25  ;;  %v3759_v5 = vsel %vm384_vm0, %v821_v27, %v11397_v47  ;;  %v1724_v63 = vld [vmem:[#allocation2 + $0x1ba] ss:$2 sm:$0xff] }
 0x1bf   : > { %v11795_v53 = vpop.permute.xlu1 %2015  ;;  %v11797_v60 = vpop.permute.xlu0 %1889 }
 0x1c1   : > { %3419 = vrot.lane.b32.xlu1 %v1660_v40, %s16790_s19  ;;  %3293 = vrot.lane.b32.xlu0 %v1598_v26, %s16789_s26  ;;  %v1662_v40 = vld [vmem:[#allocation2 + $0x1c9] ss:$2 sm:$0xff]  ;;  %v3792_v26 = vsel %vm3787_vm2, %v3759_v5, %v11419_v6 }
 0x1c2   : > { %v1033_v6 = vld [vmem:[#allocation2 + $0x233] ss:$2 sm:$0xff] }
 0x1c3   : > { %v11801_v62 = vpop.permute.xlu1 %2523  ;;  %v11803_v33 = vpop.permute.xlu0 %2397 }
 0x1c5   : > { %2023 = vrot.lane.b32.xlu1 %v969_v22, %s16783_s13  ;;  %1897 = vrot.lane.b32.xlu0 %v907_v41, %s16788_s1 }
 0x1c7   : > { %v11807_v11 = vpop.permute.xlu1 %3031  ;;  %v11809_v36 = vpop.permute.xlu0 %2905 }
 0x1c9   : > { %2531 = vrot.lane.b32.xlu1 %v1220_v30, %s16784_s15  ;;  %2405 = vrot.lane.b32.xlu0 %v1158_v4, %s16780_s29  ;;  %v3825_v30 = vsel %vm3820_vm3, %v3792_v26, %v11440_v32  ;;  %v1222_v26 = vld [vmem:[#allocation2 + $0x21a] ss:$2 sm:$0xff] }
 0x1ca   : > { %v3858_v4 = vsel %vm3853_vm4, %v3825_v30, %v11473_v56 }
 0x1cb   : > { %v3540_v50 = vpop.permute.xlu1 %3539  ;;  %v11813_v8 = vpop.permute.xlu0 %3413  ;;  %v3891_v47 = vsel %vm3886_vm5, %v3858_v4, %v11518_v51  ;;  %v628_v51 = vld [vmem:[%s11149_s14 + $0x240] sm:$0xff] }
 0x1cc   : > { %757 = vst.msk [vmem:[#allocation2 + $0x2f9] sm:$0xff] %vm384_vm0, %v628_v51  ;;  %v1726_v51 = vld [vmem:[#allocation2 + $0x1ca] ss:$2 sm:$0xff] }
 0x1cd   : > { %3039 = vrot.lane.b32.xlu1 %v1472_v17, %s16785_s24  ;;  %2913 = vrot.lane.b32.xlu0 %v1410_v34, %s16782_s12  ;;  %v971_v17 = vld [vmem:[#allocation2 + $0x242] ss:$2 sm:$0xff]  ;;  %v3924_v34 = vsel %vm3919_vm6, %v3891_v47, %v11559_v43  ;;  %v1284_v43 = vld [vmem:[#allocation2 + $0x20b] ss:$2 sm:$0xff] }
 0x1ce   : > { %v3957_v32 = vsel %vm3952_vm7, %v3924_v34, %v11581_v55 }
 0x1cf   : > { %v11821_v22 = vpop.permute.xlu1 %2143  ;;  %v11823_v41 = vpop.permute.xlu0 %2017  ;;  %v3990_v56 = vsel %vm3985_vm8, %v3957_v32, %v11607_v12 }
 0x1d1   : > { %3547 = vrot.lane.b32.xlu1 %v1724_v63, %s16791_s23  ;;  %3421 = vrot.lane.b32.xlu0 %v1662_v40, %s16790_s19  ;;  %v629_v63 = vld [vmem:[%s11149_s14 + $0x248] sm:$0xff]  ;;  %v4023_v40 = vsel %vm4018_vm9, %v3990_v56, %v11627_v13 }
 0x1d2   : > { %758 = vst.msk [vmem:[#allocation2 + $0x301] sm:$0xff] %vm384_vm0, %v629_v63  ;;  %v4056_v55 = vsel %vm4051_vm10, %v4023_v40, %v11651_v39  ;;  %v823_v39 = vld [vmem:[#allocation2 + $0xb0] ss:$2 sm:$0xff] }
 0x1d3   : > { %v11835_v27 = vpop.permute.xlu1 %2651  ;;  %v11837_v5 = vpop.permute.xlu0 %2525  ;;  %v4089_v4 = vsel %vm4084_vm11, %v4056_v55, %v11697_v2  ;;  %v1096_v55 = vld [vmem:[#allocation2 + $0x258] ss:$2 sm:$0xff] }
 0x1d4   : > { %v4122_v47 = vsel %vm4117_vm12, %v4089_v4, %v11752_v21  ;;  %v3760_v21 = vsel %vm384_vm0, %v823_v39, %v11407_v58  ;;  %v632_v58 = vld [vmem:[%s11149_s14 + $0x260] sm:$0xff]  ;;  %v631_v39 = vld [vmem:[%s11149_s14 + $0x258] sm:$0xff] }
 0x1d5   : > { %2151 = vrot.lane.b32.xlu1 %v1033_v6, %s16786_s16  ;;  %2025 = vrot.lane.b32.xlu0 %v971_v17, %s16783_s13  ;;  %v4155_v13 = vsel %vm4150_vm13, %v4122_v47, %v11789_v29  ;;  %v1536_v6 = vld [vmem:[#allocation2 + $0x1e3] ss:$2 sm:$0xff]  ;;  %v1474_v17 = vld [vmem:[#allocation2 + $0x1f2] ss:$2 sm:$0xff]  ;;  %761 = vst.msk [vmem:[#allocation2 + $0x321] sm:$0xff] %vm384_vm0, %v632_v58  ;;  %760 = vst.msk [vmem:[#allocation2 + $0x311] sm:$0xff] %vm384_vm0, %v631_v39 }
 0x1d6   : > { %v4188_v34 = vsel %vm4183_vm14, %v4155_v13, %v3540_v50  ;;  %v1788_v29 = vld [vmem:[#allocation2 + $0x1bb] ss:$2 sm:$0xff]  ;;  %v3793_v50 = vsel %vm3787_vm2, %v3760_v21, %v11429_v19  ;;  %v1790_v58 = vld [vmem:[#allocation2 + $0x1cb] ss:$2 sm:$0xff] }
 0x1d7   : > { %v11853_v30 = vpop.permute.xlu1 %3159  ;;  %v11855_v12 = vpop.permute.xlu0 %3033  ;;  %v1035_v4 = vld [vmem:[#allocation2 + $0x243] ss:$2 sm:$0xff] }
 0x1d8   : > { %v633_v47 = vld [vmem:[%s11149_s14 + $0x268] sm:$0xff] }
 0x1d9   : > { %2659 = vrot.lane.b32.xlu1 %v1284_v43, %s16777_s30  ;;  %2533 = vrot.lane.b32.xlu0 %v1222_v26, %s16784_s15  ;;  %v3826_v43 = vsel %vm3820_vm3, %v3793_v50, %v11459_v1  ;;  %762 = vst.msk [vmem:[#allocation2 + $0x329] sm:$0xff] %vm384_vm0, %v633_v47  ;;  %v1098_v47 = vld [vmem:[#allocation2 + $0x268] ss:$2 sm:$0xff] }
 0x1da   : > { %v3859_v26 = vsel %vm3853_vm4, %v3826_v43, %v11520_v10 }
 0x1db   : > { %v3668_v32 = vpop.permute.xlu1 %3667  ;;  %v3542_v56 = vpop.permute.xlu0 %3541  ;;  %v3892_v19 = vsel %vm3886_vm5, %v3859_v26, %v11551_v9 }
 0x1dc   : > { %v4221_v2 = vsel %vm4216_vm15, %v4188_v34, %v3668_v32  ;;  %v3925_v1 = vsel %vm3919_vm6, %v3892_v19, %v11573_v42  ;;  %v1348_v34 = vld [vmem:[#allocation2 + $0x230] ss:$2 sm:$0xff]  ;;  %v1286_v32 = vld [vmem:[#allocation2 + $0x21b] ss:$2 sm:$0xff] }
 0x1dd   : > { %3167 = vrot.lane.b32.xlu1 %v1536_v6, %s16787_s0  ;;  %3041 = vrot.lane.b32.xlu0 %v1474_v17, %s16785_s24  ;;  %v3958_v6 = vsel %vm3952_vm7, %v3925_v1, %v11594_v25  ;;  %v630_v17 = vld [vmem:[%s11149_s14 + $0x250] sm:$0xff] }
 0x1de   : > { %9437 = vmatprep.mubr.msk.f32.mxu0 %vm4258_vm1, %v4221_v2  ;;  %v3991_v9 = vsel %vm3985_vm8, %v3958_v6, %v11629_v23  ;;  %759 = vst.msk [vmem:[#allocation2 + $0x309] sm:$0xff] %vm384_vm0, %v630_v17  ;;  %v1350_v17 = vld [vmem:[#allocation2 + $0x240] ss:$2 sm:$0xff] }
 0x1df   : > { %v11874_v63 = vpop.permute.xlu1 %2271  ;;  %v11876_v40 = vpop.permute.xlu0 %2145  ;;  %v4024_v42 = vsel %vm4018_vm9, %v3991_v9, %v11653_v0  ;;  %v1412_v9 = vld [vmem:[#allocation2 + $0x231] ss:$2 sm:$0xff] }
 0x1e0   : > { %v4057_v25 = vsel %vm4051_vm10, %v4024_v42, %v11699_v37  ;;  %v1538_v37 = vld [vmem:[#allocation2 + $0x1f3] ss:$2 sm:$0xff] }
 0x1e1   : > { %3675 = vrot.lane.b32.xlu1 %v1788_v29, %s16792_s28  ;;  %3549 = vrot.lane.b32.xlu0 %v1726_v51, %s16791_s23  ;;  %v4090_v21 = vsel %vm4084_vm11, %v4057_v25, %v11754_v18  ;;  %v1600_v51 = vld [vmem:[#allocation2 + $0x208] ss:$2 sm:$0xff] }
 0x1e2   : > { %v4123_v29 = vsel %vm4117_vm12, %v4090_v21, %v11791_v46  ;;  %v909_v46 = vld [vmem:[#allocation2 + $0x281] ss:$2 sm:$0xff] }
 0x1e3   : > { %v11891_v13 = vpop.permute.xlu1 %2779  ;;  %v11893_v10 = vpop.permute.xlu0 %2653  ;;  %v4156_v0 = vsel %vm4150_vm13, %v4123_v29, %v11813_v8  ;;  %v973_v29 = vld [vmem:[#allocation2 + $0x282] ss:$2 sm:$0xff] }
 0x1e4   : > { %v4189_v50 = vsel %vm4183_vm14, %v4156_v0, %v3542_v56  ;;  %v634_v56 = vld [vmem:[%s11149_s14 + $0x270] sm:$0xff] }
 0x1e5   : > { %2279 = vrot.lane.b32.xlu1 %v1096_v55, %s16781_s22  ;;  %2153 = vrot.lane.b32.xlu0 %v1035_v4, %s16786_s16  ;;  %v635_v55 = vld [vmem:[%s11149_s14 + $0x278] sm:$0xff]  ;;  %763 = vst.msk [vmem:[#allocation2 + $0x331] sm:$0xff] %vm384_vm0, %v634_v56  ;;  %v1414_v56 = vld [vmem:[#allocation2 + $0x241] ss:$2 sm:$0xff] }
 0x1e6   : > { %v1160_v4 = vld [vmem:[#allocation2 + $0x259] ss:$2 sm:$0xff]  ;;  %764 = vst.msk [vmem:[#allocation2 + $0x339] sm:$0xff] %vm384_vm0, %v635_v55  ;;  %v825_v55 = vld [vmem:[#allocation2 + $0xf0] ss:$2 sm:$0xff] }
 0x1e7   : > { %v11910_v2 = vpop.permute.xlu1 %3287  ;;  %v11912_v23 = vpop.permute.xlu0 %3161  ;;  %v911_v0 = vld [vmem:[#allocation2 + $0x291] ss:$2 sm:$0xff] }
 0x1e9   : > { %2787 = vrot.lane.b32.xlu1 %v1348_v34, %s16779_s25  ;;  %2661 = vrot.lane.b32.xlu0 %v1286_v32, %s16777_s30  ;;  %v1664_v34 = vld [vmem:[#allocation2 + $0x209] ss:$2 sm:$0xff]  ;;  %v1602_v32 = vld [vmem:[#allocation2 + $0x218] ss:$2 sm:$0xff] }
 0x1eb   : > { %v11923_v43 = vpop.permute.xlu1 %1891  ;;  %v3670_v26 = vpop.permute.xlu0 %3669 }
 0x1ec   : > { %v4222_v18 = vsel %vm4216_vm15, %v4189_v50, %v3670_v26  ;;  %v1224_v50 = vld [vmem:[#allocation2 + $0x25a] ss:$2 sm:$0xff]  ;;  %v1162_v26 = vld [vmem:[#allocation2 + $0x269] ss:$2 sm:$0xff] }
 0x1ed   : > { %3295 = vrot.lane.b32.xlu1 %v1600_v51, %s16789_s26  ;;  %3169 = vrot.lane.b32.xlu0 %v1538_v37, %s16787_s0 }
 0x1ee   : > { %9438 = vmatmul.mubr.msk.f32.gmra.mrb[4].mxu0 %vm4258_vm1, %v4222_v18 }
 0x1ef   : > { %v11929_v8 = vpop.permute.xlu1 %2399  ;;  %v11931_v19 = vpop.permute.xlu0 %2273 }
 0x1f1   : > { %1899 = vrot.lane.b32.xlu1 %v909_v46, %s16788_s1  ;;  %3677 = vrot.lane.b32.xlu0 %v1790_v58, %s16792_s28  ;;  %v1476_v58 = vld [vmem:[#allocation2 + $0x232] ss:$2 sm:$0xff] }
 0x1f3   : > { %v11939_v1 = vpop.permute.xlu1 %2907  ;;  %v11941_v6 = vpop.permute.xlu0 %2781 }
 0x1f5   : > { %2407 = vrot.lane.b32.xlu1 %v1160_v4, %s16780_s29  ;;  %2281 = vrot.lane.b32.xlu0 %v1098_v47, %s16781_s22 }
 0x1f7   : > { %v11945_v39 = vpop.permute.xlu1 %3415  ;;  %v11947_v42 = vpop.permute.xlu0 %3289 }
 0x1f9   : > { %2915 = vrot.lane.b32.xlu1 %v1412_v9, %s16782_s12  ;;  %2789 = vrot.lane.b32.xlu0 %v1350_v17, %s16779_s25  ;;  %v3761_v9 = vsel %vm384_vm0, %v825_v55, %v11504_v38  ;;  %v1728_v17 = vld [vmem:[#allocation2 + $0x20a] ss:$2 sm:$0xff] }
 0x1fb   : > { %v11951_v25 = vpop.permute.xlu1 %2019  ;;  %v11953_v21 = vpop.permute.xlu0 %1893 }
 0x1fd   : > { %3423 = vrot.lane.b32.xlu1 %v1664_v34, %s16790_s19  ;;  %3297 = vrot.lane.b32.xlu0 %v1602_v32, %s16789_s26  ;;  %v1666_v34 = vld [vmem:[#allocation2 + $0x219] ss:$2 sm:$0xff]  ;;  %v3794_v32 = vsel %vm3787_vm2, %v3761_v9, %v11553_v48 }
 0x1fe   : > { %v1037_v48 = vld [vmem:[#allocation2 + $0x283] ss:$2 sm:$0xff] }
 0x1ff   : > { %v11957_v51 = vpop.permute.xlu1 %2527  ;;  %v11959_v37 = vpop.permute.xlu0 %2401 }
 0x201   : > { %2027 = vrot.lane.b32.xlu1 %v973_v29, %s16783_s13  ;;  %1901 = vrot.lane.b32.xlu0 %v911_v0, %s16788_s1 }
 0x203   : > { %v11963_v18 = vpop.permute.xlu1 %3035  ;;  %v11965_v46 = vpop.permute.xlu0 %2909 }
 0x205   : > { %2535 = vrot.lane.b32.xlu1 %v1224_v50, %s16784_s15  ;;  %2409 = vrot.lane.b32.xlu0 %v1162_v26, %s16780_s29  ;;  %v3827_v50 = vsel %vm3820_vm3, %v3794_v32, %v11575_v45  ;;  %v1226_v32 = vld [vmem:[#allocation2 + $0x26a] ss:$2 sm:$0xff] }
 0x206   : > { %v3860_v26 = vsel %vm3853_vm4, %v3827_v50, %v11596_v3 }
 0x207   : > { %v3544_v4 = vpop.permute.xlu1 %3543  ;;  %v11969_v47 = vpop.permute.xlu0 %3417  ;;  %v3893_v38 = vsel %vm3886_vm5, %v3860_v26, %v11617_v7  ;;  %v636_v7 = vld [vmem:[%s11149_s14 + $0x280] sm:$0xff] }
 0x208   : > { %765 = vst.msk [vmem:[#allocation2 + $0x349] sm:$0xff] %vm384_vm0, %v636_v7  ;;  %v1730_v7 = vld [vmem:[#allocation2 + $0x21a] ss:$2 sm:$0xff] }
 0x209   : > { %3043 = vrot.lane.b32.xlu1 %v1476_v58, %s16785_s24  ;;  %2917 = vrot.lane.b32.xlu0 %v1414_v56, %s16782_s12  ;;  %v975_v58 = vld [vmem:[#allocation2 + $0x292] ss:$2 sm:$0xff]  ;;  %v3926_v56 = vsel %vm3919_vm6, %v3893_v38, %v11645_v15  ;;  %v1288_v15 = vld [vmem:[#allocation2 + $0x25b] ss:$2 sm:$0xff] }
 0x20a   : > { %v3959_v45 = vsel %vm3952_vm7, %v3926_v56, %v11679_v61 }
 0x20b   : > { %v11977_v29 = vpop.permute.xlu1 %2147  ;;  %v11979_v0 = vpop.permute.xlu0 %2021  ;;  %v3992_v3 = vsel %vm3985_vm8, %v3959_v45, %v11734_v35 }
 0x20d   : > { %3551 = vrot.lane.b32.xlu1 %v1728_v17, %s16791_s23  ;;  %3425 = vrot.lane.b32.xlu0 %v1666_v34, %s16790_s19  ;;  %v637_v17 = vld [vmem:[%s11149_s14 + $0x288] sm:$0xff]  ;;  %v4025_v34 = vsel %vm4018_vm9, %v3992_v3, %v11783_v24 }
 0x20e   : > { %766 = vst.msk [vmem:[#allocation2 + $0x351] sm:$0xff] %vm384_vm0, %v637_v17  ;;  %v4058_v61 = vsel %vm4051_vm10, %v4025_v34, %v11807_v11  ;;  %v827_v11 = vld [vmem:[#allocation2 + $0x100] ss:$2 sm:$0xff] }
 0x20f   : > { %v11991_v55 = vpop.permute.xlu1 %2655  ;;  %v11993_v9 = vpop.permute.xlu0 %2529  ;;  %v4091_v26 = vsel %vm4084_vm11, %v4058_v61, %v11853_v30  ;;  %v16801_v61 = vld [vmem:[#allocation14_spill] sm:$0xff] }
 0x210   : > { %v4124_v38 = vsel %vm4117_vm12, %v4091_v26, %v11910_v2  ;;  %v3762_v2 = vsel %vm384_vm0, %v827_v11, %v11545_v28  ;;  %v640_v28 = vld [vmem:[%s11149_s14 + $0x2a0] sm:$0xff] }
 0x211   : > { %2155 = vrot.lane.b32.xlu1 %v1037_v48, %s16786_s16  ;;  %2029 = vrot.lane.b32.xlu0 %v975_v58, %s16783_s13  ;;  %v4157_v24 = vsel %vm4150_vm13, %v4124_v38, %v11945_v39  ;;  %v1540_v48 = vld [vmem:[#allocation2 + $0x233] ss:$2 sm:$0xff]  ;;  %v1478_v58 = vld [vmem:[#allocation2 + $0x242] ss:$2 sm:$0xff]  ;;  %769 = vst.msk [vmem:[#allocation2 + $0x371] sm:$0xff] %vm384_vm0, %v640_v28 }
 0x212   : > { %v4190_v56 = vsel %vm4183_vm14, %v4157_v24, %v3544_v4  ;;  %v1792_v39 = vld [vmem:[#allocation2 + $0x20b] ss:$2 sm:$0xff]  ;;  %v3795_v4 = vsel %vm3787_vm2, %v3762_v2, %v11563_v57  ;;  %v1100_v24 = vld [vmem:[#allocation2 + $0x2a8] ss:$2 sm:$0xff] }
 0x213   : > { %v12009_v50 = vpop.permute.xlu1 %3163  ;;  %v12011_v35 = vpop.permute.xlu0 %3037  ;;  %v16802_v38 = vld [vmem:[#allocation17_spill] sm:$0xff] }
 0x215   : > { %2663 = vrot.lane.b32.xlu1 %v1288_v15, %s16777_s30  ;;  %2537 = vrot.lane.b32.xlu0 %v1226_v32, %s16784_s15  ;;  %v16800_v15 = vld [vmem:[#allocation12_spill] sm:$0xff] }
 0x216   : > { %v3828_v32 = vsel %vm3820_vm3, %v3795_v4, %v16800_v15  ;;  %v1352_v4 = vld [vmem:[#allocation2 + $0x280] ss:$2 sm:$0xff]  ;;  %v1290_v15 = vld [vmem:[#allocation2 + $0x26b] ss:$2 sm:$0xff] }
 0x217   : > { %v3672_v45 = vpop.permute.xlu1 %3671  ;;  %v3546_v3 = vpop.permute.xlu0 %3545  ;;  %v3861_v26 = vsel %vm3853_vm4, %v3828_v32, %v16801_v61 }
 0x218   : > { %v4223_v30 = vsel %vm4216_vm15, %v4190_v56, %v3672_v45  ;;  %v3894_v57 = vsel %vm3886_vm5, %v3861_v26, %v16802_v38  ;;  %v1604_v38 = vld [vmem:[#allocation2 + $0x258] ss:$2 sm:$0xff] }
 0x219   : > { %3171 = vrot.lane.b32.xlu1 %v1540_v48, %s16787_s0  ;;  %3045 = vrot.lane.b32.xlu0 %v1478_v58, %s16785_s24  ;;  %v1039_v48 = vld [vmem:[#allocation2 + $0x293] ss:$2 sm:$0xff]  ;;  %v641_v58 = vld [vmem:[%s11149_s14 + $0x2a8] sm:$0xff]  ;;  %v3927_v11 = vsel %vm3919_vm6, %v3894_v57, %v11681_v31 }
 0x21a   : > { %9440 = vmatprep.mubr.msk.f32.mxu0 %vm4258_vm1, %v4223_v30  ;;  %770 = vst.msk [vmem:[#allocation2 + $0x379] sm:$0xff] %vm384_vm0, %v641_v58  ;;  %v3960_v30 = vsel %vm3952_vm7, %v3927_v11, %v11736_v16  ;;  %v1542_v57 = vld [vmem:[#allocation2 + $0x243] ss:$2 sm:$0xff] }
 0x21b   : > { %v12030_v17 = vpop.permute.xlu1 %2275  ;;  %v12032_v34 = vpop.permute.xlu0 %2149  ;;  %v3993_v2 = vsel %vm3985_vm8, %v3960_v30, %v11785_v44  ;;  %v1794_v58 = vld [vmem:[#allocation2 + $0x21b] ss:$2 sm:$0xff] }
 0x21c   : > { %v4026_v31 = vsel %vm4018_vm9, %v3993_v2, %v11809_v36  ;;  %v643_v2 = vld [vmem:[%s11149_s14 + $0x2b8] sm:$0xff] }
 0x21d   : > { %3679 = vrot.lane.b32.xlu1 %v1792_v39, %s16792_s28  ;;  %3553 = vrot.lane.b32.xlu0 %v1730_v7, %s16791_s23  ;;  %v638_v39 = vld [vmem:[%s11149_s14 + $0x290] sm:$0xff]  ;;  %v639_v7 = vld [vmem:[%s11149_s14 + $0x298] sm:$0xff]  ;;  %v4059_v16 = vsel %vm4051_vm10, %v4026_v31, %v11855_v12  ;;  %772 = vst.msk [vmem:[#allocation2 + $0x389] sm:$0xff] %vm384_vm0, %v643_v2 }
 0x21e   : > { %767 = vst.msk [vmem:[#allocation2 + $0x359] sm:$0xff] %vm384_vm0, %v638_v39  ;;  %768 = vst.msk [vmem:[#allocation2 + $0x361] sm:$0xff] %vm384_vm0, %v639_v7  ;;  %v4092_v61 = vsel %vm4084_vm11, %v4059_v16, %v11912_v23  ;;  %v1164_v39 = vld [vmem:[#allocation2 + $0x2a9] ss:$2 sm:$0xff]  ;;  %v1102_v7 = vld [vmem:[#allocation2 + $0x2b8] ss:$2 sm:$0xff] }
 0x21f   : > { %v12047_v56 = vpop.permute.xlu1 %2783  ;;  %v12049_v45 = vpop.permute.xlu0 %2657  ;;  %v4125_v26 = vsel %vm4117_vm12, %v4092_v61, %v11947_v42  ;;  %v1354_v16 = vld [vmem:[#allocation2 + $0x290] ss:$2 sm:$0xff]  ;;  %v1166_v2 = vld [vmem:[#allocation2 + $0x2b9] ss:$2 sm:$0xff] }
 0x220   : > { %v4158_v28 = vsel %vm4150_vm13, %v4125_v26, %v11969_v47  ;;  %v913_v47 = vld [vmem:[#allocation2 + $0x2d1] ss:$2 sm:$0xff] }
 0x221   : > { %2283 = vrot.lane.b32.xlu1 %v1100_v24, %s16781_s22  ;;  %2157 = vrot.lane.b32.xlu0 %v1039_v48, %s16786_s16  ;;  %v4191_v23 = vsel %vm4183_vm14, %v4158_v28, %v3546_v3  ;;  %v642_v3 = vld [vmem:[%s11149_s14 + $0x2b0] sm:$0xff]  ;;  %v1668_v28 = vld [vmem:[#allocation2 + $0x259] ss:$2 sm:$0xff] }
 0x222   : > { %771 = vst.msk [vmem:[#allocation2 + $0x381] sm:$0xff] %vm384_vm0, %v642_v3  ;;  %v1228_v3 = vld [vmem:[#allocation2 + $0x2aa] ss:$2 sm:$0xff] }
 0x223   : > { %v12066_v32 = vpop.permute.xlu1 %3291  ;;  %v12068_v44 = vpop.permute.xlu0 %3165 }
 0x225   : > { %v12074_v36 = vpop.f32.mrb[0].mxu0  ;;  %2791 = vrot.lane.b32.xlu1 %v1352_v4, %s16779_s25  ;;  %2665 = vrot.lane.b32.xlu0 %v1290_v15, %s16777_s30  ;;  %v1416_v15 = vld [vmem:[#allocation2 + $0x281] ss:$2 sm:$0xff] }
 0x226   : > { %16803 = vst [vmem:[#allocation12_spill] sm:$0xff] %v12074_v36  ;;  %v12080_v12 = vpop.f32.mrb[1].mxu0  ;;  %v1732_v36 = vld [vmem:[#allocation2 + $0x25a] ss:$2 sm:$0xff] }
 0x227   : > { %16804 = vst [vmem:[#allocation14_spill] sm:$0xff] %v12080_v12  ;;  %v12083_v24 = vpop.permute.xlu1 %1895  ;;  %v3674_v42 = vpop.permute.xlu0 %3673 }
 0x228   : > { %16805 = vst [vmem:[#allocation17_spill] sm:$0xff] %v12083_v24  ;;  %v4224_v48 = vsel %vm4216_vm15, %v4191_v23, %v3674_v42  ;;  %v977_v42 = vld [vmem:[#allocation2 + $0x2d2] ss:$2 sm:$0xff] }
 0x229   : > { %3299 = vrot.lane.b32.xlu1 %v1604_v38, %s16789_s26  ;;  %3173 = vrot.lane.b32.xlu0 %v1542_v57, %s16787_s0  ;;  %v1606_v38 = vld [vmem:[#allocation2 + $0x268] ss:$2 sm:$0xff] }
 0x22a   : > { %9441 = vmatmul.mubr.msk.f32.gmra.mrb[6].mxu0 %vm4258_vm1, %v4224_v48  ;;  %v915_v48 = vld [vmem:[#allocation2 + $0x2e1] ss:$2 sm:$0xff] }
 0x22b   : > { %v12089_v11 = vpop.permute.xlu1 %2403  ;;  %v12091_v30 = vpop.permute.xlu0 %2277 }
 0x22d   : > { %1903 = vrot.lane.b32.xlu1 %v913_v47, %s16788_s1  ;;  %3681 = vrot.lane.b32.xlu0 %v1794_v58, %s16792_s28 }
 0x22f   : > { %v12099_v31 = vpop.permute.xlu1 %2911  ;;  %v12101_v4 = vpop.permute.xlu0 %2785 }
 0x231   : > { %2411 = vrot.lane.b32.xlu1 %v1164_v39, %s16780_s29  ;;  %2285 = vrot.lane.b32.xlu0 %v1102_v7, %s16781_s22 }
 0x233   : > { %v12105_v61 = vpop.permute.xlu1 %3419  ;;  %v12107_v26 = vpop.permute.xlu0 %3293 }
 0x235   : > { %2919 = vrot.lane.b32.xlu1 %v1416_v15, %s16782_s12  ;;  %2793 = vrot.lane.b32.xlu0 %v1354_v16, %s16779_s25  ;;  %v1480_v15 = vld [vmem:[#allocation2 + $0x282] ss:$2 sm:$0xff]  ;;  %v1418_v16 = vld [vmem:[#allocation2 + $0x291] ss:$2 sm:$0xff] }
 0x237   : > { %v12111_v57 = vpop.permute.xlu1 %2023  ;;  %v12113_v23 = vpop.permute.xlu0 %1897 }
 0x238   : > { %16806 = vst [vmem:[#allocation19_spill] sm:$0xff] %v12111_v57  ;;  %16807 = vst [vmem:[#allocation20_spill] sm:$0xff] %v12113_v23  ;;  %v1670_v23 = vld [vmem:[#allocation2 + $0x269] ss:$2 sm:$0xff]  ;;  %v16810_v57 = vld [vmem:[#allocation15_spill] sm:$0xff] }
 0x239   : > { %3427 = vrot.lane.b32.xlu1 %v1668_v28, %s16790_s19  ;;  %3301 = vrot.lane.b32.xlu0 %v1606_v38, %s16789_s26  ;;  %v829_v28 = vld [vmem:[#allocation2 + $0x140] ss:$2 sm:$0xff] }
 0x23b   : > { %v12117_v47 = vpop.permute.xlu1 %2531  ;;  %v12119_v58 = vpop.permute.xlu0 %2405 }
 0x23c   : > { %16808 = vst [vmem:[#allocation21_spill] sm:$0xff] %v12119_v58 }
 0x23d   : > { %2031 = vrot.lane.b32.xlu1 %v977_v42, %s16783_s13  ;;  %1905 = vrot.lane.b32.xlu0 %v915_v48, %s16788_s1  ;;  %v16809_v42 = vld [vmem:[#allocation13_spill] sm:$0xff] }
 0x23e   : > { %v3763_v48 = vsel %vm384_vm0, %v829_v28, %v16809_v42  ;;  %v979_v28 = vld [vmem:[#allocation2 + $0x2e2] ss:$2 sm:$0xff] }
 0x23f   : > { %v12123_v39 = vpop.permute.xlu1 %3039  ;;  %v12125_v7 = vpop.permute.xlu0 %2913 }
 0x241   : > { %2539 = vrot.lane.b32.xlu1 %v1228_v3, %s16784_s15  ;;  %2413 = vrot.lane.b32.xlu0 %v1166_v2, %s16780_s29  ;;  %v3796_v3 = vsel %vm3787_vm2, %v3763_v48, %v16810_v57  ;;  %v1041_v57 = vld [vmem:[#allocation2 + $0x2d3] ss:$2 sm:$0xff] }
 0x242   : > { %v3829_v58 = vsel %vm3820_vm3, %v3796_v3, %v11665_v20 }
 0x243   : > { %v3548_v38 = vpop.permute.xlu1 %3547  ;;  %v12129_v12 = vpop.permute.xlu0 %3421 }
 0x245   : > { %3047 = vrot.lane.b32.xlu1 %v1480_v15, %s16785_s24  ;;  %2921 = vrot.lane.b32.xlu0 %v1418_v16, %s16782_s12  ;;  %v3862_v15 = vsel %vm3853_vm4, %v3829_v58, %v11718_v52  ;;  %v1230_v58 = vld [vmem:[#allocation2 + $0x2ba] ss:$2 sm:$0xff] }
 0x246   : > { %v3895_v16 = vsel %vm3886_vm5, %v3862_v15, %v11773_v54  ;;  %v644_v54 = vld [vmem:[%s11149_s14 + $0x2c0] sm:$0xff] }
 0x247   : > { %v12137_v24 = vpop.permute.xlu1 %2151  ;;  %v12139_v2 = vpop.permute.xlu0 %2025  ;;  %v3928_v42 = vsel %vm3919_vm6, %v3895_v16, %v11801_v62  ;;  %v1292_v62 = vld [vmem:[#allocation2 + $0x2ab] ss:$2 sm:$0xff]  ;;  %773 = vst.msk [vmem:[#allocation2 + $0x399] sm:$0xff] %vm384_vm0, %v644_v54 }
 0x248   : > { %16811 = vst [vmem:[#allocation13_spill] sm:$0xff] %v12139_v2  ;;  %v3961_v20 = vsel %vm3952_vm7, %v3928_v42, %v11835_v27 }
 0x249   : > { %3555 = vrot.lane.b32.xlu1 %v1732_v36, %s16791_s23  ;;  %3429 = vrot.lane.b32.xlu0 %v1670_v23, %s16790_s19  ;;  %v3994_v52 = vsel %vm3985_vm8, %v3961_v20, %v11891_v13  ;;  %v645_v36 = vld [vmem:[%s11149_s14 + $0x2c8] sm:$0xff] }
 0x24a   : > { %v4027_v23 = vsel %vm4018_vm9, %v3994_v52, %v11939_v1  ;;  %774 = vst.msk [vmem:[#allocation2 + $0x3a1] sm:$0xff] %vm384_vm0, %v645_v36  ;;  %v1734_v36 = vld [vmem:[#allocation2 + $0x26a] ss:$2 sm:$0xff] }
 0x24b   : > { %v12151_v48 = vpop.permute.xlu1 %2659  ;;  %v12153_v2 = vpop.permute.xlu0 %2533  ;;  %v4060_v27 = vsel %vm4051_vm10, %v4027_v23, %v11963_v18  ;;  %v831_v18 = vld [vmem:[#allocation2 + $0x150] ss:$2 sm:$0xff] }
 0x24c   : > { %v4093_v15 = vsel %vm4084_vm11, %v4060_v27, %v12009_v50  ;;  %v16813_v23 = vld [vmem:[#allocation18_spill] sm:$0xff] }
 0x24d   : > { %2159 = vrot.lane.b32.xlu1 %v1041_v57, %s16786_s16  ;;  %2033 = vrot.lane.b32.xlu0 %v979_v28, %s16783_s13  ;;  %v4126_v16 = vsel %vm4117_vm12, %v4093_v15, %v12066_v32  ;;  %v1544_v57 = vld [vmem:[#allocation2 + $0x283] ss:$2 sm:$0xff]  ;;  %v1482_v28 = vld [vmem:[#allocation2 + $0x292] ss:$2 sm:$0xff] }
 0x24e   : > { %v4159_v1 = vsel %vm4150_vm13, %v4126_v16, %v12105_v61  ;;  %v16812_v32 = vld [vmem:[#allocation16_spill] sm:$0xff] }
 0x24f   : > { %v12169_v3 = vpop.permute.xlu1 %3167  ;;  %v12171_v13 = vpop.permute.xlu0 %3041  ;;  %v4192_v42 = vsel %vm4183_vm14, %v4159_v1, %v3548_v38  ;;  %v3764_v54 = vsel %vm384_vm0, %v831_v18, %v16812_v32  ;;  %v1796_v61 = vld [vmem:[#allocation2 + $0x25b] ss:$2 sm:$0xff] }
 0x250   : > { %v3797_v38 = vsel %vm3787_vm2, %v3764_v54, %v16813_v23  ;;  %v648_v16 = vld [vmem:[%s11149_s14 + $0x2e0] sm:$0xff]  ;;  %v649_v18 = vld [vmem:[%s11149_s14 + $0x2e8] sm:$0xff]  ;;  %v647_v32 = vld [vmem:[%s11149_s14 + $0x2d8] sm:$0xff] }
 0x251   : > { %2667 = vrot.lane.b32.xlu1 %v1292_v62, %s16777_s30  ;;  %2541 = vrot.lane.b32.xlu0 %v1230_v58, %s16784_s15  ;;  %v3830_v27 = vsel %vm3820_vm3, %v3797_v38, %v11720_v59  ;;  %777 = vst.msk [vmem:[#allocation2 + $0x3c1] sm:$0xff] %vm384_vm0, %v648_v16  ;;  %778 = vst.msk [vmem:[#allocation2 + $0x3c9] sm:$0xff] %vm384_vm0, %v649_v18  ;;  %v1356_v54 = vld [vmem:[#allocation2 + $0x2d0] ss:$2 sm:$0xff] }
 0x252   : > { %v3863_v15 = vsel %vm3853_vm4, %v3830_v27, %v11775_v49  ;;  %776 = vst.msk [vmem:[#allocation2 + $0x3b1] sm:$0xff] %vm384_vm0, %v647_v32  ;;  %v1608_v27 = vld [vmem:[#allocation2 + $0x2a8] ss:$2 sm:$0xff]  ;;  %v651_v18 = vld [vmem:[%s11149_s14 + $0x2f8] sm:$0xff] }
 0x253   : > { %v3676_v20 = vpop.permute.xlu1 %3675  ;;  %v3550_v52 = vpop.permute.xlu0 %3549  ;;  %v3896_v1 = vsel %vm3886_vm5, %v3863_v15, %v11803_v33  ;;  %780 = vst.msk [vmem:[#allocation2 + $0x3d9] sm:$0xff] %vm384_vm0, %v651_v18  ;;  %v1420_v32 = vld [vmem:[#allocation2 + $0x2d1] ss:$2 sm:$0xff]  ;;  %v1484_v18 = vld [vmem:[#allocation2 + $0x2d2] ss:$2 sm:$0xff] }
 0x254   : > { %v4225_v50 = vsel %vm4216_vm15, %v4192_v42, %v3676_v20  ;;  %v3929_v59 = vsel %vm3919_vm6, %v3896_v1, %v11837_v5 }
 0x255   : > { %3175 = vrot.lane.b32.xlu1 %v1544_v57, %s16787_s0  ;;  %3049 = vrot.lane.b32.xlu0 %v1482_v28, %s16785_s24  ;;  %v1104_v57 = vld [vmem:[#allocation2 + $0x2f8] ss:$2 sm:$0xff]  ;;  %v1043_v28 = vld [vmem:[#allocation2 + $0x2e3] ss:$2 sm:$0xff]  ;;  %v3962_v20 = vsel %vm3952_vm7, %v3929_v59, %v11893_v10 }
 0x256   : > { %9443 = vmatprep.mubr.msk.f32.mxu0 %vm4258_vm1, %v4225_v50  ;;  %v3995_v33 = vsel %vm3985_vm8, %v3962_v20, %v11941_v6  ;;  %v646_v50 = vld [vmem:[%s11149_s14 + $0x2d0] sm:$0xff]  ;;  %v1168_v59 = vld [vmem:[#allocation2 + $0x2f9] ss:$2 sm:$0xff] }
 0x257   : > { %v12190_v62 = vpop.permute.xlu1 %2279  ;;  %v12192_v58 = vpop.permute.xlu0 %2153  ;;  %v4028_v5 = vsel %vm4018_vm9, %v3995_v33, %v11965_v46  ;;  %775 = vst.msk [vmem:[#allocation2 + $0x3a9] sm:$0xff] %vm384_vm0, %v646_v50  ;;  %v1106_v20 = vld [vmem:[#allocation2 + $0x308] ss:$2 sm:$0xff] }
 0x258   : > { %v4061_v10 = vsel %vm4051_vm10, %v4028_v5, %v12011_v35  ;;  %v1546_v35 = vld [vmem:[#allocation2 + $0x293] ss:$2 sm:$0xff]  ;;  %v1358_v5 = vld [vmem:[#allocation2 + $0x2e0] ss:$2 sm:$0xff] }
 0x259   : > { %3683 = vrot.lane.b32.xlu1 %v1796_v61, %s16792_s28  ;;  %3557 = vrot.lane.b32.xlu0 %v1734_v36, %s16791_s23  ;;  %v1294_v61 = vld [vmem:[#allocation2 + $0x2bb] ss:$2 sm:$0xff]  ;;  %v4094_v23 = vsel %vm4084_vm11, %v4061_v10, %v12068_v44 }
 0x25a   : > { %v4127_v38 = vsel %vm4117_vm12, %v4094_v23, %v12107_v26  ;;  %v917_v26 = vld [vmem:[#allocation2 + $0x321] ss:$2 sm:$0xff]  ;;  %v1610_v23 = vld [vmem:[#allocation2 + $0x2b8] ss:$2 sm:$0xff] }
 0x25b   : > { %v12207_v42 = vpop.permute.xlu1 %2787  ;;  %v12209_v49 = vpop.permute.xlu0 %2661  ;;  %v4160_v46 = vsel %vm4150_vm13, %v4127_v38, %v12129_v12  ;;  %v1672_v10 = vld [vmem:[#allocation2 + $0x2a9] ss:$2 sm:$0xff] }
 0x25c   : > { %v4193_v15 = vsel %vm4183_vm14, %v4160_v46, %v3550_v52  ;;  %v650_v52 = vld [vmem:[%s11149_s14 + $0x2f0] sm:$0xff] }
 0x25d   : > { %2287 = vrot.lane.b32.xlu1 %v1104_v57, %s16781_s22  ;;  %2161 = vrot.lane.b32.xlu0 %v1043_v28, %s16786_s16  ;;  %v1798_v57 = vld [vmem:[#allocation2 + $0x26b] ss:$2 sm:$0xff]  ;;  %779 = vst.msk [vmem:[#allocation2 + $0x3d1] sm:$0xff] %vm384_vm0, %v650_v52 }
 0x25f   : > { %v12226_v36 = vpop.permute.xlu1 %3295  ;;  %v12228_v6 = vpop.permute.xlu0 %3169 }
 0x261   : > { %2795 = vrot.lane.b32.xlu1 %v1356_v54, %s16779_s25  ;;  %2669 = vrot.lane.b32.xlu0 %v1294_v61, %s16777_s30 }
 0x263   : > { %v12239_v16 = vpop.permute.xlu1 %1899  ;;  %v3678_v1 = vpop.permute.xlu0 %3677 }
 0x264   : > { %v4226_v44 = vsel %vm4216_vm15, %v4193_v15, %v3678_v1 }
 0x265   : > { %3303 = vrot.lane.b32.xlu1 %v1608_v27, %s16789_s26  ;;  %3177 = vrot.lane.b32.xlu0 %v1546_v35, %s16787_s0  ;;  %v981_v27 = vld [vmem:[#allocation2 + $0x322] ss:$2 sm:$0xff]  ;;  %v919_v35 = vld [vmem:[#allocation2 + $0x331] ss:$2 sm:$0xff] }
 0x266   : > { %9444 = vmatmul.mubr.msk.f32.gmra.mrb[8].mxu0 %vm4258_vm1, %v4226_v44  ;;  %v1232_v44 = vld [vmem:[#allocation2 + $0x2fa] ss:$2 sm:$0xff] }
 0x267   : > { %v12245_v12 = vpop.permute.xlu1 %2407  ;;  %v12247_v28 = vpop.permute.xlu0 %2281 }
 0x269   : > { %1907 = vrot.lane.b32.xlu1 %v917_v26, %s16788_s1  ;;  %3685 = vrot.lane.b32.xlu0 %v1798_v57, %s16792_s28  ;;  %v1170_v26 = vld [vmem:[#allocation2 + $0x309] ss:$2 sm:$0xff] }
 0x26b   : > { %v12255_v33 = vpop.permute.xlu1 %2915  ;;  %v12257_v50 = vpop.permute.xlu0 %2789 }
 0x26d   : > { %2415 = vrot.lane.b32.xlu1 %v1168_v59, %s16780_s29  ;;  %2289 = vrot.lane.b32.xlu0 %v1106_v20, %s16781_s22  ;;  %v1422_v59 = vld [vmem:[#allocation2 + $0x2e1] ss:$2 sm:$0xff]  ;;  %v833_v20 = vld [vmem:[#allocation2 + $0x190] ss:$2 sm:$0xff] }
 0x26f   : > { %v12261_v54 = vpop.permute.xlu1 %3423  ;;  %v12263_v61 = vpop.permute.xlu0 %3297 }
 0x271   : > { %2923 = vrot.lane.b32.xlu1 %v1420_v32, %s16782_s12  ;;  %2797 = vrot.lane.b32.xlu0 %v1358_v5, %s16779_s25 }
 0x273   : > { %v12267_v38 = vpop.permute.xlu1 %2027  ;;  %v12269_v46 = vpop.permute.xlu0 %1901 }
 0x274   : > { %16814 = vst [vmem:[#allocation15_spill] sm:$0xff] %v12269_v46 }
 0x275   : > { %3431 = vrot.lane.b32.xlu1 %v1672_v10, %s16790_s19  ;;  %3305 = vrot.lane.b32.xlu0 %v1610_v23, %s16789_s26  ;;  %v3765_v10 = vsel %vm384_vm0, %v833_v20, %v11767_v14  ;;  %v1736_v23 = vld [vmem:[#allocation2 + $0x2aa] ss:$2 sm:$0xff]  ;;  %v1045_v20 = vld [vmem:[#allocation2 + $0x323] ss:$2 sm:$0xff] }
 0x277   : > { %v12273_v15 = vpop.permute.xlu1 %2535  ;;  %v12275_v1 = vpop.permute.xlu0 %2409 }
 0x279   : > { %2035 = vrot.lane.b32.xlu1 %v981_v27, %s16783_s13  ;;  %1909 = vrot.lane.b32.xlu0 %v919_v35, %s16788_s1  ;;  %v1674_v27 = vld [vmem:[#allocation2 + $0x2b9] ss:$2 sm:$0xff]  ;;  %v3798_v35 = vsel %vm3787_vm2, %v3765_v10, %v11795_v53  ;;  %v983_v10 = vld [vmem:[#allocation2 + $0x332] ss:$2 sm:$0xff] }
 0x27a   : > { %v3831_v46 = vsel %vm3820_vm3, %v3798_v35, %v11821_v22 }
 0x27b   : > { %v12279_v57 = vpop.permute.xlu1 %3043  ;;  %v12281_v52 = vpop.permute.xlu0 %2917 }
 0x27d   : > { %2543 = vrot.lane.b32.xlu1 %v1232_v44, %s16784_s15  ;;  %2417 = vrot.lane.b32.xlu0 %v1170_v26, %s16780_s29 }
 0x27f   : > { %v3552_v32 = vpop.permute.xlu1 %3551  ;;  %v12285_v5 = vpop.permute.xlu0 %3425 }
 0x281   : > { %3051 = vrot.lane.b32.xlu1 %v1484_v18, %s16785_s24  ;;  %2925 = vrot.lane.b32.xlu0 %v1422_v59, %s16782_s12  ;;  %v3864_v18 = vsel %vm3853_vm4, %v3831_v46, %v11874_v63 }
 0x282   : > { %v3897_v14 = vsel %vm3886_vm5, %v3864_v18, %v11929_v8  ;;  %v652_v8 = vld [vmem:[%s11149_s14 + $0x300] sm:$0xff] }
 0x283   : > { %v12293_v44 = vpop.permute.xlu1 %2155  ;;  %v12295_v26 = vpop.permute.xlu0 %2029  ;;  %v3930_v22 = vsel %vm3919_vm6, %v3897_v14, %v11957_v51  ;;  %v1296_v51 = vld [vmem:[#allocation2 + $0x2fb] ss:$2 sm:$0xff]  ;;  %v1234_v14 = vld [vmem:[#allocation2 + $0x30a] ss:$2 sm:$0xff]  ;;  %781 = vst.msk [vmem:[#allocation2 + $0x3e9] sm:$0xff] %vm384_vm0, %v652_v8 }
 0x284   : > { %v3963_v46 = vsel %vm3952_vm7, %v3930_v22, %v11991_v55 }
 0x285   : > { %v12301_v59 = vpop.f32.mrb[2].mxu0  ;;  %3559 = vrot.lane.b32.xlu1 %v1736_v23, %s16791_s23  ;;  %3433 = vrot.lane.b32.xlu0 %v1674_v27, %s16790_s19  ;;  %v3996_v23 = vsel %vm3985_vm8, %v3963_v46, %v12047_v56  ;;  %v653_v27 = vld [vmem:[%s11149_s14 + $0x308] sm:$0xff]  ;;  %v1548_v46 = vld [vmem:[#allocation2 + $0x2d3] ss:$2 sm:$0xff] }
 0x286   : > { %16815 = vst [vmem:[#allocation16_spill] sm:$0xff] %v12301_v59  ;;  %v12307_v53 = vpop.f32.mrb[3].mxu0  ;;  %v4029_v18 = vsel %vm4018_vm9, %v3996_v23, %v12099_v31  ;;  %782 = vst.msk [vmem:[#allocation2 + $0x3f1] sm:$0xff] %vm384_vm0, %v653_v27  ;;  %v1486_v23 = vld [vmem:[#allocation2 + $0x2e2] ss:$2 sm:$0xff] }
 0x287   : > { %16816 = vst [vmem:[#allocation18_spill] sm:$0xff] %v12307_v53  ;;  %v12311_v35 = vpop.permute.xlu1 %2663  ;;  %v12313_v63 = vpop.permute.xlu0 %2537  ;;  %v4062_v55 = vsel %vm4051_vm10, %v4029_v18, %v12123_v39  ;;  %v835_v39 = vld [vmem:[#allocation2 + $0x1a0] ss:$2 sm:$0xff] }
 0x289   : > { %2163 = vrot.lane.b32.xlu1 %v1045_v20, %s16786_s16  ;;  %2037 = vrot.lane.b32.xlu0 %v983_v10, %s16783_s13  ;;  %v4095_v20 = vsel %vm4084_vm11, %v4062_v55, %v12169_v3 }
 0x28a   : > { %v4128_v10 = vsel %vm4117_vm12, %v4095_v20, %v12226_v36  ;;  %v3766_v36 = vsel %vm384_vm0, %v835_v39, %v11797_v60  ;;  %v656_v60 = vld [vmem:[%s11149_s14 + $0x320] sm:$0xff] }
 0x28b   : > { %v12329_v22 = vpop.permute.xlu1 %3171  ;;  %v12331_v56 = vpop.permute.xlu0 %3045  ;;  %v4161_v31 = vsel %vm4150_vm13, %v4128_v10, %v12261_v54  ;;  %v1800_v54 = vld [vmem:[#allocation2 + $0x2ab] ss:$2 sm:$0xff]  ;;  %785 = vst.msk [vmem:[#allocation2 + $0x411] sm:$0xff] %vm384_vm0, %v656_v60 }
 0x28c   : > { %v4194_v8 = vsel %vm4183_vm14, %v4161_v31, %v3552_v32  ;;  %v3799_v32 = vsel %vm3787_vm2, %v3766_v36, %v11823_v41  ;;  %v1108_v31 = vld [vmem:[#allocation2 + $0x348] ss:$2 sm:$0xff] }
 0x28d   : > { %2671 = vrot.lane.b32.xlu1 %v1296_v51, %s16777_s30  ;;  %2545 = vrot.lane.b32.xlu0 %v1234_v14, %s16784_s15  ;;  %v1738_v51 = vld [vmem:[#allocation2 + $0x2ba] ss:$2 sm:$0xff]  ;;  %v3832_v20 = vsel %vm3820_vm3, %v3799_v32, %v11876_v40 }
 0x28e   : > { %v3865_v10 = vsel %vm3853_vm4, %v3832_v20, %v11931_v19  ;;  %v1360_v36 = vld [vmem:[#allocation2 + $0x320] ss:$2 sm:$0xff] }
 0x28f   : > { %v3680_v27 = vpop.permute.xlu1 %3679  ;;  %v3554_v18 = vpop.permute.xlu0 %3553  ;;  %v3898_v41 = vsel %vm3886_vm5, %v3865_v10, %v11959_v37  ;;  %v1612_v10 = vld [vmem:[#allocation2 + $0x2f8] ss:$2 sm:$0xff] }
 0x290   : > { %v4227_v3 = vsel %vm4216_vm15, %v4194_v8, %v3680_v27  ;;  %v3931_v40 = vsel %vm3919_vm6, %v3898_v41, %v11993_v9  ;;  %v654_v27 = vld [vmem:[%s11149_s14 + $0x310] sm:$0xff] }
 0x291   : > { %3179 = vrot.lane.b32.xlu1 %v1548_v46, %s16787_s0  ;;  %3053 = vrot.lane.b32.xlu0 %v1486_v23, %s16785_s24  ;;  %v1047_v46 = vld [vmem:[#allocation2 + $0x333] ss:$2 sm:$0xff]  ;;  %v657_v23 = vld [vmem:[%s11149_s14 + $0x328] sm:$0xff]  ;;  %v3964_v8 = vsel %vm3952_vm7, %v3931_v40, %v12049_v45  ;;  %783 = vst.msk [vmem:[#allocation2 + $0x3f9] sm:$0xff] %vm384_vm0, %v654_v27 }
 0x292   : > { %9446 = vmatprep.mubr.msk.f32.mxu0 %vm4258_vm1, %v4227_v3  ;;  %786 = vst.msk [vmem:[#allocation2 + $0x419] sm:$0xff] %vm384_vm0, %v657_v23  ;;  %v3997_v37 = vsel %vm3985_vm8, %v3964_v8, %v12101_v4  ;;  %v655_v3 = vld [vmem:[%s11149_s14 + $0x318] sm:$0xff]  ;;  %v1172_v8 = vld [vmem:[#allocation2 + $0x349] ss:$2 sm:$0xff] }
 0x293   : > { %v12350_v14 = vpop.permute.xlu1 %2283  ;;  %v12352_v55 = vpop.permute.xlu0 %2157  ;;  %v4030_v9 = vsel %vm4018_vm9, %v3997_v37, %v12125_v7  ;;  %784 = vst.msk [vmem:[#allocation2 + $0x401] sm:$0xff] %vm384_vm0, %v655_v3  ;;  %v659_v40 = vld [vmem:[%s11149_s14 + $0x338] sm:$0xff] }
 0x294   : > { %v4063_v45 = vsel %vm4051_vm10, %v4030_v9, %v12171_v13  ;;  %v1550_v13 = vld [vmem:[#allocation2 + $0x2e3] ss:$2 sm:$0xff]  ;;  %v1110_v37 = vld [vmem:[#allocation2 + $0x358] ss:$2 sm:$0xff]  ;;  %788 = vst.msk [vmem:[#allocation2 + $0x429] sm:$0xff] %vm384_vm0, %v659_v40 }
 0x295   : > { %3687 = vrot.lane.b32.xlu1 %v1800_v54, %s16792_s28  ;;  %3561 = vrot.lane.b32.xlu0 %v1738_v51, %s16791_s23  ;;  %v1298_v54 = vld [vmem:[#allocation2 + $0x30b] ss:$2 sm:$0xff]  ;;  %v4096_v32 = vsel %vm4084_vm11, %v4063_v45, %v12228_v6 }
 0x296   : > { %v4129_v20 = vsel %vm4117_vm12, %v4096_v32, %v12263_v61  ;;  %v921_v61 = vld [vmem:[#allocation2 + $0x371] ss:$2 sm:$0xff]  ;;  %v1424_v9 = vld [vmem:[#allocation2 + $0x321] ss:$2 sm:$0xff] }
 0x297   : > { %v12367_v39 = vpop.permute.xlu1 %2791  ;;  %v12369_v19 = vpop.permute.xlu0 %2665  ;;  %v4162_v7 = vsel %vm4150_vm13, %v4129_v20, %v12285_v5  ;;  %v1676_v32 = vld [vmem:[#allocation2 + $0x2f9] ss:$2 sm:$0xff]  ;;  %v1614_v20 = vld [vmem:[#allocation2 + $0x308] ss:$2 sm:$0xff] }
 0x298   : > { %v4195_v60 = vsel %vm4183_vm14, %v4162_v7, %v3554_v18  ;;  %v658_v18 = vld [vmem:[%s11149_s14 + $0x330] sm:$0xff] }
 0x299   : > { %2291 = vrot.lane.b32.xlu1 %v1108_v31, %s16781_s22  ;;  %2165 = vrot.lane.b32.xlu0 %v1047_v46, %s16786_s16  ;;  %v1802_v46 = vld [vmem:[#allocation2 + $0x2bb] ss:$2 sm:$0xff]  ;;  %787 = vst.msk [vmem:[#allocation2 + $0x421] sm:$0xff] %vm384_vm0, %v658_v18 }
 0x29b   : > { %v12386_v51 = vpop.permute.xlu1 %3299  ;;  %v12388_v4 = vpop.permute.xlu0 %3173 }
 0x29d   : > { %2799 = vrot.lane.b32.xlu1 %v1360_v36, %s16779_s25  ;;  %2673 = vrot.lane.b32.xlu0 %v1298_v54, %s16777_s30  ;;  %v1362_v36 = vld [vmem:[#allocation2 + $0x330] ss:$2 sm:$0xff] }
 0x29f   : > { %v12399_v41 = vpop.permute.xlu1 %1903  ;;  %v3682_v31 = vpop.permute.xlu0 %3681 }
 0x2a0   : > { %v4228_v6 = vsel %vm4216_vm15, %v4195_v60, %v3682_v31  ;;  %v923_v60 = vld [vmem:[#allocation2 + $0x381] ss:$2 sm:$0xff] }
 0x2a1   : > { %3307 = vrot.lane.b32.xlu1 %v1612_v10, %s16789_s26  ;;  %3181 = vrot.lane.b32.xlu0 %v1550_v13, %s16787_s0  ;;  %v985_v13 = vld [vmem:[#allocation2 + $0x372] ss:$2 sm:$0xff] }
 0x2a2   : > { %9447 = vmatmul.mubr.msk.f32.gmra.mrb[10].mxu0 %vm4258_vm1, %v4228_v6 }
 0x2a3   : > { %v12405_v5 = vpop.permute.xlu1 %2411  ;;  %v12407_v23 = vpop.permute.xlu0 %2285 }
 0x2a5   : > { %1911 = vrot.lane.b32.xlu1 %v921_v61, %s16788_s1  ;;  %3689 = vrot.lane.b32.xlu0 %v1802_v46, %s16792_s28  ;;  %v1236_v61 = vld [vmem:[#allocation2 + $0x34a] ss:$2 sm:$0xff]  ;;  %v1174_v46 = vld [vmem:[#allocation2 + $0x359] ss:$2 sm:$0xff] }
 0x2a7   : > { %v12415_v27 = vpop.permute.xlu1 %2919  ;;  %v12417_v3 = vpop.permute.xlu0 %2793 }
 0x2a9   : > { %2419 = vrot.lane.b32.xlu1 %v1172_v8, %s16780_s29  ;;  %2293 = vrot.lane.b32.xlu0 %v1110_v37, %s16781_s22  ;;  %v1488_v8 = vld [vmem:[#allocation2 + $0x322] ss:$2 sm:$0xff]  ;;  %v1426_v37 = vld [vmem:[#allocation2 + $0x331] ss:$2 sm:$0xff] }
 0x2ab   : > { %v12421_v54 = vpop.permute.xlu1 %3427  ;;  %v12423_v45 = vpop.permute.xlu0 %3301 }
 0x2ad   : > { %2927 = vrot.lane.b32.xlu1 %v1424_v9, %s16782_s12  ;;  %2801 = vrot.lane.b32.xlu0 %v1362_v36, %s16779_s25  ;;  %v837_v9 = vld [vmem:[#allocation2 + $0x1e0] ss:$2 sm:$0xff] }
 0x2af   : > { %v12427_v7 = vpop.permute.xlu1 %2031  ;;  %v12429_v10 = vpop.permute.xlu0 %1905 }
 0x2b1   : > { %3435 = vrot.lane.b32.xlu1 %v1676_v32, %s16790_s19  ;;  %3309 = vrot.lane.b32.xlu0 %v1614_v20, %s16789_s26  ;;  %v3767_v20 = vsel %vm384_vm0, %v837_v9, %v11923_v43  ;;  %v1049_v9 = vld [vmem:[#allocation2 + $0x373] ss:$2 sm:$0xff] }
 0x2b3   : > { %v12433_v31 = vpop.permute.xlu1 %2539  ;;  %v12435_v6 = vpop.permute.xlu0 %2413 }
 0x2b5   : > { %2039 = vrot.lane.b32.xlu1 %v985_v13, %s16783_s13  ;;  %1913 = vrot.lane.b32.xlu0 %v923_v60, %s16788_s1  ;;  %v1740_v13 = vld [vmem:[#allocation2 + $0x2fa] ss:$2 sm:$0xff]  ;;  %v1678_v60 = vld [vmem:[#allocation2 + $0x309] ss:$2 sm:$0xff] }
 0x2b7   : > { %v12439_v18 = vpop.permute.xlu1 %3047  ;;  %v12441_v40 = vpop.permute.xlu0 %2921 }
 0x2b9   : > { %2547 = vrot.lane.b32.xlu1 %v1236_v61, %s16784_s15  ;;  %2421 = vrot.lane.b32.xlu0 %v1174_v46, %s16780_s29  ;;  %v3800_v61 = vsel %vm3787_vm2, %v3767_v20, %v11951_v25  ;;  %v987_v20 = vld [vmem:[#allocation2 + $0x382] ss:$2 sm:$0xff] }
 0x2ba   : > { %v3833_v53 = vsel %vm3820_vm3, %v3800_v61, %v11977_v29 }
 0x2bb   : > { %v3556_v36 = vpop.permute.xlu1 %3555  ;;  %v12445_v32 = vpop.permute.xlu0 %3429 }
 0x2bd   : > { %3055 = vrot.lane.b32.xlu1 %v1488_v8, %s16785_s24  ;;  %2929 = vrot.lane.b32.xlu0 %v1426_v37, %s16782_s12  ;;  %v3866_v8 = vsel %vm3853_vm4, %v3833_v53, %v12030_v17 }
 0x2be   : > { %v3899_v43 = vsel %vm3886_vm5, %v3866_v8, %v12089_v11  ;;  %v660_v11 = vld [vmem:[%s11149_s14 + $0x340] sm:$0xff] }
 0x2bf   : > { %v12453_v59 = vpop.permute.xlu1 %2159  ;;  %v12455_v46 = vpop.permute.xlu0 %2033  ;;  %v3932_v29 = vsel %vm3919_vm6, %v3899_v43, %v12117_v47  ;;  %v1300_v47 = vld [vmem:[#allocation2 + $0x34b] ss:$2 sm:$0xff]  ;;  %v1238_v43 = vld [vmem:[#allocation2 + $0x35a] ss:$2 sm:$0xff]  ;;  %789 = vst.msk [vmem:[#allocation2 + $0x439] sm:$0xff] %vm384_vm0, %v660_v11 }
 0x2c0   : > { %v3965_v53 = vsel %vm3952_vm7, %v3932_v29, %v12151_v48 }
 0x2c1   : > { %v12461_v37 = vpop.f32.mrb[4].mxu0  ;;  %3563 = vrot.lane.b32.xlu1 %v1740_v13, %s16791_s23  ;;  %3437 = vrot.lane.b32.xlu0 %v1678_v60, %s16790_s19  ;;  %v3998_v13 = vsel %vm3985_vm8, %v3965_v53, %v12207_v42  ;;  %v661_v60 = vld [vmem:[%s11149_s14 + $0x348] sm:$0xff] }
 0x2c2   : > { %16817 = vst [vmem:[#allocation22_spill] sm:$0xff] %v12461_v37  ;;  %v12467_v25 = vpop.f32.mrb[5].mxu0  ;;  %v4031_v8 = vsel %vm4018_vm9, %v3998_v13, %v12255_v33  ;;  %790 = vst.msk [vmem:[#allocation2 + $0x441] sm:$0xff] %vm384_vm0, %v661_v60  ;;  %v1552_v53 = vld [vmem:[#allocation2 + $0x323] ss:$2 sm:$0xff] }
 0x2c3   : > { %16818 = vst [vmem:[#allocation23_spill] sm:$0xff] %v12467_v25  ;;  %v12471_v61 = vpop.permute.xlu1 %2667  ;;  %v12473_v17 = vpop.permute.xlu0 %2541  ;;  %v4064_v48 = vsel %vm4051_vm10, %v4031_v8, %v12279_v57  ;;  %v1490_v13 = vld [vmem:[#allocation2 + $0x332] ss:$2 sm:$0xff]  ;;  %v1682_v25 = vld [vmem:[#allocation2 + $0x359] ss:$2 sm:$0xff] }
 0x2c4   : > { %v839_v57 = vld [vmem:[#allocation2 + $0x1f0] ss:$2 sm:$0xff] }
 0x2c5   : > { %2167 = vrot.lane.b32.xlu1 %v1049_v9, %s16786_s16  ;;  %2041 = vrot.lane.b32.xlu0 %v987_v20, %s16783_s13  ;;  %v4097_v9 = vsel %vm4084_vm11, %v4064_v48, %v12329_v22  ;;  %v1744_v37 = vld [vmem:[#allocation2 + $0x34a] ss:$2 sm:$0xff] }
 0x2c6   : > { %v4130_v20 = vsel %vm4117_vm12, %v4097_v9, %v12386_v51  ;;  %v3768_v51 = vsel %vm384_vm0, %v839_v57, %v11953_v21  ;;  %v664_v21 = vld [vmem:[%s11149_s14 + $0x360] sm:$0xff]  ;;  %v665_v57 = vld [vmem:[%s11149_s14 + $0x368] sm:$0xff] }
 0x2c7   : > { %v12489_v29 = vpop.permute.xlu1 %3175  ;;  %v12491_v42 = vpop.permute.xlu0 %3049  ;;  %v4163_v33 = vsel %vm4150_vm13, %v4130_v20, %v12421_v54  ;;  %v1804_v54 = vld [vmem:[#allocation2 + $0x2fb] ss:$2 sm:$0xff]  ;;  %793 = vst.msk [vmem:[#allocation2 + $0x461] sm:$0xff] %vm384_vm0, %v664_v21  ;;  %794 = vst.msk [vmem:[#allocation2 + $0x469] sm:$0xff] %vm384_vm0, %v665_v57  ;;  %v1806_v57 = vld [vmem:[#allocation2 + $0x30b] ss:$2 sm:$0xff] }
 0x2c8   : > { %v4196_v11 = vsel %vm4183_vm14, %v4163_v33, %v3556_v36  ;;  %v3801_v36 = vsel %vm3787_vm2, %v3768_v51, %v11979_v0  ;;  %v16819_v33 = vld [vmem:[#allocation21_spill] sm:$0xff] }
 0x2c9   : > { %2675 = vrot.lane.b32.xlu1 %v1300_v47, %s16777_s30  ;;  %2549 = vrot.lane.b32.xlu0 %v1238_v43, %s16784_s15  ;;  %v1742_v47 = vld [vmem:[#allocation2 + $0x30a] ss:$2 sm:$0xff]  ;;  %v3834_v9 = vsel %vm3820_vm3, %v3801_v36, %v12032_v34  ;;  %v1302_v36 = vld [vmem:[#allocation2 + $0x35b] ss:$2 sm:$0xff] }
 0x2ca   : > { %v3867_v20 = vsel %vm3853_vm4, %v3834_v9, %v12091_v30  ;;  %v662_v51 = vld [vmem:[%s11149_s14 + $0x350] sm:$0xff] }
 0x2cb   : > { %v3684_v60 = vpop.permute.xlu1 %3683  ;;  %v3558_v8 = vpop.permute.xlu0 %3557  ;;  %v3900_v0 = vsel %vm3886_vm5, %v3867_v20, %v16819_v33  ;;  %791 = vst.msk [vmem:[#allocation2 + $0x449] sm:$0xff] %vm384_vm0, %v662_v51  ;;  %v1616_v33 = vld [vmem:[#allocation2 + $0x348] ss:$2 sm:$0xff] }
 0x2cc   : > { %v4229_v22 = vsel %vm4216_vm15, %v4196_v11, %v3684_v60  ;;  %v3933_v34 = vsel %vm3919_vm6, %v3900_v0, %v12153_v2  ;;  %v1114_v51 = vld [vmem:[#allocation2 + $0x3a8] ss:$2 sm:$0xff] }
 0x2cd   : > { %3183 = vrot.lane.b32.xlu1 %v1552_v53, %s16787_s0  ;;  %3057 = vrot.lane.b32.xlu0 %v1490_v13, %s16785_s24  ;;  %v1112_v53 = vld [vmem:[#allocation2 + $0x398] ss:$2 sm:$0xff]  ;;  %v1051_v13 = vld [vmem:[#allocation2 + $0x383] ss:$2 sm:$0xff]  ;;  %v3966_v60 = vsel %vm3952_vm7, %v3933_v34, %v12209_v49 }
 0x2ce   : > { %9449 = vmatprep.mubr.msk.f32.mxu0 %vm4258_vm1, %v4229_v22  ;;  %v3999_v22 = vsel %vm3985_vm8, %v3966_v60, %v12257_v50  ;;  %v667_v60 = vld [vmem:[%s11149_s14 + $0x378] sm:$0xff] }
 0x2cf   : > { %v12510_v43 = vpop.permute.xlu1 %2287  ;;  %v12512_v48 = vpop.permute.xlu0 %2161  ;;  %v4032_v2 = vsel %vm4018_vm9, %v3999_v22, %v12281_v52  ;;  %v1176_v22 = vld [vmem:[#allocation2 + $0x399] ss:$2 sm:$0xff]  ;;  %796 = vst.msk [vmem:[#allocation2 + $0x479] sm:$0xff] %vm384_vm0, %v667_v60 }
 0x2d0   : > { %v4065_v49 = vsel %vm4051_vm10, %v4032_v2, %v12331_v56  ;;  %v1554_v56 = vld [vmem:[#allocation2 + $0x333] ss:$2 sm:$0xff] }
 0x2d1   : > { %3691 = vrot.lane.b32.xlu1 %v1804_v54, %s16792_s28  ;;  %3565 = vrot.lane.b32.xlu0 %v1742_v47, %s16791_s23  ;;  %v663_v54 = vld [vmem:[%s11149_s14 + $0x358] sm:$0xff]  ;;  %v4098_v20 = vsel %vm4084_vm11, %v4065_v49, %v12388_v4 }
 0x2d2   : > { %v1364_v47 = vld [vmem:[#allocation2 + $0x370] ss:$2 sm:$0xff]  ;;  %792 = vst.msk [vmem:[#allocation2 + $0x451] sm:$0xff] %vm384_vm0, %v663_v54  ;;  %v4131_v21 = vsel %vm4117_vm12, %v4098_v20, %v12423_v45  ;;  %v925_v45 = vld [vmem:[#allocation2 + $0x3c1] ss:$2 sm:$0xff] }
 0x2d3   : > { %v12527_v11 = vpop.permute.xlu1 %2795  ;;  %v12529_v30 = vpop.permute.xlu0 %2669  ;;  %v4164_v52 = vsel %vm4150_vm13, %v4131_v21, %v12445_v32  ;;  %v1680_v21 = vld [vmem:[#allocation2 + $0x349] ss:$2 sm:$0xff] }
 0x2d4   : > { %v4197_v0 = vsel %vm4183_vm14, %v4164_v52, %v3558_v8  ;;  %v666_v8 = vld [vmem:[%s11149_s14 + $0x370] sm:$0xff]  ;;  %v1618_v52 = vld [vmem:[#allocation2 + $0x358] ss:$2 sm:$0xff] }
 0x2d5   : > { %2295 = vrot.lane.b32.xlu1 %v1112_v53, %s16781_s22  ;;  %2169 = vrot.lane.b32.xlu0 %v1051_v13, %s16786_s16  ;;  %795 = vst.msk [vmem:[#allocation2 + $0x471] sm:$0xff] %vm384_vm0, %v666_v8  ;;  %v1178_v8 = vld [vmem:[#allocation2 + $0x3a9] ss:$2 sm:$0xff] }
 0x2d7   : > { %v12546_v9 = vpop.permute.xlu1 %3303  ;;  %v12548_v50 = vpop.permute.xlu0 %3177 }
 0x2d9   : > { %2803 = vrot.lane.b32.xlu1 %v1364_v47, %s16779_s25  ;;  %2677 = vrot.lane.b32.xlu0 %v1302_v36, %s16777_s30  ;;  %v1428_v47 = vld [vmem:[#allocation2 + $0x371] ss:$2 sm:$0xff]  ;;  %v1366_v36 = vld [vmem:[#allocation2 + $0x380] ss:$2 sm:$0xff] }
 0x2db   : > { %v12559_v53 = vpop.permute.xlu1 %1907  ;;  %v3686_v13 = vpop.permute.xlu0 %3685 }
 0x2dc   : > { %16820 = vst [vmem:[#allocation21_spill] sm:$0xff] %v12559_v53  ;;  %v4230_v4 = vsel %vm4216_vm15, %v4197_v0, %v3686_v13  ;;  %v989_v0 = vld [vmem:[#allocation2 + $0x3c2] ss:$2 sm:$0xff]  ;;  %v927_v13 = vld [vmem:[#allocation2 + $0x3d1] ss:$2 sm:$0xff] }
 0x2dd   : > { %3311 = vrot.lane.b32.xlu1 %v1616_v33, %s16789_s26  ;;  %3185 = vrot.lane.b32.xlu0 %v1554_v56, %s16787_s0 }
 0x2de   : > { %9450 = vmatmul.mubr.msk.f32.gmra.mrb[12].mxu0 %vm4258_vm1, %v4230_v4 }
 0x2df   : > { %v12565_v32 = vpop.permute.xlu1 %2415  ;;  %v12567_v34 = vpop.permute.xlu0 %2289 }
 0x2e1   : > { %1915 = vrot.lane.b32.xlu1 %v925_v45, %s16788_s1  ;;  %3693 = vrot.lane.b32.xlu0 %v1806_v57, %s16792_s28  ;;  %v1240_v57 = vld [vmem:[#allocation2 + $0x39a] ss:$2 sm:$0xff] }
 0x2e3   : > { %v12575_v54 = vpop.permute.xlu1 %2923  ;;  %v12577_v2 = vpop.permute.xlu0 %2797 }
 0x2e5   : > { %2423 = vrot.lane.b32.xlu1 %v1176_v22, %s16780_s29  ;;  %2297 = vrot.lane.b32.xlu0 %v1114_v51, %s16781_s22  ;;  %v1492_v51 = vld [vmem:[#allocation2 + $0x372] ss:$2 sm:$0xff] }
 0x2e7   : > { %v12581_v49 = vpop.permute.xlu1 %3431  ;;  %v12583_v20 = vpop.permute.xlu0 %3305 }
 0x2e9   : > { %2931 = vrot.lane.b32.xlu1 %v1428_v47, %s16782_s12  ;;  %2805 = vrot.lane.b32.xlu0 %v1366_v36, %s16779_s25  ;;  %v1430_v47 = vld [vmem:[#allocation2 + $0x381] ss:$2 sm:$0xff]  ;;  %v841_v36 = vld [vmem:[#allocation2 + $0x230] ss:$2 sm:$0xff] }
 0x2eb   : > { %v12587_v33 = vpop.permute.xlu1 %2035  ;;  %v12589_v56 = vpop.permute.xlu0 %1909 }
 0x2ec   : > { %16821 = vst [vmem:[#allocation24_spill] sm:$0xff] %v12587_v33  ;;  %16822 = vst [vmem:[#allocation25_spill] sm:$0xff] %v12589_v56  ;;  %v16824_v56 = vld [vmem:[#allocation19_spill] sm:$0xff] }
 0x2ed   : > { %3439 = vrot.lane.b32.xlu1 %v1680_v21, %s16790_s19  ;;  %3313 = vrot.lane.b32.xlu0 %v1618_v52, %s16789_s26 }
 0x2ef   : > { %v12593_v4 = vpop.permute.xlu1 %2543  ;;  %v12595_v45 = vpop.permute.xlu0 %2417 }
 0x2f1   : > { %2043 = vrot.lane.b32.xlu1 %v989_v0, %s16783_s13  ;;  %1917 = vrot.lane.b32.xlu0 %v927_v13, %s16788_s1  ;;  %v16823_v0 = vld [vmem:[#allocation17_spill] sm:$0xff] }
 0x2f2   : > { %v3769_v13 = vsel %vm384_vm0, %v841_v36, %v16823_v0  ;;  %v1053_v0 = vld [vmem:[#allocation2 + $0x3c3] ss:$2 sm:$0xff] }
 0x2f3   : > { %v12599_v60 = vpop.permute.xlu1 %3051  ;;  %v12601_v22 = vpop.permute.xlu0 %2925 }
 0x2f5   : > { %2551 = vrot.lane.b32.xlu1 %v1240_v57, %s16784_s15  ;;  %2425 = vrot.lane.b32.xlu0 %v1178_v8, %s16780_s29  ;;  %v3802_v57 = vsel %vm3787_vm2, %v3769_v13, %v16824_v56  ;;  %v991_v13 = vld [vmem:[#allocation2 + $0x3d2] ss:$2 sm:$0xff] }
 0x2f6   : > { %v3835_v53 = vsel %vm3820_vm3, %v3802_v57, %v12137_v24 }
 0x2f7   : > { %v3560_v21 = vpop.permute.xlu1 %3559  ;;  %v12605_v52 = vpop.permute.xlu0 %3433 }
 0x2f9   : > { %3059 = vrot.lane.b32.xlu1 %v1492_v51, %s16785_s24  ;;  %2933 = vrot.lane.b32.xlu0 %v1430_v47, %s16782_s12  ;;  %v3868_v51 = vsel %vm3853_vm4, %v3835_v53, %v12190_v62 }
 0x2fa   : > { %v3901_v56 = vsel %vm3886_vm5, %v3868_v51, %v12245_v12  ;;  %v668_v12 = vld [vmem:[%s11149_s14 + $0x380] sm:$0xff] }
 0x2fb   : > { %v12613_v33 = vpop.permute.xlu1 %2163  ;;  %v12615_v8 = vpop.permute.xlu0 %2037  ;;  %v3934_v24 = vsel %vm3919_vm6, %v3901_v56, %v12273_v15  ;;  %v1304_v15 = vld [vmem:[#allocation2 + $0x39b] ss:$2 sm:$0xff]  ;;  %v1242_v56 = vld [vmem:[#allocation2 + $0x3aa] ss:$2 sm:$0xff]  ;;  %797 = vst.msk [vmem:[#allocation2 + $0x489] sm:$0xff] %vm384_vm0, %v668_v12 }
 0x2fc   : > { %v3967_v53 = vsel %vm3952_vm7, %v3934_v24, %v12311_v35 }
 0x2fd   : > { %v12621_v47 = vpop.f32.mrb[6].mxu0  ;;  %3567 = vrot.lane.b32.xlu1 %v1744_v37, %s16791_s23  ;;  %3441 = vrot.lane.b32.xlu0 %v1682_v25, %s16790_s19  ;;  %v4000_v37 = vsel %vm3985_vm8, %v3967_v53, %v12367_v39  ;;  %v669_v25 = vld [vmem:[%s11149_s14 + $0x388] sm:$0xff]  ;;  %v1556_v53 = vld [vmem:[#allocation2 + $0x373] ss:$2 sm:$0xff] }
 0x2fe   : > { %16825 = vst [vmem:[#allocation17_spill] sm:$0xff] %v12621_v47  ;;  %v12627_v36 = vpop.f32.mrb[7].mxu0  ;;  %v4033_v51 = vsel %vm4018_vm9, %v4000_v37, %v12415_v27  ;;  %798 = vst.msk [vmem:[#allocation2 + $0x491] sm:$0xff] %vm384_vm0, %v669_v25  ;;  %v1494_v37 = vld [vmem:[#allocation2 + $0x382] ss:$2 sm:$0xff] }
 0x2ff   : > { %16826 = vst [vmem:[#allocation19_spill] sm:$0xff] %v12627_v36  ;;  %v12631_v57 = vpop.permute.xlu1 %2671  ;;  %v12633_v62 = vpop.permute.xlu0 %2545  ;;  %v4066_v35 = vsel %vm4051_vm10, %v4033_v51, %v12439_v18  ;;  %v843_v18 = vld [vmem:[#allocation2 + $0x240] ss:$2 sm:$0xff] }
 0x300   : > { %v1748_v36 = vld [vmem:[#allocation2 + $0x39a] ss:$2 sm:$0xff] }
 0x301   : > { %2171 = vrot.lane.b32.xlu1 %v1053_v0, %s16786_s16  ;;  %2045 = vrot.lane.b32.xlu0 %v991_v13, %s16783_s13  ;;  %v4099_v0 = vsel %vm4084_vm11, %v4066_v35, %v12489_v29  ;;  %v16828_v35 = vld [vmem:[#allocation13_spill] sm:$0xff] }
 0x302   : > { %v4132_v13 = vsel %vm4117_vm12, %v4099_v0, %v12546_v9  ;;  %v16827_v9 = vld [vmem:[#allocation20_spill] sm:$0xff] }
 0x303   : > { %v12649_v24 = vpop.permute.xlu1 %3179  ;;  %v12651_v39 = vpop.permute.xlu0 %3053  ;;  %v4165_v27 = vsel %vm4150_vm13, %v4132_v13, %v12581_v49  ;;  %v1808_v49 = vld [vmem:[#allocation2 + $0x34b] ss:$2 sm:$0xff] }
 0x304   : > { %v4198_v12 = vsel %vm4183_vm14, %v4165_v27, %v3560_v21 }
 0x305   : > { %2679 = vrot.lane.b32.xlu1 %v1304_v15, %s16777_s30  ;;  %2553 = vrot.lane.b32.xlu0 %v1242_v56, %s16784_s15  ;;  %v3770_v15 = vsel %vm384_vm0, %v843_v18, %v16827_v9  ;;  %v1746_v56 = vld [vmem:[#allocation2 + $0x35a] ss:$2 sm:$0xff] }
 0x306   : > { %v3803_v21 = vsel %vm3787_vm2, %v3770_v15, %v16828_v35 }
 0x307   : > { %v3688_v25 = vpop.permute.xlu1 %3687  ;;  %v3562_v51 = vpop.permute.xlu0 %3561  ;;  %v3836_v27 = vsel %vm3820_vm3, %v3803_v21, %v12192_v58 }
 0x308   : > { %v4231_v29 = vsel %vm4216_vm15, %v4198_v12, %v3688_v25  ;;  %v1116_v12 = vld [vmem:[#allocation2 + $0x3e8] ss:$2 sm:$0xff]  ;;  %v1055_v25 = vld [vmem:[#allocation2 + $0x3d3] ss:$2 sm:$0xff] }
 0x309   : > { %3187 = vrot.lane.b32.xlu1 %v1556_v53, %s16787_s0  ;;  %3061 = vrot.lane.b32.xlu0 %v1494_v37, %s16785_s24  ;;  %v3869_v53 = vsel %vm3853_vm4, %v3836_v27, %v12247_v28  ;;  %v670_v37 = vld [vmem:[%s11149_s14 + $0x390] sm:$0xff] }
 0x30a   : > { %9452 = vmatprep.mubr.msk.f32.mxu0 %vm4258_vm1, %v4231_v29  ;;  %v3902_v18 = vsel %vm3886_vm5, %v3869_v53, %v12275_v1  ;;  %v671_v29 = vld [vmem:[%s11149_s14 + $0x398] sm:$0xff]  ;;  %799 = vst.msk [vmem:[#allocation2 + $0x499] sm:$0xff] %vm384_vm0, %v670_v37  ;;  %v1558_v37 = vld [vmem:[#allocation2 + $0x383] ss:$2 sm:$0xff] }
 0x30b   : > { %v12670_v0 = vpop.permute.xlu1 %2291  ;;  %v12672_v13 = vpop.permute.xlu0 %2165  ;;  %v3935_v9 = vsel %vm3919_vm6, %v3902_v18, %v12313_v63  ;;  %800 = vst.msk [vmem:[#allocation2 + $0x4a1] sm:$0xff] %vm384_vm0, %v671_v29  ;;  %v1368_v63 = vld [vmem:[#allocation2 + $0x3c0] ss:$2 sm:$0xff] }
 0x30c   : > { %v3968_v28 = vsel %vm3952_vm7, %v3935_v9, %v12369_v19  ;;  %v1620_v53 = vld [vmem:[#allocation2 + $0x398] ss:$2 sm:$0xff] }
 0x30d   : > { %3695 = vrot.lane.b32.xlu1 %v1808_v49, %s16792_s28  ;;  %3569 = vrot.lane.b32.xlu0 %v1746_v56, %s16791_s23  ;;  %v4001_v1 = vsel %vm3985_vm8, %v3968_v28, %v12417_v3  ;;  %v1306_v56 = vld [vmem:[#allocation2 + $0x3ab] ss:$2 sm:$0xff]  ;;  %v1118_v9 = vld [vmem:[#allocation2 + $0x3f8] ss:$2 sm:$0xff] }
 0x30e   : > { %v4034_v49 = vsel %vm4018_vm9, %v4001_v1, %v12441_v40 }
 0x30f   : > { %v12687_v58 = vpop.permute.xlu1 %2799  ;;  %v12689_v15 = vpop.permute.xlu0 %2673  ;;  %v4067_v35 = vsel %vm4051_vm10, %v4034_v49, %v12491_v42  ;;  %v1432_v49 = vld [vmem:[#allocation2 + $0x3c1] ss:$2 sm:$0xff] }
 0x310   : > { %v4100_v19 = vsel %vm4084_vm11, %v4067_v35, %v12548_v50  ;;  %v929_v50 = vld [vmem:[#allocation2 + $0x411] ss:$2 sm:$0xff] }
 0x311   : > { %2299 = vrot.lane.b32.xlu1 %v1116_v12, %s16781_s22  ;;  %2173 = vrot.lane.b32.xlu0 %v1055_v25, %s16786_s16  ;;  %v4133_v3 = vsel %vm4117_vm12, %v4100_v19, %v12583_v20  ;;  %v1810_v20 = vld [vmem:[#allocation2 + $0x35b] ss:$2 sm:$0xff] }
 0x312   : > { %v4166_v40 = vsel %vm4150_vm13, %v4133_v3, %v12605_v52  ;;  %v1684_v19 = vld [vmem:[#allocation2 + $0x399] ss:$2 sm:$0xff]  ;;  %v1622_v3 = vld [vmem:[#allocation2 + $0x3a8] ss:$2 sm:$0xff] }
 0x313   : > { %v12702_v21 = vpop.permute.xlu1 %3307  ;;  %v12704_v27 = vpop.permute.xlu0 %3181  ;;  %v4199_v42 = vsel %vm4183_vm14, %v4166_v40, %v3562_v51  ;;  %v1180_v51 = vld [vmem:[#allocation2 + $0x3e9] ss:$2 sm:$0xff] }
 0x315   : > { %2807 = vrot.lane.b32.xlu1 %v1368_v63, %s16779_s25  ;;  %2681 = vrot.lane.b32.xlu0 %v1306_v56, %s16777_s30  ;;  %v1370_v63 = vld [vmem:[#allocation2 + $0x3d0] ss:$2 sm:$0xff] }
 0x317   : > { %v12715_v18 = vpop.permute.xlu1 %1911  ;;  %v3690_v12 = vpop.permute.xlu0 %3689 }
 0x318   : > { %16829 = vst [vmem:[#allocation20_spill] sm:$0xff] %v12715_v18  ;;  %v4232_v25 = vsel %vm4216_vm15, %v4199_v42, %v3690_v12  ;;  %v931_v42 = vld [vmem:[#allocation2 + $0x421] ss:$2 sm:$0xff] }
 0x319   : > { %3315 = vrot.lane.b32.xlu1 %v1620_v53, %s16789_s26  ;;  %3189 = vrot.lane.b32.xlu0 %v1558_v37, %s16787_s0  ;;  %v993_v37 = vld [vmem:[#allocation2 + $0x412] ss:$2 sm:$0xff] }
 0x31a   : > { %9453 = vmatmul.mubr.msk.f32.gmra.mrb[14].mxu0 %vm4258_vm1, %v4232_v25 }
 0x31b   : > { %v12721_v29 = vpop.permute.xlu1 %2419  ;;  %v12723_v52 = vpop.permute.xlu0 %2293 }
 0x31d   : > { %1919 = vrot.lane.b32.xlu1 %v929_v50, %s16788_s1  ;;  %3697 = vrot.lane.b32.xlu0 %v1810_v20, %s16792_s28  ;;  %v1244_v50 = vld [vmem:[#allocation2 + $0x3ea] ss:$2 sm:$0xff]  ;;  %v1182_v20 = vld [vmem:[#allocation2 + $0x3f9] ss:$2 sm:$0xff] }
 0x31f   : > { %v12727_v28 = vpop.permute.xlu1 %2927  ;;  %v12729_v1 = vpop.permute.xlu0 %2801 }
 0x321   : > { %2427 = vrot.lane.b32.xlu1 %v1180_v51, %s16780_s29  ;;  %2301 = vrot.lane.b32.xlu0 %v1118_v9, %s16781_s22 }
 0x323   : > { %v12733_v56 = vpop.permute.xlu1 %3435  ;;  %v12735_v35 = vpop.permute.xlu0 %3309 }
 0x325   : > { %2935 = vrot.lane.b32.xlu1 %v1432_v49, %s16782_s12  ;;  %2809 = vrot.lane.b32.xlu0 %v1370_v63, %s16779_s25  ;;  %v1496_v49 = vld [vmem:[#allocation2 + $0x3c2] ss:$2 sm:$0xff]  ;;  %v1434_v63 = vld [vmem:[#allocation2 + $0x3d1] ss:$2 sm:$0xff] }
 0x327   : > { %v12739_v40 = vpop.permute.xlu1 %2039  ;;  %v12741_v53 = vpop.permute.xlu0 %1913 }
 0x328   : > { %16830 = vst [vmem:[#allocation13_spill] sm:$0xff] %v12739_v40  ;;  %16831 = vst [vmem:[#allocation26_spill] sm:$0xff] %v12741_v53  ;;  %v1686_v53 = vld [vmem:[#allocation2 + $0x3a9] ss:$2 sm:$0xff] }
 0x329   : > { %3443 = vrot.lane.b32.xlu1 %v1684_v19, %s16790_s19  ;;  %3317 = vrot.lane.b32.xlu0 %v1622_v3, %s16789_s26  ;;  %v845_v19 = vld [vmem:[#allocation2 + $0x280] ss:$2 sm:$0xff] }
 0x32a   : > { %v673_v40 = vld [vmem:[%s11149_s14 + $0x3a8] sm:$0xff] }
 0x32b   : > { %v12745_v12 = vpop.permute.xlu1 %2547  ;;  %v12747_v25 = vpop.permute.xlu0 %2421  ;;  %802 = vst.msk [vmem:[#allocation2 + $0x4b9] sm:$0xff] %vm384_vm0, %v673_v40  ;;  %v1057_v40 = vld [vmem:[#allocation2 + $0x413] ss:$2 sm:$0xff] }
 0x32d   : > { %2047 = vrot.lane.b32.xlu1 %v993_v37, %s16783_s13  ;;  %1921 = vrot.lane.b32.xlu0 %v931_v42, %s16788_s1  ;;  %v672_v37 = vld [vmem:[%s11149_s14 + $0x3a0] sm:$0xff]  ;;  %v3771_v42 = vsel %vm384_vm0, %v845_v19, %v12239_v16 }
 0x32e   : > { %801 = vst.msk [vmem:[#allocation2 + $0x4b1] sm:$0xff] %vm384_vm0, %v672_v37  ;;  %v995_v37 = vld [vmem:[#allocation2 + $0x422] ss:$2 sm:$0xff] }
 0x32f   : > { %v12751_v51 = vpop.permute.xlu1 %3055  ;;  %v12753_v9 = vpop.permute.xlu0 %2929 }
 0x331   : > { %2555 = vrot.lane.b32.xlu1 %v1244_v50, %s16784_s15  ;;  %2429 = vrot.lane.b32.xlu0 %v1182_v20, %s16780_s29  ;;  %v3804_v50 = vsel %vm3787_vm2, %v3771_v42, %v12267_v38 }
 0x333   : > { %v3564_v3 = vpop.permute.xlu1 %3563  ;;  %v12757_v47 = vpop.permute.xlu0 %3437 }
 0x335   : > { %3063 = vrot.lane.b32.xlu1 %v1496_v49, %s16785_s24  ;;  %2937 = vrot.lane.b32.xlu0 %v1434_v63, %s16782_s12  ;;  %v3837_v49 = vsel %vm3820_vm3, %v3804_v50, %v12293_v44 }
 0x336   : > { %v3870_v16 = vsel %vm3853_vm4, %v3837_v49, %v12350_v14 }
 0x337   : > { %v12768_v20 = vpop.permute.xlu1 %2167  ;;  %v12770_v18 = vpop.permute.xlu0 %2041  ;;  %v3903_v38 = vsel %vm3886_vm5, %v3870_v16, %v12405_v5  ;;  %v674_v5 = vld [vmem:[%s11149_s14 + $0x3b0] sm:$0xff]  ;;  %v1246_v16 = vld [vmem:[#allocation2 + $0x3fa] ss:$2 sm:$0xff] }
 0x338   : > { %v3936_v44 = vsel %vm3919_vm6, %v3903_v38, %v12433_v31  ;;  %v1308_v31 = vld [vmem:[#allocation2 + $0x3eb] ss:$2 sm:$0xff]  ;;  %803 = vst.msk [vmem:[#allocation2 + $0x4c1] sm:$0xff] %vm384_vm0, %v674_v5 }
 0x339   : > { %v12777_v63 = vpop.f32.mrb[8].mxu0  ;;  %3571 = vrot.lane.b32.xlu1 %v1748_v36, %s16791_s23  ;;  %3445 = vrot.lane.b32.xlu0 %v1686_v53, %s16790_s19  ;;  %v3969_v50 = vsel %vm3952_vm7, %v3936_v44, %v12471_v61  ;;  %v675_v53 = vld [vmem:[%s11149_s14 + $0x3b8] sm:$0xff]  ;;  %v1560_v44 = vld [vmem:[#allocation2 + $0x3c3] ss:$2 sm:$0xff] }
 0x33a   : > { %16832 = vst [vmem:[#allocation27_spill] sm:$0xff] %v12777_v63  ;;  %v12783_v19 = vpop.f32.mrb[9].mxu0  ;;  %v4002_v36 = vsel %vm3985_vm8, %v3969_v50, %v12527_v11  ;;  %804 = vst.msk [vmem:[#allocation2 + $0x4c9] sm:$0xff] %vm384_vm0, %v675_v53  ;;  %v1498_v50 = vld [vmem:[#allocation2 + $0x3d2] ss:$2 sm:$0xff] }
 0x33b   : > { %16833 = vst [vmem:[#allocation28_spill] sm:$0xff] %v12783_v19  ;;  %v12787_v42 = vpop.permute.xlu1 %2675  ;;  %v12789_v14 = vpop.permute.xlu0 %2549  ;;  %v4035_v49 = vsel %vm4018_vm9, %v4002_v36, %v12575_v54 }
 0x33c   : > { %v4068_v61 = vsel %vm4051_vm10, %v4035_v49, %v12599_v60  ;;  %v847_v60 = vld [vmem:[#allocation2 + $0x290] ss:$2 sm:$0xff] }
 0x33d   : > { %2175 = vrot.lane.b32.xlu1 %v1057_v40, %s16786_s16  ;;  %2049 = vrot.lane.b32.xlu0 %v995_v37, %s16783_s13  ;;  %v4101_v40 = vsel %vm4084_vm11, %v4068_v61, %v12649_v24  ;;  %v16834_v24 = vld [vmem:[#allocation15_spill] sm:$0xff] }
 0x33e   : > { %v4134_v37 = vsel %vm4117_vm12, %v4101_v40, %v12702_v21  ;;  %v3772_v21 = vsel %vm384_vm0, %v847_v60, %v16834_v24 }
 0x33f   : > { %v12805_v38 = vpop.permute.xlu1 %3183  ;;  %v12807_v11 = vpop.permute.xlu0 %3057  ;;  %v4167_v54 = vsel %vm4150_vm13, %v4134_v37, %v12733_v56  ;;  %v1750_v56 = vld [vmem:[#allocation2 + $0x3aa] ss:$2 sm:$0xff] }
 0x340   : > { %v4200_v36 = vsel %vm4183_vm14, %v4167_v54, %v3564_v3 }
 0x341   : > { %2683 = vrot.lane.b32.xlu1 %v1308_v31, %s16777_s30  ;;  %2557 = vrot.lane.b32.xlu0 %v1246_v16, %s16784_s15  ;;  %v1812_v31 = vld [vmem:[#allocation2 + $0x39b] ss:$2 sm:$0xff]  ;;  %v3805_v16 = vsel %vm3787_vm2, %v3772_v21, %v12295_v26 }
 0x342   : > { %v3838_v40 = vsel %vm3820_vm3, %v3805_v16, %v12352_v55 }
 0x343   : > { %v3692_v5 = vpop.permute.xlu1 %3691  ;;  %v3566_v53 = vpop.permute.xlu0 %3565  ;;  %v3871_v37 = vsel %vm3853_vm4, %v3838_v40, %v12407_v23 }
 0x344   : > { %v4233_v49 = vsel %vm4216_vm15, %v4200_v36, %v3692_v5  ;;  %v3904_v54 = vsel %vm3886_vm5, %v3871_v37, %v12435_v6  ;;  %v1372_v5 = vld [vmem:[#allocation2 + $0x410] ss:$2 sm:$0xff]  ;;  %v677_v37 = vld [vmem:[%s11149_s14 + $0x3c8] sm:$0xff] }
 0x345   : > { %3191 = vrot.lane.b32.xlu1 %v1560_v44, %s16787_s0  ;;  %3065 = vrot.lane.b32.xlu0 %v1498_v50, %s16785_s24  ;;  %v1120_v44 = vld [vmem:[#allocation2 + $0x438] ss:$2 sm:$0xff]  ;;  %v1059_v50 = vld [vmem:[#allocation2 + $0x423] ss:$2 sm:$0xff]  ;;  %v3937_v26 = vsel %vm3919_vm6, %v3904_v54, %v12473_v17  ;;  %806 = vst.msk [vmem:[#allocation2 + $0x4e1] sm:$0xff] %vm384_vm0, %v677_v37 }
 0x346   : > { %9455 = vmatprep.mubr.msk.f32.mxu0 %vm4258_vm1, %v4233_v49  ;;  %v3970_v55 = vsel %vm3952_vm7, %v3937_v26, %v12529_v30  ;;  %v1310_v49 = vld [vmem:[#allocation2 + $0x3fb] ss:$2 sm:$0xff]  ;;  %v1814_v54 = vld [vmem:[#allocation2 + $0x3ab] ss:$2 sm:$0xff] }
 0x347   : > { %v12826_v61 = vpop.permute.xlu1 %2295  ;;  %v12828_v3 = vpop.permute.xlu0 %2169  ;;  %v4003_v23 = vsel %vm3985_vm8, %v3970_v55, %v12577_v2  ;;  %v679_v26 = vld [vmem:[%s11149_s14 + $0x3d8] sm:$0xff] }
 0x348   : > { %v4036_v6 = vsel %vm4018_vm9, %v4003_v23, %v12601_v22  ;;  %v1184_v55 = vld [vmem:[#allocation2 + $0x439] ss:$2 sm:$0xff]  ;;  %v1122_v23 = vld [vmem:[#allocation2 + $0x448] ss:$2 sm:$0xff]  ;;  %808 = vst.msk [vmem:[#allocation2 + $0x4f1] sm:$0xff] %vm384_vm0, %v679_v26 }
 0x349   : > { %3699 = vrot.lane.b32.xlu1 %v1812_v31, %s16792_s28  ;;  %3573 = vrot.lane.b32.xlu0 %v1750_v56, %s16791_s23  ;;  %v4069_v17 = vsel %vm4051_vm10, %v4036_v6, %v12651_v39  ;;  %v1624_v39 = vld [vmem:[#allocation2 + $0x3e8] ss:$2 sm:$0xff]  ;;  %v1562_v31 = vld [vmem:[#allocation2 + $0x3d3] ss:$2 sm:$0xff] }
 0x34a   : > { %v4102_v2 = vsel %vm4084_vm11, %v4069_v17, %v12704_v27  ;;  %v1374_v17 = vld [vmem:[#allocation2 + $0x420] ss:$2 sm:$0xff] }
 0x34b   : > { %v12840_v60 = vpop.permute.xlu1 %2803  ;;  %v12842_v36 = vpop.permute.xlu0 %2677  ;;  %v4135_v21 = vsel %vm4117_vm12, %v4102_v2, %v12735_v35  ;;  %v676_v35 = vld [vmem:[%s11149_s14 + $0x3c0] sm:$0xff] }
 0x34c   : > { %v4168_v22 = vsel %vm4150_vm13, %v4135_v21, %v12757_v47  ;;  %v933_v47 = vld [vmem:[#allocation2 + $0x461] ss:$2 sm:$0xff]  ;;  %805 = vst.msk [vmem:[#allocation2 + $0x4d9] sm:$0xff] %vm384_vm0, %v676_v35 }
 0x34d   : > { %2303 = vrot.lane.b32.xlu1 %v1120_v44, %s16781_s22  ;;  %2177 = vrot.lane.b32.xlu0 %v1059_v50, %s16786_s16  ;;  %v4201_v56 = vsel %vm4183_vm14, %v4168_v22, %v3566_v53  ;;  %v678_v50 = vld [vmem:[%s11149_s14 + $0x3d0] sm:$0xff] }
 0x34e   : > { %807 = vst.msk [vmem:[#allocation2 + $0x4e9] sm:$0xff] %vm384_vm0, %v678_v50  ;;  %v1688_v22 = vld [vmem:[#allocation2 + $0x3e9] ss:$2 sm:$0xff] }
 0x34f   : > { %v12854_v24 = vpop.permute.xlu1 %3311  ;;  %v12856_v30 = vpop.permute.xlu0 %3185 }
 0x351   : > { %2811 = vrot.lane.b32.xlu1 %v1372_v5, %s16779_s25  ;;  %2685 = vrot.lane.b32.xlu0 %v1310_v49, %s16777_s30  ;;  %v1436_v49 = vld [vmem:[#allocation2 + $0x411] ss:$2 sm:$0xff] }
 0x353   : > { %v12867_v16 = vpop.permute.xlu1 %1915  ;;  %v3694_v40 = vpop.permute.xlu0 %3693 }
 0x354   : > { %v4234_v27 = vsel %vm4216_vm15, %v4201_v56, %v3694_v40  ;;  %v997_v40 = vld [vmem:[#allocation2 + $0x462] ss:$2 sm:$0xff] }
 0x355   : > { %3319 = vrot.lane.b32.xlu1 %v1624_v39, %s16789_s26  ;;  %3193 = vrot.lane.b32.xlu0 %v1562_v31, %s16787_s0  ;;  %v1626_v39 = vld [vmem:[#allocation2 + $0x3f8] ss:$2 sm:$0xff] }
 0x356   : > { %9456 = vmatmul.mubr.msk.f32.gmra.mrb[16].mxu0 %vm4258_vm1, %v4234_v27  ;;  %v935_v27 = vld [vmem:[#allocation2 + $0x471] ss:$2 sm:$0xff] }
 0x357   : > { %v12877_v53 = vpop.permute.xlu1 %2423  ;;  %v12879_v44 = vpop.permute.xlu0 %2297 }
 0x359   : > { %1923 = vrot.lane.b32.xlu1 %v933_v47, %s16788_s1  ;;  %3701 = vrot.lane.b32.xlu0 %v1814_v54, %s16792_s28  ;;  %v1248_v47 = vld [vmem:[#allocation2 + $0x43a] ss:$2 sm:$0xff]  ;;  %v1186_v54 = vld [vmem:[#allocation2 + $0x449] ss:$2 sm:$0xff] }
 0x35b   : > { %v12887_v6 = vpop.permute.xlu1 %2931  ;;  %v12889_v5 = vpop.permute.xlu0 %2805 }
 0x35d   : > { %2431 = vrot.lane.b32.xlu1 %v1184_v55, %s16780_s29  ;;  %2305 = vrot.lane.b32.xlu0 %v1122_v23, %s16781_s22  ;;  %v1500_v55 = vld [vmem:[#allocation2 + $0x412] ss:$2 sm:$0xff]  ;;  %v1438_v23 = vld [vmem:[#allocation2 + $0x421] ss:$2 sm:$0xff] }
 0x35f   : > { %v3440_v2 = vpop.permute.xlu1 %3439  ;;  %v12893_v21 = vpop.permute.xlu0 %3313 }
 0x361   : > { %2939 = vrot.lane.b32.xlu1 %v1436_v49, %s16782_s12  ;;  %2813 = vrot.lane.b32.xlu0 %v1374_v17, %s16779_s25  ;;  %v849_v49 = vld [vmem:[#allocation2 + $0x2d0] ss:$2 sm:$0xff] }
 0x363   : > { %v12897_v31 = vpop.permute.xlu1 %2043  ;;  %v12899_v56 = vpop.permute.xlu0 %1917 }
 0x364   : > { %16835 = vst [vmem:[#allocation15_spill] sm:$0xff] %v12899_v56 }
 0x365   : > { %3447 = vrot.lane.b32.xlu1 %v1688_v22, %s16790_s19  ;;  %3321 = vrot.lane.b32.xlu0 %v1626_v39, %s16789_s26  ;;  %v3773_v39 = vsel %vm384_vm0, %v849_v49, %v12399_v41  ;;  %v999_v49 = vld [vmem:[#allocation2 + $0x472] ss:$2 sm:$0xff] }
 0x367   : > { %v12903_v35 = vpop.permute.xlu1 %2551  ;;  %v12905_v37 = vpop.permute.xlu0 %2425 }
 0x369   : > { %2051 = vrot.lane.b32.xlu1 %v997_v40, %s16783_s13  ;;  %1925 = vrot.lane.b32.xlu0 %v935_v27, %s16788_s1  ;;  %v1752_v40 = vld [vmem:[#allocation2 + $0x3ea] ss:$2 sm:$0xff]  ;;  %v1690_v27 = vld [vmem:[#allocation2 + $0x3f9] ss:$2 sm:$0xff] }
 0x36b   : > { %v12909_v50 = vpop.permute.xlu1 %3059  ;;  %v12911_v26 = vpop.permute.xlu0 %2933 }
 0x36d   : > { %2559 = vrot.lane.b32.xlu1 %v1248_v47, %s16784_s15  ;;  %2433 = vrot.lane.b32.xlu0 %v1186_v54, %s16780_s29  ;;  %v3806_v47 = vsel %vm3787_vm2, %v3773_v39, %v12427_v7 }
 0x36e   : > { %v3839_v56 = vsel %vm3820_vm3, %v3806_v47, %v12453_v59 }
 0x36f   : > { %v3568_v17 = vpop.permute.xlu1 %3567  ;;  %v12915_v22 = vpop.permute.xlu0 %3441 }
 0x371   : > { %3067 = vrot.lane.b32.xlu1 %v1500_v55, %s16785_s24  ;;  %2941 = vrot.lane.b32.xlu0 %v1438_v23, %s16782_s12  ;;  %v3872_v55 = vsel %vm3853_vm4, %v3839_v56, %v12510_v43  ;;  %v1061_v23 = vld [vmem:[#allocation2 + $0x463] ss:$2 sm:$0xff] }
 0x372   : > { %v3905_v41 = vsel %vm3886_vm5, %v3872_v55, %v12565_v32 }
 0x373   : > { %v12923_v63 = vpop.permute.xlu1 %2171  ;;  %v12925_v54 = vpop.permute.xlu0 %2045  ;;  %v3938_v39 = vsel %vm3919_vm6, %v3905_v41, %v12593_v4 }
 0x374   : > { %v3971_v43 = vsel %vm3952_vm7, %v3938_v39, %v12631_v57  ;;  %v851_v39 = vld [vmem:[#allocation2 + $0x2e0] ss:$2 sm:$0xff] }
 0x375   : > { %v12931_v19 = vpop.f32.mrb[10].mxu0  ;;  %3575 = vrot.lane.b32.xlu1 %v1752_v40, %s16791_s23  ;;  %3449 = vrot.lane.b32.xlu0 %v1690_v27, %s16790_s19  ;;  %v4004_v56 = vsel %vm3985_vm8, %v3971_v43, %v12687_v58  ;;  %v1312_v40 = vld [vmem:[#allocation2 + $0x43b] ss:$2 sm:$0xff]  ;;  %v1250_v27 = vld [vmem:[#allocation2 + $0x44a] ss:$2 sm:$0xff] }
 0x376   : > { %v12937_v7 = vpop.f32.mrb[11].mxu0  ;;  %v4037_v32 = vsel %vm4018_vm9, %v4004_v56, %v12727_v28 }
 0x377   : > { %16836 = vst [vmem:[#allocation29_spill] sm:$0xff] %v12937_v7  ;;  %v12941_v59 = vpop.permute.xlu1 %2679  ;;  %v12943_v47 = vpop.permute.xlu0 %2553  ;;  %v4070_v4 = vsel %vm4051_vm10, %v4037_v32, %v12751_v51 }
 0x378   : > { %v4103_v57 = vsel %vm4084_vm11, %v4070_v4, %v12805_v38  ;;  %v3774_v38 = vsel %vm384_vm0, %v851_v39, %v12429_v10  ;;  %v681_v39 = vld [vmem:[%s11149_s14 + $0x3e8] sm:$0xff] }
 0x379   : > { %2179 = vrot.lane.b32.xlu1 %v1061_v23, %s16786_s16  ;;  %2053 = vrot.lane.b32.xlu0 %v999_v49, %s16783_s13  ;;  %v4136_v58 = vsel %vm4117_vm12, %v4103_v57, %v12854_v24  ;;  %v1564_v23 = vld [vmem:[#allocation2 + $0x413] ss:$2 sm:$0xff]  ;;  %v1502_v49 = vld [vmem:[#allocation2 + $0x422] ss:$2 sm:$0xff]  ;;  %810 = vst.msk [vmem:[#allocation2 + $0x509] sm:$0xff] %vm384_vm0, %v681_v39 }
 0x37a   : > { %v4169_v28 = vsel %vm4150_vm13, %v4136_v58, %v3440_v2  ;;  %v1816_v24 = vld [vmem:[#allocation2 + $0x3eb] ss:$2 sm:$0xff]  ;;  %v1754_v2 = vld [vmem:[#allocation2 + $0x3fa] ss:$2 sm:$0xff] }
 0x37b   : > { %v12955_v55 = vpop.permute.xlu1 %3187  ;;  %v12957_v41 = vpop.permute.xlu0 %3061  ;;  %v4202_v51 = vsel %vm4183_vm14, %v4169_v28, %v3568_v17  ;;  %v1063_v58 = vld [vmem:[#allocation2 + $0x473] ss:$2 sm:$0xff]  ;;  %v1630_v39 = vld [vmem:[#allocation2 + $0x448] ss:$2 sm:$0xff] }
 0x37d   : > { %2687 = vrot.lane.b32.xlu1 %v1312_v40, %s16777_s30  ;;  %2561 = vrot.lane.b32.xlu0 %v1250_v27, %s16784_s15  ;;  %v3807_v40 = vsel %vm3787_vm2, %v3774_v38, %v12455_v46  ;;  %v1124_v46 = vld [vmem:[#allocation2 + $0x488] ss:$2 sm:$0xff] }
 0x37e   : > { %v3840_v4 = vsel %vm3820_vm3, %v3807_v40, %v12512_v48 }
 0x37f   : > { %v3696_v43 = vpop.permute.xlu1 %3695  ;;  %v3570_v56 = vpop.permute.xlu0 %3569  ;;  %v3873_v57 = vsel %vm3853_vm4, %v3840_v4, %v12567_v34  ;;  %v1566_v4 = vld [vmem:[#allocation2 + $0x423] ss:$2 sm:$0xff] }
 0x380   : > { %v4235_v32 = vsel %vm4216_vm15, %v4202_v51, %v3696_v43  ;;  %v3906_v10 = vsel %vm3886_vm5, %v3873_v57, %v12595_v45  ;;  %v680_v45 = vld [vmem:[%s11149_s14 + $0x3e0] sm:$0xff]  ;;  %v1314_v43 = vld [vmem:[#allocation2 + $0x44b] ss:$2 sm:$0xff] }
 0x381   : > { %3195 = vrot.lane.b32.xlu1 %v1564_v23, %s16787_s0  ;;  %3069 = vrot.lane.b32.xlu0 %v1502_v49, %s16785_s24  ;;  %v3939_v28 = vsel %vm3919_vm6, %v3906_v10, %v12633_v62  ;;  %v1376_v51 = vld [vmem:[#allocation2 + $0x460] ss:$2 sm:$0xff]  ;;  %809 = vst.msk [vmem:[#allocation2 + $0x501] sm:$0xff] %vm384_vm0, %v680_v45 }
 0x382   : > { %9458 = vmatprep.mubr.msk.f32.mxu0 %vm4258_vm1, %v4235_v32  ;;  %v3972_v48 = vsel %vm3952_vm7, %v3939_v28, %v12689_v15 }
 0x383   : > { %v12975_v27 = vpop.permute.xlu1 %2299  ;;  %v12977_v17 = vpop.permute.xlu0 %2173  ;;  %v4005_v34 = vsel %vm3985_vm8, %v3972_v48, %v12729_v1  ;;  %v1188_v48 = vld [vmem:[#allocation2 + $0x489] ss:$2 sm:$0xff] }
 0x384   : > { %v4038_v62 = vsel %vm4018_vm9, %v4005_v34, %v12753_v9  ;;  %v682_v9 = vld [vmem:[%s11149_s14 + $0x3f0] sm:$0xff] }
 0x385   : > { %3703 = vrot.lane.b32.xlu1 %v1816_v24, %s16792_s28  ;;  %3577 = vrot.lane.b32.xlu0 %v1754_v2, %s16791_s23  ;;  %v4071_v15 = vsel %vm4051_vm10, %v4038_v62, %v12807_v11  ;;  %v683_v2 = vld [vmem:[%s11149_s14 + $0x3f8] sm:$0xff]  ;;  %811 = vst.msk [vmem:[#allocation2 + $0x511] sm:$0xff] %vm384_vm0, %v682_v9  ;;  %v1440_v62 = vld [vmem:[#allocation2 + $0x461] ss:$2 sm:$0xff]  ;;  %s8819_s14 = sshll.u32 %s10777_s21, 4  ;;  %s10695_s21 = smov [#allocation4]  }
 0x386   : > { %v4104_v38 = vsel %vm4084_vm11, %v4071_v15, %v12856_v30  ;;  %v1628_v11 = vld [vmem:[#allocation2 + $0x438] ss:$2 sm:$0xff]  ;;  %812 = vst.msk [vmem:[#allocation2 + $0x519] sm:$0xff] %vm384_vm0, %v683_v2  ;;  %v1190_v15 = vld [vmem:[#allocation2 + $0x499] ss:$2 sm:$0xff] }
 0x387   : > { %v12989_v23 = vpop.permute.xlu1 %2807  ;;  %v12991_v49 = vpop.permute.xlu0 %2681  ;;  %v4137_v24 = vsel %vm4117_vm12, %v4104_v38, %v12893_v21  ;;  %v1692_v38 = vld [vmem:[#allocation2 + $0x439] ss:$2 sm:$0xff] }
 0x388   : > { %v4170_v40 = vsel %vm4150_vm13, %v4137_v24, %v12915_v22  ;;  %v1126_v22 = vld [vmem:[#allocation2 + $0x498] ss:$2 sm:$0xff]  ;;  %v1442_v2 = vld [vmem:[#allocation2 + $0x471] ss:$2 sm:$0xff] }
 0x389   : > { %2307 = vrot.lane.b32.xlu1 %v1124_v46, %s16781_s22  ;;  %2181 = vrot.lane.b32.xlu0 %v1063_v58, %s16786_s16  ;;  %v4203_v30 = vsel %vm4183_vm14, %v4170_v40, %v3570_v56  ;;  %v1818_v46 = vld [vmem:[#allocation2 + $0x3fb] ss:$2 sm:$0xff]  ;;  %v1378_v56 = vld [vmem:[#allocation2 + $0x470] ss:$2 sm:$0xff] }
 0x38a   : > { %v1252_v40 = vld [vmem:[#allocation2 + $0x48a] ss:$2 sm:$0xff] }
 0x38b   : > { %v13007_v1 = vpop.permute.xlu1 %3315  ;;  %v13009_v32 = vpop.permute.xlu0 %3189 }
 0x38d   : > { %2815 = vrot.lane.b32.xlu1 %v1376_v51, %s16779_s25  ;;  %2689 = vrot.lane.b32.xlu0 %v1314_v43, %s16777_s30 }
 0x38f   : > { %v13024_v57 = vpop.permute.xlu1 %1919  ;;  %v3698_v21 = vpop.permute.xlu0 %3697 }
 0x390   : > { %16837 = vst [vmem:[#allocation30_spill] sm:$0xff] %v13024_v57  ;;  %v4236_v10 = vsel %vm4216_vm15, %v4203_v30, %v3698_v21  ;;  %v1694_v30 = vld [vmem:[#allocation2 + $0x449] ss:$2 sm:$0xff]  ;;  %v1504_v21 = vld [vmem:[#allocation2 + $0x462] ss:$2 sm:$0xff] }
 0x391   : > { %3323 = vrot.lane.b32.xlu1 %v1628_v11, %s16789_s26  ;;  %3197 = vrot.lane.b32.xlu0 %v1566_v4, %s16787_s0 }
 0x392   : > { %9459 = vmatmul.mubr.msk.f32.gmra.mrb[18].mxu0 %vm4258_vm1, %v4236_v10 }
 0x393   : > { %v13030_v58 = vpop.permute.xlu1 %2427  ;;  %v13032_v28 = vpop.permute.xlu0 %2301 }
 0x395   : > { %2309 = vrot.lane.b32.xlu1 %v1126_v22, %s16781_s22  ;;  %3705 = vrot.lane.b32.xlu0 %v1818_v46, %s16792_s28  ;;  %v1254_v46 = vld [vmem:[#allocation2 + $0x49a] ss:$2 sm:$0xff] }
 0x397   : > { %v13036_v34 = vpop.permute.xlu1 %2935  ;;  %v13038_v45 = vpop.permute.xlu0 %2809 }
 0x399   : > { %2817 = vrot.lane.b32.xlu1 %v1378_v56, %s16779_s25  ;;  %2435 = vrot.lane.b32.xlu0 %v1188_v48, %s16780_s29  ;;  %v1756_v56 = vld [vmem:[#allocation2 + $0x43a] ss:$2 sm:$0xff] }
 0x39a   : > { %v853_v48 = vld [vmem:[#allocation2 + $0x320] ss:$2 sm:$0xff] }
 0x39b   : > { %v3444_v51 = vpop.permute.xlu1 %3443  ;;  %v13042_v43 = vpop.permute.xlu0 %3317 }
 0x39d   : > { %3325 = vrot.lane.b32.xlu1 %v1630_v39, %s16789_s26  ;;  %2943 = vrot.lane.b32.xlu0 %v1440_v62, %s16782_s12 }
 0x39f   : > { %v13046_v24 = vpop.permute.xlu1 %2047  ;;  %v13048_v9 = vpop.permute.xlu0 %1921 }
 0x3a0   : > { %16838 = vst [vmem:[#allocation31_spill] sm:$0xff] %v13046_v24  ;;  %16839 = vst [vmem:[#allocation32_spill] sm:$0xff] %v13048_v9  ;;  %v16841_v9 = vld [vmem:[#allocation24_spill] sm:$0xff] }
 0x3a1   : > { %2437 = vrot.lane.b32.xlu1 %v1190_v15, %s16780_s29  ;;  %3451 = vrot.lane.b32.xlu0 %v1692_v38, %s16790_s19  ;;  %v16840_v15 = vld [vmem:[#allocation21_spill] sm:$0xff] }
 0x3a2   : > { %v3775_v38 = vsel %vm384_vm0, %v853_v48, %v16840_v15  ;;  %v1758_v48 = vld [vmem:[#allocation2 + $0x44a] ss:$2 sm:$0xff]  ;;  %v1568_v15 = vld [vmem:[#allocation2 + $0x463] ss:$2 sm:$0xff] }
 0x3a3   : > { %v13052_v11 = vpop.permute.xlu1 %2555  ;;  %v13054_v4 = vpop.permute.xlu0 %2429 }
 0x3a5   : > { %2945 = vrot.lane.b32.xlu1 %v1442_v2, %s16782_s12  ;;  %2563 = vrot.lane.b32.xlu0 %v1252_v40, %s16784_s15  ;;  %v1506_v2 = vld [vmem:[#allocation2 + $0x472] ss:$2 sm:$0xff]  ;;  %v1316_v40 = vld [vmem:[#allocation2 + $0x48b] ss:$2 sm:$0xff] }
 0x3a7   : > { %v13058_v10 = vpop.permute.xlu1 %3063  ;;  %v13060_v22 = vpop.permute.xlu0 %2937 }
 0x3a9   : > { %3453 = vrot.lane.b32.xlu1 %v1694_v30, %s16790_s19  ;;  %3071 = vrot.lane.b32.xlu0 %v1504_v21, %s16785_s24  ;;  %v3808_v30 = vsel %vm3787_vm2, %v3775_v38, %v16841_v9 }
 0x3aa   : > { %v3841_v7 = vsel %vm3820_vm3, %v3808_v30, %v12613_v33 }
 0x3ab   : > { %v3572_v39 = vpop.permute.xlu1 %3571  ;;  %v13064_v62 = vpop.permute.xlu0 %3445 }
 0x3ad   : > { %2565 = vrot.lane.b32.xlu1 %v1254_v46, %s16784_s15  ;;  %3579 = vrot.lane.b32.xlu0 %v1756_v56, %s16791_s23  ;;  %v3874_v46 = vsel %vm3853_vm4, %v3841_v7, %v12670_v0 }
 0x3ae   : > { %v3907_v56 = vsel %vm3886_vm5, %v3874_v46, %v12721_v29 }
 0x3af   : > { %v13072_v24 = vpop.permute.xlu1 %2175  ;;  %v13074_v21 = vpop.permute.xlu0 %2049  ;;  %v3940_v38 = vsel %vm3919_vm6, %v3907_v56, %v12745_v12 }
 0x3b0   : > { %16842 = vst [vmem:[#allocation21_spill] sm:$0xff] %v13074_v21  ;;  %v3973_v0 = vsel %vm3952_vm7, %v3940_v38, %v12787_v42  ;;  %v855_v38 = vld [vmem:[#allocation2 + $0x330] ss:$2 sm:$0xff] }
 0x3b1   : > { %v13080_v57 = vpop.f32.mrb[12].mxu0  ;;  %3073 = vrot.lane.b32.xlu1 %v1506_v2, %s16785_s24  ;;  %2691 = vrot.lane.b32.xlu0 %v1316_v40, %s16777_s30  ;;  %v4006_v7 = vsel %vm3985_vm8, %v3973_v0, %v12840_v60  ;;  %v1318_v2 = vld [vmem:[#allocation2 + $0x49b] ss:$2 sm:$0xff] }
 0x3b2   : > { %v13086_v9 = vpop.f32.mrb[13].mxu0  ;;  %v4039_v29 = vsel %vm4018_vm9, %v4006_v7, %v12887_v6  ;;  %v1820_v40 = vld [vmem:[#allocation2 + $0x43b] ss:$2 sm:$0xff] }
 0x3b3   : > { %v13090_v33 = vpop.permute.xlu1 %2683  ;;  %v13092_v30 = vpop.permute.xlu0 %2557  ;;  %v4072_v12 = vsel %vm4051_vm10, %v4039_v29, %v12909_v50 }
 0x3b4   : > { %v4105_v42 = vsel %vm4084_vm11, %v4072_v12, %v12955_v55  ;;  %v16843_v55 = vld [vmem:[#allocation25_spill] sm:$0xff] }
 0x3b5   : > { %3581 = vrot.lane.b32.xlu1 %v1758_v48, %s16791_s23  ;;  %3199 = vrot.lane.b32.xlu0 %v1568_v15, %s16787_s0  ;;  %v4138_v60 = vsel %vm4117_vm12, %v4105_v42, %v13007_v1  ;;  %v1570_v48 = vld [vmem:[#allocation2 + $0x473] ss:$2 sm:$0xff]  ;;  %v1380_v15 = vld [vmem:[#allocation2 + $0x4b0] ss:$2 sm:$0xff]  ;;  %v3776_v1 = vsel %vm384_vm0, %v855_v38, %v16843_v55 }
 0x3b6   : > { %v4171_v6 = vsel %vm4150_vm13, %v4138_v60, %v3444_v51  ;;  %v1632_v51 = vld [vmem:[#allocation2 + $0x488] ss:$2 sm:$0xff] }
 0x3b7   : > { %v13104_v46 = vpop.permute.xlu1 %3191  ;;  %v13106_v56 = vpop.permute.xlu0 %3065  ;;  %v4204_v50 = vsel %vm4183_vm14, %v4171_v6, %v3572_v39 }
 0x3b9   : > { %2693 = vrot.lane.b32.xlu1 %v1318_v2, %s16777_s30  ;;  %3707 = vrot.lane.b32.xlu0 %v1820_v40, %s16792_s28  ;;  %v1822_v2 = vld [vmem:[#allocation2 + $0x44b] ss:$2 sm:$0xff]  ;;  %v3809_v40 = vsel %vm3787_vm2, %v3776_v1, %v12615_v8 }
 0x3ba   : > { %v3842_v42 = vsel %vm3820_vm3, %v3809_v40, %v12672_v13 }
 0x3bb   : > { %v3700_v0 = vpop.permute.xlu1 %3699  ;;  %v3574_v7 = vpop.permute.xlu0 %3573  ;;  %v3875_v60 = vsel %vm3853_vm4, %v3842_v42, %v12723_v52 }
 0x3bc   : > { %v4237_v29 = vsel %vm4216_vm15, %v4204_v50, %v3700_v0  ;;  %v3908_v6 = vsel %vm3886_vm5, %v3875_v60, %v12747_v25  ;;  %v1696_v0 = vld [vmem:[#allocation2 + $0x489] ss:$2 sm:$0xff] }
 0x3bd   : > { %3201 = vrot.lane.b32.xlu1 %v1570_v48, %s16787_s0  ;;  %2819 = vrot.lane.b32.xlu0 %v1380_v15, %s16779_s25  ;;  %v1444_v48 = vld [vmem:[#allocation2 + $0x4b1] ss:$2 sm:$0xff]  ;;  %v1382_v15 = vld [vmem:[#allocation2 + $0x4c0] ss:$2 sm:$0xff]  ;;  %v3941_v8 = vsel %vm3919_vm6, %v3908_v6, %v12789_v14 }
 0x3be   : > { %9461 = vmatprep.mubr.msk.f32.mxu0 %vm4258_vm1, %v4237_v29  ;;  %v3974_v13 = vsel %vm3952_vm7, %v3941_v8, %v12842_v36  ;;  %v1634_v29 = vld [vmem:[#allocation2 + $0x498] ss:$2 sm:$0xff] }
 0x3bf   : > { %v13124_v12 = vpop.permute.xlu1 %2303  ;;  %v13126_v39 = vpop.permute.xlu0 %2177  ;;  %v4007_v52 = vsel %vm3985_vm8, %v3974_v13, %v12889_v5  ;;  %v1824_v13 = vld [vmem:[#allocation2 + $0x48b] ss:$2 sm:$0xff] }
 0x3c0   : > { %16844 = vst [vmem:[#allocation24_spill] sm:$0xff] %v13126_v39  ;;  %v4040_v25 = vsel %vm4018_vm9, %v4007_v52, %v12911_v26  ;;  %v1762_v52 = vld [vmem:[#allocation2 + $0x49a] ss:$2 sm:$0xff] }
 0x3c1   : > { %3709 = vrot.lane.b32.xlu1 %v1822_v2, %s16792_s28  ;;  %3327 = vrot.lane.b32.xlu0 %v1632_v51, %s16789_s26  ;;  %v4073_v14 = vsel %vm4051_vm10, %v4040_v25, %v12957_v41  ;;  %v1508_v2 = vld [vmem:[#allocation2 + $0x4b2] ss:$2 sm:$0xff]  ;;  %v1446_v51 = vld [vmem:[#allocation2 + $0x4c1] ss:$2 sm:$0xff] }
 0x3c2   : > { %v4106_v36 = vsel %vm4084_vm11, %v4073_v14, %v13009_v32  ;;  %v1760_v32 = vld [vmem:[#allocation2 + $0x48a] ss:$2 sm:$0xff]  ;;  %v1574_v14 = vld [vmem:[#allocation2 + $0x4c3] ss:$2 sm:$0xff] }
 0x3c3   : > { %v13138_v38 = vpop.permute.xlu1 %2811  ;;  %v13140_v50 = vpop.permute.xlu0 %2685  ;;  %v4139_v5 = vsel %vm4117_vm12, %v4106_v36, %v13042_v43  ;;  %v1698_v43 = vld [vmem:[#allocation2 + $0x499] ss:$2 sm:$0xff] }
 0x3c4   : > { %v4172_v26 = vsel %vm4150_vm13, %v4139_v5, %v13064_v62 }
 0x3c5   : > { %2947 = vrot.lane.b32.xlu1 %v1444_v48, %s16782_s12  ;;  %2821 = vrot.lane.b32.xlu0 %v1382_v15, %s16779_s25  ;;  %v4205_v41 = vsel %vm4183_vm14, %v4172_v26, %v3574_v7  ;;  %v1572_v7 = vld [vmem:[#allocation2 + $0x4b3] ss:$2 sm:$0xff]  ;;  %v1510_v48 = vld [vmem:[#allocation2 + $0x4c2] ss:$2 sm:$0xff] }
 0x3c6   : > { %v1638_v26 = vld [vmem:[#allocation2 + $0x4e8] ss:$2 sm:$0xff] }
 0x3c7   : > { %v13152_v55 = vpop.permute.xlu1 %3319  ;;  %v13154_v1 = vpop.permute.xlu0 %3193 }
 0x3c9   : > { %3455 = vrot.lane.b32.xlu1 %v1696_v0, %s16790_s19  ;;  %3329 = vrot.lane.b32.xlu0 %v1634_v29, %s16789_s26  ;;  %v1636_v29 = vld [vmem:[#allocation2 + $0x4d8] ss:$2 sm:$0xff] }
 0x3cb   : > { %v13165_v40 = vpop.permute.xlu1 %1923  ;;  %v3702_v42 = vpop.permute.xlu0 %3701 }
 0x3cc   : > { %16845 = vst [vmem:[#allocation25_spill] sm:$0xff] %v13165_v40  ;;  %v4238_v60 = vsel %vm4216_vm15, %v4205_v41, %v3702_v42  ;;  %v1702_v42 = vld [vmem:[#allocation2 + $0x4e9] ss:$2 sm:$0xff] }
 0x3cd   : > { %3075 = vrot.lane.b32.xlu1 %v1508_v2, %s16785_s24  ;;  %2949 = vrot.lane.b32.xlu0 %v1446_v51, %s16782_s12  ;;  %v1826_v2 = vld [vmem:[#allocation2 + $0x49b] ss:$2 sm:$0xff]  ;;  %v16852_v40 = vld [vmem:[#allocation14_spill] sm:$0xff] }
 0x3ce   : > { %9462 = vmatmul.mubr.msk.f32.gmra.mrb[20].mxu0 %vm4258_vm1, %v4238_v60  ;;  %v1700_v60 = vld [vmem:[#allocation2 + $0x4d9] ss:$2 sm:$0xff] }
 0x3cf   : > { %v13171_v6 = vpop.permute.xlu1 %2431  ;;  %v13173_v62 = vpop.permute.xlu0 %2305 }
 0x3d0   : > { %16846 = vst [vmem:[#allocation33_spill] sm:$0xff] %v13173_v62  ;;  %v16854_v62 = vld [vmem:[#allocation13_spill] sm:$0xff] }
 0x3d1   : > { %3583 = vrot.lane.b32.xlu1 %v1760_v32, %s16791_s23  ;;  %3457 = vrot.lane.b32.xlu0 %v1698_v43, %s16790_s19 }
 0x3d3   : > { %v13177_v15 = vpop.permute.xlu1 %2939  ;;  %v13179_v8 = vpop.permute.xlu0 %2813 }
 0x3d5   : > { %3203 = vrot.lane.b32.xlu1 %v1572_v7, %s16787_s0  ;;  %3077 = vrot.lane.b32.xlu0 %v1510_v48, %s16785_s24  ;;  %v1766_v7 = vld [vmem:[#allocation2 + $0x4ea] ss:$2 sm:$0xff]  ;;  %v1764_v48 = vld [vmem:[#allocation2 + $0x4da] ss:$2 sm:$0xff] }
 0x3d7   : > { %v13183_v25 = vpop.permute.xlu1 %3447  ;;  %v13185_v0 = vpop.permute.xlu0 %3321 }
 0x3d9   : > { %3711 = vrot.lane.b32.xlu1 %v1824_v13, %s16792_s28  ;;  %3585 = vrot.lane.b32.xlu0 %v1762_v52, %s16791_s23  ;;  %v857_v13 = vld [vmem:[#allocation2 + $0x370] ss:$2 sm:$0xff] }
 0x3db   : > { %v13189_v36 = vpop.permute.xlu1 %2051  ;;  %v13191_v5 = vpop.permute.xlu0 %1925 }
 0x3dc   : > { %16847 = vst [vmem:[#allocation34_spill] sm:$0xff] %v13189_v36  ;;  %16848 = vst [vmem:[#allocation35_spill] sm:$0xff] %v13191_v5  ;;  %v16851_v36 = vld [vmem:[#allocation12_spill] sm:$0xff] }
 0x3dd   : > { %3331 = vrot.lane.b32.xlu1 %v1636_v29, %s16789_s26  ;;  %3205 = vrot.lane.b32.xlu0 %v1574_v14, %s16787_s0  ;;  %v13212_v14 = vld [vmem:[%s16705_s2] ss:$0 sm:$0xff] }
 0x3de   : > { %v13220_v5 = vadd.f32 %v16851_v36, %v13212_v14 }
 0x3df   : > { %v13195_v51 = vpop.permute.xlu1 %2559  ;;  %v13197_v41 = vpop.permute.xlu0 %2433 }
 0x3e0   : > { %16849 = vst [vmem:[#allocation36_spill] sm:$0xff] %v13197_v41  ;;  %v13224_v41 = vadd.f32 %v13212_v14, %v16852_v40  ;;  %v16753_v36 = vmax.f32 %v13220_v5, 0.0 }
 0x3e1   : > { %3333 = vrot.lane.b32.xlu1 %v1638_v26, %s16789_s26  ;;  %3713 = vrot.lane.b32.xlu0 %v1826_v2, %s16792_s28  ;;  %v16850_v26 = vld [vmem:[#allocation20_spill] sm:$0xff] }
 0x3e2   : > { %v3777_v2 = vsel %vm384_vm0, %v857_v13, %v16850_v26  ;;  %16853 = vst [vmem:[#allocation20_spill] sm:$0xff] %v13224_v41 }
 0x3e3   : > { %v13201_v32 = vpop.permute.xlu1 %3067  ;;  %v13203_v43 = vpop.permute.xlu0 %2941  ;;  %v3810_v39 = vsel %vm3787_vm2, %v3777_v2, %v16854_v62  ;;  %v16752_v2 = vmax.f32 %v13224_v41, 0.0 }
 0x3e5   : > { %3461 = vrot.lane.b32.xlu1 %v1702_v42, %s16790_s19  ;;  %3459 = vrot.lane.b32.xlu0 %v1700_v60, %s16790_s19  ;;  %v1830_v42 = vld [vmem:[#allocation2 + $0x4eb] ss:$2 sm:$0xff]  ;;  %v1828_v60 = vld [vmem:[#allocation2 + $0x4db] ss:$2 sm:$0xff] }
 0x3e7   : > { %v3576_v52 = vpop.permute.xlu1 %3575  ;;  %v13207_v29 = vpop.permute.xlu0 %3449 }
 0x3e9   : > { %3589 = vrot.lane.b32.xlu1 %v1766_v7, %s16791_s23  ;;  %3587 = vrot.lane.b32.xlu0 %v1764_v48, %s16791_s23  ;;  %v3843_v48 = vsel %vm3820_vm3, %v3810_v39, %v12768_v20 }
 0x3ea   : > { %v3876_v13 = vsel %vm3853_vm4, %v3843_v48, %v12826_v61  ;;  %v937_v48 = vld [vmem:[#allocation2 + $0x4b1] ss:$2 sm:$0xff] }
 0x3eb   : > { %v13228_v21 = vpop.permute.xlu1 %2179  ;;  %v13230_v7 = vpop.permute.xlu0 %2053  ;;  %v3909_v40 = vsel %vm3886_vm5, %v3876_v13, %v12877_v53 }
 0x3ec   : > { %v3942_v20 = vsel %vm3919_vm6, %v3909_v40, %v12903_v35  ;;  %v939_v35 = vld [vmem:[#allocation2 + $0x4c1] ss:$2 sm:$0xff] }
 0x3ed   : > { %v13236_v26 = vpop.f32.mrb[14].mxu0  ;;  %3717 = vrot.lane.b32.xlu1 %v1830_v42, %s16792_s28  ;;  %3715 = vrot.lane.b32.xlu0 %v1828_v60, %s16792_s28  ;;  %v3975_v42 = vsel %vm3952_vm7, %v3942_v20, %v12941_v59 }
 0x3ee   : > { %v13242_v62 = vpop.f32.mrb[15].mxu0  ;;  %v4008_v60 = vsel %vm3985_vm8, %v3975_v42, %v12989_v23  ;;  %v1003_v42 = vld [vmem:[#allocation2 + $0x4c2] ss:$2 sm:$0xff] }
 0x3ef   : > { %v13248_v39 = vpop.permute.xlu1 %2687  ;;  %v13250_v61 = vpop.permute.xlu0 %2561  ;;  %v4041_v53 = vsel %vm4018_vm9, %v4008_v60, %v13036_v34  ;;  %v1001_v60 = vld [vmem:[#allocation2 + $0x4b2] ss:$2 sm:$0xff] }
 0x3f0   : > { %v4074_v59 = vsel %vm4051_vm10, %v4041_v53, %v13058_v10  ;;  %v859_v10 = vld [vmem:[#allocation2 + $0x380] ss:$2 sm:$0xff] }
 0x3f1   : > { %4646 = vrot.lane.b32.xlu1 %v16753_v36, %s10690_s17  ;;  %4644 = vrot.lane.b32.xlu0 %v16752_v2, %s10690_s17  ;;  %v4107_v40 = vsel %vm4084_vm11, %v4074_v59, %v13104_v46  ;;  %v16855_v46 = vld [vmem:[#allocation26_spill] sm:$0xff] }
 0x3f2   : > { %v4140_v20 = vsel %vm4117_vm12, %v4107_v40, %v13152_v55  ;;  %v3778_v55 = vsel %vm384_vm0, %v859_v10, %v16855_v46  ;;  %v1194_v10 = vld [vmem:[#allocation2 + $0x4e9] ss:$2 sm:$0xff] }
 0x3f3   : > { %v13266_v13 = vpop.permute.xlu1 %3195  ;;  %v13268_v23 = vpop.permute.xlu0 %3069  ;;  %v4173_v34 = vsel %vm4150_vm13, %v4140_v20, %v13183_v25  ;;  %v1065_v25 = vld [vmem:[#allocation2 + $0x4b3] ss:$2 sm:$0xff]  ;;  %v1130_v20 = vld [vmem:[#allocation2 + $0x4e8] ss:$2 sm:$0xff] }
 0x3f4   : > { %v4206_v53 = vsel %vm4183_vm14, %v4173_v34, %v3576_v52  ;;  %v1128_v34 = vld [vmem:[#allocation2 + $0x4d8] ss:$2 sm:$0xff] }
 0x3f5   : > { %1929 = vrot.lane.b32.xlu1 %v939_v35, %s16788_s1  ;;  %1927 = vrot.lane.b32.xlu0 %v937_v48, %s16788_s1  ;;  %v1067_v35 = vld [vmem:[#allocation2 + $0x4c3] ss:$2 sm:$0xff]  ;;  %v3811_v48 = vsel %vm3787_vm2, %v3778_v55, %v12770_v18 }
 0x3f7   : > { %v3704_v2 = vpop.permute.xlu1 %3703  ;;  %v3578_v36 = vpop.permute.xlu0 %3577 }
 0x3f8   : > { %v4239_v41 = vsel %vm4216_vm15, %v4206_v53, %v3704_v2  ;;  %v3844_v2 = vsel %vm3820_vm3, %v3811_v48, %v12828_v3  ;;  %v1192_v53 = vld [vmem:[#allocation2 + $0x4d9] ss:$2 sm:$0xff] }
 0x3f9   : > { %2057 = vrot.lane.b32.xlu1 %v1003_v42, %s16783_s13  ;;  %2055 = vrot.lane.b32.xlu0 %v1001_v60, %s16783_s13  ;;  %v3877_v40 = vsel %vm3853_vm4, %v3844_v2, %v12879_v44  ;;  %s377_s13 = sand.u32 1, %s10664_s18  }
 0x3fa   : > { %9464 = vmatprep.mubr.msk.f32.mxu0 %vm4258_vm1, %v4239_v41  ;;  %v3910_v41 = vsel %vm3886_vm5, %v3877_v40, %v12905_v37  ;;  %s378_s1 = scalar_lea.vmem [#allocation4], %s377_s13 }
 0x3fb   : > { %v13287_v59 = vpop.permute.xlu1 %2307  ;;  %v13289_v52 = vpop.permute.xlu0 %2181  ;;  %v3943_v18 = vsel %vm3919_vm6, %v3910_v41, %v12943_v47  ;;  %v16856_v41 = vld [vmem:[#allocation23_spill] sm:$0xff] }
 0x3fc   : > { %v3976_v3 = vsel %vm3952_vm7, %v3943_v18, %v12991_v49  ;;  %v16858_v18 = vld [vmem:[#allocation22_spill] sm:$0xff] }
 0x3fd   : > { %2185 = vrot.lane.b32.xlu1 %v1067_v35, %s16786_s16  ;;  %2183 = vrot.lane.b32.xlu0 %v1065_v25, %s16786_s16  ;;  %v4009_v44 = vsel %vm3985_vm8, %v3976_v3, %v13038_v45  ;;  %v1258_v35 = vld [vmem:[#allocation2 + $0x4ea] ss:$2 sm:$0xff]  ;;  %v1256_v25 = vld [vmem:[#allocation2 + $0x4da] ss:$2 sm:$0xff]  ;;  %v13346_v3 = vadd.f32 %v16858_v18, %v13212_v14 }
 0x3fe   : > { %v4042_v37 = vsel %vm4018_vm9, %v4009_v44, %v13060_v22  ;;  %v861_v18 = vld [vmem:[#allocation2 + $0x3c0] ss:$2 sm:$0xff] }
 0x3ff   : > { %v13301_v42 = vpop.permute.xlu1 %2815  ;;  %v13303_v60 = vpop.permute.xlu0 %2689  ;;  %v4075_v47 = vsel %vm4051_vm10, %v4042_v37, %v13106_v56 }
 0x400   : > { %v4108_v49 = vsel %vm4084_vm11, %v4075_v47, %v13154_v1  ;;  %v1322_v1 = vld [vmem:[#allocation2 + $0x4eb] ss:$2 sm:$0xff] }
 0x401   : > { %2313 = vrot.lane.b32.xlu1 %v1130_v20, %s16781_s22  ;;  %2311 = vrot.lane.b32.xlu0 %v1128_v34, %s16781_s22  ;;  %v4141_v45 = vsel %vm4117_vm12, %v4108_v49, %v13185_v0  ;;  %v1320_v0 = vld [vmem:[#allocation2 + $0x4db] ss:$2 sm:$0xff]  ;;  %v1384_v34 = vld [vmem:[#allocation2 + $0x500] ss:$2 sm:$0xff]  ;;  %v16859_v47 = vld [vmem:[#allocation18_spill] sm:$0xff] }
 0x402   : > { %v4174_v22 = vsel %vm4150_vm13, %v4141_v45, %v13207_v29  ;;  %v13336_v29 = vadd.f32 %v13212_v14, %v16856_v41  ;;  %v13359_v49 = vadd.f32 %v13212_v14, %v16859_v47  ;;  %v16757_v45 = vmax.f32 %v13346_v3, 0.0  ;;  %v1450_v41 = vld [vmem:[#allocation2 + $0x511] ss:$2 sm:$0xff] }
 0x403   : > { %v13315_v46 = vpop.permute.xlu1 %3323  ;;  %v13317_v55 = vpop.permute.xlu0 %3197  ;;  %v4207_v56 = vsel %vm4183_vm14, %v4174_v22, %v3578_v36 }
 0x404   : > { %16857 = vst [vmem:[#allocation12_spill] sm:$0xff] %v13336_v29  ;;  %v16756_v44 = vmax.f32 %v13336_v29, 0.0  ;;  %16860 = vst [vmem:[#allocation14_spill] sm:$0xff] %v13359_v49 }
 0x405   : > { %2441 = vrot.lane.b32.xlu1 %v1194_v10, %s16780_s29  ;;  %2439 = vrot.lane.b32.xlu0 %v1192_v53, %s16780_s29  ;;  %v1386_v53 = vld [vmem:[#allocation2 + $0x510] ss:$2 sm:$0xff] }
 0x407   : > { %v13328_v48 = vpop.permute.xlu1 %2309  ;;  %v3706_v2 = vpop.permute.xlu0 %3705 }
 0x408   : > { %v4240_v40 = vsel %vm4216_vm15, %v4207_v56, %v3706_v2  ;;  %v16861_v56 = vld [vmem:[#allocation16_spill] sm:$0xff] }
 0x409   : > { %2569 = vrot.lane.b32.xlu1 %v1258_v35, %s16784_s15  ;;  %2567 = vrot.lane.b32.xlu0 %v1256_v25, %s16784_s15  ;;  %v1448_v25 = vld [vmem:[#allocation2 + $0x501] ss:$2 sm:$0xff]  ;;  %v13370_v2 = vadd.f32 %v16861_v56, %v13212_v14  ;;  %v3779_v56 = vsel %vm384_vm0, %v861_v18, %v12867_v16  ;;  %s8237_s15 = scalar_lea.sflag [#allocation5], %s377_s13 }
 0x40a   : > { %9465 = vmatmul.mubr.msk.f32.gmra.mrb[22].mxu0 %vm4258_vm1, %v4240_v40  ;;  %v16755_v40 = vmax.f32 %v13359_v49, 0.0  ;;  %v1578_v18 = vld [vmem:[#allocation2 + $0x513] ss:$2 sm:$0xff] }
 0x40b   : > { %v13338_v20 = vpop.permute.xlu1 %2817  ;;  %v13340_v36 = vpop.permute.xlu0 %2435  ;;  %16862 = vst [vmem:[#allocation13_spill] sm:$0xff] %v13370_v2 }
 0x40d   : > { %2697 = vrot.lane.b32.xlu1 %v1322_v1, %s16777_s30  ;;  %2695 = vrot.lane.b32.xlu0 %v1320_v0, %s16777_s30 }
 0x40f   : > { %v13349_v37 = vpop.permute.xlu1 %3325  ;;  %v13351_v10 = vpop.permute.xlu0 %2943 }
 0x411   : > { %4652 = vrot.lane.b32.xlu1 %v16756_v44, %s10690_s17  ;;  %2823 = vrot.lane.b32.xlu0 %v1384_v34, %s16779_s25  ;;  %v16760_v34 = vmax.f32 %v13370_v2, 0.0  ;;  %v1512_v44 = vld [vmem:[#allocation2 + $0x502] ss:$2 sm:$0xff] }
 0x412   : > { %v16863_v2 = vld [vmem:[#allocation28_spill] sm:$0xff] }
 0x413   : > { %v13362_v22 = vpop.permute.xlu1 %2437  ;;  %v3452_v35 = vpop.permute.xlu0 %3451 }
 0x415   : > { %2825 = vrot.lane.b32.xlu1 %v1386_v53, %s16779_s25  ;;  %4654 = vrot.lane.b32.xlu0 %v16757_v45, %s10690_s17  ;;  %s10692_s25 = smov 32  }
 0x417   : > { %v13373_v1 = vpop.permute.xlu1 %2945  ;;  %v13375_v0 = vpop.permute.xlu0 %2563 }
 0x419   : > { %4648 = vrot.lane.b32.xlu1 %v16755_v40, %s10690_s17  ;;  %2951 = vrot.lane.b32.xlu0 %v1448_v25, %s16782_s12  ;;  %v1514_v40 = vld [vmem:[#allocation2 + $0x512] ss:$2 sm:$0xff]  ;;  %v3812_v25 = vsel %vm3787_vm2, %v3779_v56, %v12897_v31  ;;  %v13406_v31 = vadd.f32 %v13212_v14, %v16863_v2 }
 0x41a   : > { %v3845_v29 = vsel %vm3820_vm3, %v3812_v25, %v12923_v63  ;;  %v863_v56 = vld [vmem:[#allocation2 + $0x3d0] ss:$2 sm:$0xff] }
 0x41b   : > { %v13382_v53 = vpop.permute.xlu1 %3453  ;;  %v13384_v47 = vpop.permute.xlu0 %3071 }
 0x41d   : > { %2953 = vrot.lane.b32.xlu1 %v1450_v41, %s16782_s12  ;;  %4650 = vrot.lane.b32.xlu0 %v16760_v34, %s10690_s17  ;;  %v3878_v41 = vsel %vm3853_vm4, %v3845_v29, %v12975_v27  ;;  %v1576_v34 = vld [vmem:[#allocation2 + $0x503] ss:$2 sm:$0xff] }
 0x41e   : > { %v3911_v16 = vsel %vm3886_vm5, %v3878_v41, %v13030_v58  ;;  %v16865_v41 = vld [vmem:[#allocation27_spill] sm:$0xff] }
 0x41f   : > { %v13394_v45 = vpop.permute.xlu1 %2565  ;;  %v3580_v49 = vpop.permute.xlu0 %3579  ;;  %v3944_v63 = vsel %vm3919_vm6, %v3911_v16, %v13052_v11  ;;  %v13426_v16 = vadd.f32 %v16865_v41, %v13212_v14 }
 0x420   : > { %v3977_v29 = vsel %vm3952_vm7, %v3944_v63, %v13090_v33  ;;  %v4588_v33 = vmax.f32 %v13406_v31, 0.0 }
 0x421   : > { %3081 = vrot.lane.b32.xlu1 %v1514_v40, %s16785_s24  ;;  %3079 = vrot.lane.b32.xlu0 %v1512_v44, %s16785_s24  ;;  %v4010_v58 = vsel %vm3985_vm8, %v3977_v29, %v13138_v38  ;;  %v16864_v44 = vld [vmem:[#allocation15_spill] sm:$0xff]  ;;  %v1640_v40 = vld [vmem:[#allocation2 + $0x528] ss:$2 sm:$0xff]  ;;  %s10614_s24 = sshll.u32 %s10695_s21, 4  ;;  %s10615_s24 = int_to_ptr.vmem [resolvable:$false] %s10614_s24 }
 0x422   : > { %v3780_v2 = vsel %vm384_vm0, %v863_v56, %v16864_v44  ;;  %v4043_v11 = vsel %vm4018_vm9, %v4010_v58, %v13177_v15  ;;  %s10616_s30 = scalar_lea.vmem %s10615_s24, 32 }
 0x423   : > { %v13410_v25 = vpop.permute.xlu1 %3073  ;;  %v13412_v27 = vpop.permute.xlu0 %2691  ;;  %v3813_v38 = vsel %vm3787_vm2, %v3780_v2, %v12925_v54 }
 0x424   : > { %v3846_v56 = vsel %vm3820_vm3, %v3813_v38, %v12977_v17 }
 0x425   : > { %3209 = vrot.lane.b32.xlu1 %v1578_v18, %s16787_s0  ;;  %3207 = vrot.lane.b32.xlu0 %v1576_v34, %s16787_s0  ;;  %v4076_v18 = vsel %vm4051_vm10, %v4043_v11, %v13201_v32  ;;  %v3879_v29 = vsel %vm3853_vm4, %v3846_v56, %v13032_v28  ;;  %v16866_v28 = vld [vmem:[#allocation19_spill] sm:$0xff]  ;;  %v16867_v56 = vld [vmem:[#allocation17_spill] sm:$0xff]  ;;  %s10691_s0 = smov 64  }
 0x426   : > { %v4109_v15 = vsel %vm4084_vm11, %v4076_v18, %v13266_v13  ;;  %v3912_v54 = vsel %vm3886_vm5, %v3879_v29, %v13054_v4  ;;  %v1642_v13 = vld [vmem:[#allocation2 + $0x538] ss:$2 sm:$0xff]  ;;  %v13456_v2 = vadd.f32 %v13212_v14, %v16866_v28 }
 0x427   : > { %v3582_v34 = vpop.permute.xlu1 %3581  ;;  %v13433_v63 = vpop.permute.xlu0 %3199  ;;  %v4142_v58 = vsel %vm4117_vm12, %v4109_v15, %v13315_v46  ;;  %v4589_v46 = vmax.f32 %v13426_v16, 0.0  ;;  %v3945_v11 = vsel %vm3919_vm6, %v3912_v54, %v13092_v30 }
 0x428   : > { %v4175_v17 = vsel %vm4150_vm13, %v4142_v58, %v3452_v35  ;;  %v3978_v4 = vsel %vm3952_vm7, %v3945_v11, %v13140_v50  ;;  %v13478_v50 = vadd.f32 %v16867_v56, %v13212_v14  ;;  %v4586_v15 = vmax.f32 %v13456_v2, 0.0 }
 0x429   : > { %v13443_v44 = vpop.f32.mrb[16].mxu0  ;;  %4660 = vrot.lane.b32.xlu1 %v4588_v33, %s10690_s17  ;;  %3335 = vrot.lane.b32.xlu0 %v1640_v40, %s16789_s26  ;;  %v4208_v41 = vsel %vm4183_vm14, %v4175_v17, %v3580_v49  ;;  %v4011_v18 = vsel %vm3985_vm8, %v3978_v4, %v13179_v8  ;;  %v1704_v49 = vld [vmem:[#allocation2 + $0x529] ss:$2 sm:$0xff] }
 0x42a   : > { %v13452_v32 = vpop.f32.mrb[17].mxu0  ;;  %v4044_v30 = vsel %vm4018_vm9, %v4011_v18, %v13203_v43  ;;  %v865_v18 = vld [vmem:[#allocation2 + $0x410] ss:$2 sm:$0xff] }
 0x42b   : > { %v13462_v40 = vpop.permute.xlu1 %2693  ;;  %v3708_v38 = vpop.permute.xlu0 %3707  ;;  %v4077_v8 = vsel %vm4051_vm10, %v4044_v30, %v13268_v23  ;;  %v1706_v23 = vld [vmem:[#allocation2 + $0x539] ss:$2 sm:$0xff]  ;;  %v13513_v30 = vadd.f32 %v13080_v57, %v13212_v14  ;;  %v16869_v57 = vld [vmem:[#allocation29_spill] sm:$0xff] }
 0x42c   : > { %v4241_v35 = vsel %vm4216_vm15, %v4208_v41, %v3708_v38  ;;  %v4110_v54 = vsel %vm4084_vm11, %v4077_v8, %v13317_v55  ;;  %v1768_v38 = vld [vmem:[#allocation2 + $0x52a] ss:$2 sm:$0xff] }
 0x42d   : > { %3337 = vrot.lane.b32.xlu1 %v1642_v13, %s16789_s26  ;;  %4662 = vrot.lane.b32.xlu0 %v4589_v46, %s10690_s17  ;;  %v4143_v43 = vsel %vm4117_vm12, %v4110_v54, %v13349_v37  ;;  %v4587_v13 = vmax.f32 %v13478_v50, 0.0  ;;  %v1770_v37 = vld [vmem:[#allocation2 + $0x53a] ss:$2 sm:$0xff]  ;;  %v13525_v54 = vadd.f32 %v12931_v19, %v13212_v14 }
 0x42e   : > { %9467 = vmatprep.mubr.msk.f32.mxu0 %vm4258_vm1, %v4241_v35  ;;  %v4176_v17 = vsel %vm4150_vm13, %v4143_v43, %v13382_v53  ;;  %v1832_v35 = vld [vmem:[#allocation2 + $0x52b] ss:$2 sm:$0xff] }
 0x42f   : > { %v13483_v29 = vpop.permute.xlu1 %3201  ;;  %v13485_v58 = vpop.permute.xlu0 %2819  ;;  %v4209_v28 = vsel %vm4183_vm14, %v4176_v17, %v3582_v34  ;;  %v1834_v34 = vld [vmem:[#allocation2 + $0x53b] ss:$2 sm:$0xff]  ;;  %v16868_v43 = vld [vmem:[#allocation30_spill] sm:$0xff] }
 0x430   : > { %v3781_v17 = vsel %vm384_vm0, %v865_v18, %v16868_v43  ;;  %v867_v18 = vld [vmem:[#allocation2 + $0x420] ss:$2 sm:$0xff] }
 0x431   : > { %4656 = vrot.lane.b32.xlu1 %v4586_v15, %s10690_s17  ;;  %3463 = vrot.lane.b32.xlu0 %v1704_v49, %s16790_s19  ;;  %v13517_v49 = vadd.f32 %v13212_v14, %v13086_v9  ;;  %v16870_v9 = vld [vmem:[#allocation31_spill] sm:$0xff] }
 0x433   : > { %v3710_v11 = vpop.permute.xlu1 %3709  ;;  %v3328_v41 = vpop.permute.xlu0 %3327 }
 0x434   : > { %v4242_v55 = vsel %vm4216_vm15, %v4209_v28, %v3710_v11  ;;  %v3814_v28 = vsel %vm3787_vm2, %v3781_v17, %v16870_v9  ;;  %v4593_v11 = vmax.f32 %v13513_v30, 0.0 }
 0x435   : > { %3465 = vrot.lane.b32.xlu1 %v1706_v23, %s16790_s19  ;;  %4658 = vrot.lane.b32.xlu0 %v4587_v13, %s10690_s17  ;;  %v13531_v23 = vadd.f32 %v13212_v14, %v16869_v57  ;;  %v3847_v19 = vsel %vm3820_vm3, %v3814_v28, %v13072_v24  ;;  %v13563_v57 = vadd.f32 %v13212_v14, %v13452_v32  ;;  %s8249_s19 = sshll.u32 %s378_s1, 4  ;;  %s16663_s19 = int_to_ptr.vmem [resolvable:$true] %s8249_s19 }
 0x436   : > { %9468 = vmatmul.mubr.msk.f32.gmra.mrb[24].mxu0 %vm4258_vm1, %v4242_v55  ;;  %v16762_v55 = vmax.f32 %v13517_v49, 0.0  ;;  %s10610_s16 = scalar_lea.vmem %s16663_s19, 16  ;;  %p10617_p0 = scmp.lt.s32.totalorder %s16663_s19, %s10615_s24 }
 0x437   : > { %v13505_v53 = vpop.permute.xlu1 %2947  ;;  %v13507_v4 = vpop.permute.xlu0 %2821  ;;  %v4590_v17 = vmax.f32 %v13531_v23, 0.0  ;;  %p10611_p11 = scmp.ne.s32.totalorder %s16663_s19, %s10610_s16  ;;  %p10618_p1 = scmp.lt.s32.totalorder %s10616_s30, %s10610_s16 }
 0x439   : > { %3593 = vrot.lane.b32.xlu1 %v1770_v37, %s16791_s23  ;;  %3591 = vrot.lane.b32.xlu0 %v1768_v38, %s16791_s23  ;;  %p10612_p12 = pnand %p10611_p11, %p10794_p5  ;;  %p10619_p2 = por %p10618_p1, %p10617_p0 }
 0x43b   : > { %v3456_v56 = vpop.permute.xlu1 %3455  ;;  %v13519_v8 = vpop.permute.xlu0 %3329  ;;  %p10613_p13 = pneg %p10612_p12 }
 0x43d   : > { %3721 = vrot.lane.b32.xlu1 %v1834_v34, %s16792_s28  ;;  %3719 = vrot.lane.b32.xlu0 %v1832_v35, %s16792_s28  ;;  %v3880_v34 = vsel %vm3853_vm4, %v3847_v19, %v13124_v12  ;;  %v4591_v35 = vmax.f32 %v13525_v54, 0.0  ;;  %v13559_v12 = vadd.f32 %v13443_v44, %v13212_v14  ;;  %v16891_v54 = vmax.f32 %v13563_v57, 0.0  ;;  %s16661_s28 = scalar_lea.hbm %s16714_s11, %s8819_s14  ;;  %p10620_p3 = pnand %p10619_p2, %p10613_p13 }
 0x43e   : > { %v3913_v43 = vsel %vm3886_vm5, %v3880_v34, %v13171_v6 }
 0x43f   : > { %v13537_v37 = vpop.permute.xlu1 %3075  ;;  %v13539_v38 = vpop.permute.xlu0 %2949  ;;  %v3946_v24 = vsel %vm3919_vm6, %v3913_v43, %v13195_v51  ;;  %v16872_v51 = vld [vmem:[#allocation21_spill] sm:$0xff]  ;;  %v16763_v43 = vmax.f32 %v13563_v57, 0.0 }
 0x440   : > { %v3979_v19 = vsel %vm3952_vm7, %v3946_v24, %v13248_v39  ;;  %v13581_v39 = vadd.f32 %v13236_v26, %v13212_v14 }
 0x441   : > { %4670 = vrot.lane.b32.xlu1 %v4593_v11, %s10690_s17  ;;  %4668 = vrot.lane.b32.xlu0 %v16762_v55, %s10690_s17  ;;  %v16871_v55 = vld [vmem:[#allocation32_spill] sm:$0xff]  ;;  %v4012_v34 = vsel %vm3985_vm8, %v3979_v19, %v13301_v42  ;;  %v13587_v42 = vadd.f32 %v13212_v14, %v13242_v62 }
 0x442   : > { %v3782_v6 = vsel %vm384_vm0, %v867_v18, %v16871_v55  ;;  %v4045_v32 = vsel %vm4018_vm9, %v4012_v34, %v13351_v10  ;;  %v4597_v18 = vmax.f32 %v13559_v12, 0.0  ;;  %v16874_v10 = vld [vmem:[#allocation33_spill] sm:$0xff] }
 0x443   : > { %v3584_v9 = vpop.permute.xlu1 %3583  ;;  %v3458_v28 = vpop.permute.xlu0 %3457  ;;  %v3815_v44 = vsel %vm3787_vm2, %v3782_v6, %v16872_v51  ;;  %v4078_v55 = vsel %vm4051_vm10, %v4045_v32, %v13384_v47  ;;  %v16873_v6 = vld [vmem:[#allocation24_spill] sm:$0xff] }
 0x444   : > { %v3848_v26 = vsel %vm3820_vm3, %v3815_v44, %v16873_v6  ;;  %v4111_v51 = vsel %vm4084_vm11, %v4078_v55, %v13433_v63  ;;  %v16875_v47 = vld [vmem:[#allocation36_spill] sm:$0xff]  ;;  %v4595_v63 = vmax.f32 %v13581_v39, 0.0  ;;  %v4594_v55 = vmax.f32 %v13587_v42, 0.0 }
 0x445   : > { %4666 = vrot.lane.b32.xlu1 %v4591_v35, %s10690_s17  ;;  %4664 = vrot.lane.b32.xlu0 %v4590_v17, %s10690_s17  ;;  %v3881_v34 = vsel %vm3853_vm4, %v3848_v26, %v16874_v10  ;;  %v4144_v62 = vsel %vm4117_vm12, %v4111_v51, %v3328_v41 }
 0x446   : > { %v3914_v32 = vsel %vm3886_vm5, %v3881_v34, %v16875_v47  ;;  %v4177_v44 = vsel %vm4150_vm13, %v4144_v62, %v3456_v56  ;;  %v869_v56 = vld [vmem:[#allocation2 + $0x460] ss:$2 sm:$0xff] }
 0x447   : > { %v3204_v24 = vpop.permute.xlu1 %3203  ;;  %v3078_v19 = vpop.permute.xlu0 %3077  ;;  %v3947_v41 = vsel %vm3919_vm6, %v3914_v32, %v13250_v61  ;;  %v4210_v6 = vsel %vm4183_vm14, %v4177_v44, %v3584_v9  ;;  %v16876_v44 = vld [vmem:[#allocation25_spill] sm:$0xff] }
 0x448   : > { %v3980_v10 = vsel %vm3952_vm7, %v3947_v41, %v13303_v60  ;;  %v871_v60 = vld [vmem:[#allocation2 + $0x470] ss:$2 sm:$0xff]  ;;  %v3783_v41 = vsel %vm384_vm0, %v869_v56, %v16876_v44 }
 0x449   : > { %4678 = vrot.lane.b32.xlu1 %v4597_v18, %s10690_s17  ;;  %4676 = vrot.lane.b32.xlu0 %v16763_v43, %s10690_s17  ;;  %v4013_v34 = vsel %vm3985_vm8, %v3980_v10, %v13338_v20 }
 0x44a   : > { %v4046_v61 = vsel %vm4018_vm9, %v4013_v34, %v13373_v1 }
 0x44b   : > { %v3712_v26 = vpop.permute.xlu1 %3711  ;;  %v3586_v51 = vpop.permute.xlu0 %3585  ;;  %v4079_v9 = vsel %vm4051_vm10, %v4046_v61, %v13410_v25 }
 0x44c   : > { %v4243_v43 = vsel %vm4216_vm15, %v4210_v6, %v3712_v26  ;;  %v4112_v47 = vsel %vm4084_vm11, %v4079_v9, %v13483_v29  ;;  %v16877_v6 = vld [vmem:[#allocation35_spill] sm:$0xff]  ;;  %v16878_v26 = vld [vmem:[#allocation34_spill] sm:$0xff] }
 0x44d   : > { %4674 = vrot.lane.b32.xlu1 %v4595_v63, %s10690_s17  ;;  %4672 = vrot.lane.b32.xlu0 %v4594_v55, %s10690_s17  ;;  %v4145_v32 = vsel %vm4117_vm12, %v4112_v47, %v13519_v8  ;;  %v3784_v1 = vsel %vm384_vm0, %v871_v60, %v16877_v6  ;;  %v3816_v10 = vsel %vm3787_vm2, %v3783_v41, %v16878_v26 }
 0x44e   : > { %9470 = vmatprep.mubr.msk.f32.mxu0 %vm4258_vm1, %v4243_v43  ;;  %v4178_v43 = vsel %vm4150_vm13, %v4145_v32, %v3458_v28  ;;  %v3817_v25 = vsel %vm3787_vm2, %v3784_v1, %v13230_v7  ;;  %v3849_v8 = vsel %vm3820_vm3, %v3816_v10, %v13228_v21 }
 0x44f   : > { %v3332_v62 = vpop.permute.xlu1 %3331  ;;  %v3206_v20 = vpop.permute.xlu0 %3205  ;;  %v4211_v34 = vsel %vm4183_vm14, %v4178_v43, %v3586_v51  ;;  %v3850_v56 = vsel %vm3820_vm3, %v3817_v25, %v13289_v52  ;;  %v3882_v28 = vsel %vm3853_vm4, %v3849_v8, %v13287_v59 }
 0x450   : > { %v3883_v9 = vsel %vm3853_vm4, %v3850_v56, %v13328_v48  ;;  %v3915_v7 = vsel %vm3886_vm5, %v3882_v28, %v13340_v36 }
 0x451   : > { %v3916_v51 = vsel %vm3886_vm5, %v3883_v9, %v13362_v22  ;;  %v3948_v21 = vsel %vm3919_vm6, %v3915_v7, %v13375_v0 }
 0x452   : > { %v3949_v52 = vsel %vm3919_vm6, %v3916_v51, %v13394_v45  ;;  %v3981_v59 = vsel %vm3952_vm7, %v3948_v21, %v13412_v27 }
 0x453   : > { %v3334_v29 = vpop.permute.xlu1 %3333  ;;  %v3714_v61 = vpop.permute.xlu0 %3713  ;;  %v3982_v48 = vsel %vm3952_vm7, %v3949_v52, %v13462_v40  ;;  %v4014_v36 = vsel %vm3985_vm8, %v3981_v59, %v13485_v58 }
 0x454   : > { %v4244_v60 = vsel %vm4216_vm15, %v4211_v34, %v3714_v61  ;;  %v4015_v22 = vsel %vm3985_vm8, %v3982_v48, %v13507_v4  ;;  %v4047_v0 = vsel %vm4018_vm9, %v4014_v36, %v13505_v53  ;;  %v875_v48 = vld [vmem:[#allocation2 + $0x4c0] ss:$2 sm:$0xff]  ;;  %v873_v36 = vld [vmem:[#allocation2 + $0x4b0] ss:$2 sm:$0xff] }
 0x455   : > { %9471 = vmatmul.mubr.msk.f32.gmra.mrb[26].mxu0 %vm4258_vm1, %v4244_v60  ;;  %v4048_v45 = vsel %vm4018_vm9, %v4015_v22, %v13539_v38  ;;  %v4080_v44 = vsel %vm4051_vm10, %v4047_v0, %v13537_v37 }
 0x456   : > { %v4081_v27 = vsel %vm4051_vm10, %v4048_v45, %v3078_v19  ;;  %v4113_v40 = vsel %vm4084_vm11, %v4080_v44, %v3204_v24 }
 0x457   : > { %v3462_v47 = vpop.permute.xlu1 %3461  ;;  %v3460_v32 = vpop.permute.xlu0 %3459  ;;  %v4114_v58 = vsel %vm4084_vm11, %v4081_v27, %v3206_v20  ;;  %v4146_v1 = vsel %vm4117_vm12, %v4113_v40, %v3332_v62 }
 0x458   : > { %v4147_v4 = vsel %vm4117_vm12, %v4114_v58, %v3334_v29  ;;  %v4179_v43 = vsel %vm4150_vm13, %v4146_v1, %v3460_v32 }
 0x459   : > { %v4180_v53 = vsel %vm4150_vm13, %v4147_v4, %v3462_v47 }
 0x45b   : > { %v3590_v41 = vpop.permute.xlu1 %3589  ;;  %v3588_v6 = vpop.permute.xlu0 %3587 }
 0x45c   : > { %v4213_v38 = vsel %vm4183_vm14, %v4180_v53, %v3590_v41  ;;  %v4212_v37 = vsel %vm4183_vm14, %v4179_v43, %v3588_v6 }
 0x45f   : > { %v3718_v26 = vpop.permute.xlu1 %3717  ;;  %v3716_v19 = vpop.permute.xlu0 %3715 }
 0x460   : > { %v4246_v10 = vsel %vm4216_vm15, %v4213_v38, %v3718_v26  ;;  %v4245_v24 = vsel %vm4216_vm15, %v4212_v37, %v3716_v19 }
 0x461   : > { %9473 = vmatprep.mubr.msk.f32.mxu0 %vm4258_vm1, %v4245_v24 }
 0x462   : > { %9474 = vmatmul.mubr.msk.f32.gmra.mrb[28].mxu0 %vm4258_vm1, %v4246_v10 }
 0x463   : > { %v13689_v62 = vpop.permute.xlu1 %4646  ;;  %v13691_v20 = vpop.permute.xlu0 %4644 }
 0x465   : > { %v9460_v25 = vpop.f32.mrb[18].mxu0 }
 0x466   : > { %v13693_v34 = vpop.f32.mrb[19].mxu0 }
 0x467   : > { %v1930_v29 = vpop.permute.xlu1 %1929  ;;  %v1928_v61 = vpop.permute.xlu0 %1927 }
 0x468   : > { %v3786_v45 = vsel %vm384_vm0, %v875_v48, %v1930_v29  ;;  %v3785_v44 = vsel %vm384_vm0, %v873_v36, %v1928_v61  ;;  %vm4932_vm0 = vcmask 261120  }
 0x46b   : > { %v2058_v8 = vpop.permute.xlu1 %2057  ;;  %v2056_v56 = vpop.permute.xlu0 %2055 }
 0x46c   : > { %v3819_v6 = vsel %vm3787_vm2, %v3786_v45, %v2058_v8  ;;  %v3818_v40 = vsel %vm3787_vm2, %v3785_v44, %v2056_v56  ;;  %vm4935_vm2 = vcmask 254976  }
 0x46f   : > { %v2186_v60 = vpop.permute.xlu1 %2185  ;;  %v2184_v28 = vpop.permute.xlu0 %2183 }
 0x470   : > { %v3852_v4 = vsel %vm3820_vm3, %v3819_v6, %v2186_v60  ;;  %v3851_v53 = vsel %vm3820_vm3, %v3818_v40, %v2184_v28  ;;  %vm5667_vm3 = vcmask 523264  }
 0x473   : > { %v2314_v9 = vpop.permute.xlu1 %2313  ;;  %v2312_v7 = vpop.permute.xlu0 %2311 }
 0x474   : > { %v3885_v43 = vsel %vm3853_vm4, %v3852_v4, %v2314_v9  ;;  %v3884_v38 = vsel %vm3853_vm4, %v3851_v53, %v2312_v7  ;;  %v13736_v4 = vadd.f32 %v9460_v25, %v13212_v14  ;;  %vm5676_vm4 = vcmask 785408  }
 0x477   : > { %v2442_v51 = vpop.permute.xlu1 %2441  ;;  %v2440_v21 = vpop.permute.xlu0 %2439 }
 0x478   : > { %v3918_v19 = vsel %vm3886_vm5, %v3885_v43, %v2442_v51  ;;  %v3917_v10 = vsel %vm3886_vm5, %v3884_v38, %v2440_v21  ;;  %vm10694_vm5 = vmmov 0  }
 0x47b   : > { %v2570_v52 = vpop.permute.xlu1 %2569  ;;  %v2568_v47 = vpop.permute.xlu0 %2567 }
 0x47c   : > { %v3951_v61 = vsel %vm3919_vm6, %v3918_v19, %v2570_v52  ;;  %v3950_v8 = vsel %vm3919_vm6, %v3917_v10, %v2568_v47  ;;  %vm8234_vm6 = vcmask 8192  }
 0x47f   : > { %v2698_v32 = vpop.permute.xlu1 %2697  ;;  %v2696_v59 = vpop.permute.xlu0 %2695 }
 0x480   : > { %v3984_v28 = vsel %vm3952_vm7, %v3951_v61, %v2698_v32  ;;  %v3983_v9 = vsel %vm3952_vm7, %v3950_v8, %v2696_v59 }
 0x483   : > { %v13695_v22 = vpop.permute.xlu1 %4652  ;;  %v2824_v0 = vpop.permute.xlu0 %2823 }
 0x484   : > { %v4016_v7 = vsel %vm3985_vm8, %v3983_v9, %v2824_v0 }
 0x487   : > { %v2826_v27 = vpop.permute.xlu1 %2825  ;;  %v13699_v41 = vpop.permute.xlu0 %4654 }
 0x488   : > { %v4017_v48 = vsel %vm3985_vm8, %v3984_v28, %v2826_v27 }
 0x48b   : > { %v13703_v58 = vpop.permute.xlu1 %4648  ;;  %v2952_v1 = vpop.permute.xlu0 %2951 }
 0x48c   : > { %v4049_v21 = vsel %vm4018_vm9, %v4016_v7, %v2952_v1 }
 0x48f   : > { %v2954_v37 = vpop.permute.xlu1 %2953  ;;  %v13709_v26 = vpop.permute.xlu0 %4650 }
 0x490   : > { %v4050_v45 = vsel %vm4018_vm9, %v4017_v48, %v2954_v37  ;;  %v13743_v37 = vadd.f32 %v13212_v14, %v13693_v34  ;;  %v4599_v34 = vmax.f32 %v13736_v4, 0.0  ;;  %v5757_v4 = vld [vmem:[%s16706_s3] sm:$0xff] }
 0x492   : > { %v4598_v61 = vmax.f32 %v13743_v37, 0.0 }
 0x493   : > { %v3082_v24 = vpop.permute.xlu1 %3081  ;;  %v3080_v29 = vpop.permute.xlu0 %3079 }
 0x494   : > { %v4083_v47 = vsel %vm4051_vm10, %v4050_v45, %v3082_v24  ;;  %v4082_v32 = vsel %vm4051_vm10, %v4049_v21, %v3080_v29 }
 0x497   : > { %v3210_v56 = vpop.permute.xlu1 %3209  ;;  %v3208_v60 = vpop.permute.xlu0 %3207 }
 0x498   : > { %v4116_v53 = vsel %vm4084_vm11, %v4083_v47, %v3210_v56  ;;  %v4115_v43 = vsel %vm4084_vm11, %v4082_v32, %v3208_v60 }
 0x49b   : > { %v13719_v36 = vpop.permute.xlu1 %4660  ;;  %v3336_v51 = vpop.permute.xlu0 %3335 }
 0x49c   : > { %v4148_v10 = vsel %vm4117_vm12, %v4115_v43, %v3336_v51 }
 0x49f   : > { %v3338_v52 = vpop.permute.xlu1 %3337  ;;  %v13723_v44 = vpop.permute.xlu0 %4662 }
 0x4a0   : > { %v4149_v25 = vsel %vm4117_vm12, %v4116_v53, %v3338_v52 }
 0x4a1   : > { %v9463_v6 = vpop.f32.mrb[20].mxu0 }
 0x4a2   : > { %v13728_v59 = vadd.f32 %v9463_v6, %v13212_v14  ;;  %v4521_v0 = vpop.f32.mrb[21].mxu0 }
 0x4a3   : > { %v13731_v27 = vadd.f32 %v13212_v14, %v4521_v0  ;;  %v13733_v40 = vpop.permute.xlu1 %4656  ;;  %v3464_v1 = vpop.permute.xlu0 %3463 }
 0x4a4   : > { %v4601_v38 = vmax.f32 %v13728_v59, 0.0  ;;  %v4181_v8 = vsel %vm4150_vm13, %v4148_v10, %v3464_v1  ;;  %v5758_v59 = vld [vmem:[%s16706_s3 + $0x8] sm:$0xff] }
 0x4a5   : > { %v4600_v19 = vmax.f32 %v13731_v27, 0.0  ;;  %v5760_v27 = vld [vmem:[%s16706_s3 + $0x18] sm:$0xff] }
 0x4a6   : > { %4686 = vrot.lane.b32.xlu1 %v4601_v38, %s10690_s17 }
 0x4a7   : > { %4684 = vrot.lane.b32.xlu0 %v4600_v19, %s10690_s17  ;;  %v3466_v24 = vpop.permute.xlu1 %3465  ;;  %v13754_v29 = vpop.permute.xlu0 %4658 }
 0x4a8   : > { %v4182_v56 = vsel %vm4150_vm13, %v4149_v25, %v3466_v24 }
 0x4aa   : > { %4682 = vrot.lane.b32.xlu1 %v4599_v34, %s10690_s17 }
 0x4ab   : > { %4680 = vrot.lane.b32.xlu0 %v4598_v61, %s10690_s17  ;;  %v3594_v60 = vpop.permute.xlu1 %3593  ;;  %v3592_v28 = vpop.permute.xlu0 %3591 }
 0x4ac   : > { %v4215_v9 = vsel %vm4183_vm14, %v4182_v56, %v3594_v60  ;;  %v4214_v7 = vsel %vm4183_vm14, %v4181_v8, %v3592_v28  ;;  %v16879_v28 = vmov 0.0  }
 0x4ad   : > { %4938 = vst.msk [vmem:[#allocation3 + $0x20] sm:$0xff] %vm4932_vm0, %v16879_v28  ;;  %4933 = vst.msk [vmem:[#allocation3] sm:$0xff] %vm4932_vm0, %v16879_v28 }
 0x4ae   : > { %4939 = vst.msk [vmem:[#allocation3 + $0x28] sm:$0x3] %vm4935_vm2, %v16879_v28  ;;  %4936 = vst.msk [vmem:[#allocation3 + $0x10] sm:$0x3] %vm4935_vm2, %v16879_v28 }
 0x4af   : > { %v3722_v48 = vpop.permute.xlu1 %3721  ;;  %v3720_v51 = vpop.permute.xlu0 %3719  ;;  %4934 = vst.msk [vmem:[#allocation3 + $0x8] sm:$0xff] %vm4932_vm0, %v16879_v28  ;;  %4937 = vst.msk [vmem:[#allocation3 + $0x18] sm:$0xff] %vm4932_vm0, %v16879_v28 }
 0x4b0   : > { %v4248_v21 = vsel %vm4216_vm15, %v4215_v9, %v3722_v48  ;;  %v4247_v45 = vsel %vm4216_vm15, %v4214_v7, %v3720_v51  ;;  %4940 = vst.msk [vmem:[#allocation3 + $0x30] sm:$0xff] %vm4932_vm0, %v16879_v28  ;;  %4941 = vst.msk [vmem:[#allocation3 + $0x38] sm:$0xff] %vm4932_vm0, %v16879_v28 }
 0x4b1   : > { %9476 = vmatprep.mubr.msk.f32.mxu0 %vm4258_vm1, %v4247_v45  ;;  %4942 = vst.msk [vmem:[#allocation3 + $0x40] sm:$0x3] %vm4935_vm2, %v16879_v28  ;;  %4945 = vst.msk [vmem:[#allocation3 + $0x58] sm:$0x3] %vm4935_vm2, %v16879_v28 }
 0x4b2   : > { %9477 = vmatmul.mubr.msk.f32.gmra.mrb[30].mxu0 %vm4258_vm1, %v4248_v21  ;;  %4943 = vst.msk [vmem:[#allocation3 + $0x48] sm:$0xff] %vm4932_vm0, %v16879_v28  ;;  %4944 = vst.msk [vmem:[#allocation3 + $0x50] sm:$0xff] %vm4932_vm0, %v16879_v28 }
 0x4b3   : > { %4946 = vst.msk [vmem:[#allocation3 + $0x60] sm:$0xff] %vm4932_vm0, %v16879_v28  ;;  %4947 = vst.msk [vmem:[#allocation3 + $0x68] sm:$0xff] %vm4932_vm0, %v16879_v28 }
 0x4b4   : > { %4948 = vst.msk [vmem:[#allocation3 + $0x70] sm:$0x3] %vm4935_vm2, %v16879_v28  ;;  %4951 = vst.msk [vmem:[#allocation3 + $0x88] sm:$0x3] %vm4935_vm2, %v16879_v28 }
 0x4b5   : > { %4949 = vst.msk [vmem:[#allocation3 + $0x78] sm:$0xff] %vm4932_vm0, %v16879_v28  ;;  %4950 = vst.msk [vmem:[#allocation3 + $0x80] sm:$0xff] %vm4932_vm0, %v16879_v28 }
 0x4b6   : > { %4952 = vst.msk [vmem:[#allocation3 + $0x90] sm:$0xff] %vm4932_vm0, %v16879_v28  ;;  %4953 = vst.msk [vmem:[#allocation3 + $0x98] sm:$0xff] %vm4932_vm0, %v16879_v28 }
 0x4b7   : > { %4954 = vst.msk [vmem:[#allocation3 + $0xa0] sm:$0x3] %vm4935_vm2, %v16879_v28  ;;  %4957 = vst.msk [vmem:[#allocation3 + $0xb8] sm:$0x3] %vm4935_vm2, %v16879_v28 }
 0x4b8   : > { %4955 = vst.msk [vmem:[#allocation3 + $0xa8] sm:$0xff] %vm4932_vm0, %v16879_v28  ;;  %4956 = vst.msk [vmem:[#allocation3 + $0xb0] sm:$0xff] %vm4932_vm0, %v16879_v28 }
 0x4b9   : > { %4958 = vst.msk [vmem:[#allocation3 + $0xc0] sm:$0xff] %vm4932_vm0, %v16879_v28  ;;  %4959 = vst.msk [vmem:[#allocation3 + $0xc8] sm:$0xff] %vm4932_vm0, %v16879_v28 }
 0x4ba   : > { %4960 = vst.msk [vmem:[#allocation3 + $0xd0] sm:$0x3] %vm4935_vm2, %v16879_v28  ;;  %4963 = vst.msk [vmem:[#allocation3 + $0xe8] sm:$0x3] %vm4935_vm2, %v16879_v28 }
 0x4bb   : > { %4961 = vst.msk [vmem:[#allocation3 + $0xd8] sm:$0xff] %vm4932_vm0, %v16879_v28  ;;  %4962 = vst.msk [vmem:[#allocation3 + $0xe0] sm:$0xff] %vm4932_vm0, %v16879_v28 }
 0x4bc   : > { %4964 = vst.msk [vmem:[#allocation3 + $0xf0] sm:$0xff] %vm4932_vm0, %v16879_v28  ;;  %4965 = vst.msk [vmem:[#allocation3 + $0xf8] sm:$0xff] %vm4932_vm0, %v16879_v28 }
 0x4bd   : > { %4966 = vst.msk [vmem:[#allocation3 + $0x100] sm:$0x3] %vm4935_vm2, %v16879_v28  ;;  %4969 = vst.msk [vmem:[#allocation3 + $0x118] sm:$0x3] %vm4935_vm2, %v16879_v28 }
 0x4be   : > { %4967 = vst.msk [vmem:[#allocation3 + $0x108] sm:$0xff] %vm4932_vm0, %v16879_v28  ;;  %4968 = vst.msk [vmem:[#allocation3 + $0x110] sm:$0xff] %vm4932_vm0, %v16879_v28 }
 0x4bf   : > { %4970 = vst.msk [vmem:[#allocation3 + $0x120] sm:$0xff] %vm4932_vm0, %v16879_v28  ;;  %4971 = vst.msk [vmem:[#allocation3 + $0x128] sm:$0xff] %vm4932_vm0, %v16879_v28 }
 0x4c0   : > { %4972 = vst.msk [vmem:[#allocation3 + $0x130] sm:$0x3] %vm4935_vm2, %v16879_v28  ;;  %4975 = vst.msk [vmem:[#allocation3 + $0x148] sm:$0x3] %vm4935_vm2, %v16879_v28 }
 0x4c1   : > { %4973 = vst.msk [vmem:[#allocation3 + $0x138] sm:$0xff] %vm4932_vm0, %v16879_v28  ;;  %4974 = vst.msk [vmem:[#allocation3 + $0x140] sm:$0xff] %vm4932_vm0, %v16879_v28 }
 0x4c2   : > { %4976 = vst.msk [vmem:[#allocation3 + $0x150] sm:$0xff] %vm4932_vm0, %v16879_v28  ;;  %4977 = vst.msk [vmem:[#allocation3 + $0x158] sm:$0xff] %vm4932_vm0, %v16879_v28 }
 0x4c3   : > { %4978 = vst.msk [vmem:[#allocation3 + $0x160] sm:$0x3] %vm4935_vm2, %v16879_v28  ;;  %4981 = vst.msk [vmem:[#allocation3 + $0x178] sm:$0x3] %vm4935_vm2, %v16879_v28 }
 0x4c4   : > { %4979 = vst.msk [vmem:[#allocation3 + $0x168] sm:$0xff] %vm4932_vm0, %v16879_v28  ;;  %4980 = vst.msk [vmem:[#allocation3 + $0x170] sm:$0xff] %vm4932_vm0, %v16879_v28 }
 0x4c5   : > { %4982 = vst.msk [vmem:[#allocation3 + $0x180] sm:$0xff] %vm4932_vm0, %v16879_v28  ;;  %4983 = vst.msk [vmem:[#allocation3 + $0x188] sm:$0xff] %vm4932_vm0, %v16879_v28 }
 0x4c6   : > { %4984 = vst.msk [vmem:[#allocation3 + $0x190] sm:$0x3] %vm4935_vm2, %v16879_v28  ;;  %4987 = vst.msk [vmem:[#allocation3 + $0x1a8] sm:$0x3] %vm4935_vm2, %v16879_v28 }
 0x4c7   : > { %4985 = vst.msk [vmem:[#allocation3 + $0x198] sm:$0xff] %vm4932_vm0, %v16879_v28  ;;  %4986 = vst.msk [vmem:[#allocation3 + $0x1a0] sm:$0xff] %vm4932_vm0, %v16879_v28 }
 0x4dd   : > { %v9466_v52 = vpop.f32.mrb[22].mxu0 }
 0x4de   : > { %v4531_v47 = vpop.f32.mrb[23].mxu0  ;;  %v13779_v53 = vadd.f32 %v9466_v52, %v13212_v14 }
 0x4df   : > { %v13783_v10 = vadd.f32 %v13212_v14, %v4531_v47 }
 0x4e0   : > { %v4603_v24 = vmax.f32 %v13779_v53, 0.0  ;;  %v5769_v53 = vld [vmem:[%s16706_s3 + $0x60] sm:$0xff] }
 0x4e1   : > { %v4602_v8 = vmax.f32 %v13783_v10, 0.0 }
 0x509   : > { %v9469_v32 = vpop.f32.mrb[24].mxu0 }
 0x50a   : > { %v13773_v6 = vadd.f32 %v9469_v32, %v13212_v14  ;;  %v4541_v0 = vpop.f32.mrb[25].mxu0 }
 0x50b   : > { %v13776_v1 = vadd.f32 %v13212_v14, %v4541_v0 }
 0x50c   : > { %v4605_v43 = vmax.f32 %v13773_v6, 0.0 }
 0x50d   : > { %v4604_v25 = vmax.f32 %v13776_v1, 0.0 }
 0x50e   : > { %4694 = vrot.lane.b32.xlu1 %v4605_v43, %s10690_s17 }
 0x50f   : > { %4692 = vrot.lane.b32.xlu0 %v4604_v25, %s10690_s17 }
 0x512   : > { %4690 = vrot.lane.b32.xlu1 %v4603_v24, %s10690_s17 }
 0x513   : > { %4688 = vrot.lane.b32.xlu0 %v4602_v8, %s10690_s17 }
 0x528   : > { %v9472_v56 = vpop.f32.mrb[26].mxu0 }
 0x529   : > { %v13800_v60 = vpop.f32.mrb[27].mxu0  ;;  %v13917_v21 = vadd.f32 %v9472_v56, %v13212_v14 }
 0x52a   : > { %v13922_v52 = vadd.f32 %v13212_v14, %v13800_v60  ;;  %v16881_v60 = vld [vmem:[#allocation20_spill] sm:$0xff] }
 0x52b   : > { %v16765_v32 = vmax.f32 %v13917_v21, 0.0 }
 0x52c   : > { %v16764_v0 = vmax.f32 %v13922_v52, 0.0 }
 0x535   : > { %v9475_v9 = vpop.f32.mrb[28].mxu0 }
 0x536   : > { %v13911_v7 = vadd.f32 %v9475_v9, %v13212_v14  ;;  %v4561_v48 = vpop.f32.mrb[29].mxu0  ;;  %v16882_v9 = vmax.f32 %v16881_v60, 0.0 }
 0x537   : > { %v13914_v51 = vadd.f32 %v13212_v14, %v4561_v48  ;;  %v16880_v14 = vmax.f32 %v13220_v5, 0.0  ;;  %v16884_v5 = vld [vmem:[#allocation12_spill] sm:$0xff] }
 0x538   : > { %v4609_v45 = vmax.f32 %v13911_v7, 0.0  ;;  %v13947_v48 = vmax.f32 %v16882_v9, %v13691_v20  ;;  %v16886_v20 = vld [vmem:[#allocation13_spill] sm:$0xff] }
 0x539   : > { %v16766_v47 = vmax.f32 %v13914_v51, 0.0  ;;  %v13942_v56 = vmax.f32 %v16880_v14, %v13689_v62  ;;  %v16885_v62 = vmax.f32 %v16884_v5, 0.0  ;;  %v16887_v60 = vmax.f32 %v16886_v20, 0.0  ;;  %v4669_v5 = vpop.permute.xlu0 %4668  ;;  %v5766_v20 = vld [vmem:[%s16706_s3 + $0x48] sm:$0xff] }
 0x53a   : > { %4702 = vrot.lane.b32.xlu1 %v4609_v45, %s10690_s17 }
 0x53b   : > { %4700 = vrot.lane.b32.xlu0 %v16766_v47, %s10690_s17  ;;  %v13961_v14 = vmax.f32 %v16885_v62, %v13695_v22  ;;  %v13970_v9 = vmax.f32 %v16887_v60, %v13709_v26  ;;  %v4671_v47 = vpop.permute.xlu1 %4670  ;;  %v13984_v22 = vmax.f32 %v4589_v46, %v13723_v44  ;;  %v13989_v26 = vmax.f32 %v4588_v33, %v13719_v36  ;;  %v5768_v60 = vld [vmem:[%s16706_s3 + $0x58] sm:$0xff] }
 0x53c   : > { %v13998_v62 = vmax.f32 %v4587_v13, %v13754_v29  ;;  %v14003_v46 = vmax.f32 %v4586_v15, %v13733_v40  ;;  %v14011_v31 = vmax.f32 %v4593_v11, %v4671_v47  ;;  %v16890_v33 = vmax.f32 %v13517_v49, 0.0  ;;  %v5764_v29 = vld [vmem:[%s16706_s3 + $0x38] sm:$0xff]  ;;  %v5763_v47 = vld [vmem:[%s16706_s3 + $0x30] sm:$0xff] }
 0x53d   : > { %v4665_v16 = vpop.permute.xlu0 %4664  ;;  %v9505_v40 = vpack.c.bf16 %v5760_v27, %v5758_v59 }
 0x53e   : > { %4698 = vrot.lane.b32.xlu1 %v16765_v32, %s10690_s17  ;;  %v14015_v50 = vmax.f32 %v16890_v33, %v4669_v5  ;;  %v14027_v15 = vmax.f32 %v4590_v17, %v4665_v16  ;;  %v9513_v5 = vpack.c.bf16 %v5768_v60, %v5766_v20  ;;  %v5767_v16 = vld [vmem:[%s16706_s3 + $0x50] sm:$0xff] }
 0x53f   : > { %4696 = vrot.lane.b32.xlu0 %v16764_v0, %s10690_s17  ;;  %v16883_v0 = vmax.f32 %v13346_v3, 0.0  ;;  %v16888_v3 = vld [vmem:[#allocation14_spill] sm:$0xff]  ;;  %9506 = vmatprep.subr.bf16.mxu1 %v9505_v40 }
 0x540   : > { %v5775_v40 = vld [vmem:[%s16706_s3 + $0x90] sm:$0xff] }
 0x541   : > { %v13956_v32 = vmax.f32 %v16883_v0, %v13699_v41  ;;  %v16889_v41 = vmax.f32 %v16888_v3, 0.0  ;;  %v4677_v36 = vpop.permute.xlu0 %4676 }
 0x542   : > { %4806 = vrot.lane.b32.xlu1 %v13942_v56, %s10691_s0 }
 0x543   : > { %4804 = vrot.lane.b32.xlu0 %v13947_v48, %s10691_s0  ;;  %v13975_v0 = vmax.f32 %v16889_v41, %v13703_v58  ;;  %v4667_v58 = vpop.permute.xlu1 %4666 }
 0x544   : > { %v14023_v2 = vmax.f32 %v4591_v35, %v4667_v58  ;;  %v14039_v35 = vmax.f32 %v16891_v54, %v4677_v36  ;;  %v5765_v58 = vld [vmem:[%s16706_s3 + $0x40] sm:$0xff]  ;;  %v5772_v54 = vld [vmem:[%s16706_s3 + $0x78] sm:$0xff] }
 0x545   : > { %v4673_v11 = vpop.permute.xlu0 %4672 }
 0x546   : > { %4814 = vrot.lane.b32.xlu1 %v13956_v32, %s10691_s0  ;;  %v14051_v12 = vmax.f32 %v4594_v55, %v4673_v11 }
 0x547   : > { %4812 = vrot.lane.b32.xlu0 %v13961_v14, %s10691_s0  ;;  %v4679_v13 = vpop.permute.xlu1 %4678 }
 0x548   : > { %v14035_v49 = vmax.f32 %v4597_v18, %v4679_v13 }
 0x549   : > { %v4685_v44 = vpop.permute.xlu0 %4684 }
 0x54a   : > { %4810 = vrot.lane.b32.xlu1 %v13970_v9, %s10691_s0  ;;  %v14063_v39 = vmax.f32 %v4600_v19, %v4685_v44  ;;  %v5762_v19 = vld [vmem:[%s16706_s3 + $0x28] sm:$0xff] }
 0x54b   : > { %4808 = vrot.lane.b32.xlu0 %v13975_v0, %s10691_s0  ;;  %v4675_v30 = vpop.permute.xlu1 %4674  ;;  %v5774_v44 = vld [vmem:[%s16706_s3 + $0x88] sm:$0xff] }
 0x54c   : > { %v14047_v17 = vmax.f32 %v4595_v63, %v4675_v30  ;;  %v9515_v30 = vpack.c.bf16 %v5767_v16, %v5765_v58  ;;  %v5788_v58 = vld [vmem:[%s16706_s3 + $0xf8] sm:$0xff] }
 0x54d   : > { %v4681_v63 = vpop.permute.xlu0 %4680 }
 0x54e   : > { %4822 = vrot.lane.b32.xlu1 %v13984_v22, %s10691_s0  ;;  %v14075_v55 = vmax.f32 %v4598_v61, %v4681_v63  ;;  %v9509_v61 = vpack.c.bf16 %v5764_v29, %v5762_v19  ;;  %v5773_v63 = vld [vmem:[%s16706_s3 + $0x80] sm:$0xff] }
 0x54f   : > { %4820 = vrot.lane.b32.xlu0 %v13989_v26, %s10691_s0  ;;  %v4687_v23 = vpop.permute.xlu1 %4686  ;;  %v5777_v29 = vld [vmem:[%s16706_s3 + $0xa0] sm:$0xff] }
 0x550   : > { %v14059_v57 = vmax.f32 %v4601_v38, %v4687_v23  ;;  %v5759_v38 = vld [vmem:[%s16706_s3 + $0x10] sm:$0xff] }
 0x551   : > { %v9507_v37 = vpack.c.bf16 %v5759_v38, %v5757_v4  ;;  %v5778_v4 = vld [vmem:[%s16706_s3 + $0xa8] sm:$0xff]  ;;  %v5780_v38 = vld [vmem:[%s16706_s3 + $0xb8] sm:$0xff] }
 0x552   : > { %4818 = vrot.lane.b32.xlu1 %v13998_v62, %s10691_s0  ;;  %v9525_v19 = vpack.c.bf16 %v5780_v38, %v5778_v4  ;;  %v5798_v38 = vld [vmem:[%s16706_s3 + $0x148] sm:$0xff] }
 0x553   : > { %4816 = vrot.lane.b32.xlu0 %v14003_v46, %s10691_s0  ;;  %v4683_v18 = vpop.permute.xlu1 %4682  ;;  %9508 = vmatpush1.bf16.msra.mxu1 %v9507_v37  ;;  %v9523_v37 = vpack.c.bf16 %v5775_v40, %v5773_v63  ;;  %v5795_v40 = vld [vmem:[%s16706_s3 + $0x130] sm:$0xff] }
 0x554   : > { %v14071_v42 = vmax.f32 %v4599_v34, %v4683_v18  ;;  %v5761_v34 = vld [vmem:[%s16706_s3 + $0x20] sm:$0xff]  ;;  %9510 = vmatprep.subr.bf16.mxu1 %v9509_v61  ;;  %v5776_v18 = vld [vmem:[%s16706_s3 + $0x98] sm:$0xff]  ;;  %v5782_v61 = vld [vmem:[%s16706_s3 + $0xc8] sm:$0xff] }
 0x555   : > { %v9511_v3 = vpack.c.bf16 %v5763_v47, %v5761_v34  ;;  %v9521_v59 = vpack.c.bf16 %v5776_v18, %v5774_v44  ;;  %v5779_v34 = vld [vmem:[%s16706_s3 + $0xb0] sm:$0xff]  ;;  %v5784_v47 = vld [vmem:[%s16706_s3 + $0xd8] sm:$0xff] }
 0x556   : > { %4830 = vrot.lane.b32.xlu1 %v14011_v31, %s10691_s0  ;;  %v9527_v20 = vpack.c.bf16 %v5779_v34, %v5777_v29  ;;  %v9529_v60 = vpack.c.bf16 %v5784_v47, %v5782_v61  ;;  %v5796_v44 = vld [vmem:[%s16706_s3 + $0x138] sm:$0xff]  ;;  %v5797_v29 = vld [vmem:[%s16706_s3 + $0x140] sm:$0xff]  ;;  %v5799_v34 = vld [vmem:[%s16706_s3 + $0x150] sm:$0xff] }
 0x557   : > { %4828 = vrot.lane.b32.xlu0 %v14015_v50, %s10691_s0  ;;  %9512 = vmatpush1.bf16.msra.mxu1 %v9511_v3  ;;  %v5781_v3 = vld [vmem:[%s16706_s3 + $0xc0] sm:$0xff]  ;;  %v9547_v61 = vpack.c.bf16 %v5799_v34, %v5797_v29  ;;  %v5802_v47 = vld [vmem:[%s16706_s3 + $0x168] sm:$0xff]  ;;  %v5816_v29 = vld [vmem:[%s16706_s3 + $0x1d8] sm:$0xff] }
 0x558   : > { %9514 = vmatprep.subr.bf16.mxu1 %v9513_v5  ;;  %v5786_v5 = vld [vmem:[%s16706_s3 + $0xe8] sm:$0xff] }
 0x55a   : > { %4826 = vrot.lane.b32.xlu1 %v14023_v2, %s10691_s0 }
 0x55b   : > { %4824 = vrot.lane.b32.xlu0 %v14027_v15, %s10691_s0  ;;  %9516 = vmatpush1.bf16.msra.mxu1 %v9515_v30  ;;  %v5785_v30 = vld [vmem:[%s16706_s3 + $0xe0] sm:$0xff] }
 0x55e   : > { %4838 = vrot.lane.b32.xlu1 %v14035_v49, %s10691_s0 }
 0x55f   : > { %4836 = vrot.lane.b32.xlu0 %v14039_v35, %s10691_s0 }
 0x562   : > { %4834 = vrot.lane.b32.xlu1 %v14047_v17, %s10691_s0 }
 0x563   : > { %4832 = vrot.lane.b32.xlu0 %v14051_v12, %s10691_s0 }
 0x566   : > { %4846 = vrot.lane.b32.xlu1 %v14059_v57, %s10691_s0 }
 0x567   : > { %4844 = vrot.lane.b32.xlu0 %v14063_v39, %s10691_s0 }
 0x56a   : > { %4842 = vrot.lane.b32.xlu1 %v14071_v42, %s10691_s0 }
 0x56b   : > { %4840 = vrot.lane.b32.xlu0 %v14075_v55, %s10691_s0 }
 0x580   : > { %v4695_v41 = vpop.permute.xlu1 %4694 }
 0x581   : > { %v14119_v33 = vmax.f32 %v4605_v43, %v4695_v41  ;;  %v4693_v13 = vpop.permute.xlu0 %4692  ;;  %v5783_v41 = vld [vmem:[%s16706_s3 + $0xd0] sm:$0xff] }
 0x582   : > { %v14123_v36 = vmax.f32 %v4604_v25, %v4693_v13  ;;  %v5770_v25 = vld [vmem:[%s16706_s3 + $0x68] sm:$0xff]  ;;  %v9531_v16 = vpack.c.bf16 %v5783_v41, %v5781_v3  ;;  %v9533_v13 = vpack.c.bf16 %v5788_v58, %v5786_v5  ;;  %v5801_v3 = vld [vmem:[%s16706_s3 + $0x160] sm:$0xff]  ;;  %v5803_v41 = vld [vmem:[%s16706_s3 + $0x170] sm:$0xff] }
 0x583   : > { %4854 = vrot.lane.b32.xlu1 %v14119_v33, %s10691_s0  ;;  %v9517_v10 = vpack.c.bf16 %v5772_v54, %v5770_v25  ;;  %v5792_v25 = vld [vmem:[%s16706_s3 + $0x118] sm:$0xff]  ;;  %v9551_v5 = vpack.c.bf16 %v5803_v41, %v5801_v3  ;;  %v5806_v58 = vld [vmem:[%s16706_s3 + $0x188] sm:$0xff] }
 0x584   : > { %v4691_v11 = vpop.permute.xlu1 %4690  ;;  %4852 = vrot.lane.b32.xlu0 %v14123_v36, %s10691_s0  ;;  %v5818_v41 = vld [vmem:[%s16706_s3 + $0x1e8] sm:$0xff] }
 0x585   : > { %v14131_v6 = vmax.f32 %v4603_v24, %v4691_v11  ;;  %v4689_v43 = vpop.permute.xlu0 %4688  ;;  %v5771_v24 = vld [vmem:[%s16706_s3 + $0x70] sm:$0xff]  ;;  %9518 = vmatprep.subr.bf16.mxu1 %v9517_v10  ;;  %v14153_v23 = vpop.f32.mrb[30].mxu0  ;;  %v5789_v10 = vld [vmem:[%s16706_s3 + $0x100] sm:$0xff] }
 0x586   : > { %v14135_v1 = vmax.f32 %v4602_v8, %v4689_v43  ;;  %v9519_v8 = vpack.c.bf16 %v5771_v24, %v5769_v53  ;;  %v14164_v27 = vpop.f32.mrb[31].mxu0  ;;  %v5787_v11 = vld [vmem:[%s16706_s3 + $0xf0] sm:$0xff]  ;;  %v5790_v43 = vld [vmem:[%s16706_s3 + $0x108] sm:$0xff] }
 0x587   : > { %4850 = vrot.lane.b32.xlu1 %v14131_v6, %s10691_s0  ;;  %v9535_v54 = vpack.c.bf16 %v5787_v11, %v5785_v30  ;;  %v9537_v53 = vpack.c.bf16 %v5792_v25, %v5790_v43  ;;  %v5791_v24 = vld [vmem:[%s16706_s3 + $0x110] sm:$0xff]  ;;  %v5810_v43 = vld [vmem:[%s16706_s3 + $0x1a8] sm:$0xff]  ;;  %v5812_v25 = vld [vmem:[%s16706_s3 + $0x1b8] sm:$0xff] }
 0x588   : > { %4848 = vrot.lane.b32.xlu0 %v14135_v1, %s10691_s0  ;;  %9520 = vmatpush1.bf16.msra.mxu1 %v9519_v8  ;;  %v5794_v8 = vld [vmem:[%s16706_s3 + $0x128] sm:$0xff]  ;;  %v9539_v18 = vpack.c.bf16 %v5791_v24, %v5789_v10  ;;  %v5807_v11 = vld [vmem:[%s16706_s3 + $0x190] sm:$0xff]  ;;  %v9557_v10 = vpack.c.bf16 %v5812_v25, %v5810_v43  ;;  %v5809_v24 = vld [vmem:[%s16706_s3 + $0x1a0] sm:$0xff] }
 0x589   : > { %9522 = vmatprep.subr.bf16.mxu1 %v9521_v59  ;;  %v9541_v63 = vpack.c.bf16 %v5796_v44, %v5794_v8  ;;  %v5793_v59 = vld [vmem:[%s16706_s3 + $0x120] sm:$0xff]  ;;  %v5811_v8 = vld [vmem:[%s16706_s3 + $0x1b0] sm:$0xff] }
 0x58a   : > { %v9543_v4 = vpack.c.bf16 %v5795_v40, %v5793_v59  ;;  %v9559_v40 = vpack.c.bf16 %v5811_v8, %v5809_v24  ;;  %v5037_v24 = vld [vmem:[#allocation3 + $0x1] ss:$2 sm:$0xff] }
 0x58c   : > { %9524 = vmatpush1.bf16.msra.mxu1 %v9523_v37  ;;  %v5800_v37 = vld [vmem:[%s16706_s3 + $0x158] sm:$0xff] }
 0x58d   : > { %9526 = vmatprep.subr.bf16.mxu1 %v9525_v19  ;;  %v9545_v19 = vpack.c.bf16 %v5800_v37, %v5798_v38  ;;  %v16893_v38 = vmax.f32 %v13917_v21, 0.0  ;;  %v16894_v37 = vmax.f32 %v13922_v52, 0.0  ;;  %v5813_v52 = vld [vmem:[%s16706_s3 + $0x1c0] sm:$0xff] }
 0x590   : > { %9528 = vmatpush1.bf16.msra.mxu1 %v9527_v20  ;;  %v5804_v20 = vld [vmem:[%s16706_s3 + $0x178] sm:$0xff] }
 0x591   : > { %9530 = vmatprep.subr.bf16.mxu1 %v9529_v60  ;;  %v9549_v60 = vpack.c.bf16 %v5804_v20, %v5802_v47 }
 0x594   : > { %9532 = vmatpush1.bf16.msra.mxu1 %v9531_v16  ;;  %v5808_v16 = vld [vmem:[%s16706_s3 + $0x198] sm:$0xff] }
 0x595   : > { %9534 = vmatprep.subr.bf16.mxu1 %v9533_v13  ;;  %v5805_v13 = vld [vmem:[%s16706_s3 + $0x180] sm:$0xff]  ;;  %v9553_v30 = vpack.c.bf16 %v5808_v16, %v5806_v58  ;;  %v5819_v16 = vld [vmem:[%s16706_s3 + $0x1f0] sm:$0xff] }
 0x598   : > { %9536 = vmatpush1.bf16.msra.mxu1 %v9535_v54  ;;  %v9555_v54 = vpack.c.bf16 %v5807_v11, %v5805_v13 }
 0x599   : > { %9538 = vmatprep.subr.bf16.mxu1 %v9537_v53 }
 0x59c   : > { %9540 = vmatpush1.bf16.msra.mxu1 %v9539_v18 }
 0x59d   : > { %9542 = vmatprep.subr.bf16.mxu1 %v9541_v63  ;;  %v16892_v63 = vmax.f32 %v13914_v51, 0.0 }
 0x5a0   : > { %9544 = vmatpush1.bf16.msra.mxu1 %v9543_v4 }
 0x5a1   : > { %9546 = vmatprep.subr.bf16.mxu1 %v9545_v19  ;;  %v5814_v19 = vld [vmem:[%s16706_s3 + $0x1c8] sm:$0xff] }
 0x5a2   : > { %v9561_v34 = vpack.c.bf16 %v5816_v29, %v5814_v19 }
 0x5a4   : > { %9548 = vmatpush1.bf16.msra.mxu1 %v9547_v61  ;;  %v5815_v61 = vld [vmem:[%s16706_s3 + $0x1d0] sm:$0xff] }
 0x5a5   : > { %9550 = vmatprep.subr.bf16.mxu1 %v9549_v60  ;;  %v9563_v60 = vpack.c.bf16 %v5815_v61, %v5813_v52 }
 0x5a8   : > { %9552 = vmatpush1.bf16.msra.mxu1 %v9551_v5  ;;  %v5820_v5 = vld [vmem:[%s16706_s3 + $0x1f8] sm:$0xff] }
 0x5a9   : > { %9554 = vmatprep.subr.bf16.mxu1 %v9553_v30 }
 0x5ac   : > { %v4703_v53 = vpop.permute.xlu1 %4702  ;;  %9556 = vmatpush1.bf16.msra.mxu1 %v9555_v54 }
 0x5ad   : > { %v14279_v44 = vmax.f32 %v4609_v45, %v4703_v53  ;;  %v4701_v18 = vpop.permute.xlu0 %4700  ;;  %9558 = vmatprep.subr.bf16.mxu1 %v9557_v10  ;;  %v5053_v10 = vld [vmem:[#allocation3 + $0x2] ss:$2 sm:$0xff] }
 0x5ae   : > { %v14283_v59 = vmax.f32 %v16892_v63, %v4701_v18 }
 0x5af   : > { %4862 = vrot.lane.b32.xlu1 %v14279_v44, %s10691_s0 }
 0x5b0   : > { %v4699_v4 = vpop.permute.xlu1 %4698  ;;  %4860 = vrot.lane.b32.xlu0 %v14283_v59, %s10691_s0  ;;  %9560 = vmatpush1.bf16.msra.mxu1 %v9559_v40 }
 0x5b1   : > { %v14291_v7 = vmax.f32 %v16893_v38, %v4699_v4  ;;  %v4697_v45 = vpop.permute.xlu0 %4696  ;;  %9562 = vmatprep.subr.bf16.mxu1 %v9561_v34 }
 0x5b2   : > { %v14295_v51 = vmax.f32 %v16894_v37, %v4697_v45  ;;  %v5069_v45 = vld [vmem:[#allocation3 + $0x3] ss:$2 sm:$0xff] }
 0x5b3   : > { %4858 = vrot.lane.b32.xlu1 %v14291_v7, %s10691_s0 }
 0x5b4   : > { %v4807_v21 = vpop.permute.xlu1 %4806  ;;  %4856 = vrot.lane.b32.xlu0 %v14295_v51, %s10691_s0  ;;  %9564 = vmatpush1.bf16.msra.mxu1 %v9563_v60 }
 0x5b5   : > { %v4901_v47 = vmax.f32 %v13942_v56, %v4807_v21  ;;  %v4805_v20 = vpop.permute.xlu0 %4804  ;;  %v9565_v56 = vpack.c.bf16 %v5820_v5, %v5818_v41 }
 0x5b6   : > { %v4900_v3 = vmax.f32 %v13947_v48, %v4805_v20  ;;  %v5817_v48 = vld [vmem:[%s16706_s3 + $0x1e0] sm:$0xff] }
 0x5b7   : > { %4990 = vst.msk [vmem:[#allocation3 + $0x21] sm:$0xff] %vm4932_vm0, %v4901_v47  ;;  %v9567_v11 = vpack.c.bf16 %v5819_v16, %v5817_v48  ;;  %9566 = vmatprep.subr.bf16.mxu1 %v9565_v56 }
 0x5b8   : > { %4989 = vst.msk [vmem:[#allocation3 + $0x19] sm:$0xff] %vm4932_vm0, %v4900_v3  ;;  %v4815_v58 = vpop.permute.xlu1 %4814 }
 0x5b9   : > { %v4905_v13 = vmax.f32 %v13956_v32, %v4815_v58  ;;  %v4813_v30 = vpop.permute.xlu0 %4812  ;;  %9568 = vmatpush1.bf16.msra.mxu1 %v9567_v11 }
 0x5ba   : > { %v4904_v43 = vmax.f32 %v13961_v14, %v4813_v30 }
 0x5bb   : > { %4994 = vst.msk [vmem:[#allocation3 + $0x51] sm:$0xff] %vm4932_vm0, %v4905_v13 }
 0x5bc   : > { %4993 = vst.msk [vmem:[#allocation3 + $0x49] sm:$0xff] %vm4932_vm0, %v4904_v43  ;;  %v4811_v25 = vpop.permute.xlu1 %4810 }
 0x5bd   : > { %v4903_v54 = vmax.f32 %v13970_v9, %v4811_v25  ;;  %v4809_v53 = vpop.permute.xlu0 %4808 }
 0x5be   : > { %v4902_v8 = vmax.f32 %v13975_v0, %v4809_v53 }
 0x5bf   : > { %4992 = vst.msk [vmem:[#allocation3 + $0x39] sm:$0xff] %vm4932_vm0, %v4903_v54  ;;  %v5116_v32 = vld [vmem:[#allocation3 + $0x1a] ss:$2 sm:$0xff]  ;;  %v5100_v18 = vld [vmem:[#allocation3 + $0x19] ss:$2 sm:$0xff] }
 0x5c0   : > { %4991 = vst.msk [vmem:[#allocation3 + $0x31] sm:$0xff] %vm4932_vm0, %v4902_v8  ;;  %v4823_v14 = vpop.permute.xlu1 %4822  ;;  %v10254_v63 = vpack.i.bf16 %v5053_v10, %v5116_v32  ;;  %v10249_v40 = vpack.i.bf16 %v5037_v24, %v5100_v18  ;;  %v5132_v37 = vld [vmem:[#allocation3 + $0x1b] ss:$2 sm:$0xff] }
 0x5c1   : > { %v4909_v4 = vmax.f32 %v13984_v22, %v4823_v14  ;;  %v4821_v38 = vpop.permute.xlu0 %4820  ;;  %v10259_v19 = vpack.i.bf16 %v5069_v45, %v5132_v37 }
 0x5c2   : > { %v4908_v9 = vmax.f32 %v13989_v26, %v4821_v38  ;;  %10255 = vrot.lane.b32.xlu1 %v10254_v63, %s10691_s0  ;;  %10250 = vrot.lane.b32.xlu0 %v10249_v40, %s10692_s25 }
 0x5c3   : > { %4998 = vst.msk [vmem:[#allocation3 + $0x81] sm:$0xff] %vm4932_vm0, %v4909_v4  ;;  %v5118_v34 = vld [vmem:[#allocation3 + $0x4a] ss:$2 sm:$0xff]  ;;  %v5102_v61 = vld [vmem:[#allocation3 + $0x49] ss:$2 sm:$0xff] }
 0x5c4   : > { %4997 = vst.msk [vmem:[#allocation3 + $0x79] sm:$0xff] %vm4932_vm0, %v4908_v9  ;;  %v4819_v0 = vpop.permute.xlu1 %4818 }
 0x5c5   : > { %v4907_v29 = vmax.f32 %v13998_v62, %v4819_v0  ;;  %v4817_v21 = vpop.permute.xlu0 %4816 }
 0x5c6   : > { %v4906_v22 = vmax.f32 %v14003_v46, %v4817_v21  ;;  %10260 = vrot.lane.b32.xlu0 %v10259_v19, %s10690_s17  ;;  %v5134_v46 = vld [vmem:[#allocation3 + $0x4b] ss:$2 sm:$0xff] }
 0x5c7   : > { %4996 = vst.msk [vmem:[#allocation3 + $0x69] sm:$0xff] %vm4932_vm0, %v4907_v29  ;;  %v5055_v26 = vld [vmem:[#allocation3 + $0x32] ss:$2 sm:$0xff]  ;;  %v5039_v52 = vld [vmem:[#allocation3 + $0x31] ss:$2 sm:$0xff] }
 0x5c8   : > { %4995 = vst.msk [vmem:[#allocation3 + $0x61] sm:$0xff] %vm4932_vm0, %v4906_v22  ;;  %v4831_v47 = vpop.permute.xlu1 %4830  ;;  %v10269_v20 = vpack.i.bf16 %v5055_v26, %v5118_v34  ;;  %v10264_v60 = vpack.i.bf16 %v5039_v52, %v5102_v61  ;;  %v5071_v62 = vld [vmem:[#allocation3 + $0x33] ss:$2 sm:$0xff] }
 0x5c9   : > { %v4913_v3 = vmax.f32 %v14011_v31, %v4831_v47  ;;  %v4829_v41 = vpop.permute.xlu0 %4828  ;;  %v10274_v56 = vpack.i.bf16 %v5071_v62, %v5134_v46 }
 0x5ca   : > { %v4912_v5 = vmax.f32 %v14015_v50, %v4829_v41  ;;  %10270 = vrot.lane.b32.xlu0 %v10269_v20, %s10691_s0  ;;  %10265 = vrot.lane.b32.xlu1 %v10264_v60, %s10692_s25  ;;  %v5824_v41 = vld [vmem:[%s16706_s3 + $0x218] sm:$0xff] }
 0x5cb   : > { %5002 = vst.msk [vmem:[#allocation3 + $0xb1] sm:$0xff] %vm4932_vm0, %v4913_v3  ;;  %v5120_v13 = vld [vmem:[#allocation3 + $0x7a] ss:$2 sm:$0xff]  ;;  %v5104_v11 = vld [vmem:[#allocation3 + $0x79] ss:$2 sm:$0xff] }
 0x5cc   : > { %5001 = vst.msk [vmem:[#allocation3 + $0xa9] sm:$0xff] %vm4932_vm0, %v4912_v5  ;;  %v4827_v58 = vpop.permute.xlu1 %4826 }
 0x5cd   : > { %v4911_v48 = vmax.f32 %v14023_v2, %v4827_v58  ;;  %v4825_v16 = vpop.permute.xlu0 %4824 }
 0x5ce   : > { %v4910_v31 = vmax.f32 %v14027_v15, %v4825_v16  ;;  %10275 = vrot.lane.b32.xlu1 %v10274_v56, %s10690_s17  ;;  %v5136_v15 = vld [vmem:[#allocation3 + $0x7b] ss:$2 sm:$0xff] }
 0x5cf   : > { %5000 = vst.msk [vmem:[#allocation3 + $0x99] sm:$0xff] %vm4932_vm0, %v4911_v48  ;;  %v5057_v50 = vld [vmem:[#allocation3 + $0x62] ss:$2 sm:$0xff]  ;;  %v5041_v30 = vld [vmem:[#allocation3 + $0x61] ss:$2 sm:$0xff] }
 0x5d0   : > { %4999 = vst.msk [vmem:[#allocation3 + $0x91] sm:$0xff] %vm4932_vm0, %v4910_v31  ;;  %v4839_v43 = vpop.permute.xlu1 %4838  ;;  %v10284_v25 = vpack.i.bf16 %v5057_v50, %v5120_v13  ;;  %v10279_v54 = vpack.i.bf16 %v5041_v30, %v5104_v11  ;;  %v5073_v2 = vld [vmem:[#allocation3 + $0x63] ss:$2 sm:$0xff] }
 0x5d1   : > { %v4917_v53 = vmax.f32 %v14035_v49, %v4839_v43  ;;  %v4837_v10 = vpop.permute.xlu0 %4836  ;;  %v10289_v32 = vpack.i.bf16 %v5073_v2, %v5136_v15 }
 0x5d2   : > { %v4916_v24 = vmax.f32 %v14039_v35, %v4837_v10  ;;  %10285 = vrot.lane.b32.xlu1 %v10284_v25, %s10691_s0  ;;  %10280 = vrot.lane.b32.xlu0 %v10279_v54, %s10692_s25 }
 0x5d3   : > { %5006 = vst.msk [vmem:[#allocation3 + $0xe1] sm:$0xff] %vm4932_vm0, %v4917_v53  ;;  %v5122_v63 = vld [vmem:[#allocation3 + $0xaa] ss:$2 sm:$0xff]  ;;  %v5106_v4 = vld [vmem:[#allocation3 + $0xa9] ss:$2 sm:$0xff] }
 0x5d4   : > { %5005 = vst.msk [vmem:[#allocation3 + $0xd9] sm:$0xff] %vm4932_vm0, %v4916_v24  ;;  %v4835_v8 = vpop.permute.xlu1 %4834 }
 0x5d5   : > { %v4915_v18 = vmax.f32 %v14047_v17, %v4835_v8  ;;  %v4833_v14 = vpop.permute.xlu0 %4832 }
 0x5d6   : > { %v4914_v49 = vmax.f32 %v14051_v12, %v4833_v14  ;;  %10290 = vrot.lane.b32.xlu0 %v10289_v32, %s10690_s17  ;;  %v5138_v12 = vld [vmem:[#allocation3 + $0xab] ss:$2 sm:$0xff] }
 0x5d7   : > { %5004 = vst.msk [vmem:[#allocation3 + $0xc9] sm:$0xff] %vm4932_vm0, %v4915_v18  ;;  %v5059_v35 = vld [vmem:[#allocation3 + $0x92] ss:$2 sm:$0xff]  ;;  %v5043_v40 = vld [vmem:[#allocation3 + $0x91] ss:$2 sm:$0xff] }
 0x5d8   : > { %5003 = vst.msk [vmem:[#allocation3 + $0xc1] sm:$0xff] %vm4932_vm0, %v4914_v49  ;;  %v4847_v38 = vpop.permute.xlu1 %4846  ;;  %v10299_v45 = vpack.i.bf16 %v5059_v35, %v5122_v63  ;;  %v10294_v37 = vpack.i.bf16 %v5043_v40, %v5106_v4  ;;  %v5075_v17 = vld [vmem:[#allocation3 + $0x93] ss:$2 sm:$0xff] }
 0x5d9   : > { %v4921_v9 = vmax.f32 %v14059_v57, %v4847_v38  ;;  %v4845_v0 = vpop.permute.xlu0 %4844  ;;  %v10304_v21 = vpack.i.bf16 %v5075_v17, %v5138_v12 }
 0x5da   : > { %v4920_v19 = vmax.f32 %v14063_v39, %v4845_v0  ;;  %10300 = vrot.lane.b32.xlu0 %v10299_v45, %s10691_s0  ;;  %10295 = vrot.lane.b32.xlu1 %v10294_v37, %s10692_s25 }
 0x5db   : > { %5010 = vst.msk [vmem:[#allocation3 + $0x111] sm:$0xff] %vm4932_vm0, %v4921_v9  ;;  %v5124_v26 = vld [vmem:[#allocation3 + $0xda] ss:$2 sm:$0xff]  ;;  %v5108_v61 = vld [vmem:[#allocation3 + $0xd9] ss:$2 sm:$0xff] }
 0x5dc   : > { %5009 = vst.msk [vmem:[#allocation3 + $0x109] sm:$0xff] %vm4932_vm0, %v4920_v19  ;;  %v4843_v29 = vpop.permute.xlu1 %4842  ;;  %v5164_v19 = vld [vmem:[#allocation3 + $0x31] ss:$2 sm:$0xff] }
 0x5dd   : > { %v4919_v22 = vmax.f32 %v14071_v42, %v4843_v29  ;;  %v4841_v34 = vpop.permute.xlu0 %4840  ;;  %v5140_v42 = vld [vmem:[#allocation3 + $0xdb] ss:$2 sm:$0xff] }
 0x5de   : > { %v4918_v57 = vmax.f32 %v14075_v55, %v4841_v34  ;;  %10305 = vrot.lane.b32.xlu1 %v10304_v21, %s10690_s17  ;;  %v5822_v55 = vld [vmem:[%s16706_s3 + $0x208] sm:$0xff]  ;;  %v5228_v21 = vld [vmem:[#allocation3 + $0x49] ss:$2 sm:$0xff] }
 0x5df   : > { %5008 = vst.msk [vmem:[#allocation3 + $0xf9] sm:$0xff] %vm4932_vm0, %v4919_v22  ;;  %v5061_v39 = vld [vmem:[#allocation3 + $0xc2] ss:$2 sm:$0xff]  ;;  %v5045_v52 = vld [vmem:[#allocation3 + $0xc1] ss:$2 sm:$0xff]  ;;  %v9569_v5 = vpack.c.bf16 %v5824_v41, %v5822_v55 }
 0x5e0   : > { %5007 = vst.msk [vmem:[#allocation3 + $0xf1] sm:$0xff] %vm4932_vm0, %v4918_v57  ;;  %v10314_v47 = vpack.i.bf16 %v5061_v39, %v5124_v26  ;;  %v10309_v20 = vpack.i.bf16 %v5045_v52, %v5108_v61  ;;  %v5077_v60 = vld [vmem:[#allocation3 + $0xc3] ss:$2 sm:$0xff]  ;;  %v5021_v22 = vld [vmem:[#allocation3] ss:$2 sm:$0xff]  ;;  %v10369_v26 = vpack.i.bf16 %v5164_v19, %v5228_v21 }
 0x5e1   : > { %v10319_v3 = vpack.i.bf16 %v5077_v60, %v5140_v42  ;;  %9570 = vmatprep.subr.bf16.mxu1 %v9569_v5  ;;  %v5084_v60 = vld [vmem:[#allocation3 + $0x18] ss:$2 sm:$0xff]  ;;  %v5821_v55 = vld [vmem:[%s16706_s3 + $0x200] sm:$0xff] }
 0x5e2   : > { %10315 = vrot.lane.b32.xlu1 %v10314_v47, %s10691_s0  ;;  %10310 = vrot.lane.b32.xlu0 %v10309_v20, %s10692_s25  ;;  %v5196_v47 = vld [vmem:[#allocation3 + $0x33] ss:$2 sm:$0xff]  ;;  %v5180_v20 = vld [vmem:[#allocation3 + $0x32] ss:$2 sm:$0xff] }
 0x5e3   : > { %v5126_v62 = vld [vmem:[#allocation3 + $0x10a] ss:$2 sm:$0xff]  ;;  %v5110_v56 = vld [vmem:[#allocation3 + $0x109] ss:$2 sm:$0xff]  ;;  %v5823_v41 = vld [vmem:[%s16706_s3 + $0x210] sm:$0xff] }
 0x5e4   : > { %v5142_v13 = vld [vmem:[#allocation3 + $0x10b] ss:$2 sm:$0xff] }
 0x5e5   : > { %v5260_v5 = vld [vmem:[#allocation3 + $0x4b] ss:$2 sm:$0xff] }
 0x5e6   : > { %10320 = vrot.lane.b32.xlu0 %v10319_v3, %s10690_s17  ;;  %v5232_v19 = vld [vmem:[#allocation3 + $0xa9] ss:$2 sm:$0xff] }
 0x5e7   : > { %v5063_v46 = vld [vmem:[#allocation3 + $0xf2] ss:$2 sm:$0xff]  ;;  %v5047_v58 = vld [vmem:[#allocation3 + $0xf1] ss:$2 sm:$0xff] }
 0x5e8   : > { %v10329_v48 = vpack.i.bf16 %v5063_v46, %v5126_v62  ;;  %v10324_v16 = vpack.i.bf16 %v5047_v58, %v5110_v56  ;;  %v5079_v31 = vld [vmem:[#allocation3 + $0xf3] ss:$2 sm:$0xff]  ;;  %v5244_v46 = vld [vmem:[#allocation3 + $0x4a] ss:$2 sm:$0xff] }
 0x5e9   : > { %v10334_v50 = vpack.i.bf16 %v5079_v31, %v5142_v13  ;;  %v5826_v31 = vld [vmem:[%s16706_s3 + $0x228] sm:$0xff]  ;;  %v5828_v13 = vld [vmem:[%s16706_s3 + $0x238] sm:$0xff] }
 0x5ea   : > { %10330 = vrot.lane.b32.xlu0 %v10329_v48, %s10691_s0  ;;  %10325 = vrot.lane.b32.xlu1 %v10324_v16, %s10692_s25  ;;  %v10379_v48 = vpack.i.bf16 %v5196_v47, %v5260_v5  ;;  %v10374_v16 = vpack.i.bf16 %v5180_v20, %v5244_v46 }
 0x5ee   : > { %10335 = vrot.lane.b32.xlu1 %v10334_v50, %s10690_s17 }
 0x5f5   : > { %v4855_v30 = vpop.permute.xlu1 %4854 }
 0x5f6   : > { %v4925_v11 = vmax.f32 %v14119_v33, %v4855_v30  ;;  %v4853_v43 = vpop.permute.xlu0 %4852 }
 0x5f7   : > { %v4924_v25 = vmax.f32 %v14123_v36, %v4853_v43  ;;  %v5166_v43 = vld [vmem:[#allocation3 + $0x61] ss:$2 sm:$0xff] }
 0x5f8   : > { %5014 = vst.msk [vmem:[#allocation3 + $0x141] sm:$0xff] %vm4932_vm0, %v4925_v11  ;;  %v5182_v11 = vld [vmem:[#allocation3 + $0x62] ss:$2 sm:$0xff] }
 0x5f9   : > { %5013 = vst.msk [vmem:[#allocation3 + $0x139] sm:$0xff] %vm4932_vm0, %v4924_v25  ;;  %v4851_v54 = vpop.permute.xlu1 %4850  ;;  %v9571_v25 = vpack.c.bf16 %v5823_v41, %v5821_v55  ;;  %v10609_v55 = vld [vmem:[%s16705_s2] ss:$0 sm:$0xff] }
 0x5fa   : > { %v4923_v53 = vmax.f32 %v14131_v6, %v4851_v54  ;;  %v4849_v10 = vpop.permute.xlu0 %4848  ;;  %v14480_v41 = vadd.f32 %v10609_v55, %v14153_v23  ;;  %v5838_v23 = vld [vmem:[%s16706_s3 + $0x288] sm:$0xff] }
 0x5fb   : > { %v4922_v2 = vmax.f32 %v14135_v1, %v4849_v10  ;;  %v5825_v10 = vld [vmem:[%s16706_s3 + $0x220] sm:$0xff] }
 0x5fc   : > { %5012 = vst.msk [vmem:[#allocation3 + $0x129] sm:$0xff] %vm4932_vm0, %v4923_v53 }
 0x5fd   : > { %5011 = vst.msk [vmem:[#allocation3 + $0x121] sm:$0xff] %vm4932_vm0, %v4922_v2  ;;  %v5827_v2 = vld [vmem:[%s16706_s3 + $0x230] sm:$0xff] }
 0x600   : > { %v5128_v24 = vld [vmem:[#allocation3 + $0x13a] ss:$2 sm:$0xff]  ;;  %v5112_v8 = vld [vmem:[#allocation3 + $0x139] ss:$2 sm:$0xff] }
 0x601   : > { %v5144_v14 = vld [vmem:[#allocation3 + $0x13b] ss:$2 sm:$0xff] }
 0x604   : > { %v5065_v15 = vld [vmem:[#allocation3 + $0x122] ss:$2 sm:$0xff]  ;;  %v5049_v33 = vld [vmem:[#allocation3 + $0x121] ss:$2 sm:$0xff] }
 0x605   : > { %v10344_v32 = vpack.i.bf16 %v5065_v15, %v5128_v24  ;;  %v10339_v36 = vpack.i.bf16 %v5049_v33, %v5112_v8  ;;  %v5081_v18 = vld [vmem:[#allocation3 + $0x123] ss:$2 sm:$0xff]  ;;  %v5246_v33 = vld [vmem:[#allocation3 + $0x7a] ss:$2 sm:$0xff] }
 0x606   : > { %v10349_v6 = vpack.i.bf16 %v5081_v18, %v5144_v14  ;;  %v5230_v8 = vld [vmem:[#allocation3 + $0x79] ss:$2 sm:$0xff]  ;;  %v10389_v14 = vpack.i.bf16 %v5182_v11, %v5246_v33 }
 0x607   : > { %10345 = vrot.lane.b32.xlu1 %v10344_v32, %s10691_s0  ;;  %10340 = vrot.lane.b32.xlu0 %v10339_v36, %s10692_s25  ;;  %v9573_v32 = vpack.c.bf16 %v5828_v13, %v5826_v31 }
 0x60b   : > { %10350 = vrot.lane.b32.xlu0 %v10349_v6, %s10690_s17  ;;  %v10384_v6 = vpack.i.bf16 %v5166_v43, %v5230_v8  ;;  %v5088_v43 = vld [vmem:[#allocation3 + $0x78] ss:$2 sm:$0xff]  ;;  %v4611_v8 = vmax.f32 %v14480_v41, 0.0 }
 0x621   : > { %v4863_v1 = vpop.permute.xlu1 %4862 }
 0x622   : > { %v4929_v49 = vmax.f32 %v14279_v44, %v4863_v1  ;;  %v4861_v63 = vpop.permute.xlu0 %4860  ;;  %v5086_v1 = vld [vmem:[#allocation3 + $0x48] ss:$2 sm:$0xff] }
 0x623   : > { %v4928_v35 = vmax.f32 %v14283_v59, %v4861_v63  ;;  %v5832_v63 = vld [vmem:[%s16706_s3 + $0x258] sm:$0xff] }
 0x624   : > { %5018 = vst.msk [vmem:[#allocation3 + $0x171] sm:$0xff] %vm4932_vm0, %v4929_v49  ;;  %v5830_v49 = vld [vmem:[%s16706_s3 + $0x248] sm:$0xff] }
 0x625   : > { %5017 = vst.msk [vmem:[#allocation3 + $0x169] sm:$0xff] %vm4932_vm0, %v4928_v35  ;;  %v4859_v40 = vpop.permute.xlu1 %4858 }
 0x626   : > { %v4927_v4 = vmax.f32 %v14291_v7, %v4859_v40  ;;  %v4857_v38 = vpop.permute.xlu0 %4856 }
 0x627   : > { %v4926_v45 = vmax.f32 %v14295_v51, %v4857_v38  ;;  %v5198_v38 = vld [vmem:[#allocation3 + $0x63] ss:$2 sm:$0xff] }
 0x628   : > { %5016 = vst.msk [vmem:[#allocation3 + $0x159] sm:$0xff] %vm4932_vm0, %v4927_v4  ;;  %v5168_v4 = vld [vmem:[#allocation3 + $0x91] ss:$2 sm:$0xff] }
 0x629   : > { %5015 = vst.msk [vmem:[#allocation3 + $0x151] sm:$0xff] %vm4932_vm0, %v4926_v45  ;;  %v5023_v45 = vld [vmem:[#allocation3 + $0x30] ss:$2 sm:$0xff] }
 0x62c   : > { %v5130_v37 = vld [vmem:[#allocation3 + $0x16a] ss:$2 sm:$0xff]  ;;  %v5114_v0 = vld [vmem:[#allocation3 + $0x169] ss:$2 sm:$0xff] }
 0x62d   : > { %v5146_v51 = vld [vmem:[#allocation3 + $0x16b] ss:$2 sm:$0xff] }
 0x630   : > { %v5067_v9 = vld [vmem:[#allocation3 + $0x152] ss:$2 sm:$0xff]  ;;  %v5051_v44 = vld [vmem:[#allocation3 + $0x151] ss:$2 sm:$0xff] }
 0x631   : > { %v10359_v17 = vpack.i.bf16 %v5067_v9, %v5130_v37  ;;  %v10354_v59 = vpack.i.bf16 %v5051_v44, %v5114_v0  ;;  %v5083_v12 = vld [vmem:[#allocation3 + $0x153] ss:$2 sm:$0xff]  ;;  %v9575_v37 = vpack.c.bf16 %v5827_v2, %v5825_v10 }
 0x632   : > { %v10364_v39 = vpack.i.bf16 %v5083_v12, %v5146_v51  ;;  %v5829_v0 = vld [vmem:[%s16706_s3 + $0x240] sm:$0xff]  ;;  %v5262_v12 = vld [vmem:[#allocation3 + $0x7b] ss:$2 sm:$0xff]  ;;  %v10399_v51 = vpack.i.bf16 %v5168_v4, %v5232_v19 }
 0x633   : > { %10360 = vrot.lane.b32.xlu0 %v10359_v17, %s10691_s0  ;;  %10355 = vrot.lane.b32.xlu1 %v10354_v59, %s10692_s25  ;;  %v5831_v17 = vld [vmem:[%s16706_s3 + $0x250] sm:$0xff]  ;;  %v5837_v2 = vld [vmem:[%s16706_s3 + $0x280] sm:$0xff] }
 0x634   : > { %v10256_v7 = vpop.permute.xlu1 %10255  ;;  %v10251_v29 = vpop.permute.xlu0 %10250  ;;  %v9579_v47 = vpack.c.bf16 %v5831_v17, %v5829_v0  ;;  %v5250_v0 = vld [vmem:[#allocation3 + $0xda] ss:$2 sm:$0xff]  ;;  %v5234_v17 = vld [vmem:[#allocation3 + $0xd9] ss:$2 sm:$0xff] }
 0x635   : > { %v10253_v34 = vunpack.i.h.bf16 %v10251_v29  ;;  %v10252_v57 = vunpack.i.l.bf16 %v10251_v29  ;;  %v10258_v52 = vunpack.i.h.bf16 %v10256_v7  ;;  %v10257_v61 = vunpack.i.l.bf16 %v10256_v7 }
 0x636   : > { %v9577_v7 = vpack.c.bf16 %v5832_v63, %v5830_v49  ;;  %v5186_v63 = vld [vmem:[#allocation3 + $0xc2] ss:$2 sm:$0xff] }
 0x637   : > { %10370 = vrot.lane.b32.xlu0 %v10369_v26, %s10692_s25  ;;  %10365 = vrot.lane.b32.xlu1 %v10364_v39, %s10690_s17  ;;  %v5685_v42 = vsel %vm4932_vm0, %v5084_v60, %v10252_v57  ;;  %v5659_v3 = vsel %vm4932_vm0, %v5021_v22, %v10253_v34  ;;  %v10394_v22 = vpack.i.bf16 %v5198_v38, %v5262_v12  ;;  %v5834_v34 = vld [vmem:[%s16706_s3 + $0x268] sm:$0xff]  ;;  %v5836_v57 = vld [vmem:[%s16706_s3 + $0x278] sm:$0xff] }
 0x638   : > { %v10261_v62 = vpop.permute.xlu0 %10260  ;;  %v5693_v50 = vsel %vm5667_vm3, %v5685_v42, %v10257_v61  ;;  %v5668_v30 = vsel %vm5667_vm3, %v5659_v3, %v10258_v52  ;;  %v5200_v52 = vld [vmem:[#allocation3 + $0x93] ss:$2 sm:$0xff]  ;;  %v5184_v61 = vld [vmem:[#allocation3 + $0x92] ss:$2 sm:$0xff] }
 0x639   : > { %v10263_v58 = vunpack.i.h.bf16 %v10261_v62  ;;  %v10262_v56 = vunpack.i.l.bf16 %v10261_v62  ;;  %v5833_v42 = vld [vmem:[%s16706_s3 + $0x260] sm:$0xff]  ;;  %v5835_v3 = vld [vmem:[%s16706_s3 + $0x270] sm:$0xff]  ;;  %v14483_v62 = vadd.f32 %v10609_v55, %v14164_v27  ;;  %v5840_v27 = vld [vmem:[%s16706_s3 + $0x298] sm:$0xff] }
 0x63a   : > { %v9585_v33 = vpack.c.bf16 %v5840_v27, %v5838_v23  ;;  %v5236_v55 = vld [vmem:[#allocation3 + $0x109] ss:$2 sm:$0xff] }
 0x63b   : > { %10380 = vrot.lane.b32.xlu0 %v10379_v48, %s10690_s17  ;;  %10375 = vrot.lane.b32.xlu1 %v10374_v16, %s10691_s0  ;;  %v5701_v54 = vsel %vm5676_vm4, %v5693_v50, %v10262_v56  ;;  %v5677_v53 = vsel %vm5676_vm4, %v5668_v30, %v10263_v58  ;;  %v5264_v58 = vld [vmem:[#allocation3 + $0xab] ss:$2 sm:$0xff]  ;;  %v5248_v56 = vld [vmem:[#allocation3 + $0xaa] ss:$2 sm:$0xff]  ;;  %v9581_v48 = vpack.c.bf16 %v5836_v57, %v5834_v34 }
 0x63c   : > { %v10266_v24 = vpop.permute.xlu1 %10265  ;;  %v10271_v15 = vpop.permute.xlu0 %10270  ;;  %5961 = vmatprep.mubr.f32.mxu1 %v5701_v54  ;;  %v10409_v13 = vpack.i.bf16 %v5200_v52, %v5264_v58  ;;  %v10404_v50 = vpack.i.bf16 %v5184_v61, %v5248_v56  ;;  %v9583_v54 = vpack.c.bf16 %v5835_v3, %v5833_v42  ;;  %v5027_v52 = vld [vmem:[#allocation3 + $0x90] ss:$2 sm:$0xff]  ;;  %v5847_v42 = vld [vmem:[%s16706_s3 + $0x2d0] sm:$0xff] }
 0x63d   : > { %v10268_v36 = vunpack.i.h.bf16 %v10266_v24  ;;  %v10267_v18 = vunpack.i.l.bf16 %v10266_v24  ;;  %5962 = vmatmul.mubr.f32.vlgmr.msra.gmra.mrb[0].mxu1 %v5677_v53  ;;  %v10273_v35 = vunpack.i.h.bf16 %v10271_v15  ;;  %v10272_v40 = vunpack.i.l.bf16 %v10271_v15  ;;  %v5839_v24 = vld [vmem:[%s16706_s3 + $0x290] sm:$0xff] }
 0x63e   : > { %9572 = vmatpush1.bf16.msra.mxu1 %v9571_v25  ;;  %v5025_v25 = vld [vmem:[#allocation3 + $0x60] ss:$2 sm:$0xff]  ;;  %v5204_v27 = vld [vmem:[#allocation3 + $0xf3] ss:$2 sm:$0xff] }
 0x63f   : > { %10390 = vrot.lane.b32.xlu0 %v10389_v14, %s10691_s0  ;;  %10385 = vrot.lane.b32.xlu1 %v10384_v6, %s10692_s25  ;;  %v5686_v9 = vsel %vm4932_vm0, %v5086_v1, %v10267_v18  ;;  %v5660_v44 = vsel %vm4932_vm0, %v5023_v45, %v10268_v36  ;;  %v5842_v14 = vld [vmem:[%s16706_s3 + $0x2a8] sm:$0xff]  ;;  %v5844_v6 = vld [vmem:[%s16706_s3 + $0x2b8] sm:$0xff] }
 0x640   : > { %v10276_v59 = vpop.permute.xlu1 %10275  ;;  %9574 = vmatprep.subr.bf16.mxu1 %v9573_v32  ;;  %v5694_v26 = vsel %vm5667_vm3, %v5686_v9, %v10272_v40  ;;  %v5669_v39 = vsel %vm5667_vm3, %v5660_v44, %v10273_v35  ;;  %v4610_v32 = vmax.f32 %v14483_v62, 0.0  ;;  %v5170_v35 = vld [vmem:[#allocation3 + $0xc1] ss:$2 sm:$0xff]  ;;  %v9587_v40 = vpack.c.bf16 %v5839_v24, %v5837_v2  ;;  %v5841_v45 = vld [vmem:[%s16706_s3 + $0x2a0] sm:$0xff]  ;;  %v5254_v62 = vld [vmem:[#allocation3 + $0x13a] ss:$2 sm:$0xff] }
 0x641   : > { %v10278_v29 = vunpack.i.h.bf16 %v10276_v59  ;;  %v10277_v21 = vunpack.i.l.bf16 %v10276_v59  ;;  %v9589_v59 = vpack.c.bf16 %v5844_v6, %v5842_v14 }
 0x642   : > { %9576 = vmatpush1.bf16.msra.mxu1 %v9575_v37  ;;  %v5843_v37 = vld [vmem:[%s16706_s3 + $0x2b0] sm:$0xff] }
 0x643   : > { %10400 = vrot.lane.b32.xlu0 %v10399_v51, %s10692_s25  ;;  %10395 = vrot.lane.b32.xlu1 %v10394_v22, %s10690_s17  ;;  %v5702_v20 = vsel %vm5676_vm4, %v5694_v26, %v10277_v21  ;;  %v5678_v60 = vsel %vm5676_vm4, %v5669_v39, %v10278_v29  ;;  %v10414_v29 = vpack.i.bf16 %v5170_v35, %v5234_v17  ;;  %v5090_v21 = vld [vmem:[#allocation3 + $0xa8] ss:$2 sm:$0xff]  ;;  %v5846_v51 = vld [vmem:[%s16706_s3 + $0x2c8] sm:$0xff]  ;;  %v5202_v39 = vld [vmem:[#allocation3 + $0xc3] ss:$2 sm:$0xff] }
 0x644   : > { %v10286_v5 = vpop.permute.xlu1 %10285  ;;  %v10281_v46 = vpop.permute.xlu0 %10280  ;;  %5967 = vmatprep.mubr.f32.mxu1 %v5702_v20  ;;  %9578 = vmatprep.subr.bf16.mxu1 %v9577_v7  ;;  %v10419_v7 = vpack.i.bf16 %v5186_v63, %v5250_v0  ;;  %v5848_v22 = vld [vmem:[%s16706_s3 + $0x2d8] sm:$0xff]  ;;  %v5172_v26 = vld [vmem:[#allocation3 + $0xf1] ss:$2 sm:$0xff]  ;;  %v9591_v61 = vpack.c.bf16 %v5843_v37, %v5841_v45  ;;  %v5855_v0 = vld [vmem:[%s16706_s3 + $0x310] sm:$0xff] }
 0x645   : > { %v10283_v16 = vunpack.i.h.bf16 %v10281_v46  ;;  %v10282_v31 = vunpack.i.l.bf16 %v10281_v46  ;;  %5968 = vmatmul.mubr.f32.gmra.mrb[2].mxu1 %v5678_v60  ;;  %v10288_v30 = vunpack.i.h.bf16 %v10286_v5  ;;  %v10287_v11 = vunpack.i.l.bf16 %v10286_v5  ;;  %v5845_v60 = vld [vmem:[%s16706_s3 + $0x2c0] sm:$0xff]  ;;  %v5266_v5 = vld [vmem:[#allocation3 + $0xdb] ss:$2 sm:$0xff] }
 0x646   : > { %9580 = vmatpush1.bf16.msra.mxu1 %v9579_v47  ;;  %v9593_v46 = vpack.c.bf16 %v5848_v22, %v5846_v51 }
 0x647   : > { %10410 = vrot.lane.b32.xlu0 %v10409_v13, %s10690_s17  ;;  %10405 = vrot.lane.b32.xlu1 %v10404_v50, %s10691_s0  ;;  %v5687_v53 = vsel %vm4932_vm0, %v5088_v43, %v10282_v31  ;;  %v5661_v10 = vsel %vm4932_vm0, %v5025_v25, %v10283_v16  ;;  %v10424_v16 = vpack.i.bf16 %v5202_v39, %v5266_v5  ;;  %v5850_v31 = vld [vmem:[%s16706_s3 + $0x2e8] sm:$0xff]  ;;  %v5852_v13 = vld [vmem:[%s16706_s3 + $0x2f8] sm:$0xff] }
 0x648   : > { %v10291_v15 = vpop.permute.xlu0 %10290  ;;  %9582 = vmatprep.subr.bf16.mxu1 %v9581_v48  ;;  %v5695_v1 = vsel %vm5667_vm3, %v5687_v53, %v10287_v11  ;;  %v5670_v49 = vsel %vm5667_vm3, %v5661_v10, %v10288_v30  ;;  %v10429_v48 = vpack.i.bf16 %v5172_v26, %v5236_v55  ;;  %v5188_v30 = vld [vmem:[#allocation3 + $0xf2] ss:$2 sm:$0xff]  ;;  %v9595_v11 = vpack.c.bf16 %v5847_v42, %v5845_v60 }
 0x649   : > { %v10293_v36 = vunpack.i.h.bf16 %v10291_v15  ;;  %v10292_v18 = vunpack.i.l.bf16 %v10291_v15  ;;  %v5849_v53 = vld [vmem:[%s16706_s3 + $0x2e0] sm:$0xff]  ;;  %v5851_v10 = vld [vmem:[%s16706_s3 + $0x2f0] sm:$0xff] }
 0x64a   : > { %9584 = vmatpush1.bf16.msra.mxu1 %v9583_v54  ;;  %v5268_v54 = vld [vmem:[#allocation3 + $0x10b] ss:$2 sm:$0xff]  ;;  %v5252_v15 = vld [vmem:[#allocation3 + $0x10a] ss:$2 sm:$0xff]  ;;  %v5859_v39 = vld [vmem:[%s16706_s3 + $0x330] sm:$0xff] }
 0x64b   : > { %4706 = vrot.lane.b32.xlu0 %v4611_v8, %s10690_s17  ;;  %4704 = vrot.lane.b32.xlu1 %v4610_v32, %s10690_s17  ;;  %v5703_v4 = vsel %vm5676_vm4, %v5695_v1, %v10292_v18  ;;  %v5679_v38 = vsel %vm5676_vm4, %v5670_v49, %v10293_v36  ;;  %v5854_v36 = vld [vmem:[%s16706_s3 + $0x308] sm:$0xff]  ;;  %v5856_v18 = vld [vmem:[%s16706_s3 + $0x318] sm:$0xff]  ;;  %v10439_v1 = vpack.i.bf16 %v5204_v27, %v5268_v54 }
 0x64c   : > { %v10296_v9 = vpop.permute.xlu1 %10295  ;;  %v10301_v44 = vpop.permute.xlu0 %10300  ;;  %5973 = vmatprep.mubr.f32.mxu1 %v5703_v4  ;;  %9586 = vmatprep.subr.bf16.mxu1 %v9585_v33  ;;  %v9597_v33 = vpack.c.bf16 %v5852_v13, %v5850_v31  ;;  %v10434_v49 = vpack.i.bf16 %v5188_v30, %v5252_v15  ;;  %v5029_v4 = vld [vmem:[#allocation3 + $0xc0] ss:$2 sm:$0xff]  ;;  %v5857_v26 = vld [vmem:[%s16706_s3 + $0x320] sm:$0xff] }
 0x64d   : > { %v10298_v19 = vunpack.i.h.bf16 %v10296_v9  ;;  %v10297_v12 = vunpack.i.l.bf16 %v10296_v9  ;;  %5974 = vmatmul.mubr.f32.gmra.mrb[4].mxu1 %v5679_v38  ;;  %v10303_v34 = vunpack.i.h.bf16 %v10301_v44  ;;  %v10302_v57 = vunpack.i.l.bf16 %v10301_v44  ;;  %v5853_v44 = vld [vmem:[%s16706_s3 + $0x300] sm:$0xff]  ;;  %v5863_v13 = vld [vmem:[%s16706_s3 + $0x350] sm:$0xff]  ;;  %v5868_v27 = vld [vmem:[%s16706_s3 + $0x378] sm:$0xff] }
 0x64e   : > { %9588 = vmatpush1.bf16.msra.mxu1 %v9587_v40  ;;  %v5092_v40 = vld [vmem:[#allocation3 + $0xd8] ss:$2 sm:$0xff]  ;;  %v9599_v38 = vpack.c.bf16 %v5851_v10, %v5849_v53  ;;  %v9601_v9 = vpack.c.bf16 %v5856_v18, %v5854_v36  ;;  %v9603_v51 = vpack.c.bf16 %v5855_v0, %v5853_v44  ;;  %v5094_v5 = vld [vmem:[#allocation3 + $0x108] ss:$2 sm:$0xff] }
 0x64f   : > { %10420 = vrot.lane.b32.xlu0 %v10419_v7, %s10691_s0  ;;  %10415 = vrot.lane.b32.xlu1 %v10414_v29, %s10692_s25  ;;  %v5688_v47 = vsel %vm4932_vm0, %v5090_v21, %v10297_v12  ;;  %v5662_v20 = vsel %vm4932_vm0, %v5027_v52, %v10298_v19  ;;  %v5860_v19 = vld [vmem:[%s16706_s3 + $0x338] sm:$0xff]  ;;  %v5861_v31 = vld [vmem:[%s16706_s3 + $0x340] sm:$0xff] }
 0x650   : > { %v10306_v3 = vpop.permute.xlu1 %10305  ;;  %9590 = vmatprep.subr.bf16.mxu1 %v9589_v59  ;;  %v5696_v50 = vsel %vm5667_vm3, %v5688_v47, %v10302_v57  ;;  %v5671_v23 = vsel %vm5667_vm3, %v5662_v20, %v10303_v34  ;;  %v5858_v59 = vld [vmem:[%s16706_s3 + $0x328] sm:$0xff]  ;;  %v5864_v20 = vld [vmem:[%s16706_s3 + $0x358] sm:$0xff]  ;;  %v9611_v54 = vpack.c.bf16 %v5863_v13, %v5861_v31  ;;  %v5867_v15 = vld [vmem:[%s16706_s3 + $0x370] sm:$0xff] }
 0x651   : > { %v10308_v58 = vunpack.i.h.bf16 %v10306_v3  ;;  %v10307_v56 = vunpack.i.l.bf16 %v10306_v3  ;;  %v9605_v57 = vpack.c.bf16 %v5860_v19, %v5858_v59  ;;  %v5862_v47 = vld [vmem:[%s16706_s3 + $0x348] sm:$0xff]  ;;  %v5872_v36 = vld [vmem:[%s16706_s3 + $0x398] sm:$0xff]  ;;  %v5877_v0 = vld [vmem:[%s16706_s3 + $0x3c0] sm:$0xff] }
 0x652   : > { %9592 = vmatpush1.bf16.msra.mxu1 %v9591_v61  ;;  %v5882_v59 = vld [vmem:[%s16706_s3 + $0x3e8] sm:$0xff]  ;;  %v5884_v19 = vld [vmem:[%s16706_s3 + $0x3f8] sm:$0xff] }
 0x653   : > { %10430 = vrot.lane.b32.xlu0 %v10429_v48, %s10692_s25  ;;  %10425 = vrot.lane.b32.xlu1 %v10424_v16, %s10690_s17  ;;  %v5704_v43 = vsel %vm5676_vm4, %v5696_v50, %v10307_v56  ;;  %v5680_v25 = vsel %vm5676_vm4, %v5671_v23, %v10308_v58  ;;  %v9607_v58 = vpack.c.bf16 %v5859_v39, %v5857_v26  ;;  %v5866_v23 = vld [vmem:[%s16706_s3 + $0x368] sm:$0xff] }
 0x654   : > { %v10316_v2 = vpop.permute.xlu1 %10315  ;;  %v10311_v24 = vpop.permute.xlu0 %10310  ;;  %5979 = vmatprep.mubr.f32.mxu1 %v5704_v43  ;;  %9594 = vmatprep.subr.bf16.mxu1 %v9593_v46  ;;  %v5031_v46 = vld [vmem:[#allocation3 + $0xf0] ss:$2 sm:$0xff]  ;;  %v9609_v16 = vpack.c.bf16 %v5864_v20, %v5862_v47  ;;  %v5033_v47 = vld [vmem:[#allocation3 + $0x120] ss:$2 sm:$0xff] }
 0x655   : > { %v10313_v14 = vunpack.i.h.bf16 %v10311_v24  ;;  %v10312_v6 = vunpack.i.l.bf16 %v10311_v24  ;;  %5980 = vmatmul.mubr.f32.gmra.mrb[6].mxu1 %v5680_v25  ;;  %v10318_v63 = vunpack.i.h.bf16 %v10316_v2  ;;  %v10317_v35 = vunpack.i.l.bf16 %v10316_v2  ;;  %v5865_v24 = vld [vmem:[%s16706_s3 + $0x360] sm:$0xff] }
 0x656   : > { %9596 = vmatpush1.bf16.msra.mxu1 %v9595_v11  ;;  %v9613_v2 = vpack.c.bf16 %v5868_v27, %v5866_v23  ;;  %v9615_v18 = vpack.c.bf16 %v5867_v15, %v5865_v24  ;;  %v5098_v27 = vld [vmem:[#allocation3 + $0x168] ss:$2 sm:$0xff] }
 0x657   : > { %10440 = vrot.lane.b32.xlu0 %v10439_v1, %s10690_s17  ;;  %10435 = vrot.lane.b32.xlu1 %v10434_v49, %s10691_s0  ;;  %v5689_v45 = vsel %vm4932_vm0, %v5092_v40, %v10312_v6  ;;  %v5663_v37 = vsel %vm4932_vm0, %v5029_v4, %v10313_v14  ;;  %v5869_v6 = vld [vmem:[%s16706_s3 + $0x380] sm:$0xff]  ;;  %v5871_v1 = vld [vmem:[%s16706_s3 + $0x390] sm:$0xff] }
 0x658   : > { %v10321_v17 = vpop.permute.xlu0 %10320  ;;  %9598 = vmatprep.subr.bf16.mxu1 %v9597_v33  ;;  %v5697_v29 = vsel %vm5667_vm3, %v5689_v45, %v10317_v35  ;;  %v5672_v21 = vsel %vm5667_vm3, %v5663_v37, %v10318_v63  ;;  %v5870_v33 = vld [vmem:[%s16706_s3 + $0x388] sm:$0xff]  ;;  %v5876_v63 = vld [vmem:[%s16706_s3 + $0x3b8] sm:$0xff]  ;;  %v9619_v35 = vpack.c.bf16 %v5871_v1, %v5869_v6  ;;  %v5873_v4 = vld [vmem:[%s16706_s3 + $0x3a0] sm:$0xff] }
 0x659   : > { %v10323_v12 = vunpack.i.h.bf16 %v10321_v17  ;;  %v10322_v7 = vunpack.i.l.bf16 %v10321_v17  ;;  %v9617_v14 = vpack.c.bf16 %v5872_v36, %v5870_v33  ;;  %v5874_v49 = vld [vmem:[%s16706_s3 + $0x3a8] sm:$0xff]  ;;  %v5880_v37 = vld [vmem:[%s16706_s3 + $0x3d8] sm:$0xff]  ;;  %v5879_v17 = vld [vmem:[%s16706_s3 + $0x3d0] sm:$0xff] }
 0x65a   : > { %9600 = vmatpush1.bf16.msra.mxu1 %v9599_v38  ;;  %v9621_v40 = vpack.c.bf16 %v5876_v63, %v5874_v49  ;;  %v5875_v38 = vld [vmem:[%s16706_s3 + $0x3b0] sm:$0xff]  ;;  %v5878_v45 = vld [vmem:[%s16706_s3 + $0x3c8] sm:$0xff] }
 0x65b   : > { %v5705_v22 = vsel %vm5676_vm4, %v5697_v29, %v10322_v7  ;;  %v5681_v34 = vsel %vm5676_vm4, %v5672_v21, %v10323_v12  ;;  %9602 = vmatprep.subr.bf16.mxu1 %v9601_v9  ;;  %v9623_v9 = vpack.c.bf16 %v5875_v38, %v5873_v4  ;;  %v9625_v44 = vpack.c.bf16 %v5880_v37, %v5878_v45  ;;  %v5881_v29 = vld [vmem:[%s16706_s3 + $0x3e0] sm:$0xff]  ;;  %v5883_v21 = vld [vmem:[%s16706_s3 + $0x3f0] sm:$0xff] }
 0x65c   : > { %v10326_v52 = vpop.permute.xlu1 %10325  ;;  %v10331_v61 = vpop.permute.xlu0 %10330  ;;  %5985 = vmatprep.mubr.f32.mxu1 %v5705_v22  ;;  %v9627_v12 = vpack.c.bf16 %v5879_v17, %v5877_v0  ;;  %v9629_v7 = vpack.c.bf16 %v5884_v19, %v5882_v59  ;;  %v5148_v1 = vld [vmem:[#allocation3 + $0x30] ss:$2 sm:$0xff] }
 0x65d   : > { %v10328_v60 = vunpack.i.h.bf16 %v10326_v52  ;;  %v10327_v42 = vunpack.i.l.bf16 %v10326_v52  ;;  %5986 = vmatmul.mubr.f32.gmra.mrb[8].mxu1 %v5681_v34  ;;  %v10333_v3 = vunpack.i.h.bf16 %v10331_v61  ;;  %v10332_v55 = vunpack.i.l.bf16 %v10331_v61  ;;  %v5096_v61 = vld [vmem:[#allocation3 + $0x138] ss:$2 sm:$0xff]  ;;  %v5212_v4 = vld [vmem:[#allocation3 + $0x48] ss:$2 sm:$0xff] }
 0x65e   : > { %9604 = vmatpush1.bf16.msra.mxu1 %v9603_v51  ;;  %v9631_v51 = vpack.c.bf16 %v5883_v21, %v5881_v29  ;;  %v5214_v21 = vld [vmem:[#allocation3 + $0x78] ss:$2 sm:$0xff] }
 0x65f   : > { %v5690_v56 = vsel %vm4932_vm0, %v5094_v5, %v10327_v42  ;;  %v5664_v48 = vsel %vm4932_vm0, %v5031_v46, %v10328_v60  ;;  %9606 = vmatprep.subr.bf16.mxu1 %v9605_v57 }
 0x660   : > { %v10336_v50 = vpop.permute.xlu1 %10335  ;;  %v5698_v43 = vsel %vm5667_vm3, %v5690_v56, %v10332_v55  ;;  %v5673_v25 = vsel %vm5667_vm3, %v5664_v48, %v10333_v3 }
 0x661   : > { %v10338_v30 = vunpack.i.h.bf16 %v10336_v50  ;;  %v10337_v11 = vunpack.i.l.bf16 %v10336_v50 }
 0x662   : > { %9608 = vmatpush1.bf16.msra.mxu1 %v9607_v58 }
 0x663   : > { %v5706_v53 = vsel %vm5676_vm4, %v5698_v43, %v10337_v11  ;;  %v5682_v10 = vsel %vm5676_vm4, %v5673_v25, %v10338_v30  ;;  %9610 = vmatprep.subr.bf16.mxu1 %v9609_v16  ;;  %v5035_v30 = vld [vmem:[#allocation3 + $0x150] ss:$2 sm:$0xff] }
 0x664   : > { %5991 = vmatprep.mubr.f32.mxu1 %v5706_v53 }
 0x665   : > { %5992 = vmatmul.mubr.f32.gmra.mrb[10].mxu1 %v5682_v10 }
 0x666   : > { %9612 = vmatpush1.bf16.msra.mxu1 %v9611_v54 }
 0x667   : > { %9614 = vmatprep.subr.bf16.mxu1 %v9613_v2 }
 0x66a   : > { %9616 = vmatpush1.bf16.msra.mxu1 %v9615_v18 }
 0x66b   : > { %9618 = vmatprep.subr.bf16.mxu1 %v9617_v14 }
 0x66e   : > { %9620 = vmatpush1.bf16.msra.mxu1 %v9619_v35 }
 0x66f   : > { %9622 = vmatprep.subr.bf16.mxu1 %v9621_v40 }
 0x672   : > { %9624 = vmatpush1.bf16.msra.mxu1 %v9623_v9 }
 0x673   : > { %9626 = vmatprep.subr.bf16.mxu1 %v9625_v44 }
 0x676   : > { %9628 = vmatpush1.bf16.msra.mxu1 %v9627_v12 }
 0x677   : > { %9630 = vmatprep.subr.bf16.mxu1 %v9629_v7 }
 0x679   : > { %v10346_v22 = vpop.permute.xlu1 %10345  ;;  %v10341_v34 = vpop.permute.xlu0 %10340 }
 0x67a   : > { %v10343_v57 = vunpack.i.h.bf16 %v10341_v34  ;;  %v10342_v26 = vunpack.i.l.bf16 %v10341_v34  ;;  %9632 = vmatpush1.bf16.msra.mxu1 %v9631_v51  ;;  %v10348_v39 = vunpack.i.h.bf16 %v10346_v22  ;;  %v10347_v52 = vunpack.i.l.bf16 %v10346_v22  ;;  %v5150_v51 = vld [vmem:[#allocation3 + $0x60] ss:$2 sm:$0xff] }
 0x67c   : > { %v5691_v20 = vsel %vm4932_vm0, %v5096_v61, %v10342_v26  ;;  %v5665_v60 = vsel %vm4932_vm0, %v5033_v47, %v10343_v57 }
 0x67d   : > { %v10351_v42 = vpop.permute.xlu0 %10350  ;;  %v5699_v5 = vsel %vm5667_vm3, %v5691_v20, %v10347_v52  ;;  %v5674_v46 = vsel %vm5667_vm3, %v5665_v60, %v10348_v39 }
 0x67e   : > { %v10353_v3 = vunpack.i.h.bf16 %v10351_v42  ;;  %v10352_v55 = vunpack.i.l.bf16 %v10351_v42 }
 0x680   : > { %v5707_v58 = vsel %vm5676_vm4, %v5699_v5, %v10352_v55  ;;  %v5683_v56 = vsel %vm5676_vm4, %v5674_v46, %v10353_v3 }
 0x681   : > { %5997 = vmatprep.mubr.f32.mxu1 %v5707_v58 }
 0x682   : > { %5998 = vmatmul.mubr.f32.gmra.mrb[12].mxu1 %v5683_v56 }
 0x6a5   : > { %v10356_v48 = vpop.permute.xlu1 %10355  ;;  %v10361_v16 = vpop.permute.xlu0 %10360 }
 0x6a6   : > { %v10358_v31 = vunpack.i.h.bf16 %v10356_v48  ;;  %v10357_v13 = vunpack.i.l.bf16 %v10356_v48  ;;  %v10363_v50 = vunpack.i.h.bf16 %v10361_v16  ;;  %v10362_v23 = vunpack.i.l.bf16 %v10361_v16  ;;  %v5216_v16 = vld [vmem:[#allocation3 + $0xa8] ss:$2 sm:$0xff] }
 0x6a8   : > { %v5692_v11 = vsel %vm4932_vm0, %v5098_v27, %v10357_v13  ;;  %v5666_v43 = vsel %vm4932_vm0, %v5035_v30, %v10358_v31  ;;  %v5152_v31 = vld [vmem:[#allocation3 + $0x90] ss:$2 sm:$0xff] }
 0x6a9   : > { %v10366_v25 = vpop.permute.xlu1 %10365  ;;  %v10371_v54 = vpop.permute.xlu0 %10370  ;;  %v5700_v15 = vsel %vm5667_vm3, %v5692_v11, %v10362_v23  ;;  %v5675_v33 = vsel %vm5667_vm3, %v5666_v43, %v10363_v50 }
 0x6aa   : > { %v10368_v53 = vunpack.i.h.bf16 %v10366_v25  ;;  %v10367_v10 = vunpack.i.l.bf16 %v10366_v25  ;;  %v10373_v2 = vunpack.i.h.bf16 %v10371_v54  ;;  %v10372_v24 = vunpack.i.l.bf16 %v10371_v54 }
 0x6ac   : > { %v5708_v36 = vsel %vm5676_vm4, %v5700_v15, %v10367_v10  ;;  %v5684_v18 = vsel %vm5676_vm4, %v5675_v33, %v10368_v53  ;;  %v5709_v38 = vsel %vm4932_vm0, %v5148_v1, %v10373_v2  ;;  %v5733_v45 = vsel %vm4932_vm0, %v5212_v4, %v10372_v24  ;;  %v5174_v10 = vld [vmem:[#allocation3 + $0x121] ss:$2 sm:$0xff]  ;;  %v5190_v2 = vld [vmem:[#allocation3 + $0x122] ss:$2 sm:$0xff] }
 0x6ad   : > { %v10376_v14 = vpop.permute.xlu1 %10375  ;;  %v10381_v6 = vpop.permute.xlu0 %10380  ;;  %6003 = vmatprep.mubr.f32.mxu1 %v5708_v36  ;;  %v5238_v33 = vld [vmem:[#allocation3 + $0x139] ss:$2 sm:$0xff]  ;;  %v10449_v41 = vpack.i.bf16 %v5190_v2, %v5254_v62  ;;  %v5222_v2 = vld [vmem:[#allocation3 + $0x138] ss:$2 sm:$0xff] }
 0x6ae   : > { %v10378_v49 = vunpack.i.h.bf16 %v10376_v14  ;;  %v10377_v63 = vunpack.i.l.bf16 %v10376_v14  ;;  %v10383_v35 = vunpack.i.h.bf16 %v10381_v6  ;;  %v10382_v40 = vunpack.i.l.bf16 %v10381_v6  ;;  %6004 = vmatmul.mubr.f32.gmra.mrb[14].mxu1 %v5684_v18  ;;  %v5206_v1 = vld [vmem:[#allocation3 + $0x123] ss:$2 sm:$0xff] }
 0x6af   : > { %v10444_v18 = vpack.i.bf16 %v5174_v10, %v5238_v33 }
 0x6b0   : > { %v5717_v37 = vsel %vm5667_vm3, %v5709_v38, %v10378_v49  ;;  %v5741_v9 = vsel %vm5667_vm3, %v5733_v45, %v10377_v63  ;;  %v5176_v49 = vld [vmem:[#allocation3 + $0x151] ss:$2 sm:$0xff]  ;;  %v5154_v63 = vld [vmem:[#allocation3 + $0xc0] ss:$2 sm:$0xff] }
 0x6b1   : > { %v10386_v44 = vpop.permute.xlu1 %10385  ;;  %v10391_v0 = vpop.permute.xlu0 %10390  ;;  %v5749_v17 = vsel %vm5676_vm4, %v5741_v9, %v10382_v40  ;;  %v5725_v59 = vsel %vm5676_vm4, %v5717_v37, %v10383_v35  ;;  %v5270_v45 = vld [vmem:[#allocation3 + $0x13b] ss:$2 sm:$0xff] }
 0x6b2   : > { %v10388_v19 = vunpack.i.h.bf16 %v10386_v44  ;;  %v10387_v12 = vunpack.i.l.bf16 %v10386_v44  ;;  %6074 = vmatprep.mubr.f32.mxu1 %v5749_v17  ;;  %v10393_v7 = vunpack.i.h.bf16 %v10391_v0  ;;  %v10392_v29 = vunpack.i.l.bf16 %v10391_v0  ;;  %v5240_v37 = vld [vmem:[#allocation3 + $0x169] ss:$2 sm:$0xff] }
 0x6b3   : > { %6075 = vmatmul.mubr.f32.vlgmr.msra.gmra.mrb[0].mxu1 %v5725_v59  ;;  %v10454_v0 = vpack.i.bf16 %v5206_v1, %v5270_v45  ;;  %v10459_v17 = vpack.i.bf16 %v5176_v49, %v5240_v37  ;;  %v5192_v59 = vld [vmem:[#allocation3 + $0x152] ss:$2 sm:$0xff] }
 0x6b4   : > { %v5734_v22 = vsel %vm4932_vm0, %v5214_v21, %v10387_v12  ;;  %v5710_v34 = vsel %vm4932_vm0, %v5150_v51, %v10388_v19  ;;  %v5208_v19 = vld [vmem:[#allocation3 + $0x153] ss:$2 sm:$0xff] }
 0x6b5   : > { %v10396_v57 = vpop.permute.xlu1 %10395  ;;  %v10401_v26 = vpop.permute.xlu0 %10400  ;;  %v5742_v20 = vsel %vm5667_vm3, %v5734_v22, %v10392_v29  ;;  %v5718_v60 = vsel %vm5667_vm3, %v5710_v34, %v10393_v7  ;;  %v5256_v34 = vld [vmem:[#allocation3 + $0x16a] ss:$2 sm:$0xff] }
 0x6b6   : > { %v10398_v39 = vunpack.i.h.bf16 %v10396_v57  ;;  %v10397_v52 = vunpack.i.l.bf16 %v10396_v57  ;;  %v10403_v61 = vunpack.i.h.bf16 %v10401_v26  ;;  %v10402_v47 = vunpack.i.l.bf16 %v10401_v26  ;;  %v5272_v57 = vld [vmem:[#allocation3 + $0x16b] ss:$2 sm:$0xff] }
 0x6b8   : > { %v5750_v42 = vsel %vm5676_vm4, %v5742_v20, %v10397_v52  ;;  %v5726_v3 = vsel %vm5676_vm4, %v5718_v60, %v10398_v39  ;;  %v5735_v13 = vsel %vm4932_vm0, %v5216_v16, %v10402_v47  ;;  %v5711_v50 = vsel %vm4932_vm0, %v5152_v31, %v10403_v61 }
 0x6b9   : > { %v10406_v55 = vpop.permute.xlu1 %10405  ;;  %v10411_v5 = vpop.permute.xlu0 %10410  ;;  %6080 = vmatprep.mubr.f32.mxu1 %v5750_v42  ;;  %v10464_v52 = vpack.i.bf16 %v5192_v59, %v5256_v34  ;;  %v10469_v61 = vpack.i.bf16 %v5208_v19, %v5272_v57  ;;  %v5224_v19 = vld [vmem:[#allocation3 + $0x168] ss:$2 sm:$0xff] }
 0x6ba   : > { %v10408_v46 = vunpack.i.h.bf16 %v10406_v55  ;;  %v10407_v58 = vunpack.i.l.bf16 %v10406_v55  ;;  %v10413_v56 = vunpack.i.h.bf16 %v10411_v5  ;;  %v10412_v48 = vunpack.i.l.bf16 %v10411_v5  ;;  %6081 = vmatmul.mubr.f32.gmra.mrb[2].mxu1 %v5726_v3  ;;  %v5220_v3 = vld [vmem:[#allocation3 + $0x108] ss:$2 sm:$0xff] }
 0x6bb   : > { %v5156_v55 = vld [vmem:[#allocation3 + $0xf0] ss:$2 sm:$0xff] }
 0x6bc   : > { %v5743_v23 = vsel %vm5667_vm3, %v5735_v13, %v10407_v58  ;;  %v5719_v27 = vsel %vm5667_vm3, %v5711_v50, %v10408_v46 }
 0x6bd   : > { %v4705_v30 = vpop.permute.xlu1 %4704  ;;  %v4707_v11 = vpop.permute.xlu0 %4706  ;;  %v5751_v43 = vsel %vm5676_vm4, %v5743_v23, %v10412_v48  ;;  %v5727_v25 = vsel %vm5676_vm4, %v5719_v27, %v10413_v56 }
 0x6be   : > { %v14701_v54 = vmax.f32 %v4610_v32, %v4705_v30  ;;  %v14705_v53 = vmax.f32 %v4611_v8, %v4707_v11  ;;  %6086 = vmatprep.mubr.f32.mxu1 %v5751_v43  ;;  %v5218_v8 = vld [vmem:[#allocation3 + $0xd8] ss:$2 sm:$0xff] }
 0x6bf   : > { %6087 = vmatmul.mubr.f32.gmra.mrb[4].mxu1 %v5727_v25 }
 0x6c0   : > { %4864 = vrot.lane.b32.xlu1 %v14701_v54, %s10691_s0  ;;  %4866 = vrot.lane.b32.xlu0 %v14705_v53, %s10691_s0 }
 0x6c1   : > { %v10416_v24 = vpop.permute.xlu1 %10415  ;;  %v10421_v15 = vpop.permute.xlu0 %10420 }
 0x6c2   : > { %v10418_v32 = vunpack.i.h.bf16 %v10416_v24  ;;  %v10417_v36 = vunpack.i.l.bf16 %v10416_v24  ;;  %v10423_v14 = vunpack.i.h.bf16 %v10421_v15  ;;  %v10422_v6 = vunpack.i.l.bf16 %v10421_v15  ;;  %v5158_v24 = vld [vmem:[#allocation3 + $0x120] ss:$2 sm:$0xff] }
 0x6c4   : > { %10445 = vrot.lane.b32.xlu1 %v10444_v18, %s10692_s25  ;;  %10450 = vrot.lane.b32.xlu0 %v10449_v41, %s10691_s0  ;;  %v5736_v35 = vsel %vm4932_vm0, %v5218_v8, %v10417_v36  ;;  %v5712_v40 = vsel %vm4932_vm0, %v5154_v63, %v10418_v32  ;;  %v5258_v32 = vld [vmem:[#allocation3 + $0x19a] ss:$2 sm:$0xff] }
 0x6c5   : > { %v10426_v4 = vpop.permute.xlu1 %10425  ;;  %v10431_v38 = vpop.permute.xlu0 %10430  ;;  %v5744_v29 = vsel %vm5667_vm3, %v5736_v35, %v10422_v6  ;;  %v5720_v21 = vsel %vm5667_vm3, %v5712_v40, %v10423_v14 }
 0x6c6   : > { %v10428_v9 = vunpack.i.h.bf16 %v10426_v4  ;;  %v10427_v44 = vunpack.i.l.bf16 %v10426_v4  ;;  %v10433_v12 = vunpack.i.h.bf16 %v10431_v38  ;;  %v10432_v7 = vunpack.i.l.bf16 %v10431_v38 }
 0x6c8   : > { %10455 = vrot.lane.b32.xlu1 %v10454_v0, %s10690_s17  ;;  %10460 = vrot.lane.b32.xlu0 %v10459_v17, %s10692_s25  ;;  %v5752_v51 = vsel %vm5676_vm4, %v5744_v29, %v10427_v44  ;;  %v5728_v22 = vsel %vm5676_vm4, %v5720_v21, %v10428_v9  ;;  %v5737_v5 = vsel %vm4932_vm0, %v5220_v3, %v10432_v7  ;;  %v5274_v9 = vld [vmem:[#allocation3 + $0x19b] ss:$2 sm:$0xff] }
 0x6c9   : > { %v10436_v26 = vpop.permute.xlu1 %10435  ;;  %v10441_v39 = vpop.permute.xlu0 %10440  ;;  %6092 = vmatprep.mubr.f32.mxu1 %v5752_v51  ;;  %v5713_v46 = vsel %vm4932_vm0, %v5156_v55, %v10433_v12  ;;  %v5160_v12 = vld [vmem:[#allocation3 + $0x150] ss:$2 sm:$0xff] }
 0x6ca   : > { %v10438_v47 = vunpack.i.h.bf16 %v10436_v26  ;;  %v10437_v20 = vunpack.i.l.bf16 %v10436_v26  ;;  %v10443_v60 = vunpack.i.h.bf16 %v10441_v39  ;;  %v10442_v42 = vunpack.i.l.bf16 %v10441_v39  ;;  %6093 = vmatmul.mubr.f32.gmra.mrb[6].mxu1 %v5728_v22 }
 0x6cb   : > { %v5887_v26 = vlaneseq }
 0x6cc   : > { %10465 = vrot.lane.b32.xlu1 %v10464_v52, %s10691_s0  ;;  %10470 = vrot.lane.b32.xlu0 %v10469_v61, %s10690_s17  ;;  %v5745_v58 = vsel %vm5667_vm3, %v5737_v5, %v10437_v20  ;;  %v5721_v56 = vsel %vm5667_vm3, %v5713_v46, %v10438_v47  ;;  %v5885_v61 = vld [vmem:[%s16707_s4] sm:$0x3] }
 0x6cd   : > { %v5753_v48 = vsel %vm5676_vm4, %v5745_v58, %v10442_v42  ;;  %v5729_v16 = vsel %vm5676_vm4, %v5721_v56, %v10443_v60  ;;  %v5888_v39 = vshrl.u32 %v5887_v26, 7  ;;  %v6557_v26 = vld [vmem:[%s16708_s5 + $0x390] sm:$0xff] }
 0x6ce   : > { %6098 = vmatprep.mubr.f32.mxu1 %v5753_v48 }
 0x6cf   : > { %6099 = vmatmul.mubr.f32.gmra.mrb[8].mxu1 %v5729_v16  ;;  %v5889_v52 = vsub.s32 0, %v5888_v39  ;;  %v5893_v47 = vsub.s32 1, %v5888_v39  ;;  %v6558_v39 = vld [vmem:[%s16708_s5 + $0x398] sm:$0xff] }
 0x6d1   : > { %v14751_v20 = vrot.slane %v5885_v61, %v5889_v52  ;;  %v14753_v60 = vrot.slane %v5885_v61, %v5893_v47  ;;  %v6450_v61 = vld [vmem:[%s16708_s5 + $0x38] sm:$0xff]  ;;  %v6467_v47 = vld [vmem:[%s16708_s5 + $0xc0] sm:$0xff] }
 0x732   : > { %v4865_v31 = vpop.permute.xlu1 %4864  ;;  %v4867_v13 = vpop.permute.xlu0 %4866 }
 0x733   : > { %v4930_v50 = vmax.f32 %v14701_v54, %v4865_v31  ;;  %v4931_v23 = vmax.f32 %v14705_v53, %v4867_v13  ;;  %v5242_v53 = vld [vmem:[#allocation3 + $0x199] ss:$2 sm:$0xff] }
 0x735   : > { %5019 = vst.msk [vmem:[#allocation3 + $0x181] sm:$0xff] %vm4932_vm0, %v4930_v50  ;;  %5020 = vst.msk [vmem:[#allocation3 + $0x189] sm:$0xff] %vm4932_vm0, %v4931_v23 }
 0x736   : > { %v10446_v27 = vpop.permute.xlu1 %10445  ;;  %v10451_v30 = vpop.permute.xlu0 %10450 }
 0x737   : > { %v10448_v11 = vunpack.i.h.bf16 %v10446_v27  ;;  %v10447_v43 = vunpack.i.l.bf16 %v10446_v27  ;;  %v10453_v25 = vunpack.i.h.bf16 %v10451_v30  ;;  %v10452_v10 = vunpack.i.l.bf16 %v10451_v30 }
 0x739   : > { %v5738_v15 = vsel %vm4932_vm0, %v5222_v2, %v10447_v43  ;;  %v5714_v33 = vsel %vm4932_vm0, %v5158_v24, %v10448_v11 }
 0x73a   : > { %v10456_v62 = vpop.permute.xlu1 %10455  ;;  %v10461_v54 = vpop.permute.xlu0 %10460  ;;  %v5746_v14 = vsel %vm5667_vm3, %v5738_v15, %v10452_v10  ;;  %v5722_v49 = vsel %vm5667_vm3, %v5714_v33, %v10453_v25 }
 0x73b   : > { %v10458_v36 = vunpack.i.h.bf16 %v10456_v62  ;;  %v10457_v18 = vunpack.i.l.bf16 %v10456_v62  ;;  %v10463_v41 = vunpack.i.h.bf16 %v10461_v54  ;;  %v10462_v8 = vunpack.i.l.bf16 %v10461_v54 }
 0x73c   : > { %v5194_v6 = vld [vmem:[#allocation3 + $0x182] ss:$2 sm:$0xff]  ;;  %v5178_v1 = vld [vmem:[#allocation3 + $0x181] ss:$2 sm:$0xff] }
 0x73d   : > { %v5754_v63 = vsel %vm5676_vm4, %v5746_v14, %v10457_v18  ;;  %v10479_v35 = vpack.i.bf16 %v5194_v6, %v5258_v32  ;;  %v10474_v40 = vpack.i.bf16 %v5178_v1, %v5242_v53  ;;  %v5730_v4 = vsel %vm5676_vm4, %v5722_v49, %v10458_v36  ;;  %v5210_v37 = vld [vmem:[#allocation3 + $0x183] ss:$2 sm:$0xff]  ;;  %v6460_v14 = vld [vmem:[%s16708_s5 + $0x88] sm:$0xff] }
 0x73e   : > { %v10466_v38 = vpop.permute.xlu1 %10465  ;;  %v10471_v45 = vpop.permute.xlu0 %10470  ;;  %6104 = vmatprep.mubr.f32.mxu1 %v5754_v63  ;;  %v5739_v7 = vsel %vm4932_vm0, %v5224_v19, %v10462_v8  ;;  %v5715_v29 = vsel %vm4932_vm0, %v5160_v12, %v10463_v41  ;;  %v10484_v21 = vpack.i.bf16 %v5210_v37, %v5274_v9  ;;  %v6459_v8 = vld [vmem:[%s16708_s5 + $0x80] sm:$0xff]  ;;  %v6444_v49 = vld [vmem:[%s16708_s5 + $0x8] sm:$0xff]  ;;  %v6461_v63 = vld [vmem:[%s16708_s5 + $0x90] sm:$0xff] }
 0x73f   : > { %v10468_v44 = vunpack.i.h.bf16 %v10466_v38  ;;  %v10467_v0 = vunpack.i.l.bf16 %v10466_v38  ;;  %v10473_v17 = vunpack.i.h.bf16 %v10471_v45  ;;  %v10472_v59 = vunpack.i.l.bf16 %v10471_v45  ;;  %10480 = vrot.lane.b32.xlu0 %v10479_v35, %s10691_s0  ;;  %10475 = vrot.lane.b32.xlu1 %v10474_v40, %s10692_s25  ;;  %v6443_v6 = vld [vmem:[%s16708_s5] sm:$0xff]  ;;  %v6462_v35 = vld [vmem:[%s16708_s5 + $0x98] sm:$0xff] }
 0x740   : > { %6105 = vmatmul.mubr.f32.gmra.mrb[10].mxu1 %v5730_v4  ;;  %v9633_v1 = vpack.c.bf16 %v6460_v14, %v6459_v8  ;;  %v9635_v40 = vpack.c.bf16 %v6444_v49, %v6443_v6  ;;  %v9637_v4 = vpack.c.bf16 %v6462_v35, %v6461_v63  ;;  %v6445_v38 = vld [vmem:[%s16708_s5 + $0x10] sm:$0xff]  ;;  %v6446_v45 = vld [vmem:[%s16708_s5 + $0x18] sm:$0xff]  ;;  %v6463_v37 = vld [vmem:[%s16708_s5 + $0xa0] sm:$0xff] }
 0x741   : > { %v5747_v51 = vsel %vm5667_vm3, %v5739_v7, %v10467_v0  ;;  %v5723_v22 = vsel %vm5667_vm3, %v5715_v29, %v10468_v44  ;;  %v6464_v9 = vld [vmem:[%s16708_s5 + $0xa8] sm:$0xff]  ;;  %v9639_v44 = vpack.c.bf16 %v6446_v45, %v6445_v38  ;;  %v6447_v0 = vld [vmem:[%s16708_s5 + $0x20] sm:$0xff]  ;;  %v6465_v19 = vld [vmem:[%s16708_s5 + $0xb0] sm:$0xff] }
 0x742   : > { %v5755_v34 = vsel %vm5676_vm4, %v5747_v51, %v10472_v59  ;;  %v5731_v57 = vsel %vm5676_vm4, %v5723_v22, %v10473_v17  ;;  %9634 = vmatprep.subr.bf16.mxu0 %v9633_v1  ;;  %v6448_v17 = vld [vmem:[%s16708_s5 + $0x28] sm:$0xff]  ;;  %v9641_v59 = vpack.c.bf16 %v6464_v9, %v6463_v37  ;;  %v6555_v12 = vld [vmem:[%s16708_s5 + $0x380] sm:$0xff]  ;;  %v6466_v29 = vld [vmem:[%s16708_s5 + $0xb8] sm:$0xff] }
 0x743   : > { %10485 = vrot.lane.b32.xlu1 %v10484_v21, %s10690_s17  ;;  %6110 = vmatprep.mubr.f32.mxu1 %v5755_v34  ;;  %v6556_v7 = vld [vmem:[%s16708_s5 + $0x388] sm:$0xff]  ;;  %v6539_v51 = vld [vmem:[%s16708_s5 + $0x300] sm:$0xff]  ;;  %v6449_v34 = vld [vmem:[%s16708_s5 + $0x30] sm:$0xff]  ;;  %v9643_v52 = vpack.c.bf16 %v6448_v17, %v6447_v0 }
 0x744   : > { %6111 = vmatmul.mubr.f32.gmra.mrb[12].mxu1 %v5731_v57  ;;  %9636 = vmatpush3.bf16.msra.mxu0 %v9635_v40  ;;  %v9729_v21 = vpack.c.bf16 %v6556_v7, %v6555_v12  ;;  %v6540_v22 = vld [vmem:[%s16708_s5 + $0x308] sm:$0xff]  ;;  %v6561_v6 = vld [vmem:[%s16708_s5 + $0x3b0] sm:$0xff]  ;;  %v6562_v1 = vld [vmem:[%s16708_s5 + $0x3b8] sm:$0xff]  ;;  %v9647_v40 = vpack.c.bf16 %v6450_v61, %v6449_v34 }
 0x745   : > { %9638 = vmatprep.subr.bf16.mxu0 %v9637_v4  ;;  %v9731_v57 = vpack.c.bf16 %v6540_v22, %v6539_v51  ;;  %v5226_v14 = vld [vmem:[#allocation3 + $0x198] ss:$2 sm:$0xff]  ;;  %v6451_v4 = vld [vmem:[%s16708_s5 + $0x40] sm:$0xff]  ;;  %v6470_v17 = vld [vmem:[%s16708_s5 + $0xd8] sm:$0xff]  ;;  %v9741_v12 = vpack.c.bf16 %v6562_v1, %v6561_v6 }
 0x746   : > { %9730 = vmatprep.subr.bf16.mxu1 %v9729_v21  ;;  %v5162_v35 = vld [vmem:[#allocation3 + $0x180] ss:$2 sm:$0xff]  ;;  %v6452_v9 = vld [vmem:[%s16708_s5 + $0x48] sm:$0xff]  ;;  %v6563_v51 = vld [vmem:[%s16708_s5 + $0x3c0] sm:$0xff] }
 0x747   : > { %9732 = vmatpush3.bf16.msra.mxu1 %v9731_v57  ;;  %v6469_v0 = vld [vmem:[%s16708_s5 + $0xd0] sm:$0xff]  ;;  %v6564_v22 = vld [vmem:[%s16708_s5 + $0x3c8] sm:$0xff]  ;;  %v6455_v6 = vld [vmem:[%s16708_s5 + $0x60] sm:$0xff] }
 0x748   : > { %9640 = vmatpush3.bf16.msra.mxu0 %v9639_v44  ;;  %v6545_v7 = vld [vmem:[%s16708_s5 + $0x330] sm:$0xff]  ;;  %v6456_v1 = vld [vmem:[%s16708_s5 + $0x68] sm:$0xff] }
 0x749   : > { %9642 = vmatprep.subr.bf16.mxu0 %v9641_v59 }
 0x74c   : > { %9644 = vmatpush3.bf16.msra.mxu0 %v9643_v52 }
 0x786   : > { %v6076_v42 = vpop.f32.mrb[0].mxu1 }
 0x787   : > { %v14756_v3 = vadd.f32 %v6076_v42, %v14751_v20  ;;  %v6078_v55 = vpop.f32.mrb[1].mxu1  ;;  %v9733_v42 = vpack.c.bf16 %v6558_v39, %v6557_v26  ;;  %v9651_v26 = vpack.c.bf16 %v6452_v9, %v6451_v4  ;;  %v9653_v39 = vpack.c.bf16 %v6470_v17, %v6469_v0  ;;  %v6550_v4 = vld [vmem:[%s16708_s5 + $0x358] sm:$0xff]  ;;  %v6457_v9 = vld [vmem:[%s16708_s5 + $0x70] sm:$0xff]  ;;  %v6567_v0 = vld [vmem:[%s16708_s5 + $0x3e0] sm:$0xff] }
 0x788   : > { %v14759_v5 = vadd.f32 %v6078_v55, %v14753_v60  ;;  %v6541_v55 = vld [vmem:[%s16708_s5 + $0x310] sm:$0xff] }
 0x789   : > { %v6123_v46 = vmax.f32 %v14756_v3, 0.0  ;;  %9734 = vmatprep.subr.bf16.mxu1 %v9733_v42  ;;  %v6454_v42 = vld [vmem:[%s16708_s5 + $0x58] sm:$0xff] }
 0x78a   : > { %v6124_v58 = vmax.f32 %v14759_v5, 0.0  ;;  %v6553_v5 = vld [vmem:[%s16708_s5 + $0x370] sm:$0xff]  ;;  %v6554_v3 = vld [vmem:[%s16708_s5 + $0x378] sm:$0xff] }
 0x78c   : > { %v10489_v56 = vpack.i.bf16 %v6124_v58, %v6123_v46 }
 0x78d   : > { %v6082_v48 = vpop.f32.mrb[2].mxu1 }
 0x78e   : > { %v14768_v16 = vadd.f32 %v6082_v48, %v14751_v20  ;;  %v6084_v31 = vpop.f32.mrb[3].mxu1  ;;  %10490 = vrot.lane.b32.xlu0 %v10489_v56, %s10691_s0  ;;  %v9645_v56 = vpack.c.bf16 %v6466_v29, %v6465_v19  ;;  %v6542_v48 = vld [vmem:[%s16708_s5 + $0x318] sm:$0xff] }
 0x78f   : > { %v14772_v13 = vadd.f32 %v6084_v31, %v14753_v60  ;;  %v6559_v31 = vld [vmem:[%s16708_s5 + $0x3a0] sm:$0xff]  ;;  %v6546_v29 = vld [vmem:[%s16708_s5 + $0x338] sm:$0xff] }
 0x790   : > { %v6125_v50 = vmax.f32 %v14768_v16, 0.0  ;;  %9646 = vmatprep.subr.bf16.mxu0 %v9645_v56  ;;  %v6471_v56 = vld [vmem:[%s16708_s5 + $0xe0] sm:$0xff] }
 0x791   : > { %v6126_v23 = vmax.f32 %v14772_v13, 0.0  ;;  %9648 = vmatpush3.bf16.msra.mxu0 %v9647_v40  ;;  %v6549_v40 = vld [vmem:[%s16708_s5 + $0x350] sm:$0xff] }
 0x792   : > { %v6088_v27 = vpop.f32.mrb[4].mxu1 }
 0x793   : > { %v10494_v30 = vpack.i.bf16 %v6126_v23, %v6125_v50  ;;  %v14781_v11 = vadd.f32 %v6088_v27, %v14751_v20  ;;  %v6090_v43 = vpop.f32.mrb[5].mxu1  ;;  %v6560_v27 = vld [vmem:[%s16708_s5 + $0x3a8] sm:$0xff] }
 0x794   : > { %v14784_v25 = vadd.f32 %v6090_v43, %v14753_v60  ;;  %v9735_v43 = vpack.c.bf16 %v6542_v48, %v6541_v55  ;;  %v9743_v55 = vpack.c.bf16 %v6546_v29, %v6545_v7 }
 0x795   : > { %v6127_v10 = vmax.f32 %v14781_v11, 0.0  ;;  %10495 = vrot.lane.b32.xlu1 %v10494_v30, %s10691_s0  ;;  %v6468_v30 = vld [vmem:[%s16708_s5 + $0xc8] sm:$0xff] }
 0x796   : > { %v6128_v2 = vmax.f32 %v14784_v25, 0.0  ;;  %v9649_v37 = vpack.c.bf16 %v6468_v30, %v6467_v47  ;;  %9736 = vmatpush3.bf16.msra.mxu1 %v9735_v43  ;;  %v6453_v47 = vld [vmem:[%s16708_s5 + $0x50] sm:$0xff]  ;;  %v6472_v30 = vld [vmem:[%s16708_s5 + $0xe8] sm:$0xff]  ;;  %v6547_v43 = vld [vmem:[%s16708_s5 + $0x340] sm:$0xff] }
 0x798   : > { %v10504_v24 = vpack.i.bf16 %v6128_v2, %v6127_v10  ;;  %9650 = vmatprep.subr.bf16.mxu0 %v9649_v37  ;;  %v9751_v37 = vpack.c.bf16 %v6550_v4, %v6549_v40 }
 0x799   : > { %9652 = vmatpush3.bf16.msra.mxu0 %v9651_v26 }
 0x79a   : > { %10505 = vrot.lane.b32.xlu1 %v10504_v24, %s10691_s0  ;;  %v9737_v24 = vpack.c.bf16 %v6560_v27, %v6559_v31  ;;  %v9745_v27 = vpack.c.bf16 %v6564_v22, %v6563_v51  ;;  %9654 = vmatprep.subr.bf16.mxu0 %v9653_v39  ;;  %v6551_v51 = vld [vmem:[%s16708_s5 + $0x360] sm:$0xff]  ;;  %v6552_v22 = vld [vmem:[%s16708_s5 + $0x368] sm:$0xff] }
 0x79b   : > { %v9755_v26 = vpack.c.bf16 %v6552_v22, %v6551_v51 }
 0x79c   : > { %9738 = vmatprep.subr.bf16.mxu1 %v9737_v24  ;;  %v6548_v24 = vld [vmem:[%s16708_s5 + $0x348] sm:$0xff] }
 0x79d   : > { %v6094_v15 = vpop.f32.mrb[6].mxu1 }
 0x79e   : > { %v14795_v33 = vadd.f32 %v6094_v15, %v14751_v20  ;;  %v6096_v62 = vpop.f32.mrb[7].mxu1  ;;  %v6543_v15 = vld [vmem:[%s16708_s5 + $0x320] sm:$0xff] }
 0x79f   : > { %v14798_v54 = vadd.f32 %v6096_v62, %v14753_v60  ;;  %v6544_v62 = vld [vmem:[%s16708_s5 + $0x328] sm:$0xff] }
 0x7a0   : > { %v6129_v32 = vmax.f32 %v14795_v33, 0.0  ;;  %v9739_v44 = vpack.c.bf16 %v6544_v62, %v6543_v15  ;;  %v6565_v15 = vld [vmem:[%s16708_s5 + $0x3d0] sm:$0xff]  ;;  %v6566_v62 = vld [vmem:[%s16708_s5 + $0x3d8] sm:$0xff] }
 0x7a1   : > { %v6130_v53 = vmax.f32 %v14798_v54, 0.0 }
 0x7a2   : > { %v14802_v36 = vpop.f32.mrb[8].mxu1  ;;  %9740 = vmatpush3.bf16.msra.mxu1 %v9739_v44  ;;  %v6458_v44 = vld [vmem:[%s16708_s5 + $0x78] sm:$0xff] }
 0x7a3   : > { %v10514_v18 = vpack.i.bf16 %v6130_v53, %v6129_v32  ;;  %v14808_v41 = vpop.f32.mrb[9].mxu1  ;;  %9742 = vmatprep.subr.bf16.mxu1 %v9741_v12  ;;  %v9663_v17 = vpack.c.bf16 %v6458_v44, %v6457_v9  ;;  %v6492_v12 = vld [vmem:[%s16708_s5 + $0x188] sm:$0xff] }
 0x7a5   : > { %10515 = vrot.lane.b32.xlu1 %v10514_v18, %s10691_s0 }
 0x7a6   : > { %9744 = vmatpush3.bf16.msra.mxu1 %v9743_v55 }
 0x7a7   : > { %9746 = vmatprep.subr.bf16.mxu1 %v9745_v27 }
 0x7b1   : > { %v10476_v18 = vpop.permute.xlu1 %10475  ;;  %v10481_v8 = vpop.permute.xlu0 %10480 }
 0x7b2   : > { %v10478_v49 = vunpack.i.h.bf16 %v10476_v18  ;;  %v10477_v63 = vunpack.i.l.bf16 %v10476_v18  ;;  %v10483_v38 = vunpack.i.h.bf16 %v10481_v8  ;;  %v10482_v45 = vunpack.i.l.bf16 %v10481_v8 }
 0x7b3   : > { %v9655_v18 = vpack.c.bf16 %v6454_v42, %v6453_v47  ;;  %v9657_v8 = vpack.c.bf16 %v6472_v30, %v6471_v56  ;;  %v6570_v47 = vld [vmem:[%s16708_s5 + $0x3f8] sm:$0xff]  ;;  %v6619_v30 = vld [vmem:[%s16708_s5 + $0x580] sm:$0xff] }
 0x7b4   : > { %v5740_v59 = vsel %vm4932_vm0, %v5226_v14, %v10477_v63  ;;  %v5716_v19 = vsel %vm4932_vm0, %v5162_v35, %v10478_v49  ;;  %v9747_v14 = vpack.c.bf16 %v6548_v24, %v6547_v43  ;;  %v6473_v49 = vld [vmem:[%s16708_s5 + $0xf0] sm:$0xff]  ;;  %v9749_v63 = vpack.c.bf16 %v6566_v62, %v6565_v15  ;;  %v6474_v35 = vld [vmem:[%s16708_s5 + $0xf8] sm:$0xff]  ;;  %v6620_v43 = vld [vmem:[%s16708_s5 + $0x588] sm:$0xff] }
 0x7b5   : > { %v10486_v21 = vpop.permute.xlu1 %10485  ;;  %v5748_v52 = vsel %vm5667_vm3, %v5740_v59, %v10482_v45  ;;  %v5724_v61 = vsel %vm5667_vm3, %v5716_v19, %v10483_v38  ;;  %9656 = vmatpush3.bf16.msra.mxu0 %v9655_v18  ;;  %v9659_v38 = vpack.c.bf16 %v6456_v1, %v6455_v6  ;;  %v9661_v45 = vpack.c.bf16 %v6474_v35, %v6473_v49  ;;  %v6568_v59 = vld [vmem:[%s16708_s5 + $0x3e8] sm:$0xff]  ;;  %v6491_v19 = vld [vmem:[%s16708_s5 + $0x180] sm:$0xff] }
 0x7b6   : > { %v10488_v34 = vunpack.i.h.bf16 %v10486_v21  ;;  %v10487_v57 = vunpack.i.l.bf16 %v10486_v21  ;;  %9658 = vmatprep.subr.bf16.mxu0 %v9657_v8  ;;  %9748 = vmatpush3.bf16.msra.mxu1 %v9747_v14  ;;  %v9753_v29 = vpack.c.bf16 %v6568_v59, %v6567_v0  ;;  %v9665_v21 = vpack.c.bf16 %v6492_v12, %v6491_v19 }
 0x7b7   : > { %9750 = vmatprep.subr.bf16.mxu1 %v9749_v63  ;;  %v9793_v14 = vpack.c.bf16 %v6620_v43, %v6619_v30  ;;  %v15038_v6 = vadd.f32 %v14802_v36, %v14751_v20  ;;  %v15042_v1 = vadd.f32 %v14808_v41, %v14753_v60  ;;  %v6476_v30 = vld [vmem:[%s16708_s5 + $0x108] sm:$0xff] }
 0x7b8   : > { %v5756_v48 = vsel %vm5676_vm4, %v5748_v52, %v10487_v57  ;;  %v5732_v31 = vsel %vm5676_vm4, %v5724_v61, %v10488_v34  ;;  %v6569_v61 = vld [vmem:[%s16708_s5 + $0x3f0] sm:$0xff] }
 0x7b9   : > { %6116 = vmatprep.mubr.f32.mxu1 %v5756_v48  ;;  %9660 = vmatpush3.bf16.msra.mxu0 %v9659_v38  ;;  %v9757_v42 = vpack.c.bf16 %v6570_v47, %v6569_v61  ;;  %v6131_v38 = vmax.f32 %v15038_v6, 0.0 }
 0x7ba   : > { %6117 = vmatmul.mubr.f32.gmra.mrb[14].mxu1 %v5732_v31  ;;  %9662 = vmatprep.subr.bf16.mxu0 %v9661_v45  ;;  %v6132_v45 = vmax.f32 %v15042_v1, 0.0 }
 0x7bb   : > { %9752 = vmatpush3.bf16.msra.mxu1 %v9751_v37 }
 0x7bc   : > { %9754 = vmatprep.subr.bf16.mxu1 %v9753_v29 }
 0x7bd   : > { %9664 = vmatpush3.bf16.msra.mxu0 %v9663_v17 }
 0x7be   : > { %9666 = vmatprep.subr.bf16.mxu0 %v9665_v21 }
 0x7bf   : > { %9756 = vmatpush3.bf16.msra.mxu1 %v9755_v26 }
 0x7c0   : > { %9758 = vmatprep.subr.bf16.mxu1 %v9757_v42 }
 0x800   : > { %v10491_v7 = vpop.permute.xlu0 %10490 }
 0x801   : > { %v10493_v34 = vunpack.i.h.bf16 %v10491_v7  ;;  %v10492_v57 = vunpack.i.l.bf16 %v10491_v7 }
 0x803   : > { %v6211_v39 = vmax.f32 %v6124_v58, %v10493_v34  ;;  %v6171_v52 = vmax.f32 %v6123_v46, %v10492_v57  ;;  %v9759_v46 = vpack.c.bf16 %v6554_v3, %v6553_v5 }
 0x805   : > { %v15013_v55 = vmax.f32 %v6171_v52, %v6211_v39  ;;  %9760 = vmatpush3.bf16.msra.mxu1 %v9759_v46 }
 0x806   : > { %9794 = vmatprep.subr.bf16.mxu1 %v9793_v14 }
 0x807   : > { %v10496_v58 = vpop.permute.xlu1 %10495  ;;  %v6228_v56 = vrot.slane %v15013_v55, 1  ;;  %v6234_v48 = vrot.slane %v15013_v55, 3  ;;  %v6240_v15 = vrot.slane %v15013_v55, 5  ;;  %v6246_v62 = vrot.slane %v15013_v55, 7 }
 0x808   : > { %v10498_v31 = vunpack.i.h.bf16 %v10496_v58  ;;  %v10497_v27 = vunpack.i.l.bf16 %v10496_v58 }
 0x809   : > { %v10499_v24 = vpack.i.bf16 %v6228_v56, %v6234_v48  ;;  %v10509_v35 = vpack.i.bf16 %v6240_v15, %v6246_v62  ;;  %v6494_v15 = vld [vmem:[%s16708_s5 + $0x198] sm:$0xff] }
 0x80a   : > { %v6212_v18 = vmax.f32 %v6126_v23, %v10498_v31  ;;  %v6172_v8 = vmax.f32 %v6125_v50, %v10497_v27  ;;  %v6475_v27 = vld [vmem:[%s16708_s5 + $0x100] sm:$0xff] }
 0x80b   : > { %10500 = vrot.lane.b32.xlu0 %v10499_v24, %s10691_s0  ;;  %v6493_v24 = vld [vmem:[%s16708_s5 + $0x190] sm:$0xff]  ;;  %v9667_v14 = vpack.c.bf16 %v6476_v30, %v6475_v27  ;;  %v6482_v27 = vld [vmem:[%s16708_s5 + $0x138] sm:$0xff]  ;;  %v6623_v30 = vld [vmem:[%s16708_s5 + $0x5a0] sm:$0xff] }
 0x80c   : > { %v15044_v49 = vmax.f32 %v6172_v8, %v6212_v18  ;;  %v10506_v63 = vpop.permute.xlu1 %10505  ;;  %v6232_v8 = vrot.slane %v15013_v55, 2 }
 0x80d   : > { %v10508_v13 = vunpack.i.h.bf16 %v10506_v63  ;;  %v10507_v23 = vunpack.i.l.bf16 %v10506_v63 }
 0x80e   : > { %v6263_v16 = vrot.slane %v15044_v49, 5  ;;  %v6269_v50 = vrot.slane %v15044_v49, 7  ;;  %v6251_v40 = vrot.slane %v15044_v49, 1  ;;  %v6257_v36 = vrot.slane %v15044_v49, 3 }
 0x80f   : > { %v6213_v4 = vmax.f32 %v6128_v2, %v10508_v13  ;;  %v6173_v41 = vmax.f32 %v6127_v10, %v10507_v23  ;;  %10510 = vrot.lane.b32.xlu0 %v10509_v35, %s10691_s0  ;;  %v10529_v10 = vpack.i.bf16 %v6132_v45, %v6131_v38  ;;  %v9669_v23 = vpack.c.bf16 %v6494_v15, %v6493_v24  ;;  %v6477_v35 = vld [vmem:[%s16708_s5 + $0x110] sm:$0xff] }
 0x810   : > { %v10524_v37 = vpack.i.bf16 %v6263_v16, %v6269_v50  ;;  %v10519_v9 = vpack.i.bf16 %v6251_v40, %v6257_v36  ;;  %v6478_v16 = vld [vmem:[%s16708_s5 + $0x118] sm:$0xff]  ;;  %v6495_v40 = vld [vmem:[%s16708_s5 + $0x1a0] sm:$0xff]  ;;  %v6496_v36 = vld [vmem:[%s16708_s5 + $0x1a8] sm:$0xff] }
 0x811   : > { %v15057_v44 = vmax.f32 %v6173_v41, %v6213_v4  ;;  %v6244_v41 = vrot.slane %v15013_v55, 6 }
 0x812   : > { %10525 = vrot.lane.b32.xlu1 %v10524_v37, %s10691_s0  ;;  %v9671_v37 = vpack.c.bf16 %v6478_v16, %v6477_v35 }
 0x813   : > { %v6106_v0 = vpop.f32.mrb[10].mxu1  ;;  %10520 = vrot.lane.b32.xlu0 %v10519_v9, %s10691_s0  ;;  %v6282_v25 = vrot.slane %v15057_v44, 1  ;;  %v6288_v11 = vrot.slane %v15057_v44, 3  ;;  %v6294_v12 = vrot.slane %v15057_v44, 5  ;;  %v6300_v7 = vrot.slane %v15057_v44, 7  ;;  %v6603_v9 = vld [vmem:[%s16708_s5 + $0x500] sm:$0xff] }
 0x814   : > { %v15068_v2 = vadd.f32 %v6106_v0, %v14751_v20  ;;  %v6108_v17 = vpop.f32.mrb[11].mxu1  ;;  %v6604_v0 = vld [vmem:[%s16708_s5 + $0x508] sm:$0xff]  ;;  %v6298_v6 = vrot.slane %v15057_v44, 6 }
 0x815   : > { %v15071_v59 = vadd.f32 %v6108_v17, %v14753_v60  ;;  %v10534_v19 = vpack.i.bf16 %v6282_v25, %v6288_v11  ;;  %v10539_v52 = vpack.i.bf16 %v6294_v12, %v6300_v7  ;;  %v6479_v25 = vld [vmem:[%s16708_s5 + $0x120] sm:$0xff]  ;;  %v9673_v17 = vpack.c.bf16 %v6496_v36, %v6495_v40  ;;  %v6621_v12 = vld [vmem:[%s16708_s5 + $0x590] sm:$0xff]  ;;  %v6622_v7 = vld [vmem:[%s16708_s5 + $0x598] sm:$0xff] }
 0x816   : > { %v6133_v29 = vmax.f32 %v15068_v2, 0.0  ;;  %v6483_v40 = vld [vmem:[%s16708_s5 + $0x140] sm:$0xff]  ;;  %v6484_v36 = vld [vmem:[%s16708_s5 + $0x148] sm:$0xff] }
 0x817   : > { %v6134_v21 = vmax.f32 %v15071_v59, 0.0  ;;  %v6112_v51 = vpop.f32.mrb[12].mxu1  ;;  %v10516_v22 = vpop.permute.xlu1 %10515  ;;  %10535 = vrot.lane.b32.xlu1 %v10534_v19, %s10691_s0  ;;  %10530 = vrot.lane.b32.xlu0 %v10529_v10, %s10691_s0  ;;  %v6480_v19 = vld [vmem:[%s16708_s5 + $0x128] sm:$0xff] }
 0x818   : > { %v10518_v34 = vunpack.i.h.bf16 %v10516_v22  ;;  %v10517_v57 = vunpack.i.l.bf16 %v10516_v22  ;;  %v6114_v26 = vpop.f32.mrb[13].mxu1  ;;  %v15090_v42 = vadd.f32 %v6112_v51, %v14751_v20  ;;  %v6504_v59 = vld [vmem:[%s16708_s5 + $0x1e8] sm:$0xff] }
 0x819   : > { %v10544_v39 = vpack.i.bf16 %v6134_v21, %v6133_v29  ;;  %v15095_v3 = vadd.f32 %v6114_v26, %v14753_v60  ;;  %v6261_v26 = vrot.slane %v15044_v49, 4 }
 0x81a   : > { %v6214_v61 = vmax.f32 %v6130_v53, %v10518_v34  ;;  %v6174_v47 = vmax.f32 %v6129_v32, %v10517_v57  ;;  %v6135_v32 = vmax.f32 %v15090_v42, 0.0  ;;  %v6267_v57 = vrot.slane %v15044_v49, 6 }
 0x81b   : > { %10545 = vrot.lane.b32.xlu1 %v10544_v39, %s10691_s0  ;;  %10540 = vrot.lane.b32.xlu0 %v10539_v52, %s10691_s0  ;;  %v6136_v58 = vmax.f32 %v15095_v3, 0.0  ;;  %v6497_v39 = vld [vmem:[%s16708_s5 + $0x1b0] sm:$0xff]  ;;  %v6498_v52 = vld [vmem:[%s16708_s5 + $0x1b8] sm:$0xff] }
 0x81c   : > { %v15092_v5 = vmax.f32 %v6174_v47, %v6214_v61  ;;  %v9795_v61 = vpack.c.bf16 %v6604_v0, %v6603_v9  ;;  %v6626_v0 = vld [vmem:[%s16708_s5 + $0x5b8] sm:$0xff] }
 0x81d   : > { %v10559_v31 = vpack.i.bf16 %v6136_v58, %v6135_v32 }
 0x81e   : > { %v6317_v46 = vrot.slane %v15092_v5, 5  ;;  %v6323_v54 = vrot.slane %v15092_v5, 7  ;;  %v6305_v53 = vrot.slane %v15092_v5, 1  ;;  %v6311_v33 = vrot.slane %v15092_v5, 3 }
 0x820   : > { %v10554_v56 = vpack.i.bf16 %v6317_v46, %v6323_v54  ;;  %v10549_v48 = vpack.i.bf16 %v6305_v53, %v6311_v33  ;;  %v9675_v54 = vpack.c.bf16 %v6480_v19, %v6479_v25  ;;  %v9797_v53 = vpack.c.bf16 %v6622_v7, %v6621_v12  ;;  %v6605_v33 = vld [vmem:[%s16708_s5 + $0x510] sm:$0xff] }
 0x821   : > { %v6501_v25 = vld [vmem:[%s16708_s5 + $0x1d0] sm:$0xff] }
 0x822   : > { %10555 = vrot.lane.b32.xlu1 %v10554_v56, %s10691_s0  ;;  %10550 = vrot.lane.b32.xlu0 %v10549_v48, %s10691_s0  ;;  %v6606_v56 = vld [vmem:[%s16708_s5 + $0x518] sm:$0xff]  ;;  %v6481_v48 = vld [vmem:[%s16708_s5 + $0x130] sm:$0xff] }
 0x823   : > { %v9679_v35 = vpack.c.bf16 %v6482_v27, %v6481_v48  ;;  %v6628_v48 = vld [vmem:[%s16708_s5 + $0x5c8] sm:$0xff] }
 0x826   : > { %10560 = vrot.lane.b32.xlu0 %v10559_v31, %s10691_s0  ;;  %v9677_v31 = vpack.c.bf16 %v6498_v52, %v6497_v39 }
 0x87d   : > { %v10501_v43 = vpop.permute.xlu0 %10500 }
 0x87e   : > { %v10503_v62 = vunpack.i.h.bf16 %v10501_v43  ;;  %v10502_v18 = vunpack.i.l.bf16 %v10501_v43  ;;  %v6624_v43 = vld [vmem:[%s16708_s5 + $0x5a8] sm:$0xff] }
 0x87f   : > { %v9801_v16 = vpack.c.bf16 %v6624_v43, %v6623_v30 }
 0x880   : > { %v6274_v63 = vsel %vm5667_vm3, %v6232_v8, %v10502_v18  ;;  %v6273_v13 = vsel %vm5667_vm3, %v15013_v55, %v10503_v62  ;;  %v6499_v62 = vld [vmem:[%s16708_s5 + $0x1c0] sm:$0xff]  ;;  %v6500_v18 = vld [vmem:[%s16708_s5 + $0x1c8] sm:$0xff] }
 0x881   : > { %v15132_v50 = vpop.permute.xlu0 %10510  ;;  %7020 = vmatprep.mubr.f32.mxu0 %v6274_v63  ;;  %v9799_v63 = vpack.c.bf16 %v6606_v56, %v6605_v33  ;;  %v9681_v9 = vpack.c.bf16 %v6500_v18, %v6499_v62 }
 0x882   : > { %v10512_v4 = vunpack.i.l.bf16 %v15132_v50  ;;  %7021 = vmatmul.mubr.f32.vlgmr.msra.gmra.mrb[32].mxu0 %v6273_v13  ;;  %v6607_v13 = vld [vmem:[%s16708_s5 + $0x520] sm:$0xff]  ;;  %v10513_v42 = vunpack.i.h.bf16 %v15132_v50  ;;  %v6525_v50 = vld [vmem:[%s16708_s5 + $0x290] sm:$0xff] }
 0x883   : > { %9668 = vmatpush3.bf16.msra.mxu0 %v9667_v14 }
 0x884   : > { %v10526_v11 = vpop.permute.xlu1 %10525  ;;  %9670 = vmatprep.subr.bf16.mxu0 %v9669_v23  ;;  %v6276_v10 = vsel %vm5667_vm3, %v6244_v41, %v10512_v4  ;;  %v6608_v23 = vld [vmem:[%s16708_s5 + $0x528] sm:$0xff]  ;;  %v6625_v4 = vld [vmem:[%s16708_s5 + $0x5b0] sm:$0xff] }
 0x885   : > { %v10528_v51 = vunpack.i.h.bf16 %v10526_v11  ;;  %v10527_v22 = vunpack.i.l.bf16 %v10526_v11  ;;  %v15161_v34 = vpop.permute.xlu0 %10520  ;;  %7090 = vmatprep.mubr.f32.mxu0 %v6276_v10  ;;  %v6502_v11 = vld [vmem:[%s16708_s5 + $0x1d8] sm:$0xff]  ;;  %v9805_v52 = vpack.c.bf16 %v6626_v0, %v6625_v4  ;;  %v6488_v4 = vld [vmem:[%s16708_s5 + $0x168] sm:$0xff] }
 0x886   : > { %v6506_v0 = vld [vmem:[%s16708_s5 + $0x1f8] sm:$0xff] }
 0x887   : > { %9672 = vmatpush3.bf16.msra.mxu0 %v9671_v37  ;;  %v6280_v47 = vsel %vm5667_vm3, %v6267_v57, %v10527_v22  ;;  %v6279_v46 = vsel %vm5667_vm3, %v6261_v26, %v10528_v51  ;;  %v9683_v51 = vpack.c.bf16 %v6484_v36, %v6483_v40  ;;  %v6609_v22 = vld [vmem:[%s16708_s5 + $0x530] sm:$0xff]  ;;  %v6610_v57 = vld [vmem:[%s16708_s5 + $0x538] sm:$0xff] }
 0x888   : > { %7230 = vmatprep.mubr.f32.mxu1 %v6280_v47  ;;  %9674 = vmatprep.subr.bf16.mxu0 %v9673_v17  ;;  %v6485_v47 = vld [vmem:[%s16708_s5 + $0x150] sm:$0xff]  ;;  %v9807_v30 = vpack.c.bf16 %v6610_v57, %v6609_v22 }
 0x889   : > { %v15191_v24 = vpop.permute.xlu1 %10535  ;;  %7231 = vmatmul.mubr.f32.vlgmr.msra.gmra.mrb[16].mxu1 %v6279_v46  ;;  %v10531_v15 = vpop.permute.xlu0 %10530  ;;  %v6486_v46 = vld [vmem:[%s16708_s5 + $0x158] sm:$0xff] }
 0x88a   : > { %9796 = vmatpush3.bf16.msra.mxu1 %v9795_v61  ;;  %v10533_v8 = vunpack.i.h.bf16 %v10531_v15  ;;  %v10532_v14 = vunpack.i.l.bf16 %v10531_v15  ;;  %v9685_v61 = vpack.c.bf16 %v6502_v11, %v6501_v25  ;;  %v9687_v43 = vpack.c.bf16 %v6486_v46, %v6485_v47 }
 0x88b   : > { %9676 = vmatpush3.bf16.msra.mxu0 %v9675_v54  ;;  %9798 = vmatprep.subr.bf16.mxu1 %v9797_v53  ;;  %v6627_v54 = vld [vmem:[%s16708_s5 + $0x5c0] sm:$0xff] }
 0x88c   : > { %v6215_v41 = vmax.f32 %v6132_v45, %v10533_v8  ;;  %v6175_v37 = vmax.f32 %v6131_v38, %v10532_v14  ;;  %9678 = vmatprep.subr.bf16.mxu0 %v9677_v31  ;;  %v9803_v45 = vpack.c.bf16 %v6608_v23, %v6607_v13  ;;  %v6503_v31 = vld [vmem:[%s16708_s5 + $0x1e0] sm:$0xff]  ;;  %v9809_v18 = vpack.c.bf16 %v6628_v48, %v6627_v54 }
 0x88d   : > { %v6118_v10 = vpop.f32.mrb[14].mxu1  ;;  %v10546_v1 = vpop.permute.xlu1 %10545  ;;  %v9689_v8 = vpack.c.bf16 %v6504_v59, %v6503_v31  ;;  %v6611_v14 = vld [vmem:[%s16708_s5 + $0x540] sm:$0xff] }
 0x88e   : > { %v15228_v38 = vmax.f32 %v6175_v37, %v6215_v41  ;;  %v10548_v17 = vunpack.i.h.bf16 %v10546_v1  ;;  %v10547_v19 = vunpack.i.l.bf16 %v10546_v1  ;;  %9800 = vmatpush3.bf16.msra.mxu1 %v9799_v63  ;;  %v15230_v12 = vpop.permute.xlu0 %10540  ;;  %v6120_v7 = vpop.f32.mrb[15].mxu1  ;;  %v15239_v26 = vadd.f32 %v6118_v10, %v14751_v20  ;;  %v6612_v63 = vld [vmem:[%s16708_s5 + $0x548] sm:$0xff]  ;;  %v6487_v13 = vld [vmem:[%s16708_s5 + $0x160] sm:$0xff]  ;;  %v6629_v41 = vld [vmem:[%s16708_s5 + $0x5d0] sm:$0xff] }
 0x88f   : > { %v10542_v39 = vunpack.i.l.bf16 %v15230_v12  ;;  %9680 = vmatpush3.bf16.msra.mxu0 %v9679_v35  ;;  %9802 = vmatprep.subr.bf16.mxu1 %v9801_v16  ;;  %v15256_v33 = vadd.f32 %v6120_v7, %v14753_v60  ;;  %v6630_v37 = vld [vmem:[%s16708_s5 + $0x5d8] sm:$0xff]  ;;  %v9811_v11 = vpack.c.bf16 %v6612_v63, %v6611_v14  ;;  %v6613_v10 = vld [vmem:[%s16708_s5 + $0x550] sm:$0xff]  ;;  %v9691_v1 = vpack.c.bf16 %v6488_v4, %v6487_v13  ;;  %v6523_v54 = vld [vmem:[%s16708_s5 + $0x280] sm:$0xff] }
 0x890   : > { %v6216_v20 = vmax.f32 %v6134_v21, %v10548_v17  ;;  %v6176_v53 = vmax.f32 %v6133_v29, %v10547_v19  ;;  %9682 = vmatprep.subr.bf16.mxu0 %v9681_v9  ;;  %v6348_v56 = vrot.slane %v15228_v38, 5  ;;  %v6354_v60 = vrot.slane %v15228_v38, 7  ;;  %v6505_v9 = vld [vmem:[%s16708_s5 + $0x1f0] sm:$0xff]  ;;  %v6490_v19 = vld [vmem:[%s16708_s5 + $0x178] sm:$0xff]  ;;  %v6615_v48 = vld [vmem:[%s16708_s5 + $0x560] sm:$0xff] }
 0x891   : > { %v6330_v2 = vsel %vm5667_vm3, %v6298_v6, %v10542_v39  ;;  %v6336_v29 = vrot.slane %v15228_v38, 1  ;;  %v6342_v27 = vrot.slane %v15228_v38, 3  ;;  %v6137_v15 = vmax.f32 %v15239_v26, 0.0  ;;  %v6614_v6 = vld [vmem:[%s16708_s5 + $0x558] sm:$0xff]  ;;  %v6489_v17 = vld [vmem:[%s16708_s5 + $0x170] sm:$0xff] }
 0x892   : > { %v15271_v21 = vmax.f32 %v6176_v53, %v6216_v20  ;;  %9804 = vmatpush3.bf16.msra.mxu1 %v9803_v45  ;;  %7370 = vmatprep.mubr.f32.mxu1 %v6330_v2  ;;  %v10569_v62 = vpack.i.bf16 %v6348_v56, %v6354_v60  ;;  %v6138_v23 = vmax.f32 %v15256_v33, 0.0  ;;  %v9813_v45 = vpack.c.bf16 %v6630_v37, %v6629_v41  ;;  %v6524_v20 = vld [vmem:[%s16708_s5 + $0x288] sm:$0xff]  ;;  %v6526_v63 = vld [vmem:[%s16708_s5 + $0x298] sm:$0xff]  ;;  %v6617_v13 = vld [vmem:[%s16708_s5 + $0x570] sm:$0xff] }
 0x893   : > { %9684 = vmatpush3.bf16.msra.mxu0 %v9683_v51  ;;  %9806 = vmatprep.subr.bf16.mxu1 %v9805_v52  ;;  %v10564_v16 = vpack.i.bf16 %v6336_v29, %v6342_v27  ;;  %v9693_v39 = vpack.c.bf16 %v6506_v0, %v6505_v9  ;;  %v6631_v52 = vld [vmem:[%s16708_s5 + $0x5e0] sm:$0xff]  ;;  %v9815_v53 = vpack.c.bf16 %v6614_v6, %v6613_v10  ;;  %v6616_v60 = vld [vmem:[%s16708_s5 + $0x568] sm:$0xff]  ;;  %v6618_v4 = vld [vmem:[%s16708_s5 + $0x578] sm:$0xff]  ;;  %v6255_v37 = vrot.slane %v15044_v49, 2 }
 0x894   : > { %v15285_v35 = vpop.permute.xlu0 %10550  ;;  %9686 = vmatprep.subr.bf16.mxu0 %v9685_v61  ;;  %v6359_v40 = vrot.slane %v15271_v21, 1  ;;  %v6365_v36 = vrot.slane %v15271_v21, 3  ;;  %10570 = vrot.lane.b32.xlu0 %v10569_v62, %s10691_s0  ;;  %v10574_v7 = vpack.i.bf16 %v6138_v23, %v6137_v15  ;;  %v6371_v22 = vrot.slane %v15271_v21, 5  ;;  %v6632_v61 = vld [vmem:[%s16708_s5 + $0x5e8] sm:$0xff]  ;;  %v6507_v29 = vld [vmem:[%s16708_s5 + $0x200] sm:$0xff]  ;;  %v6509_v41 = vld [vmem:[%s16708_s5 + $0x210] sm:$0xff] }
 0x895   : > { %10565 = vrot.lane.b32.xlu1 %v10564_v16, %s10691_s0  ;;  %v6377_v57 = vrot.slane %v15271_v21, 7  ;;  %v9695_v56 = vpack.c.bf16 %v6490_v19, %v6489_v17  ;;  %v9817_v2 = vpack.c.bf16 %v6632_v61, %v6631_v52  ;;  %v6508_v27 = vld [vmem:[%s16708_s5 + $0x208] sm:$0xff]  ;;  %v10522_v62 = vunpack.i.l.bf16 %v15161_v34  ;;  %v6510_v0 = vld [vmem:[%s16708_s5 + $0x218] sm:$0xff]  ;;  %v6527_v17 = vld [vmem:[%s16708_s5 + $0x2a0] sm:$0xff] }
 0x896   : > { %9808 = vmatpush3.bf16.msra.mxu1 %v9807_v30  ;;  %v10579_v25 = vpack.i.bf16 %v6359_v40, %v6365_v36  ;;  %v6633_v30 = vld [vmem:[%s16708_s5 + $0x5f0] sm:$0xff]  ;;  %v9699_v14 = vpack.c.bf16 %v6508_v27, %v6507_v29  ;;  %v9701_v6 = vpack.c.bf16 %v6526_v63, %v6525_v50  ;;  %v6528_v19 = vld [vmem:[%s16708_s5 + $0x2a8] sm:$0xff]  ;;  %v6531_v50 = vld [vmem:[%s16708_s5 + $0x2c0] sm:$0xff] }
 0x897   : > { %9688 = vmatpush3.bf16.msra.mxu0 %v9687_v43  ;;  %9810 = vmatprep.subr.bf16.mxu1 %v9809_v18  ;;  %v10584_v3 = vpack.i.bf16 %v6371_v22, %v6377_v57  ;;  %v6634_v43 = vld [vmem:[%s16708_s5 + $0x5f8] sm:$0xff]  ;;  %v6238_v18 = vrot.slane %v15013_v55, 4  ;;  %v9823_v22 = vpack.c.bf16 %v6618_v4, %v6617_v13  ;;  %v6667_v57 = vld [vmem:[%s16708_s5 + $0x700] sm:$0xff]  ;;  %v6668_v61 = vld [vmem:[%s16708_s5 + $0x708] sm:$0xff] }
 0x898   : > { %v10561_v51 = vpop.permute.xlu0 %10560  ;;  %9690 = vmatprep.subr.bf16.mxu0 %v9689_v8  ;;  %10580 = vrot.lane.b32.xlu0 %v10579_v25, %s10691_s0  ;;  %v9819_v8 = vpack.c.bf16 %v6616_v60, %v6615_v48  ;;  %v9821_v9 = vpack.c.bf16 %v6634_v43, %v6633_v30  ;;  %v6683_v25 = vld [vmem:[%s16708_s5 + $0x780] sm:$0xff]  ;;  %v6321_v60 = vrot.slane %v15092_v5, 6  ;;  %v6532_v63 = vld [vmem:[%s16708_s5 + $0x2c8] sm:$0xff] }
 0x899   : > { %v10563_v47 = vunpack.i.h.bf16 %v10561_v51  ;;  %v10562_v46 = vunpack.i.l.bf16 %v10561_v51  ;;  %10575 = vrot.lane.b32.xlu1 %v10574_v7, %s10691_s0  ;;  %v6275_v10 = vsel %vm5667_vm3, %v6238_v18, %v10513_v42  ;;  %v15402_v7 = vpop.permute.xlu1 %10555  ;;  %v6278_v51 = vsel %vm5667_vm3, %v6255_v37, %v10522_v62  ;;  %v6513_v42 = vld [vmem:[%s16708_s5 + $0x230] sm:$0xff]  ;;  %v6514_v62 = vld [vmem:[%s16708_s5 + $0x238] sm:$0xff]  ;;  %v6687_v18 = vld [vmem:[%s16708_s5 + $0x7a0] sm:$0xff] }
 0x89a   : > { %9812 = vmatpush3.bf16.msra.mxu1 %v9811_v11  ;;  %v6684_v11 = vld [vmem:[%s16708_s5 + $0x788] sm:$0xff]  ;;  %v10557_v48 = vunpack.i.l.bf16 %v15402_v7  ;;  %v6515_v4 = vld [vmem:[%s16708_s5 + $0x240] sm:$0xff] }
 0x89b   : > { %v6217_v31 = vmax.f32 %v6136_v58, %v10563_v47  ;;  %v6177_v59 = vmax.f32 %v6135_v32, %v10562_v46  ;;  %9692 = vmatpush3.bf16.msra.mxu0 %v9691_v1  ;;  %9814 = vmatprep.subr.bf16.mxu1 %v9813_v45  ;;  %v9697_v58 = vpack.c.bf16 %v6524_v20, %v6523_v54  ;;  %v6511_v47 = vld [vmem:[%s16708_s5 + $0x220] sm:$0xff]  ;;  %v6512_v46 = vld [vmem:[%s16708_s5 + $0x228] sm:$0xff]  ;;  %v10543_v54 = vunpack.i.h.bf16 %v15230_v12  ;;  %v6529_v12 = vld [vmem:[%s16708_s5 + $0x2b0] sm:$0xff] }
 0x89c   : > { %9694 = vmatprep.subr.bf16.mxu0 %v9693_v39  ;;  %v9703_v39 = vpack.c.bf16 %v6510_v0, %v6509_v41  ;;  %v9857_v52 = vpack.c.bf16 %v6684_v11, %v6683_v25  ;;  %v9705_v20 = vpack.c.bf16 %v6528_v19, %v6527_v17  ;;  %v9707_v29 = vpack.c.bf16 %v6512_v46, %v6511_v47  ;;  %v6516_v37 = vld [vmem:[%s16708_s5 + $0x248] sm:$0xff]  ;;  %v6690_v0 = vld [vmem:[%s16708_s5 + $0x7b8] sm:$0xff]  ;;  %v6533_v25 = vld [vmem:[%s16708_s5 + $0x2d0] sm:$0xff] }
 0x89d   : > { %v15355_v32 = vmax.f32 %v6177_v59, %v6217_v31  ;;  %10585 = vrot.lane.b32.xlu1 %v10584_v3, %s10691_s0  ;;  %v6530_v31 = vld [vmem:[%s16708_s5 + $0x2b8] sm:$0xff]  ;;  %v6292_v59 = vrot.slane %v15057_v44, 4  ;;  %v6669_v3 = vld [vmem:[%s16708_s5 + $0x710] sm:$0xff]  ;;  %v9713_v41 = vpack.c.bf16 %v6532_v63, %v6531_v50  ;;  %v6588_v50 = vld [vmem:[%s16708_s5 + $0x488] sm:$0xff] }
 0x89e   : > { %9816 = vmatpush3.bf16.msra.mxu1 %v9815_v53  ;;  %v6685_v53 = vld [vmem:[%s16708_s5 + $0x790] sm:$0xff]  ;;  %v9709_v43 = vpack.c.bf16 %v6530_v31, %v6529_v12  ;;  %v6534_v11 = vld [vmem:[%s16708_s5 + $0x2d8] sm:$0xff]  ;;  %v6520_v12 = vld [vmem:[%s16708_s5 + $0x268] sm:$0xff] }
 0x89f   : > { %9696 = vmatpush3.bf16.msra.mxu0 %v9695_v56  ;;  %9818 = vmatprep.subr.bf16.mxu1 %v9817_v2  ;;  %v6390_v16 = vrot.slane %v15355_v32, 1  ;;  %v6396_v55 = vrot.slane %v15355_v32, 3  ;;  %v6402_v40 = vrot.slane %v15355_v32, 5  ;;  %v6408_v36 = vrot.slane %v15355_v32, 7  ;;  %v6686_v56 = vld [vmem:[%s16708_s5 + $0x798] sm:$0xff]  ;;  %v6517_v19 = vld [vmem:[%s16708_s5 + $0x250] sm:$0xff] }
 0x8a0   : > { %9698 = vmatprep.subr.bf16.mxu0 %v9697_v58  ;;  %v9859_v2 = vpack.c.bf16 %v6668_v61, %v6667_v57  ;;  %v9861_v27 = vpack.c.bf16 %v6686_v56, %v6685_v53  ;;  %v6670_v58 = vld [vmem:[%s16708_s5 + $0x718] sm:$0xff]  ;;  %v6329_v30 = vsel %vm5667_vm3, %v6292_v59, %v10543_v54  ;;  %v6691_v57 = vld [vmem:[%s16708_s5 + $0x7c0] sm:$0xff]  ;;  %v6536_v61 = vld [vmem:[%s16708_s5 + $0x2e8] sm:$0xff] }
 0x8a1   : > { %v10589_v1 = vpack.i.bf16 %v6390_v16, %v6396_v55  ;;  %v10594_v45 = vpack.i.bf16 %v6402_v40, %v6408_v36  ;;  %v9863_v13 = vpack.c.bf16 %v6670_v58, %v6669_v3  ;;  %v9711_v16 = vpack.c.bf16 %v6514_v62, %v6513_v42  ;;  %v6671_v40 = vld [vmem:[%s16708_s5 + $0x720] sm:$0xff]  ;;  %v6672_v36 = vld [vmem:[%s16708_s5 + $0x728] sm:$0xff]  ;;  %v6674_v17 = vld [vmem:[%s16708_s5 + $0x738] sm:$0xff] }
 0x8a2   : > { %7091 = vmatmul.mubr.f32.vlgmr.msra.gmra.mrb[34].mxu0 %v6275_v10  ;;  %9820 = vmatpush3.bf16.msra.mxu1 %v9819_v8  ;;  %v6688_v8 = vld [vmem:[%s16708_s5 + $0x7a8] sm:$0xff]  ;;  %v9867_v10 = vpack.c.bf16 %v6672_v36, %v6671_v40  ;;  %v6519_v56 = vld [vmem:[%s16708_s5 + $0x260] sm:$0xff]  ;;  %v6693_v31 = vld [vmem:[%s16708_s5 + $0x7d0] sm:$0xff] }
 0x8a3   : > { %9700 = vmatpush3.bf16.msra.mxu0 %v9699_v14  ;;  %7160 = vmatprep.mubr.f32.mxu0 %v6278_v51  ;;  %v6334_v14 = vsel %vm5667_vm3, %v6321_v60, %v10557_v48  ;;  %v9865_v55 = vpack.c.bf16 %v6688_v8, %v6687_v18  ;;  %v9717_v51 = vpack.c.bf16 %v6534_v11, %v6533_v25  ;;  %v6676_v53 = vld [vmem:[%s16708_s5 + $0x748] sm:$0xff]  ;;  %v6694_v59 = vld [vmem:[%s16708_s5 + $0x7d8] sm:$0xff]  ;;  %v6677_v58 = vld [vmem:[%s16708_s5 + $0x750] sm:$0xff] }
 0x8a4   : > { %10590 = vrot.lane.b32.xlu0 %v10589_v1, %s10691_s0  ;;  %10595 = vrot.lane.b32.xlu1 %v10594_v45, %s10691_s0  ;;  %v9715_v1 = vpack.c.bf16 %v6516_v37, %v6515_v4  ;;  %v6538_v60 = vld [vmem:[%s16708_s5 + $0x2f8] sm:$0xff]  ;;  %v9877_v3 = vpack.c.bf16 %v6694_v59, %v6693_v31  ;;  %v6695_v18 = vld [vmem:[%s16708_s5 + $0x7e0] sm:$0xff]  ;;  %v10558_v31 = vunpack.i.h.bf16 %v15402_v7 }
 0x8a5   : > { %9822 = vmatprep.subr.bf16.mxu1 %v9821_v9  ;;  %9702 = vmatprep.subr.bf16.mxu0 %v9701_v6  ;;  %v6689_v9 = vld [vmem:[%s16708_s5 + $0x7b0] sm:$0xff]  ;;  %v6678_v42 = vld [vmem:[%s16708_s5 + $0x758] sm:$0xff]  ;;  %v6696_v8 = vld [vmem:[%s16708_s5 + $0x7e8] sm:$0xff] }
 0x8a6   : > { %9824 = vmatpush3.bf16.msra.mxu1 %v9823_v22  ;;  %v9869_v45 = vpack.c.bf16 %v6690_v0, %v6689_v9  ;;  %v6673_v6 = vld [vmem:[%s16708_s5 + $0x730] sm:$0xff]  ;;  %v6518_v22 = vld [vmem:[%s16708_s5 + $0x258] sm:$0xff]  ;;  %v9879_v63 = vpack.c.bf16 %v6678_v42, %v6677_v58  ;;  %v6680_v40 = vld [vmem:[%s16708_s5 + $0x768] sm:$0xff]  ;;  %v10523_v9 = vunpack.i.h.bf16 %v15161_v34 }
 0x8a7   : > { %9704 = vmatpush3.bf16.msra.mxu0 %v9703_v39  ;;  %9858 = vmatprep.subr.bf16.mxu1 %v9857_v52  ;;  %v6692_v39 = vld [vmem:[%s16708_s5 + $0x7c8] sm:$0xff]  ;;  %v6535_v52 = vld [vmem:[%s16708_s5 + $0x2e0] sm:$0xff]  ;;  %v9871_v47 = vpack.c.bf16 %v6674_v17, %v6673_v6  ;;  %v9719_v46 = vpack.c.bf16 %v6518_v22, %v6517_v19  ;;  %v6522_v62 = vld [vmem:[%s16708_s5 + $0x278] sm:$0xff]  ;;  %v6286_v19 = vrot.slane %v15057_v44, 2 }
 0x8a8   : > { %9706 = vmatprep.subr.bf16.mxu0 %v9705_v20  ;;  %v9873_v54 = vpack.c.bf16 %v6692_v39, %v6691_v57  ;;  %v6675_v20 = vld [vmem:[%s16708_s5 + $0x740] sm:$0xff]  ;;  %v9721_v48 = vpack.c.bf16 %v6536_v61, %v6535_v52  ;;  %v6697_v37 = vld [vmem:[%s16708_s5 + $0x7f0] sm:$0xff]  ;;  %v6698_v0 = vld [vmem:[%s16708_s5 + $0x7f8] sm:$0xff]  ;;  %v6277_v61 = vsel %vm5667_vm3, %v15044_v49, %v10523_v9 }
 0x8a9   : > { %7371 = vmatmul.mubr.f32.vlgmr.msra.gmra.mrb[18].mxu1 %v6329_v30  ;;  %v6521_v30 = vld [vmem:[%s16708_s5 + $0x270] sm:$0xff]  ;;  %v6571_v4 = vld [vmem:[%s16708_s5 + $0x400] sm:$0xff]  ;;  %v6590_v11 = vld [vmem:[%s16708_s5 + $0x498] sm:$0xff] }
 0x8aa   : > { %9860 = vmatpush3.bf16.msra.mxu1 %v9859_v2  ;;  %7510 = vmatprep.mubr.f32.mxu1 %v6334_v14  ;;  %v6537_v2 = vld [vmem:[%s16708_s5 + $0x2f0] sm:$0xff]  ;;  %v6587_v14 = vld [vmem:[%s16708_s5 + $0x480] sm:$0xff]  ;;  %v6682_v6 = vld [vmem:[%s16708_s5 + $0x778] sm:$0xff] }
 0x8ab   : > { %9708 = vmatpush3.bf16.msra.mxu0 %v9707_v29  ;;  %9862 = vmatprep.subr.bf16.mxu1 %v9861_v27  ;;  %v9875_v29 = vpack.c.bf16 %v6676_v53, %v6675_v20  ;;  %v9723_v27 = vpack.c.bf16 %v6520_v12, %v6519_v56  ;;  %v9761_v36 = vpack.c.bf16 %v6588_v50, %v6587_v14  ;;  %v6589_v25 = vld [vmem:[%s16708_s5 + $0x490] sm:$0xff]  ;;  %v6574_v57 = vld [vmem:[%s16708_s5 + $0x418] sm:$0xff]  ;;  %v6747_v39 = vld [vmem:[%s16708_s5 + $0x980] sm:$0xff] }
 0x8ac   : > { %9710 = vmatprep.subr.bf16.mxu0 %v9709_v43  ;;  %v9725_v43 = vpack.c.bf16 %v6538_v60, %v6537_v2  ;;  %v6681_v34 = vld [vmem:[%s16708_s5 + $0x770] sm:$0xff]  ;;  %v9765_v22 = vpack.c.bf16 %v6590_v11, %v6589_v25  ;;  %v6748_v52 = vld [vmem:[%s16708_s5 + $0x988] sm:$0xff]  ;;  %v6575_v49 = vld [vmem:[%s16708_s5 + $0x420] sm:$0xff] }
 0x8ad   : > { %v6573_v17 = vld [vmem:[%s16708_s5 + $0x410] sm:$0xff]  ;;  %v9887_v20 = vpack.c.bf16 %v6682_v6, %v6681_v34  ;;  %v9921_v56 = vpack.c.bf16 %v6748_v52, %v6747_v39  ;;  %v6732_v12 = vld [vmem:[%s16708_s5 + $0x908] sm:$0xff]  ;;  %v6594_v7 = vld [vmem:[%s16708_s5 + $0x4b8] sm:$0xff] }
 0x8ae   : > { %9864 = vmatpush3.bf16.msra.mxu1 %v9863_v13  ;;  %v9727_v13 = vpack.c.bf16 %v6522_v62, %v6521_v30  ;;  %v9767_v53 = vpack.c.bf16 %v6574_v57, %v6573_v17  ;;  %v6576_v2 = vld [vmem:[%s16708_s5 + $0x428] sm:$0xff]  ;;  %v6749_v60 = vld [vmem:[%s16708_s5 + $0x990] sm:$0xff]  ;;  %v6578_v50 = vld [vmem:[%s16708_s5 + $0x438] sm:$0xff] }
 0x8af   : > { %9712 = vmatpush3.bf16.msra.mxu0 %v9711_v16  ;;  %9866 = vmatprep.subr.bf16.mxu1 %v9865_v55  ;;  %v9881_v16 = vpack.c.bf16 %v6696_v8, %v6695_v18  ;;  %v6679_v55 = vld [vmem:[%s16708_s5 + $0x760] sm:$0xff]  ;;  %v9771_v42 = vpack.c.bf16 %v6576_v2, %v6575_v49  ;;  %v6577_v30 = vld [vmem:[%s16708_s5 + $0x430] sm:$0xff]  ;;  %v6734_v18 = vld [vmem:[%s16708_s5 + $0x918] sm:$0xff] }
 0x8b0   : > { %9714 = vmatprep.subr.bf16.mxu0 %v9713_v41  ;;  %v6572_v41 = vld [vmem:[%s16708_s5 + $0x408] sm:$0xff]  ;;  %v6733_v62 = vld [vmem:[%s16708_s5 + $0x910] sm:$0xff]  ;;  %v6582_v39 = vld [vmem:[%s16708_s5 + $0x458] sm:$0xff] }
 0x8b1   : > { %v6736_v9 = vld [vmem:[%s16708_s5 + $0x928] sm:$0xff]  ;;  %v6753_v11 = vld [vmem:[%s16708_s5 + $0x9b0] sm:$0xff]  ;;  %v6755_v52 = vld [vmem:[%s16708_s5 + $0x9c0] sm:$0xff] }
 0x8b2   : > { %9868 = vmatpush3.bf16.msra.mxu1 %v9867_v10  ;;  %v10537_v10 = vunpack.i.l.bf16 %v15191_v24  ;;  %v6580_v25 = vld [vmem:[%s16708_s5 + $0x448] sm:$0xff]  ;;  %v6581_v17 = vld [vmem:[%s16708_s5 + $0x450] sm:$0xff]  ;;  %v6758_v2 = vld [vmem:[%s16708_s5 + $0x9d8] sm:$0xff] }
 0x8b3   : > { %9716 = vmatpush3.bf16.msra.mxu0 %v9715_v1  ;;  %9870 = vmatprep.subr.bf16.mxu1 %v9869_v45  ;;  %v9883_v1 = vpack.c.bf16 %v6680_v40, %v6679_v55  ;;  %v9763_v45 = vpack.c.bf16 %v6572_v41, %v6571_v4  ;;  %v6596_v55 = vld [vmem:[%s16708_s5 + $0x4c8] sm:$0xff]  ;;  %v9927_v40 = vpack.c.bf16 %v6734_v18, %v6733_v62  ;;  %v6579_v4 = vld [vmem:[%s16708_s5 + $0x440] sm:$0xff]  ;;  %v6586_v62 = vld [vmem:[%s16708_s5 + $0x478] sm:$0xff] }
 0x8b4   : > { %9718 = vmatprep.subr.bf16.mxu0 %v9717_v51  ;;  %v9885_v51 = vpack.c.bf16 %v6698_v0, %v6697_v37  ;;  %v6735_v37 = vld [vmem:[%s16708_s5 + $0x920] sm:$0xff]  ;;  %v9779_v6 = vpack.c.bf16 %v6580_v25, %v6579_v4  ;;  %v6761_v25 = vld [vmem:[%s16708_s5 + $0x9f0] sm:$0xff] }
 0x8b5   : > { %v9931_v34 = vpack.c.bf16 %v6736_v9, %v6735_v37  ;;  %v6759_v18 = vld [vmem:[%s16708_s5 + $0x9e0] sm:$0xff]  ;;  %v6653_v37 = vld [vmem:[%s16708_s5 + $0x690] sm:$0xff]  ;;  %v10538_v9 = vunpack.i.h.bf16 %v15191_v24 }
 0x8b6   : > { %9872 = vmatpush3.bf16.msra.mxu1 %v9871_v47  ;;  %v6591_v47 = vld [vmem:[%s16708_s5 + $0x4a0] sm:$0xff]  ;;  %v6637_v24 = vld [vmem:[%s16708_s5 + $0x610] sm:$0xff] }
 0x8b7   : > { %9720 = vmatpush3.bf16.msra.mxu0 %v9719_v46  ;;  %9874 = vmatprep.subr.bf16.mxu1 %v9873_v54  ;;  %v6592_v46 = vld [vmem:[%s16708_s5 + $0x4a8] sm:$0xff]  ;;  %v6328_v54 = vsel %vm5667_vm3, %v6286_v19, %v10537_v10  ;;  %v6754_v10 = vld [vmem:[%s16708_s5 + $0x9b8] sm:$0xff]  ;;  %v6635_v4 = vld [vmem:[%s16708_s5 + $0x600] sm:$0xff] }
 0x8b8   : > { %9722 = vmatprep.subr.bf16.mxu0 %v9721_v48  ;;  %v6731_v48 = vld [vmem:[%s16708_s5 + $0x900] sm:$0xff]  ;;  %v9769_v59 = vpack.c.bf16 %v6592_v46, %v6591_v47  ;;  %v9933_v19 = vpack.c.bf16 %v6754_v10, %v6753_v11  ;;  %v6600_v46 = vld [vmem:[%s16708_s5 + $0x4e8] sm:$0xff]  ;;  %v6762_v11 = vld [vmem:[%s16708_s5 + $0x9f8] sm:$0xff]  ;;  %v10552_v10 = vunpack.i.l.bf16 %v15285_v35 }
 0x8b9   : > { %v9923_v58 = vpack.c.bf16 %v6732_v12, %v6731_v48  ;;  %v6599_v47 = vld [vmem:[%s16708_s5 + $0x4e0] sm:$0xff]  ;;  %v6740_v48 = vld [vmem:[%s16708_s5 + $0x948] sm:$0xff] }
 0x8ba   : > { %9876 = vmatpush3.bf16.msra.mxu1 %v9875_v29  ;;  %v6750_v29 = vld [vmem:[%s16708_s5 + $0x998] sm:$0xff]  ;;  %v9785_v12 = vpack.c.bf16 %v6600_v46, %v6599_v47  ;;  %v6656_v47 = vld [vmem:[%s16708_s5 + $0x6a8] sm:$0xff] }
 0x8bb   : > { %9724 = vmatpush3.bf16.msra.mxu0 %v9723_v27  ;;  %9878 = vmatprep.subr.bf16.mxu1 %v9877_v3  ;;  %v6593_v27 = vld [vmem:[%s16708_s5 + $0x4b0] sm:$0xff]  ;;  %v6315_v3 = vrot.slane %v15092_v5, 4 }
 0x8bc   : > { %9726 = vmatprep.subr.bf16.mxu0 %v9725_v43  ;;  %v9925_v43 = vpack.c.bf16 %v6750_v29, %v6749_v60  ;;  %v9773_v14 = vpack.c.bf16 %v6594_v7, %v6593_v27  ;;  %v6601_v60 = vld [vmem:[%s16708_s5 + $0x4f0] sm:$0xff]  ;;  %v6602_v29 = vld [vmem:[%s16708_s5 + $0x4f8] sm:$0xff] }
 0x8bd   : > { %v6333_v8 = vsel %vm5667_vm3, %v6315_v3, %v10558_v31  ;;  %v6584_v31 = vld [vmem:[%s16708_s5 + $0x468] sm:$0xff]  ;;  %v6585_v3 = vld [vmem:[%s16708_s5 + $0x470] sm:$0xff] }
 0x8be   : > { %9880 = vmatpush3.bf16.msra.mxu1 %v9879_v63  ;;  %v6751_v63 = vld [vmem:[%s16708_s5 + $0x9a0] sm:$0xff] }
 0x8bf   : > { %9728 = vmatpush3.bf16.msra.mxu0 %v9727_v13  ;;  %9882 = vmatprep.subr.bf16.mxu1 %v9881_v16  ;;  %v6752_v13 = vld [vmem:[%s16708_s5 + $0x9a8] sm:$0xff]  ;;  %v6595_v16 = vld [vmem:[%s16708_s5 + $0x4c0] sm:$0xff] }
 0x8c0   : > { %9762 = vmatprep.subr.bf16.mxu0 %v9761_v36  ;;  %v9775_v36 = vpack.c.bf16 %v6578_v50, %v6577_v30  ;;  %v9929_v41 = vpack.c.bf16 %v6752_v13, %v6751_v63  ;;  %v9777_v0 = vpack.c.bf16 %v6596_v55, %v6595_v16  ;;  %v6742_v30 = vld [vmem:[%s16708_s5 + $0x958] sm:$0xff]  ;;  %v6652_v50 = vld [vmem:[%s16708_s5 + $0x688] sm:$0xff]  ;;  %v9791_v13 = vpack.c.bf16 %v6586_v62, %v6585_v3  ;;  %v6743_v55 = vld [vmem:[%s16708_s5 + $0x960] sm:$0xff] }
 0x8c2   : > { %7161 = vmatmul.mubr.f32.vlgmr.msra.gmra.mrb[36].mxu0 %v6277_v61  ;;  %9884 = vmatpush3.bf16.msra.mxu1 %v9883_v1  ;;  %v6597_v1 = vld [vmem:[%s16708_s5 + $0x4d0] sm:$0xff]  ;;  %v6756_v61 = vld [vmem:[%s16708_s5 + $0x9c8] sm:$0xff] }
 0x8c3   : > { %9764 = vmatpush3.bf16.msra.mxu0 %v9763_v45  ;;  %7300 = vmatprep.mubr.f32.mxu0 %v6328_v54  ;;  %v6598_v45 = vld [vmem:[%s16708_s5 + $0x4d8] sm:$0xff]  ;;  %v9937_v49 = vpack.c.bf16 %v6756_v61, %v6755_v52  ;;  %v6327_v52 = vsel %vm5667_vm3, %v15057_v44, %v10538_v9  ;;  %v6655_v61 = vld [vmem:[%s16708_s5 + $0x6a0] sm:$0xff]  ;;  %v6649_v9 = vld [vmem:[%s16708_s5 + $0x670] sm:$0xff] }
 0x8c4   : > { %9886 = vmatprep.subr.bf16.mxu1 %v9885_v51  ;;  %9766 = vmatprep.subr.bf16.mxu0 %v9765_v22  ;;  %v6737_v51 = vld [vmem:[%s16708_s5 + $0x930] sm:$0xff]  ;;  %v6738_v22 = vld [vmem:[%s16708_s5 + $0x938] sm:$0xff]  ;;  %v9781_v57 = vpack.c.bf16 %v6598_v45, %v6597_v1  ;;  %v6639_v44 = vld [vmem:[%s16708_s5 + $0x620] sm:$0xff] }
 0x8c5   : > { %v9935_v54 = vpack.c.bf16 %v6738_v22, %v6737_v51  ;;  %v6638_v51 = vld [vmem:[%s16708_s5 + $0x618] sm:$0xff]  ;;  %v9949_v22 = vpack.c.bf16 %v6762_v11, %v6761_v25  ;;  %v6715_v25 = vld [vmem:[%s16708_s5 + $0x880] sm:$0xff]  ;;  %v6716_v11 = vld [vmem:[%s16708_s5 + $0x888] sm:$0xff] }
 0x8c6   : > { %9888 = vmatpush3.bf16.msra.mxu1 %v9887_v20  ;;  %v9783_v20 = vpack.c.bf16 %v6582_v39, %v6581_v17  ;;  %v6309_v17 = vrot.slane %v15092_v5, 2  ;;  %v6812_v39 = vld [vmem:[%s16708_s5 + $0xb88] sm:$0xff] }
 0x8c7   : > { %9768 = vmatpush3.bf16.msra.mxu0 %v9767_v53  ;;  %9922 = vmatprep.subr.bf16.mxu1 %v9921_v56  ;;  %v6583_v53 = vld [vmem:[%s16708_s5 + $0x460] sm:$0xff] }
 0x8c8   : > { %9770 = vmatprep.subr.bf16.mxu0 %v9769_v59  ;;  %v6739_v56 = vld [vmem:[%s16708_s5 + $0x940] sm:$0xff]  ;;  %v6757_v59 = vld [vmem:[%s16708_s5 + $0x9d0] sm:$0xff]  ;;  %v9787_v7 = vpack.c.bf16 %v6584_v31, %v6583_v53  ;;  %v6332_v46 = vsel %vm5667_vm3, %v6309_v17, %v10552_v10  ;;  %v6718_v17 = vld [vmem:[%s16708_s5 + $0x898] sm:$0xff] }
 0x8c9   : > { %7511 = vmatmul.mubr.f32.vlgmr.msra.gmra.mrb[20].mxu1 %v6333_v8  ;;  %v9939_v27 = vpack.c.bf16 %v6740_v48, %v6739_v56  ;;  %v6760_v8 = vld [vmem:[%s16708_s5 + $0x9e8] sm:$0xff]  ;;  %v6657_v48 = vld [vmem:[%s16708_s5 + $0x6b0] sm:$0xff] }
 0x8ca   : > { %9924 = vmatpush3.bf16.msra.mxu1 %v9923_v58  ;;  %v9941_v58 = vpack.c.bf16 %v6758_v2, %v6757_v59  ;;  %v9945_v16 = vpack.c.bf16 %v6760_v8, %v6759_v18  ;;  %v6640_v56 = vld [vmem:[%s16708_s5 + $0x628] sm:$0xff]  ;;  %v6641_v2 = vld [vmem:[%s16708_s5 + $0x630] sm:$0xff] }
 0x8cb   : > { %9772 = vmatpush3.bf16.msra.mxu0 %v9771_v42  ;;  %9926 = vmatprep.subr.bf16.mxu1 %v9925_v43  ;;  %v6741_v42 = vld [vmem:[%s16708_s5 + $0x950] sm:$0xff]  ;;  %v9789_v43 = vpack.c.bf16 %v6602_v29, %v6601_v60  ;;  %v9835_v31 = vpack.c.bf16 %v6640_v56, %v6639_v44  ;;  %v6642_v60 = vld [vmem:[%s16708_s5 + $0x638] sm:$0xff]  ;;  %v6659_v29 = vld [vmem:[%s16708_s5 + $0x6c0] sm:$0xff] }
 0x8cc   : > { %9774 = vmatprep.subr.bf16.mxu0 %v9773_v14  ;;  %v6651_v14 = vld [vmem:[%s16708_s5 + $0x680] sm:$0xff]  ;;  %v9943_v63 = vpack.c.bf16 %v6742_v30, %v6741_v42  ;;  %v6644_v42 = vld [vmem:[%s16708_s5 + $0x648] sm:$0xff]  ;;  %v6661_v30 = vld [vmem:[%s16708_s5 + $0x6d0] sm:$0xff] }
 0x8cd   : > { %v6645_v8 = vld [vmem:[%s16708_s5 + $0x650] sm:$0xff] }
 0x8ce   : > { %9928 = vmatpush3.bf16.msra.mxu1 %v9927_v40  ;;  %v6744_v40 = vld [vmem:[%s16708_s5 + $0x968] sm:$0xff] }
 0x8cf   : > { %9776 = vmatpush3.bf16.msra.mxu0 %v9775_v36  ;;  %9930 = vmatprep.subr.bf16.mxu1 %v9929_v41  ;;  %v9825_v36 = vpack.c.bf16 %v6652_v50, %v6651_v14  ;;  %v6636_v41 = vld [vmem:[%s16708_s5 + $0x608] sm:$0xff]  ;;  %v9947_v1 = vpack.c.bf16 %v6744_v40, %v6743_v55  ;;  %v6646_v14 = vld [vmem:[%s16708_s5 + $0x658] sm:$0xff]  ;;  %v6663_v50 = vld [vmem:[%s16708_s5 + $0x6e0] sm:$0xff] }
 0x8d0   : > { %9778 = vmatprep.subr.bf16.mxu0 %v9777_v0  ;;  %v6654_v0 = vld [vmem:[%s16708_s5 + $0x698] sm:$0xff]  ;;  %v9827_v45 = vpack.c.bf16 %v6636_v41, %v6635_v4  ;;  %v6647_v55 = vld [vmem:[%s16708_s5 + $0x660] sm:$0xff]  ;;  %v6648_v40 = vld [vmem:[%s16708_s5 + $0x668] sm:$0xff] }
 0x8d1   : > { %v6666_v4 = vld [vmem:[%s16708_s5 + $0x6f8] sm:$0xff]  ;;  %v9851_v41 = vpack.c.bf16 %v6648_v40, %v6647_v55  ;;  %v6815_v55 = vld [vmem:[%s16708_s5 + $0xba0] sm:$0xff]  ;;  %v6816_v40 = vld [vmem:[%s16708_s5 + $0xba8] sm:$0xff] }
 0x8d2   : > { %9932 = vmatpush3.bf16.msra.mxu1 %v9931_v34  ;;  %v6745_v34 = vld [vmem:[%s16708_s5 + $0x970] sm:$0xff] }
 0x8d3   : > { %9780 = vmatpush3.bf16.msra.mxu0 %v9779_v6  ;;  %9934 = vmatprep.subr.bf16.mxu1 %v9933_v19  ;;  %v6746_v6 = vld [vmem:[%s16708_s5 + $0x978] sm:$0xff]  ;;  %v9829_v19 = vpack.c.bf16 %v6654_v0, %v6653_v37 }
 0x8d4   : > { %9782 = vmatprep.subr.bf16.mxu0 %v9781_v57  ;;  %v6811_v57 = vld [vmem:[%s16708_s5 + $0xb80] sm:$0xff]  ;;  %v6650_v0 = vld [vmem:[%s16708_s5 + $0x678] sm:$0xff] }
 0x8d5   : > { %v9985_v53 = vpack.c.bf16 %v6812_v39, %v6811_v57  ;;  %v9855_v10 = vpack.c.bf16 %v6650_v0, %v6649_v9  ;;  %v6719_v39 = vld [vmem:[%s16708_s5 + $0x8a0] sm:$0xff] }
 0x8d6   : > { %9936 = vmatpush3.bf16.msra.mxu1 %v9935_v54  ;;  %v9951_v54 = vpack.c.bf16 %v6746_v6, %v6745_v34  ;;  %v10553_v34 = vunpack.i.h.bf16 %v15285_v35  ;;  %v6717_v6 = vld [vmem:[%s16708_s5 + $0x890] sm:$0xff]  ;;  %v6702_v35 = vld [vmem:[%s16708_s5 + $0x818] sm:$0xff] }
 0x8d7   : > { %9784 = vmatpush3.bf16.msra.mxu0 %v9783_v20  ;;  %9938 = vmatprep.subr.bf16.mxu1 %v9937_v49  ;;  %v9831_v20 = vpack.c.bf16 %v6638_v51, %v6637_v24  ;;  %v9833_v49 = vpack.c.bf16 %v6656_v47, %v6655_v61  ;;  %v6700_v24 = vld [vmem:[%s16708_s5 + $0x808] sm:$0xff]  ;;  %v9893_v51 = vpack.c.bf16 %v6718_v17, %v6717_v6 }
 0x8d8   : > { %9786 = vmatprep.subr.bf16.mxu0 %v9785_v12  ;;  %v6658_v12 = vld [vmem:[%s16708_s5 + $0x6b8] sm:$0xff]  ;;  %v6331_v57 = vsel %vm5667_vm3, %v15092_v5, %v10553_v34  ;;  %v6704_v5 = vld [vmem:[%s16708_s5 + $0x828] sm:$0xff]  ;;  %v6709_v34 = vld [vmem:[%s16708_s5 + $0x850] sm:$0xff] }
 0x8d9   : > { %v9837_v59 = vpack.c.bf16 %v6658_v12, %v6657_v48  ;;  %v6813_v48 = vld [vmem:[%s16708_s5 + $0xb90] sm:$0xff]  ;;  %v6814_v12 = vld [vmem:[%s16708_s5 + $0xb98] sm:$0xff] }
 0x8da   : > { %9940 = vmatpush3.bf16.msra.mxu1 %v9939_v27  ;;  %v6660_v27 = vld [vmem:[%s16708_s5 + $0x6c8] sm:$0xff] }
 0x8db   : > { %9788 = vmatpush3.bf16.msra.mxu0 %v9787_v7  ;;  %9942 = vmatprep.subr.bf16.mxu1 %v9941_v58  ;;  %v9839_v7 = vpack.c.bf16 %v6642_v60, %v6641_v2  ;;  %v9841_v3 = vpack.c.bf16 %v6660_v27, %v6659_v29  ;;  %v6643_v58 = vld [vmem:[%s16708_s5 + $0x640] sm:$0xff]  ;;  %v6352_v60 = vrot.slane %v15228_v38, 6  ;;  %v6346_v29 = vrot.slane %v15228_v38, 4  ;;  %v6705_v27 = vld [vmem:[%s16708_s5 + $0x830] sm:$0xff] }
 0x8dc   : > { %9790 = vmatprep.subr.bf16.mxu0 %v9789_v43  ;;  %v6662_v43 = vld [vmem:[%s16708_s5 + $0x6d8] sm:$0xff]  ;;  %v9843_v62 = vpack.c.bf16 %v6644_v42, %v6643_v58  ;;  %v6340_v58 = vrot.slane %v15228_v38, 2 }
 0x8dd   : > { %v9845_v18 = vpack.c.bf16 %v6662_v43, %v6661_v30  ;;  %v6723_v43 = vld [vmem:[%s16708_s5 + $0x8c0] sm:$0xff] }
 0x8de   : > { %9944 = vmatpush3.bf16.msra.mxu1 %v9943_v63  ;;  %v6664_v63 = vld [vmem:[%s16708_s5 + $0x6e8] sm:$0xff] }
 0x8df   : > { %9792 = vmatpush3.bf16.msra.mxu0 %v9791_v13  ;;  %9946 = vmatprep.subr.bf16.mxu1 %v9945_v16  ;;  %v9847_v13 = vpack.c.bf16 %v6646_v14, %v6645_v8  ;;  %v9849_v16 = vpack.c.bf16 %v6664_v63, %v6663_v50  ;;  %v9989_v14 = vpack.c.bf16 %v6814_v12, %v6813_v48  ;;  %v6797_v50 = vld [vmem:[%s16708_s5 + $0xb10] sm:$0xff]  ;;  %v6798_v63 = vld [vmem:[%s16708_s5 + $0xb18] sm:$0xff]  ;;  %v6820_v48 = vld [vmem:[%s16708_s5 + $0xbc8] sm:$0xff] }
 0x8e0   : > { %9826 = vmatprep.subr.bf16.mxu0 %v9825_v36  ;;  %v6665_v36 = vld [vmem:[%s16708_s5 + $0x6f0] sm:$0xff] }
 0x8e1   : > { %v9853_v37 = vpack.c.bf16 %v6666_v4, %v6665_v36 }
 0x8e2   : > { %7301 = vmatmul.mubr.f32.vlgmr.msra.gmra.mrb[38].mxu0 %v6327_v52  ;;  %9948 = vmatpush3.bf16.msra.mxu1 %v9947_v1  ;;  %v9889_v1 = vpack.c.bf16 %v6716_v11, %v6715_v25  ;;  %v6720_v52 = vld [vmem:[%s16708_s5 + $0x8a8] sm:$0xff]  ;;  %v9991_v25 = vpack.c.bf16 %v6798_v63, %v6797_v50  ;;  %v6725_v11 = vld [vmem:[%s16708_s5 + $0x8d0] sm:$0xff]  ;;  %v6714_v63 = vld [vmem:[%s16708_s5 + $0x878] sm:$0xff] }
 0x8e3   : > { %9828 = vmatpush3.bf16.msra.mxu0 %v9827_v45  ;;  %7440 = vmatprep.mubr.f32.mxu0 %v6332_v46  ;;  %v6699_v45 = vld [vmem:[%s16708_s5 + $0x800] sm:$0xff]  ;;  %v9897_v47 = vpack.c.bf16 %v6720_v52, %v6719_v39  ;;  %v6713_v50 = vld [vmem:[%s16708_s5 + $0x870] sm:$0xff] }
 0x8e4   : > { %9830 = vmatprep.subr.bf16.mxu0 %v9829_v19  ;;  %9950 = vmatprep.subr.bf16.mxu1 %v9949_v22  ;;  %v9891_v19 = vpack.c.bf16 %v6700_v24, %v6699_v45  ;;  %v6701_v22 = vld [vmem:[%s16708_s5 + $0x810] sm:$0xff]  ;;  %v6703_v46 = vld [vmem:[%s16708_s5 + $0x820] sm:$0xff]  ;;  %v6800_v24 = vld [vmem:[%s16708_s5 + $0xb28] sm:$0xff] }
 0x8e5   : > { %v9895_v61 = vpack.c.bf16 %v6702_v35, %v6701_v22  ;;  %v9899_v56 = vpack.c.bf16 %v6704_v5, %v6703_v46  ;;  %v6799_v45 = vld [vmem:[%s16708_s5 + $0xb20] sm:$0xff]  ;;  %v6817_v22 = vld [vmem:[%s16708_s5 + $0xbb0] sm:$0xff]  ;;  %v6818_v35 = vld [vmem:[%s16708_s5 + $0xbb8] sm:$0xff] }
 0x8e6   : > { %9952 = vmatpush3.bf16.msra.mxu1 %v9951_v54  ;;  %v6795_v54 = vld [vmem:[%s16708_s5 + $0xb00] sm:$0xff]  ;;  %v9995_v39 = vpack.c.bf16 %v6800_v24, %v6799_v45  ;;  %v9997_v46 = vpack.c.bf16 %v6818_v35, %v6817_v22  ;;  %v6801_v5 = vld [vmem:[%s16708_s5 + $0xb30] sm:$0xff]  ;;  %v6826_v35 = vld [vmem:[%s16708_s5 + $0xbf8] sm:$0xff] }
 0x8e7   : > { %9832 = vmatpush3.bf16.msra.mxu0 %v9831_v20  ;;  %9986 = vmatprep.subr.bf16.mxu1 %v9985_v53  ;;  %v6796_v20 = vld [vmem:[%s16708_s5 + $0xb08] sm:$0xff]  ;;  %v6721_v53 = vld [vmem:[%s16708_s5 + $0x8b0] sm:$0xff]  ;;  %v6727_v52 = vld [vmem:[%s16708_s5 + $0x8e0] sm:$0xff] }
 0x8e8   : > { %9834 = vmatprep.subr.bf16.mxu0 %v9833_v49  ;;  %v6722_v49 = vld [vmem:[%s16708_s5 + $0x8b8] sm:$0xff]  ;;  %v9987_v42 = vpack.c.bf16 %v6796_v20, %v6795_v54  ;;  %v6781_v24 = vld [vmem:[%s16708_s5 + $0xa90] sm:$0xff] }
 0x8e9   : > { %v9901_v30 = vpack.c.bf16 %v6722_v49, %v6721_v53  ;;  %v6802_v54 = vld [vmem:[%s16708_s5 + $0xb38] sm:$0xff]  ;;  %v6825_v22 = vld [vmem:[%s16708_s5 + $0xbf0] sm:$0xff] }
 0x8eb   : > { %9836 = vmatpush3.bf16.msra.mxu0 %v9835_v31 }
 0x8ec   : > { %9838 = vmatprep.subr.bf16.mxu0 %v9837_v59 }
 0x8ef   : > { %9840 = vmatpush3.bf16.msra.mxu0 %v9839_v7  ;;  %v6706_v7 = vld [vmem:[%s16708_s5 + $0x838] sm:$0xff] }
 0x8f0   : > { %9842 = vmatprep.subr.bf16.mxu0 %v9841_v3 }
 0x8f3   : > { %9844 = vmatpush3.bf16.msra.mxu0 %v9843_v62  ;;  %v6724_v62 = vld [vmem:[%s16708_s5 + $0x8c8] sm:$0xff] }
 0x8f4   : > { %9846 = vmatprep.subr.bf16.mxu0 %v9845_v18  ;;  %v9905_v4 = vpack.c.bf16 %v6724_v62, %v6723_v43  ;;  %v6804_v43 = vld [vmem:[%s16708_s5 + $0xb48] sm:$0xff] }
 0x8f7   : > { %9848 = vmatpush3.bf16.msra.mxu0 %v9847_v13 }
 0x8f8   : > { %9850 = vmatprep.subr.bf16.mxu0 %v9849_v16  ;;  %v9903_v16 = vpack.c.bf16 %v6706_v7, %v6705_v27  ;;  %v9999_v27 = vpack.c.bf16 %v6802_v54, %v6801_v5  ;;  %v6729_v7 = vld [vmem:[%s16708_s5 + $0x8f0] sm:$0xff]  ;;  %v10013_v54 = vpack.c.bf16 %v6826_v35, %v6825_v22  ;;  %v6882_v22 = vld [vmem:[%s16708_s5 + $0xdb8] sm:$0xff] }
 0x8fb   : > { %9852 = vmatpush3.bf16.msra.mxu0 %v9851_v41  ;;  %v6707_v41 = vld [vmem:[%s16708_s5 + $0x840] sm:$0xff] }
 0x8fc   : > { %9854 = vmatprep.subr.bf16.mxu0 %v9853_v37  ;;  %v6708_v37 = vld [vmem:[%s16708_s5 + $0x848] sm:$0xff] }
 0x8ff   : > { %9856 = vmatpush3.bf16.msra.mxu0 %v9855_v10  ;;  %v6726_v10 = vld [vmem:[%s16708_s5 + $0x8d8] sm:$0xff] }
 0x900   : > { %9890 = vmatprep.subr.bf16.mxu0 %v9889_v1  ;;  %v9993_v1 = vpack.c.bf16 %v6816_v40, %v6815_v55  ;;  %v9909_v33 = vpack.c.bf16 %v6726_v10, %v6725_v11  ;;  %v6780_v55 = vld [vmem:[%s16708_s5 + $0xa88] sm:$0xff]  ;;  %v6763_v11 = vld [vmem:[%s16708_s5 + $0xa00] sm:$0xff] }
 0x901   : > { %v6764_v10 = vld [vmem:[%s16708_s5 + $0xa08] sm:$0xff] }
 0x902   : > { %7441 = vmatmul.mubr.f32.vlgmr.msra.gmra.mrb[40].mxu0 %v6331_v57 }
 0x903   : > { %9892 = vmatpush3.bf16.msra.mxu0 %v9891_v19  ;;  %v9907_v19 = vpack.c.bf16 %v6708_v37, %v6707_v41  ;;  %v9919_v37 = vpack.c.bf16 %v6714_v63, %v6713_v50  ;;  %v6787_v63 = vld [vmem:[%s16708_s5 + $0xac0] sm:$0xff] }
 0x904   : > { %9894 = vmatprep.subr.bf16.mxu0 %v9893_v51  ;;  %v6710_v51 = vld [vmem:[%s16708_s5 + $0x858] sm:$0xff] }
 0x906   : > { %v10571_v44 = vpop.permute.xlu0 %10570 }
 0x907   : > { %9896 = vmatpush3.bf16.msra.mxu0 %v9895_v61  ;;  %v10573_v31 = vunpack.i.h.bf16 %v10571_v44  ;;  %v10572_v59 = vunpack.i.l.bf16 %v10571_v44  ;;  %v15935_v2 = vpop.permute.xlu1 %10565  ;;  %v6728_v61 = vld [vmem:[%s16708_s5 + $0x8e8] sm:$0xff] }
 0x908   : > { %9898 = vmatprep.subr.bf16.mxu0 %v9897_v47  ;;  %v10567_v3 = vunpack.i.l.bf16 %v15935_v2  ;;  %v9911_v47 = vpack.c.bf16 %v6710_v51, %v6709_v34  ;;  %v6782_v34 = vld [vmem:[%s16708_s5 + $0xa98] sm:$0xff]  ;;  %v9955_v51 = vpack.c.bf16 %v6764_v10, %v6763_v11  ;;  %v6771_v10 = vld [vmem:[%s16708_s5 + $0xa40] sm:$0xff] }
 0x909   : > { %v6384_v18 = vsel %vm5667_vm3, %v6352_v60, %v10572_v59  ;;  %v6383_v8 = vsel %vm5667_vm3, %v6346_v29, %v10573_v31  ;;  %v9913_v31 = vpack.c.bf16 %v6728_v61, %v6727_v52  ;;  %v6711_v59 = vld [vmem:[%s16708_s5 + $0x860] sm:$0xff]  ;;  %v6712_v60 = vld [vmem:[%s16708_s5 + $0x868] sm:$0xff] }
 0x90a   : > { %7650 = vmatprep.mubr.f32.mxu1 %v6384_v18  ;;  %v6382_v13 = vsel %vm5667_vm3, %v6340_v58, %v10567_v3  ;;  %v6730_v3 = vld [vmem:[%s16708_s5 + $0x8f8] sm:$0xff]  ;;  %v9915_v62 = vpack.c.bf16 %v6712_v60, %v6711_v59  ;;  %v6821_v18 = vld [vmem:[%s16708_s5 + $0xbd0] sm:$0xff]  ;;  %v16075_v41 = vpop.permute.xlu0 %10580 }
 0x90b   : > { %9900 = vmatpush3.bf16.msra.mxu0 %v9899_v56  ;;  %v10576_v36 = vpop.permute.xlu1 %10575  ;;  %7580 = vmatprep.mubr.f32.mxu0 %v6382_v13  ;;  %v6819_v56 = vld [vmem:[%s16708_s5 + $0xbc0] sm:$0xff]  ;;  %v6785_v60 = vld [vmem:[%s16708_s5 + $0xab0] sm:$0xff] }
 0x90c   : > { %7651 = vmatmul.mubr.f32.vlgmr.msra.gmra.mrb[22].mxu1 %v6383_v8  ;;  %v10578_v9 = vunpack.i.h.bf16 %v10576_v36  ;;  %v10577_v0 = vunpack.i.l.bf16 %v10576_v36  ;;  %9902 = vmatprep.subr.bf16.mxu0 %v9901_v30  ;;  %v6803_v30 = vld [vmem:[%s16708_s5 + $0xb40] sm:$0xff]  ;;  %v6822_v8 = vld [vmem:[%s16708_s5 + $0xbd8] sm:$0xff]  ;;  %v6805_v36 = vld [vmem:[%s16708_s5 + $0xb50] sm:$0xff] }
 0x90d   : > { %9988 = vmatpush3.bf16.msra.mxu1 %v9987_v42  ;;  %v10001_v42 = vpack.c.bf16 %v6820_v48, %v6819_v56  ;;  %v10003_v13 = vpack.c.bf16 %v6804_v43, %v6803_v30  ;;  %v10005_v40 = vpack.c.bf16 %v6822_v8, %v6821_v18  ;;  %v6767_v48 = vld [vmem:[%s16708_s5 + $0xa20] sm:$0xff]  ;;  %v6877_v30 = vld [vmem:[%s16708_s5 + $0xd90] sm:$0xff]  ;;  %v6878_v43 = vld [vmem:[%s16708_s5 + $0xd98] sm:$0xff] }
 0x90e   : > { %9990 = vmatprep.subr.bf16.mxu1 %v9989_v14  ;;  %v6218_v6 = vmax.f32 %v6138_v23, %v10578_v9  ;;  %v6178_v17 = vmax.f32 %v6137_v15, %v10577_v0  ;;  %v6375_v23 = vrot.slane %v15271_v21, 6  ;;  %v9917_v14 = vpack.c.bf16 %v6730_v3, %v6729_v7  ;;  %v6823_v9 = vld [vmem:[%s16708_s5 + $0xbe0] sm:$0xff]  ;;  %v6824_v0 = vld [vmem:[%s16708_s5 + $0xbe8] sm:$0xff]  ;;  %v6769_v8 = vld [vmem:[%s16708_s5 + $0xa30] sm:$0xff] }
 0x90f   : > { %9904 = vmatpush3.bf16.msra.mxu0 %v9903_v16  ;;  %v16002_v57 = vpop.permute.xlu1 %10585  ;;  %v6779_v16 = vld [vmem:[%s16708_s5 + $0xa80] sm:$0xff]  ;;  %v6860_v3 = vld [vmem:[%s16708_s5 + $0xd08] sm:$0xff] }
 0x910   : > { %9906 = vmatprep.subr.bf16.mxu0 %v9905_v4  ;;  %v16004_v26 = vmax.f32 %v6178_v17, %v6218_v6  ;;  %v10587_v15 = vunpack.i.l.bf16 %v16002_v57  ;;  %v6806_v4 = vld [vmem:[%s16708_s5 + $0xb58] sm:$0xff]  ;;  %v10582_v6 = vunpack.i.l.bf16 %v16075_v41  ;;  %v10009_v17 = vpack.c.bf16 %v6824_v0, %v6823_v9  ;;  %v6859_v7 = vld [vmem:[%s16708_s5 + $0xd00] sm:$0xff]  ;;  %v6880_v0 = vld [vmem:[%s16708_s5 + $0xda8] sm:$0xff] }
 0x911   : > { %9992 = vmatpush3.bf16.msra.mxu1 %v9991_v25  ;;  %v9953_v25 = vpack.c.bf16 %v6780_v55, %v6779_v16  ;;  %v10007_v45 = vpack.c.bf16 %v6806_v4, %v6805_v36  ;;  %v10051_v50 = vpack.c.bf16 %v6860_v3, %v6859_v7  ;;  %v6406_v16 = vrot.slane %v15355_v32, 6  ;;  %v6862_v36 = vld [vmem:[%s16708_s5 + $0xd18] sm:$0xff]  ;;  %v6879_v9 = vld [vmem:[%s16708_s5 + $0xda0] sm:$0xff] }
 0x912   : > { %9994 = vmatprep.subr.bf16.mxu1 %v9993_v1  ;;  %v6388_v20 = vsel %vm5667_vm3, %v6375_v23, %v10587_v15  ;;  %v6425_v53 = vrot.slane %v16004_v26, 5  ;;  %v6431_v49 = vrot.slane %v16004_v26, 7  ;;  %v6413_v44 = vrot.slane %v16004_v26, 1  ;;  %v6765_v23 = vld [vmem:[%s16708_s5 + $0xa10] sm:$0xff]  ;;  %v6886_v7 = vld [vmem:[%s16708_s5 + $0xdd8] sm:$0xff] }
 0x913   : > { %9908 = vmatpush3.bf16.msra.mxu0 %v9907_v19  ;;  %7790 = vmatprep.mubr.f32.mxu1 %v6388_v20  ;;  %v6419_v12 = vrot.slane %v16004_v26, 3  ;;  %v10568_v1 = vunpack.i.h.bf16 %v15935_v2  ;;  %v6807_v19 = vld [vmem:[%s16708_s5 + $0xb60] sm:$0xff]  ;;  %v6808_v2 = vld [vmem:[%s16708_s5 + $0xb68] sm:$0xff]  ;;  %v9957_v15 = vpack.c.bf16 %v6782_v34, %v6781_v24  ;;  %v6809_v20 = vld [vmem:[%s16708_s5 + $0xb70] sm:$0xff]  ;;  %v10053_v55 = vpack.c.bf16 %v6878_v43, %v6877_v30 }
 0x914   : > { %9910 = vmatprep.subr.bf16.mxu0 %v9909_v33  ;;  %v10604_v29 = vpack.i.bf16 %v6425_v53, %v6431_v49  ;;  %v6363_v33 = vrot.slane %v15271_v21, 2  ;;  %v10011_v61 = vpack.c.bf16 %v6808_v2, %v6807_v19  ;;  %v6875_v49 = vld [vmem:[%s16708_s5 + $0xd80] sm:$0xff]  ;;  %v6789_v24 = vld [vmem:[%s16708_s5 + $0xad0] sm:$0xff]  ;;  %v6790_v34 = vld [vmem:[%s16708_s5 + $0xad8] sm:$0xff] }
 0x915   : > { %9996 = vmatpush3.bf16.msra.mxu1 %v9995_v39  ;;  %v10599_v58 = vpack.i.bf16 %v6413_v44, %v6419_v12  ;;  %v6766_v39 = vld [vmem:[%s16708_s5 + $0xa18] sm:$0xff]  ;;  %v6381_v52 = vsel %vm5667_vm3, %v15228_v38, %v10568_v1  ;;  %v6876_v44 = vld [vmem:[%s16708_s5 + $0xd88] sm:$0xff]  ;;  %v9973_v35 = vpack.c.bf16 %v6790_v34, %v6789_v24  ;;  %v6843_v43 = vld [vmem:[%s16708_s5 + $0xc80] sm:$0xff]  ;;  %v6394_v24 = vrot.slane %v15355_v32, 2 }
 0x916   : > { %9998 = vmatprep.subr.bf16.mxu1 %v9997_v46  ;;  %10605 = vrot.lane.b32.xlu1 %v10604_v29, %s10691_s0  ;;  %v6784_v46 = vld [vmem:[%s16708_s5 + $0xaa8] sm:$0xff]  ;;  %v6386_v5 = vsel %vm5667_vm3, %v6363_v33, %v10582_v6  ;;  %v6810_v38 = vld [vmem:[%s16708_s5 + $0xb78] sm:$0xff]  ;;  %v9959_v53 = vpack.c.bf16 %v6766_v39, %v6765_v23  ;;  %v10057_v6 = vpack.c.bf16 %v6880_v0, %v6879_v9  ;;  %v6773_v33 = vld [vmem:[%s16708_s5 + $0xa50] sm:$0xff] }
 0x917   : > { %9912 = vmatpush3.bf16.msra.mxu0 %v9911_v47  ;;  %10600 = vrot.lane.b32.xlu0 %v10599_v58, %s10691_s0  ;;  %v6783_v47 = vld [vmem:[%s16708_s5 + $0xaa0] sm:$0xff]  ;;  %v6768_v12 = vld [vmem:[%s16708_s5 + $0xa28] sm:$0xff]  ;;  %v10015_v59 = vpack.c.bf16 %v6810_v38, %v6809_v20  ;;  %v6786_v29 = vld [vmem:[%s16708_s5 + $0xab8] sm:$0xff]  ;;  %v10588_v58 = vunpack.i.h.bf16 %v16002_v57 }
 0x918   : > { %9914 = vmatprep.subr.bf16.mxu0 %v9913_v31  ;;  %v9961_v56 = vpack.c.bf16 %v6784_v46, %v6783_v47  ;;  %v16143_v31 = vpop.permute.xlu1 %10595  ;;  %v9965_v18 = vpack.c.bf16 %v6786_v29, %v6785_v60  ;;  %v6770_v57 = vld [vmem:[%s16708_s5 + $0xa38] sm:$0xff]  ;;  %v6772_v1 = vld [vmem:[%s16708_s5 + $0xa48] sm:$0xff]  ;;  %v6791_v39 = vld [vmem:[%s16708_s5 + $0xae0] sm:$0xff] }
 0x919   : > { %10000 = vmatpush3.bf16.msra.mxu1 %v9999_v27  ;;  %v10049_v27 = vpack.c.bf16 %v6876_v44, %v6875_v49  ;;  %v6864_v19 = vld [vmem:[%s16708_s5 + $0xd28] sm:$0xff]  ;;  %v9971_v2 = vpack.c.bf16 %v6772_v1, %v6771_v10  ;;  %v6865_v47 = vld [vmem:[%s16708_s5 + $0xd30] sm:$0xff]  ;;  %v6866_v46 = vld [vmem:[%s16708_s5 + $0xd38] sm:$0xff] }
 0x91a   : > { %10002 = vmatprep.subr.bf16.mxu1 %v10001_v42  ;;  %v9963_v42 = vpack.c.bf16 %v6768_v12, %v6767_v48  ;;  %v6884_v20 = vld [vmem:[%s16708_s5 + $0xdc8] sm:$0xff]  ;;  %v10063_v44 = vpack.c.bf16 %v6866_v46, %v6865_v47  ;;  %v6794_v48 = vld [vmem:[%s16708_s5 + $0xaf8] sm:$0xff]  ;;  %v6889_v1 = vld [vmem:[%s16708_s5 + $0xdf0] sm:$0xff] }
 0x91b   : > { %9916 = vmatpush3.bf16.msra.mxu0 %v9915_v62  ;;  %v10597_v62 = vunpack.i.l.bf16 %v16143_v31  ;;  %v6776_v49 = vld [vmem:[%s16708_s5 + $0xa68] sm:$0xff]  ;;  %v6846_v9 = vld [vmem:[%s16708_s5 + $0xc98] sm:$0xff]  ;;  %v6831_v47 = vld [vmem:[%s16708_s5 + $0xc20] sm:$0xff] }
 0x91c   : > { %9918 = vmatprep.subr.bf16.mxu0 %v9917_v14  ;;  %v6369_v14 = vrot.slane %v15271_v21, 4  ;;  %v6868_v60 = vld [vmem:[%s16708_s5 + $0xd48] sm:$0xff] }
 0x91d   : > { %10004 = vmatpush3.bf16.msra.mxu1 %v10003_v13  ;;  %v6788_v13 = vld [vmem:[%s16708_s5 + $0xac8] sm:$0xff] }
 0x91e   : > { %10006 = vmatprep.subr.bf16.mxu1 %v10005_v40  ;;  %v6861_v40 = vld [vmem:[%s16708_s5 + $0xd10] sm:$0xff]  ;;  %v6387_v4 = vsel %vm5667_vm3, %v6369_v14, %v10588_v58  ;;  %v9969_v11 = vpack.c.bf16 %v6788_v13, %v6787_v63  ;;  %v16283_v14 = vpop.permute.xlu0 %10590  ;;  %v6887_v63 = vld [vmem:[%s16708_s5 + $0xde0] sm:$0xff]  ;;  %v6888_v13 = vld [vmem:[%s16708_s5 + $0xde8] sm:$0xff] }
 0x91f   : > { %9920 = vmatpush3.bf16.msra.mxu0 %v9919_v37  ;;  %v9967_v37 = vpack.c.bf16 %v6770_v57, %v6769_v8  ;;  %v6777_v58 = vld [vmem:[%s16708_s5 + $0xa70] sm:$0xff]  ;;  %v6870_v57 = vld [vmem:[%s16708_s5 + $0xd58] sm:$0xff]  ;;  %v10592_v0 = vunpack.i.l.bf16 %v16283_v14  ;;  %v6832_v46 = vld [vmem:[%s16708_s5 + $0xc28] sm:$0xff] }
 0x920   : > { %9954 = vmatprep.subr.bf16.mxu0 %v9953_v25  ;;  %v6438_v25 = vsel %vm5667_vm3, %v6406_v16, %v10597_v62  ;;  %v6844_v62 = vld [vmem:[%s16708_s5 + $0xc88] sm:$0xff]  ;;  %v6869_v8 = vld [vmem:[%s16708_s5 + $0xd50] sm:$0xff] }
 0x921   : > { %10008 = vmatpush3.bf16.msra.mxu1 %v10007_v45  ;;  %v10055_v45 = vpack.c.bf16 %v6862_v36, %v6861_v40  ;;  %v10017_v16 = vpack.c.bf16 %v6844_v62, %v6843_v43  ;;  %v6828_v40 = vld [vmem:[%s16708_s5 + $0xc08] sm:$0xff]  ;;  %v10583_v36 = vunpack.i.h.bf16 %v16075_v41 }
 0x922   : > { %7581 = vmatmul.mubr.f32.vlgmr.msra.gmra.mrb[42].mxu0 %v6381_v52  ;;  %10010 = vmatprep.subr.bf16.mxu1 %v10009_v17  ;;  %v6863_v17 = vld [vmem:[%s16708_s5 + $0xd20] sm:$0xff]  ;;  %v6792_v52 = vld [vmem:[%s16708_s5 + $0xae8] sm:$0xff] }
 0x923   : > { %9956 = vmatpush3.bf16.msra.mxu0 %v9955_v51  ;;  %7720 = vmatprep.mubr.f32.mxu0 %v6386_v5  ;;  %v6881_v51 = vld [vmem:[%s16708_s5 + $0xdb0] sm:$0xff]  ;;  %v10059_v23 = vpack.c.bf16 %v6864_v19, %v6863_v17  ;;  %v9977_v38 = vpack.c.bf16 %v6792_v52, %v6791_v39  ;;  %v6872_v41 = vld [vmem:[%s16708_s5 + $0xd68] sm:$0xff]  ;;  %v6830_v17 = vld [vmem:[%s16708_s5 + $0xc18] sm:$0xff]  ;;  %v6385_v19 = vsel %vm5667_vm3, %v15271_v21, %v10583_v36 }
 0x924   : > { %9958 = vmatprep.subr.bf16.mxu0 %v9957_v15  ;;  %v6774_v15 = vld [vmem:[%s16708_s5 + $0xa58] sm:$0xff]  ;;  %v6939_v39 = vld [vmem:[%s16708_s5 + $0xf80] sm:$0xff]  ;;  %v6940_v52 = vld [vmem:[%s16708_s5 + $0xf88] sm:$0xff] }
 0x925   : > { %10012 = vmatpush3.bf16.msra.mxu1 %v10011_v61  ;;  %v10061_v61 = vpack.c.bf16 %v6882_v22, %v6881_v51  ;;  %v9975_v5 = vpack.c.bf16 %v6774_v15, %v6773_v33  ;;  %v6847_v51 = vld [vmem:[%s16708_s5 + $0xca0] sm:$0xff]  ;;  %v6848_v22 = vld [vmem:[%s16708_s5 + $0xca8] sm:$0xff]  ;;  %v6873_v15 = vld [vmem:[%s16708_s5 + $0xd70] sm:$0xff] }
 0x926   : > { %10014 = vmatprep.subr.bf16.mxu1 %v10013_v54  ;;  %v6883_v54 = vld [vmem:[%s16708_s5 + $0xdc0] sm:$0xff]  ;;  %v6874_v21 = vld [vmem:[%s16708_s5 + $0xd78] sm:$0xff] }
 0x927   : > { %9960 = vmatpush3.bf16.msra.mxu0 %v9959_v53  ;;  %v6775_v53 = vld [vmem:[%s16708_s5 + $0xa60] sm:$0xff]  ;;  %v10065_v12 = vpack.c.bf16 %v6884_v20, %v6883_v54  ;;  %v6849_v54 = vld [vmem:[%s16708_s5 + $0xcb0] sm:$0xff]  ;;  %v6850_v20 = vld [vmem:[%s16708_s5 + $0xcb8] sm:$0xff] }
 0x928   : > { %9962 = vmatprep.subr.bf16.mxu0 %v9961_v56  ;;  %v6793_v56 = vld [vmem:[%s16708_s5 + $0xaf0] sm:$0xff]  ;;  %v9979_v29 = vpack.c.bf16 %v6776_v49, %v6775_v53  ;;  %v6923_v53 = vld [vmem:[%s16708_s5 + $0xf00] sm:$0xff]  ;;  %v6924_v49 = vld [vmem:[%s16708_s5 + $0xf08] sm:$0xff] }
 0x929   : > { %10016 = vmatpush3.bf16.msra.mxu1 %v10015_v59  ;;  %v6867_v59 = vld [vmem:[%s16708_s5 + $0xd40] sm:$0xff]  ;;  %v9981_v3 = vpack.c.bf16 %v6794_v48, %v6793_v56  ;;  %v10027_v56 = vpack.c.bf16 %v6832_v46, %v6831_v47  ;;  %v6941_v48 = vld [vmem:[%s16708_s5 + $0xf90] sm:$0xff]  ;;  %v6932_v47 = vld [vmem:[%s16708_s5 + $0xf48] sm:$0xff] }
 0x92a   : > { %10050 = vmatprep.subr.bf16.mxu1 %v10049_v27  ;;  %v6885_v27 = vld [vmem:[%s16708_s5 + $0xdd0] sm:$0xff]  ;;  %v10067_v30 = vpack.c.bf16 %v6868_v60, %v6867_v59  ;;  %v10029_v59 = vpack.c.bf16 %v6850_v20, %v6849_v54  ;;  %v6927_v36 = vld [vmem:[%s16708_s5 + $0xf20] sm:$0xff]  ;;  %v6950_v20 = vld [vmem:[%s16708_s5 + $0xfd8] sm:$0xff] }
 0x92b   : > { %9964 = vmatpush3.bf16.msra.mxu0 %v9963_v42  ;;  %v6778_v42 = vld [vmem:[%s16708_s5 + $0xa78] sm:$0xff]  ;;  %v6833_v60 = vld [vmem:[%s16708_s5 + $0xc30] sm:$0xff] }
 0x92c   : > { %7791 = vmatmul.mubr.f32.vlgmr.msra.gmra.mrb[24].mxu1 %v6387_v4  ;;  %9966 = vmatprep.subr.bf16.mxu0 %v9965_v18  ;;  %v10069_v18 = vpack.c.bf16 %v6886_v7, %v6885_v27  ;;  %v10071_v4 = vpack.c.bf16 %v6870_v57, %v6869_v8  ;;  %v6851_v27 = vld [vmem:[%s16708_s5 + $0xcc0] sm:$0xff]  ;;  %v6852_v7 = vld [vmem:[%s16708_s5 + $0xcc8] sm:$0xff]  ;;  %v6949_v54 = vld [vmem:[%s16708_s5 + $0xfd0] sm:$0xff] }
 0x92d   : > { %10052 = vmatpush3.bf16.msra.mxu1 %v10051_v50  ;;  %7930 = vmatprep.mubr.f32.mxu1 %v6438_v25  ;;  %v9983_v50 = vpack.c.bf16 %v6778_v42, %v6777_v58  ;;  %v10073_v25 = vpack.c.bf16 %v6888_v13, %v6887_v63  ;;  %v6925_v42 = vld [vmem:[%s16708_s5 + $0xf10] sm:$0xff]  ;;  %v6944_v8 = vld [vmem:[%s16708_s5 + $0xfa8] sm:$0xff]  ;;  %v10033_v57 = vpack.c.bf16 %v6852_v7, %v6851_v27 }
 0x92e   : > { %10054 = vmatprep.subr.bf16.mxu1 %v10053_v55  ;;  %v6827_v55 = vld [vmem:[%s16708_s5 + $0xc00] sm:$0xff]  ;;  %v6836_v63 = vld [vmem:[%s16708_s5 + $0xc48] sm:$0xff]  ;;  %v6853_v13 = vld [vmem:[%s16708_s5 + $0xcd0] sm:$0xff] }
 0x92f   : > { %9968 = vmatpush3.bf16.msra.mxu0 %v9967_v37  ;;  %v6845_v37 = vld [vmem:[%s16708_s5 + $0xc90] sm:$0xff]  ;;  %v10019_v10 = vpack.c.bf16 %v6828_v40, %v6827_v55  ;;  %v6952_v27 = vld [vmem:[%s16708_s5 + $0xfe8] sm:$0xff] }
 0x930   : > { %9970 = vmatprep.subr.bf16.mxu0 %v9969_v11  ;;  %v6871_v11 = vld [vmem:[%s16708_s5 + $0xd60] sm:$0xff]  ;;  %v10021_v34 = vpack.c.bf16 %v6846_v9, %v6845_v37  ;;  %v6945_v9 = vld [vmem:[%s16708_s5 + $0xfb0] sm:$0xff] }
 0x931   : > { %10056 = vmatpush3.bf16.msra.mxu1 %v10055_v45  ;;  %v6890_v45 = vld [vmem:[%s16708_s5 + $0xdf8] sm:$0xff] }
 0x932   : > { %10058 = vmatprep.subr.bf16.mxu1 %v10057_v6  ;;  %v6829_v6 = vld [vmem:[%s16708_s5 + $0xc10] sm:$0xff]  ;;  %v10077_v33 = vpack.c.bf16 %v6890_v45, %v6889_v1  ;;  %v6856_v1 = vld [vmem:[%s16708_s5 + $0xce8] sm:$0xff] }
 0x933   : > { %9972 = vmatpush3.bf16.msra.mxu0 %v9971_v2  ;;  %v10075_v2 = vpack.c.bf16 %v6872_v41, %v6871_v11  ;;  %v6837_v11 = vld [vmem:[%s16708_s5 + $0xc50] sm:$0xff]  ;;  %v6838_v41 = vld [vmem:[%s16708_s5 + $0xc58] sm:$0xff] }
 0x934   : > { %9974 = vmatprep.subr.bf16.mxu0 %v9973_v35  ;;  %v6436_v35 = vsel %vm5667_vm3, %v6394_v24, %v10592_v0  ;;  %v6946_v0 = vld [vmem:[%s16708_s5 + $0xfb8] sm:$0xff] }
 0x935   : > { %10060 = vmatpush3.bf16.msra.mxu1 %v10059_v23  ;;  %v10023_v23 = vpack.c.bf16 %v6830_v17, %v6829_v6  ;;  %v10125_v24 = vpack.c.bf16 %v6946_v0, %v6945_v9  ;;  %v6930_v6 = vld [vmem:[%s16708_s5 + $0xf38] sm:$0xff]  ;;  %v10039_v17 = vpack.c.bf16 %v6838_v41, %v6837_v11  ;;  %v6911_v9 = vld [vmem:[%s16708_s5 + $0xea0] sm:$0xff]  ;;  %v6912_v0 = vld [vmem:[%s16708_s5 + $0xea8] sm:$0xff] }
 0x936   : > { %10062 = vmatprep.subr.bf16.mxu1 %v10061_v61  ;;  %v10025_v61 = vpack.c.bf16 %v6848_v22, %v6847_v51  ;;  %v6839_v22 = vld [vmem:[%s16708_s5 + $0xc60] sm:$0xff]  ;;  %v6937_v41 = vld [vmem:[%s16708_s5 + $0xf70] sm:$0xff] }
 0x937   : > { %9976 = vmatpush3.bf16.msra.mxu0 %v9975_v5  ;;  %v10079_v5 = vpack.c.bf16 %v6874_v21, %v6873_v15  ;;  %v6857_v15 = vld [vmem:[%s16708_s5 + $0xcf0] sm:$0xff]  ;;  %v6858_v21 = vld [vmem:[%s16708_s5 + $0xcf8] sm:$0xff] }
 0x938   : > { %9978 = vmatprep.subr.bf16.mxu0 %v9977_v38  ;;  %v10113_v38 = vpack.c.bf16 %v6940_v52, %v6939_v39 }
 0x939   : > { %10064 = vmatpush3.bf16.msra.mxu1 %v10063_v44  ;;  %v10598_v44 = vunpack.i.h.bf16 %v16143_v31  ;;  %v6834_v31 = vld [vmem:[%s16708_s5 + $0xc38] sm:$0xff] }
 0x93a   : > { %10066 = vmatprep.subr.bf16.mxu1 %v10065_v12  ;;  %v6942_v12 = vld [vmem:[%s16708_s5 + $0xf98] sm:$0xff]  ;;  %v10031_v62 = vpack.c.bf16 %v6834_v31, %v6833_v60 }
 0x93b   : > { %9980 = vmatpush3.bf16.msra.mxu0 %v9979_v29  ;;  %v6400_v29 = vrot.slane %v15355_v32, 4  ;;  %v10117_v58 = vpack.c.bf16 %v6942_v12, %v6941_v48  ;;  %v10133_v12 = vpack.c.bf16 %v6950_v20, %v6949_v54  ;;  %v6934_v60 = vld [vmem:[%s16708_s5 + $0xf58] sm:$0xff]  ;;  %v6901_v54 = vld [vmem:[%s16708_s5 + $0xe50] sm:$0xff] }
 0x93c   : > { %9982 = vmatprep.subr.bf16.mxu0 %v9981_v3  ;;  %v10115_v3 = vpack.c.bf16 %v6924_v49, %v6923_v53  ;;  %v6841_v53 = vld [vmem:[%s16708_s5 + $0xc70] sm:$0xff]  ;;  %v6842_v49 = vld [vmem:[%s16708_s5 + $0xc78] sm:$0xff] }
 0x93d   : > { %10068 = vmatpush3.bf16.msra.mxu1 %v10067_v30  ;;  %v6926_v30 = vld [vmem:[%s16708_s5 + $0xf18] sm:$0xff]  ;;  %v6437_v43 = vsel %vm5667_vm3, %v6400_v29, %v10598_v44  ;;  %v6907_v44 = vld [vmem:[%s16708_s5 + $0xe80] sm:$0xff]  ;;  %v10047_v31 = vpack.c.bf16 %v6842_v49, %v6841_v53  ;;  %v6920_v53 = vld [vmem:[%s16708_s5 + $0xee8] sm:$0xff] }
 0x93e   : > { %10070 = vmatprep.subr.bf16.mxu1 %v10069_v18  ;;  %v6943_v18 = vld [vmem:[%s16708_s5 + $0xfa0] sm:$0xff]  ;;  %v10119_v55 = vpack.c.bf16 %v6926_v30, %v6925_v42  ;;  %v6892_v42 = vld [vmem:[%s16708_s5 + $0xe08] sm:$0xff]  ;;  %v10593_v30 = vunpack.i.h.bf16 %v16283_v14  ;;  %v6902_v20 = vld [vmem:[%s16708_s5 + $0xe58] sm:$0xff] }
 0x93f   : > { %9984 = vmatpush3.bf16.msra.mxu0 %v9983_v50  ;;  %v6835_v50 = vld [vmem:[%s16708_s5 + $0xc40] sm:$0xff]  ;;  %v10121_v40 = vpack.c.bf16 %v6944_v8, %v6943_v18  ;;  %v6910_v18 = vld [vmem:[%s16708_s5 + $0xe98] sm:$0xff]  ;;  %v6936_v14 = vld [vmem:[%s16708_s5 + $0xf68] sm:$0xff]  ;;  %v10103_v49 = vpack.c.bf16 %v6902_v20, %v6901_v54 }
 0x940   : > { %10018 = vmatprep.subr.bf16.mxu0 %v10017_v16  ;;  %v6854_v16 = vld [vmem:[%s16708_s5 + $0xcd8] sm:$0xff]  ;;  %v10035_v37 = vpack.c.bf16 %v6836_v63, %v6835_v50  ;;  %v6951_v29 = vld [vmem:[%s16708_s5 + $0xfe0] sm:$0xff] }
 0x941   : > { %10072 = vmatpush3.bf16.msra.mxu1 %v10071_v4  ;;  %v6928_v4 = vld [vmem:[%s16708_s5 + $0xf28] sm:$0xff]  ;;  %v10137_v50 = vpack.c.bf16 %v6952_v27, %v6951_v29  ;;  %v6935_v63 = vld [vmem:[%s16708_s5 + $0xf60] sm:$0xff]  ;;  %v8080_v54 = vld [vmem:[%s16710_s7 + $0x18] sm:$0xff] }
 0x942   : > { %7721 = vmatmul.mubr.f32.vlgmr.msra.gmra.mrb[44].mxu0 %v6385_v19  ;;  %10074 = vmatprep.subr.bf16.mxu1 %v10073_v25  ;;  %v10037_v25 = vpack.c.bf16 %v6854_v16, %v6853_v13  ;;  %v10123_v45 = vpack.c.bf16 %v6928_v4, %v6927_v36  ;;  %v6947_v19 = vld [vmem:[%s16708_s5 + $0xfc0] sm:$0xff]  ;;  %v6953_v16 = vld [vmem:[%s16708_s5 + $0xff0] sm:$0xff]  ;;  %v6894_v4 = vld [vmem:[%s16708_s5 + $0xe18] sm:$0xff] }
 0x943   : > { %10020 = vmatpush3.bf16.msra.mxu0 %v10019_v10  ;;  %7860 = vmatprep.mubr.f32.mxu0 %v6436_v35  ;;  %v6855_v10 = vld [vmem:[%s16708_s5 + $0xce0] sm:$0xff]  ;;  %v6840_v35 = vld [vmem:[%s16708_s5 + $0xc68] sm:$0xff]  ;;  %v6893_v36 = vld [vmem:[%s16708_s5 + $0xe10] sm:$0xff] }
 0x944   : > { %10022 = vmatprep.subr.bf16.mxu0 %v10021_v34  ;;  %v6929_v34 = vld [vmem:[%s16708_s5 + $0xf30] sm:$0xff]  ;;  %v10041_v51 = vpack.c.bf16 %v6856_v1, %v6855_v10  ;;  %v10087_v10 = vpack.c.bf16 %v6894_v4, %v6893_v36  ;;  %v10089_v1 = vpack.c.bf16 %v6912_v0, %v6911_v9  ;;  %v6417_v4 = vrot.slane %v16004_v26, 2 }
 0x945   : > { %10076 = vmatpush3.bf16.msra.mxu1 %v10075_v2  ;;  %v6948_v2 = vld [vmem:[%s16708_s5 + $0xfc8] sm:$0xff] }
 0x946   : > { %10078 = vmatprep.subr.bf16.mxu1 %v10077_v33  ;;  %v10129_v52 = vpack.c.bf16 %v6948_v2, %v6947_v19 }
 0x947   : > { %10024 = vmatpush3.bf16.msra.mxu0 %v10023_v23  ;;  %v10127_v23 = vpack.c.bf16 %v6930_v6, %v6929_v34  ;;  %v6913_v34 = vld [vmem:[%s16708_s5 + $0xeb0] sm:$0xff]  ;;  %v6914_v6 = vld [vmem:[%s16708_s5 + $0xeb8] sm:$0xff] }
 0x948   : > { %10026 = vmatprep.subr.bf16.mxu0 %v10025_v61  ;;  %v6931_v61 = vld [vmem:[%s16708_s5 + $0xf40] sm:$0xff]  ;;  %v10093_v2 = vpack.c.bf16 %v6914_v6, %v6913_v34 }
 0x949   : > { %10080 = vmatpush3.bf16.msra.mxu1 %v10079_v5  ;;  %v10043_v5 = vpack.c.bf16 %v6840_v35, %v6839_v22  ;;  %v10131_v48 = vpack.c.bf16 %v6932_v47, %v6931_v61  ;;  %v6898_v22 = vld [vmem:[%s16708_s5 + $0xe38] sm:$0xff]  ;;  %v6915_v35 = vld [vmem:[%s16708_s5 + $0xec0] sm:$0xff] }
 0x94a   : > { %10114 = vmatprep.subr.bf16.mxu1 %v10113_v38  ;;  %v10045_v38 = vpack.c.bf16 %v6858_v21, %v6857_v15  ;;  %v6918_v61 = vld [vmem:[%s16708_s5 + $0xed8] sm:$0xff] }
 0x94b   : > { %10028 = vmatpush3.bf16.msra.mxu0 %v10027_v56  ;;  %v6908_v56 = vld [vmem:[%s16708_s5 + $0xe88] sm:$0xff] }
 0x94c   : > { %7931 = vmatmul.mubr.f32.vlgmr.msra.gmra.mrb[26].mxu1 %v6437_v43  ;;  %10030 = vmatprep.subr.bf16.mxu0 %v10029_v59  ;;  %v6933_v59 = vld [vmem:[%s16708_s5 + $0xf50] sm:$0xff] }
 0x94d   : > { %10116 = vmatpush3.bf16.msra.mxu1 %v10115_v3  ;;  %v10081_v3 = vpack.c.bf16 %v6908_v56, %v6907_v44  ;;  %v10135_v8 = vpack.c.bf16 %v6934_v60, %v6933_v59  ;;  %v6955_v44 = vld [vmem:[%s16709_s6] sm:$0x1]  ;;  %v6921_v60 = vld [vmem:[%s16708_s5 + $0xef0] sm:$0xff] }
 0x94e   : > { %10118 = vmatprep.subr.bf16.mxu1 %v10117_v58  ;;  %v6891_v58 = vld [vmem:[%s16708_s5 + $0xe00] sm:$0xff] }
 0x94f   : > { %10032 = vmatpush3.bf16.msra.mxu0 %v10031_v62  ;;  %v6909_v62 = vld [vmem:[%s16708_s5 + $0xe90] sm:$0xff]  ;;  %v10083_v13 = vpack.c.bf16 %v6892_v42, %v6891_v58 }
 0x950   : > { %10034 = vmatprep.subr.bf16.mxu0 %v10033_v57  ;;  %v6905_v42 = vld [vmem:[%s16708_s5 + $0xe70] sm:$0xff] }
 0x951   : > { %10120 = vmatpush3.bf16.msra.mxu1 %v10119_v55  ;;  %v6954_v55 = vld [vmem:[%s16708_s5 + $0xff8] sm:$0xff] }
 0x952   : > { %10122 = vmatprep.subr.bf16.mxu1 %v10121_v40  ;;  %v10085_v40 = vpack.c.bf16 %v6910_v18, %v6909_v62  ;;  %v10141_v11 = vpack.c.bf16 %v6954_v55, %v6953_v16  ;;  %v6429_v16 = vrot.slane %v16004_v26, 6  ;;  %v6423_v55 = vrot.slane %v16004_v26, 4 }
 0x953   : > { %10036 = vmatpush3.bf16.msra.mxu0 %v10035_v37  ;;  %v6435_v37 = vsel %vm5667_vm3, %v15355_v32, %v10593_v30  ;;  %v6938_v32 = vld [vmem:[%s16708_s5 + $0xf78] sm:$0xff] }
 0x954   : > { %10038 = vmatprep.subr.bf16.mxu0 %v10037_v25  ;;  %v10139_v25 = vpack.c.bf16 %v6936_v14, %v6935_v63  ;;  %v6906_v30 = vld [vmem:[%s16708_s5 + $0xe78] sm:$0xff] }
 0x955   : > { %v8889_v33 = vpop.f32.mrb[32].mxu0  ;;  %10124 = vmatpush3.bf16.msra.mxu1 %v10123_v45  ;;  %v6895_v45 = vld [vmem:[%s16708_s5 + $0xe20] sm:$0xff]  ;;  %v10111_v62 = vpack.c.bf16 %v6906_v30, %v6905_v42 }
 0x956   : > { %v8890_v39 = vpop.f32.mrb[33].mxu0  ;;  %10126 = vmatprep.subr.bf16.mxu1 %v10125_v24  ;;  %v6896_v24 = vld [vmem:[%s16708_s5 + $0xe28] sm:$0xff] }
 0x957   : > { %v16462_v46 = vadd.f32 %v8890_v39, %v8889_v33  ;;  %10040 = vmatpush3.bf16.msra.mxu0 %v10039_v17  ;;  %v10143_v17 = vpack.c.bf16 %v6938_v32, %v6937_v41  ;;  %v10091_v19 = vpack.c.bf16 %v6896_v24, %v6895_v45  ;;  %v6916_v33 = vld [vmem:[%s16708_s5 + $0xec8] sm:$0xff] }
 0x958   : > { %10042 = vmatprep.subr.bf16.mxu0 %v10041_v51  ;;  %v6897_v51 = vld [vmem:[%s16708_s5 + $0xe30] sm:$0xff]  ;;  %v10097_v21 = vpack.c.bf16 %v6916_v33, %v6915_v35  ;;  %v6900_v39 = vld [vmem:[%s16708_s5 + $0xe48] sm:$0xff] }
 0x959   : > { %10128 = vmatpush3.bf16.msra.mxu1 %v10127_v23  ;;  %v10095_v15 = vpack.c.bf16 %v6898_v22, %v6897_v51  ;;  %v6899_v23 = vld [vmem:[%s16708_s5 + $0xe40] sm:$0xff]  ;;  %v7023_v27 = vadd.f32 %v16462_v46, %v6955_v44 }
 0x95a   : > { %10130 = vmatprep.subr.bf16.mxu1 %v10129_v52  ;;  %v6917_v52 = vld [vmem:[%s16708_s5 + $0xed0] sm:$0xff]  ;;  %v10099_v47 = vpack.c.bf16 %v6900_v39, %v6899_v23 }
 0x95b   : > { %10044 = vmatpush3.bf16.msra.mxu0 %v10043_v5  ;;  %v10101_v5 = vpack.c.bf16 %v6918_v61, %v6917_v52  ;;  %v8078_v52 = vld [vmem:[%s16710_s7 + $0x8] sm:$0xff]  ;;  %v8079_v61 = vld [vmem:[%s16710_s7 + $0x10] sm:$0xff] }
 0x95c   : > { %v8994_v7 = vpop.f32.mrb[16].mxu1  ;;  %10046 = vmatprep.subr.bf16.mxu0 %v10045_v38  ;;  %v6919_v38 = vld [vmem:[%s16708_s5 + $0xee0] sm:$0xff]  ;;  %v10149_v20 = vpack.c.bf16 %v8080_v54, %v8079_v61 }
 0x95d   : > { %v8995_v43 = vpop.f32.mrb[17].mxu1  ;;  %10132 = vmatpush3.bf16.msra.mxu1 %v10131_v48  ;;  %v10105_v56 = vpack.c.bf16 %v6920_v53, %v6919_v38  ;;  %v6903_v48 = vld [vmem:[%s16708_s5 + $0xe60] sm:$0xff] }
 0x95e   : > { %v16507_v57 = vadd.f32 %v8995_v43, %v8994_v7  ;;  %10134 = vmatprep.subr.bf16.mxu1 %v10133_v12  ;;  %v6904_v12 = vld [vmem:[%s16708_s5 + $0xe68] sm:$0xff] }
 0x95f   : > { %10048 = vmatpush3.bf16.msra.mxu0 %v10047_v31  ;;  %v6922_v31 = vld [vmem:[%s16708_s5 + $0xef8] sm:$0xff] }
 0x960   : > { %10082 = vmatprep.subr.bf16.mxu0 %v10081_v3  ;;  %v10107_v3 = vpack.c.bf16 %v6904_v12, %v6903_v48  ;;  %v10109_v58 = vpack.c.bf16 %v6922_v31, %v6921_v60 }
 0x961   : > { %10136 = vmatpush3.bf16.msra.mxu1 %v10135_v8 }
 0x962   : > { %7861 = vmatmul.mubr.f32.vlgmr.msra.gmra.mrb[46].mxu0 %v6435_v37  ;;  %10138 = vmatprep.subr.bf16.mxu1 %v10137_v50 }
 0x963   : > { %10084 = vmatpush3.bf16.msra.mxu0 %v10083_v13 }
 0x964   : > { %10086 = vmatprep.subr.bf16.mxu0 %v10085_v40 }
 0x965   : > { %10140 = vmatpush3.bf16.msra.mxu1 %v10139_v25 }
 0x966   : > { %10142 = vmatprep.subr.bf16.mxu1 %v10141_v11 }
 0x967   : > { %10088 = vmatpush3.bf16.msra.mxu0 %v10087_v10 }
 0x968   : > { %10090 = vmatprep.subr.bf16.mxu0 %v10089_v1 }
 0x969   : > { %10144 = vmatpush3.bf16.msra.mxu1 %v10143_v17 }
 0x96b   : > { %10092 = vmatpush3.bf16.msra.mxu0 %v10091_v19 }
 0x96c   : > { %10094 = vmatprep.subr.bf16.mxu0 %v10093_v2 }
 0x96f   : > { %10096 = vmatpush3.bf16.msra.mxu0 %v10095_v15 }
 0x970   : > { %10098 = vmatprep.subr.bf16.mxu0 %v10097_v21 }
 0x973   : > { %10100 = vmatpush3.bf16.msra.mxu0 %v10099_v47  ;;  %v10693_v47 = vmov 0.0|0.0  }
 0x974   : > { %10102 = vmatprep.subr.bf16.mxu0 %v10101_v5 }
 0x975   : > { %v8924_v59 = vpop.f32.mrb[34].mxu0 }
 0x976   : > { %v8925_v29 = vpop.f32.mrb[35].mxu0 }
 0x977   : > { %v8926_v7 = vadd.f32 %v8925_v29, %v8924_v59  ;;  %10104 = vmatpush3.bf16.msra.mxu0 %v10103_v49 }
 0x978   : > { %10106 = vmatprep.subr.bf16.mxu0 %v10105_v56 }
 0x979   : > { %v7093_v43 = vadd.f32 %v8926_v7, %v7023_v27 }
 0x97b   : > { %10108 = vmatpush3.bf16.msra.mxu0 %v10107_v3 }
 0x97c   : > { %v9064_v18 = vpop.f32.mrb[18].mxu1  ;;  %10110 = vmatprep.subr.bf16.mxu0 %v10109_v58 }
 0x97d   : > { %v9065_v8 = vpop.f32.mrb[19].mxu1 }
 0x97e   : > { %v9066_v46 = vadd.f32 %v9065_v8, %v9064_v18 }
 0x97f   : > { %10112 = vmatpush3.bf16.msra.mxu0 %v10111_v62 }
 0x980   : > { %10145 = vmatprep.subr.bf16.mxu0 %v10693_v47 }
 0x988   : > { %v10606_v50 = vpop.permute.xlu1 %10605 }
 0x989   : > { %v10608_v63 = vunpack.i.h.bf16 %v10606_v50  ;;  %v10607_v14 = vunpack.i.l.bf16 %v10606_v50  ;;  %v10601_v13 = vpop.permute.xlu0 %10600 }
 0x98a   : > { %v10603_v40 = vunpack.i.h.bf16 %v10601_v13  ;;  %v10602_v36 = vunpack.i.l.bf16 %v10601_v13 }
 0x98b   : > { %v6442_v37 = vsel %vm5667_vm3, %v6429_v16, %v10607_v14  ;;  %v6441_v9 = vsel %vm5667_vm3, %v6423_v55, %v10608_v63 }
 0x98c   : > { %v6440_v0 = vsel %vm5667_vm3, %v6417_v4, %v10602_v36  ;;  %8070 = vmatprep.mubr.f32.mxu1 %v6442_v37  ;;  %v6439_v25 = vsel %vm5667_vm3, %v16004_v26, %v10603_v40  ;;  %v8156_v40 = vld [vmem:[%s16712_s9] sm:$0xff]  ;;  %v8157_v36 = vld [vmem:[%s16712_s9 + $0x8] sm:$0xff] }
 0x98d   : > { %8000 = vmatprep.mubr.f32.mxu0 %v6440_v0  ;;  %8071 = vmatmul.mubr.f32.vlgmr.msra.gmra.mrb[28].mxu1 %v6441_v9  ;;  %v10152_v37 = vpack.c.bf16 %v8157_v36, %v8156_v40  ;;  %v8158_v0 = vld [vmem:[%s16712_s9 + $0x10] sm:$0xff] }
 0x98e   : > { %8001 = vmatmul.mubr.f32.vlgmr.msra.gmra.mrb[48].mxu0 %v6439_v25  ;;  %v8159_v25 = vld [vmem:[%s16712_s9 + $0x18] sm:$0xff] }
 0x98f   : > { %9487 = vmatprep.mubr.msk.f32.mxu0 %vm10694_vm5, %v16879_v28 }
 0x995   : > { %v8959_v11 = vpop.f32.mrb[36].mxu0 }
 0x996   : > { %v8960_v41 = vpop.f32.mrb[37].mxu0 }
 0x997   : > { %v8961_v32 = vadd.f32 %v8960_v41, %v8959_v11  ;;  %v10155_v11 = vpack.c.bf16 %v8159_v25, %v8158_v0  ;;  %v8081_v41 = vld [vmem:[%s16711_s8] sm:$0x1] }
 0x999   : > { %v7163_v10 = vadd.f32 %v8961_v32, %v7093_v43 }
 0x99b   : > { %v7233_v1 = vadd.f32 %v16507_v57, %v7163_v10  ;;  %v8077_v57 = vld [vmem:[%s16710_s7] sm:$0xff] }
 0x99c   : > { %v9134_v45 = vpop.f32.mrb[20].mxu1  ;;  %v10146_v5 = vpack.c.bf16 %v8078_v52, %v8077_v57 }
 0x99d   : > { %v9135_v24 = vpop.f32.mrb[21].mxu1 }
 0x99e   : > { %v9136_v34 = vadd.f32 %v9135_v24, %v9134_v45  ;;  %10147 = vmatpush3.bf16.msra.mxu0 %v10146_v5 }
 0x99f   : > { %10148 = vmatprep.subr.bf16.mxu0 %v10693_v47 }
 0x9a2   : > { %10150 = vmatpush3.bf16.msra.mxu0 %v10149_v20 }
 0x9a3   : > { %10151 = vmatprep.subr.bf16.mxu0 %v10693_v47 }
 0x9b5   : > { %v9029_v6 = vpop.f32.mrb[38].mxu0 }
 0x9b6   : > { %v9030_v17 = vpop.f32.mrb[39].mxu0 }
 0x9b7   : > { %v9031_v19 = vadd.f32 %v9030_v17, %v9029_v6 }
 0x9b9   : > { %v7303_v2 = vadd.f32 %v9031_v19, %v7233_v1 }
 0x9bb   : > { %v7373_v51 = vadd.f32 %v9066_v46, %v7303_v2 }
 0x9d5   : > { %v9099_v22 = vpop.f32.mrb[40].mxu0 }
 0x9d6   : > { %v9100_v35 = vpop.f32.mrb[41].mxu0 }
 0x9d7   : > { %v9101_v26 = vadd.f32 %v9100_v35, %v9099_v22 }
 0x9d9   : > { %v7443_v33 = vadd.f32 %v9101_v26, %v7373_v51 }
 0x9db   : > { %v7513_v15 = vadd.f32 %v9136_v34, %v7443_v33 }
 0x9df   : > { %v9204_v21 = vpop.f32.mrb[22].mxu1 }
 0x9e0   : > { %v9205_v23 = vpop.f32.mrb[23].mxu1 }
 0x9e1   : > { %v9206_v39 = vadd.f32 %v9205_v23, %v9204_v21 }
 0x9f5   : > { %v9169_v38 = vpop.f32.mrb[42].mxu0 }
 0x9f6   : > { %v9170_v53 = vpop.f32.mrb[43].mxu0 }
 0x9f7   : > { %v9171_v49 = vadd.f32 %v9170_v53, %v9169_v38 }
 0x9f9   : > { %v7583_v44 = vadd.f32 %v9171_v49, %v7513_v15 }
 0x9fb   : > { %v7653_v56 = vadd.f32 %v9206_v39, %v7583_v44 }
 0x9ff   : > { %v9274_v48 = vpop.f32.mrb[24].mxu1 }
 0xa00   : > { %v9275_v12 = vpop.f32.mrb[25].mxu1 }
 0xa01   : > { %v9276_v59 = vadd.f32 %v9275_v12, %v9274_v48 }
 0xa15   : > { %v9239_v60 = vpop.f32.mrb[44].mxu0 }
 0xa16   : > { %v9240_v31 = vpop.f32.mrb[45].mxu0 }
 0xa17   : > { %v9241_v29 = vadd.f32 %v9240_v31, %v9239_v60 }
 0xa19   : > { %v7723_v27 = vadd.f32 %v9241_v29, %v7653_v56 }
 0xa1b   : > { %v7793_v7 = vadd.f32 %v9276_v59, %v7723_v27 }
 0xa1f   : > { %v9344_v3 = vpop.f32.mrb[26].mxu1 }
 0xa20   : > { %v9345_v58 = vpop.f32.mrb[27].mxu1 }
 0xa21   : > { %v9346_v42 = vadd.f32 %v9345_v58, %v9344_v3 }
 0xa35   : > { %v9309_v30 = vpop.f32.mrb[46].mxu0 }
 0xa36   : > { %v9310_v43 = vpop.f32.mrb[47].mxu0 }
 0xa37   : > { %v9311_v62 = vadd.f32 %v9310_v43, %v9309_v30 }
 0xa39   : > { %v7863_v18 = vadd.f32 %v9311_v62, %v7793_v7 }
 0xa3b   : > { %v7933_v8 = vadd.f32 %v9346_v42, %v7863_v18 }
 0xa60   : > { %v9414_v46 = vpop.f32.mrb[28].mxu1 }
 0xa61   : > { %v9379_v50 = vpop.f32.mrb[48].mxu0  ;;  %v9415_v63 = vpop.f32.mrb[29].mxu1 }
 0xa62   : > { %v9380_v14 = vpop.f32.mrb[49].mxu0  ;;  %v9416_v13 = vadd.f32 %v9415_v63, %v9414_v46 }
 0xa63   : > { %v9381_v16 = vadd.f32 %v9380_v14, %v9379_v50 }
 0xa65   : > { %v8003_v55 = vadd.f32 %v9381_v16, %v7933_v8 }
 0xa67   : > { %v8073_v4 = vadd.f32 %v9416_v13, %v8003_v55 }
 0xa69   : > { %v8076_v9 = vmax.f32 %v8073_v4, 0.0 }
 0xa6b   : > { %9488 = vmatmul.mubr.msk.f32.vlgmr.msra.gmra.mrb[50].mxu0 %vm4932_vm0, %v8076_v9 }
 0xa6c   : > { %10153 = vmatpush3.bf16.msra.mxu0 %v10152_v37  ;;  %9498 = vmatprep.mubr.msk.f32.mxu0 %vm10694_vm5, %v16879_v28  ;;  %v8160_v28 = vld [vmem:[%s16713_s10] sm:$0x1] }
 0xa6d   : > { %10154 = vmatprep.subr.bf16.mxu0 %v10693_v47 }
 0xa70   : > { %10156 = vmatpush3.bf16.msra.mxu0 %v10155_v11 }
 0xb3e   : > { %v8151_v32 = vpop.f32.mrb[50].mxu0 }
 0xb3f   : > { %v8152_v10 = vadd.f32 %v8151_v32, %v8081_v41  ;;  %v9489_v1 = vpop.f32.mrb[51].mxu0 }
 0xb41   : > { %v8155_v45 = vmax.f32 %v8152_v10, 0.0 }
 0xb43   : > { %9499 = vmatmul.mubr.msk.f32.vlgmr.msra.gmra.mrb[52].mxu0 %vm4932_vm0, %v8155_v45 }
 0xc16   : > { %v8230_v24 = vpop.f32.mrb[52].mxu0 }
 0xc17   : > { %v8231_v34 = vadd.f32 %v8230_v24, %v8160_v28  ;;  %v9500_v6 = vpop.f32.mrb[53].mxu0 }
 0xc19   : > { %8235 = vst.msk [vmem:[%s378_s1] sm:$0x1] %vm8234_vm6, %v8231_v34 }
 0xc1a   : > { %10623 = shalt.err (!%p10620_p3)
}
 0xc1b   : > { %s10624_s29 = scalar_lea.hbm %s16661_s28, 16  ;;  %s10628_s25 = scalar_lea.hbm %s16714_s11, 32 }
 0xc1c   : > { %p10625_p4 = scmp.ne.s32.totalorder %s16661_s28, %s10624_s29  ;;  %p10629_p9 = scmp.lt.u32.totalorder %s16661_s28, %s16714_s11 }
 0xc1d   : > { %p10630_p10 = scmp.lt.u32.totalorder %s10628_s25, %s10624_s29  ;;  %p10632_p12 = scmp.lt.u32.totalorder %s10624_s29, %s16661_s28 }
 0xc1e   : > { %p10626_p7 = pnand %p10625_p4, %p10794_p5 }
 0xc1f   : > { %p10631_p11 = por %p10630_p10, %p10629_p9 }
 0xc20   : > { %p10627_p8 = pneg %p10626_p7 }
 0xc21   : > { %p10633_p13 = por %p10632_p12, %p10631_p11 }
 0xc23   : > { %p10634_p0 = pnand %p10633_p13, %p10627_p8 }
 0xc25   : > { %10637 = shalt.err (!%p10634_p0)
}
 0xc26   : > { %10189 = dma.vmem_to_hbm [thread:$0]  (%p10794_p5), %s16663_s19, 16, %s16661_s28, %s8237_s15  }
 0xc27 PF: > { %s16895_s17 = sld [smem:[#allocation7_spill]]  ;;  %p10195_p1 = scmp.ge.s32.totalorder %s10672_s20, 2 }
 0xc29   : > { %p10192_p2 = pnand %p10195_p1, %p10798_p6 }
 0xc2d   : > { %s8261_s1 = sand.u32 1, %s16895_s17  }
 0xc2e   : > { %s8262_s23 = scalar_lea.sflag [#allocation5], %s8261_s1 }
 0xc2f   : > { %10655 = dma.done.wait (!%p10192_p2), %s8262_s23, 16  }
 0xc30   : > { %10657 = vsyncadd (!%p10192_p2), %s8262_s23, 4294967280  ;;  %s16897_s20 = sld [smem:[#allocation9_spill]]  ;;  %s16898_s26 = sld [smem:[#allocation8_spill]] }
 0xc31   : > { %s16899_s19 = sld [smem:[#allocation10_spill]]  ;;  %s16900_s17 = smov %s10664_s18 }
 0xc36   : > { %p21_p3 = scmp.ge.s32.totalorder %s16897_s20, 4   ;;  %s16901_s18 = smov %s16898_s26 }
 0xc38   :  { %23 = sbr.rel (!%p21_p3) target bundleno = 6 (0x6), region = 737 }
 0xc3f   :  { %8266 = vsyncpa [#allocation5], 1 }
 0xc40   :  { %8268 = vsyncpa [#allocation5 + $0x1], 1 }

</bundles_post_ra>
